<compile_context>
chip_gen: v6e
topology: v6e:2x2x1
jax: 0.10.0
libtpu: 0.0.40
codegen_flags: <defaults>
</compile_context>

<pallas_src>
import jax
import jax.numpy as jnp
from jax import lax
from jax.experimental import pallas as pl
from jax.experimental.pallas import tpu as pltpu

EPS = 1e-5
LANE = 128
_TM_DEFAULT = 512
_VMEM_LIMIT = 32 * 1024 * 1024


def _round_up(x, m):
    return ((x + m - 1) // m) * m


def _halo_stack(flat, tm, g):
    """flat: (P, C) flattened padded-pixel rows -> (nT, tm + 2g, C) with halos."""
    p_rows, _ = flat.shape
    n_t = -(-p_rows // tm)
    p_pad = n_t * tm
    xg = jnp.pad(flat, ((g, g + (p_pad - p_rows)), (0, 0)))
    tiles = [xg[t * tm: t * tm + tm + 2 * g] for t in range(n_t)]
    return jnp.stack(tiles, axis=0), p_pad, n_t


def _valid_mask(n, h, w, p_pad):
    """(p_pad, 1) f32 mask: 1.0 on real (interior) output pixels, else 0."""
    s = (h + 2) * (w + 2)
    p = jnp.arange(p_pad, dtype=jnp.int32)
    r = p % s
    a = r // (w + 2)
    b = r % (w + 2)
    valid = (p < n * s) & (a >= 1) & (a <= h) & (b >= 1) & (b <= w)
    return valid.astype(jnp.float32).reshape(p_pad, 1)


def _weight_to_k9(w, ci_pad, co_pad):
    """PyTorch conv weight (Co, Ci, 3, 3) -> (9, ci_pad, co_pad), zero-padded."""
    co, ci, _, _ = w.shape
    wk = jnp.transpose(w, (2, 3, 1, 0)).reshape(9, ci, co)
    return jnp.pad(wk, ((0, 0), (0, ci_pad - ci), (0, co_pad - co)))


def _conv_stats_pass(x3, w9, mask, tm, g, w_img):
    """Pass 1: 3x3 conv as 9 shifted MXU dots + per-tile masked sum / sum-sq.

    x3:   (nT, tm + 2g, Ci)  halo-stacked flattened padded-pixel rows
    w9:   (9, Ci, Cop)       per-tap weights, VMEM-resident
    mask: (nT * tm, 1)       1.0 on valid output pixels
    Returns: y (nT*tm, Cop) conv output; stats (nT, 2, Cop) [sum; sumsq] partials.
    """
    n_t, tmg, ci = x3.shape
    cop = w9.shape[2]
    p_pad = n_t * tm
    offs = [(kh - 1) * (w_img + 2) + (kw - 1)
            for kh in range(3) for kw in range(3)]

    def kernel(x_ref, w_ref, m_ref, y_ref, st_ref):
        acc = jnp.zeros((tm, cop), jnp.float32)
        for k, off in enumerate(offs):
            patch = x_ref[0, g + off: g + off + tm, :]
            acc = acc + jnp.dot(patch, w_ref[k],
                                preferred_element_type=jnp.float32)
        y_ref[...] = acc
        ym = acc * m_ref[...]
        st_ref[0] = jnp.concatenate(
            [jnp.sum(ym, axis=0, keepdims=True),
             jnp.sum(ym * acc, axis=0, keepdims=True)], axis=0)

    flops = 2 * p_pad * ci * cop * 9 + 4 * p_pad * cop
    bytes_accessed = 4 * (int(x3.size) + int(w9.size) + int(mask.size)
                          + p_pad * cop + n_t * 2 * cop)
    return pl.pallas_call(
        kernel,
        out_shape=(jax.ShapeDtypeStruct((p_pad, cop), jnp.float32),
                   jax.ShapeDtypeStruct((n_t, 2, cop), jnp.float32)),
        grid_spec=pltpu.PrefetchScalarGridSpec(
            num_scalar_prefetch=0,
            grid=(n_t,),
            in_specs=[
                pl.BlockSpec((1, tmg, ci), lambda t: (t, 0, 0)),
                pl.BlockSpec((9, ci, cop), lambda t: (0, 0, 0)),
                pl.BlockSpec((tm, 1), lambda t: (t, 0)),
            ],
            out_specs=(pl.BlockSpec((tm, cop), lambda t: (t, 0)),
                       pl.BlockSpec((1, 2, cop), lambda t: (t, 0, 0))),
        ),
        compiler_params=pltpu.CompilerParams(
            dimension_semantics=("parallel",),
            vmem_limit_bytes=_VMEM_LIMIT),
        cost_estimate=pl.CostEstimate(flops=flops, transcendentals=0,
                                      bytes_accessed=bytes_accessed),
    )(x3, w9, mask)


def _bn_fold(stats, gamma, beta, co, cop, count):
    """Reduce per-tile partials and fold BN into per-channel scale/shift."""
    s = jnp.sum(stats, axis=0)                      # (2, cop)
    mean = s[0] / count
    var = jnp.maximum(s[1] / count - mean * mean, 0.0)
    g = jnp.pad(gamma, (0, cop - co))
    b = jnp.pad(beta, (0, cop - co))
    scale = g * lax.rsqrt(var + EPS)
    shift = b - mean * scale
    return scale, shift


def _bn_relu_apply_pass(y, mask, scale, shift, tm):
    """Pass 2: out = max(y*scale + shift, 0) * mask  (pad rows re-zeroed)."""
    p_pad, cop = y.shape
    n_t = p_pad // tm

    def kernel(y_ref, m_ref, s_ref, t_ref, o_ref):
        o_ref[...] = (jnp.maximum(y_ref[...] * s_ref[...] + t_ref[...], 0.0)
                      * m_ref[...])

    return pl.pallas_call(
        kernel,
        out_shape=jax.ShapeDtypeStruct((p_pad, cop), jnp.float32),
        grid_spec=pltpu.PrefetchScalarGridSpec(
            num_scalar_prefetch=0,
            grid=(n_t,),
            in_specs=[
                pl.BlockSpec((tm, cop), lambda t: (t, 0)),
                pl.BlockSpec((tm, 1), lambda t: (t, 0)),
                pl.BlockSpec((1, cop), lambda t: (0, 0)),
                pl.BlockSpec((1, cop), lambda t: (0, 0)),
            ],
            out_specs=pl.BlockSpec((tm, cop), lambda t: (t, 0)),
        ),
        compiler_params=pltpu.CompilerParams(
            dimension_semantics=("parallel",),
            vmem_limit_bytes=_VMEM_LIMIT),
        cost_estimate=pl.CostEstimate(
            flops=4 * p_pad * cop, transcendentals=0,
            bytes_accessed=4 * (2 * p_pad * cop + p_pad + 2 * cop)),
    )(y, mask, scale.reshape(1, cop), shift.reshape(1, cop))


def conv_block_forward(x, params):
    """x: (N, C_in, H, W) f32 -> (N, C_out, H, W) f32 (train-mode BN semantics)."""
    n, c_in, h, w = x.shape
    c_out = params["w1"].shape[0]
    cop = _round_up(c_out, LANE)
    s = (h + 2) * (w + 2)
    p_rows = n * s
    tm = min(_TM_DEFAULT, _round_up(p_rows, 8))
    g = w + 3                                      # halo rows per tile side

    # NCHW -> NHWC, spatial zero-pad, flatten padded pixels to rows.
    x_flat = jnp.pad(jnp.transpose(x, (0, 2, 3, 1)),
                     ((0, 0), (1, 1), (1, 1), (0, 0))).reshape(p_rows, c_in)
    x3, p_pad, _ = _halo_stack(x_flat, tm, g)
    mask = _valid_mask(n, h, w, p_pad)
    count = float(n * h * w)

    # conv1 -> bn1 -> relu   (conv bias cancels exactly under train-mode BN)
    w1 = _weight_to_k9(params["w1"], c_in, cop)
    y1, st1 = _conv_stats_pass(x3, w1, mask, tm, g, w)
    s1, t1 = _bn_fold(st1, params["g1"], params["beta1"], c_out, cop, count)
    a1 = _bn_relu_apply_pass(y1, mask, s1, t1, tm)   # pad rows already zero

    # conv2 -> bn2 -> relu : a1[:p_rows] IS the zero-padded NHWC input (flattened)
    x3_2, _, _ = _halo_stack(a1[:p_rows], tm, g)
    w2 = _weight_to_k9(params["w2"], cop, cop)
    y2, st2 = _conv_stats_pass(x3_2, w2, mask, tm, g, w)
    s2, t2 = _bn_fold(st2, params["g2"], params["beta2"], c_out, cop, count)
    a2 = _bn_relu_apply_pass(y2, mask, s2, t2, tm)

    out = a2[:p_rows].reshape(n, h + 2, w + 2, cop)[:, 1:h + 1, 1:w + 1, :c_out]
    return jnp.transpose(out, (0, 3, 1, 2))


# ---------------------- pure-JAX reference (for checking) ----------------------
def _ref_conv_bn_relu(x, w, b, gamma, beta):
    y = lax.conv_general_dilated(
        x, w, window_strides=(1, 1), padding=((1, 1), (1, 1)),
        dimension_numbers=("NCHW", "OIHW", "NCHW"))
    y = y + b[None, :, None, None]
    mean = jnp.mean(y, axis=(0, 2, 3), keepdims=True)
    var = jnp.mean((y - mean) ** 2, axis=(0, 2, 3), keepdims=True)
    y = (y - mean) / jnp.sqrt(var + EPS)
    y = y * gamma[None, :, None, None] + beta[None, :, None, None]
    return jnp.maximum(y, 0.0)


def conv_block_ref(x, p):
    y = _ref_conv_bn_relu(x, p["w1"], p["b1"], p["g1"], p["beta1"])
    return _ref_conv_bn_relu(y, p["w2"], p["b2"], p["g2"], p["beta2"])


if __name__ == "__main__":
    N, C_in, C_out, H, W = 2, 4, 8, 16, 16
    key = jax.random.PRNGKey(0)
    kx, kw1, kb1, kg1, kbeta1, kw2, kb2, kg2, kbeta2 = jax.random.split(key, 9)

    x = jax.random.normal(kx, (N, C_in, H, W), dtype=jnp.float32)
    params = {
        "w1": jax.random.normal(kw1, (C_out, C_in, 3, 3), jnp.float32) * 0.1,
        "b1": jax.random.normal(kb1, (C_out,), jnp.float32) * 0.1,
        "g1": 1.0 + 0.1 * jax.random.normal(kg1, (C_out,), jnp.float32),
        "beta1": 0.1 * jax.random.normal(kbeta1, (C_out,), jnp.float32),
        "w2": jax.random.normal(kw2, (C_out, C_out, 3, 3), jnp.float32) * 0.1,
        "b2": jax.random.normal(kb2, (C_out,), jnp.float32) * 0.1,
        "g2": 1.0 + 0.1 * jax.random.normal(kg2, (C_out,), jnp.float32),
        "beta2": 0.1 * jax.random.normal(kbeta2, (C_out,), jnp.float32),
    }

    out = jax.block_until_ready(jax.jit(conv_block_forward)(x, params))
    ref = jax.block_until_ready(conv_block_ref(x, params))

    assert out.shape == (N, C_out, H, W)
    assert bool(jnp.all(jnp.isfinite(out)))
    assert jnp.allclose(out, ref, atol=1e-4, rtol=1e-4), "mismatch vs reference"

    print("KERNEL_OK")
</pallas_src>

<mosaic_0001>
module attributes {stable_mosaic.version = 11 : i64} {
  func.func @kernel(%arg0: i32, %arg1: memref<1x550x4xf32, #tpu.memory_space<vmem>>, %arg2: memref<9x4x128xf32, #tpu.memory_space<vmem>>, %arg3: memref<512x1xf32, #tpu.memory_space<vmem>>, %arg4: memref<512x128xf32, #tpu.memory_space<vmem>>, %arg5: memref<1x2x128xf32, #tpu.memory_space<vmem>>) attributes {dimension_semantics = [#tpu.dimension_semantics<parallel>], iteration_bounds = array<i64: 2>, scalar_prefetch = 0 : i64, scratch_operands = 0 : i64, tpu.core_type = #tpu.core_type<tc>, window_params = [{transform_indices = @transform_0, window_bounds = array<i64: 1, 550, 4>}, {pipeline_mode = #tpu.pipeline_mode<synchronous>, transform_indices = @transform_1, window_bounds = array<i64: 9, 4, 128>}, {transform_indices = @transform_2, window_bounds = array<i64: 512, 1>}, {transform_indices = @transform_3, window_bounds = array<i64: 512, 128>}, {transform_indices = @transform_4, window_bounds = array<i64: 1, 2, 128>}]} {
    %cst = arith.constant 0.000000e+00 : f32
    %0 = vector.broadcast %cst : f32 to vector<512x128xf32>
    %c0 = arith.constant 0 : index
    %c0_0 = arith.constant 0 : index
    %c0_1 = arith.constant 0 : index
    %1 = vector.load %arg1[%c0, %c0_0, %c0_1] : memref<1x550x4xf32, #tpu.memory_space<vmem>>, vector<1x512x4xf32>
    %2 = vector.shape_cast %1 : vector<1x512x4xf32> to vector<512x4xf32>
    %c0_2 = arith.constant 0 : index
    %c0_3 = arith.constant 0 : index
    %c0_4 = arith.constant 0 : index
    %3 = vector.load %arg2[%c0_2, %c0_3, %c0_4] : memref<9x4x128xf32, #tpu.memory_space<vmem>>, vector<1x4x128xf32>
    %4 = vector.shape_cast %3 : vector<1x4x128xf32> to vector<4x128xf32>
    %cst_5 = arith.constant dense<0.000000e+00> : vector<512x128xf32>
    %5 = tpu.matmul %2, %4, %cst_5 {dimension_numbers = #tpu.dot_dimension_numbers<[1], [0], [0], [1], [0, 0, 1, 1], [], []>} : vector<512x4xf32>, vector<4x128xf32>, vector<512x128xf32> -> vector<512x128xf32>
    %6 = arith.addf %0, %5 : vector<512x128xf32>
    %c0_6 = arith.constant 0 : index
    %c1 = arith.constant 1 : index
    %c0_7 = arith.constant 0 : index
    %7 = vector.load %arg1[%c0_6, %c1, %c0_7] : memref<1x550x4xf32, #tpu.memory_space<vmem>>, vector<1x512x4xf32>
    %8 = vector.shape_cast %7 : vector<1x512x4xf32> to vector<512x4xf32>
    %c1_8 = arith.constant 1 : index
    %c0_9 = arith.constant 0 : index
    %c0_10 = arith.constant 0 : index
    %9 = vector.load %arg2[%c1_8, %c0_9, %c0_10] : memref<9x4x128xf32, #tpu.memory_space<vmem>>, vector<1x4x128xf32>
    %10 = vector.shape_cast %9 : vector<1x4x128xf32> to vector<4x128xf32>
    %cst_11 = arith.constant dense<0.000000e+00> : vector<512x128xf32>
    %11 = tpu.matmul %8, %10, %cst_11 {dimension_numbers = #tpu.dot_dimension_numbers<[1], [0], [0], [1], [0, 0, 1, 1], [], []>} : vector<512x4xf32>, vector<4x128xf32>, vector<512x128xf32> -> vector<512x128xf32>
    %12 = arith.addf %6, %11 : vector<512x128xf32>
    %c0_12 = arith.constant 0 : index
    %c2 = arith.constant 2 : index
    %c0_13 = arith.constant 0 : index
    %13 = vector.load %arg1[%c0_12, %c2, %c0_13] : memref<1x550x4xf32, #tpu.memory_space<vmem>>, vector<1x512x4xf32>
    %14 = vector.shape_cast %13 : vector<1x512x4xf32> to vector<512x4xf32>
    %c2_14 = arith.constant 2 : index
    %c0_15 = arith.constant 0 : index
    %c0_16 = arith.constant 0 : index
    %15 = vector.load %arg2[%c2_14, %c0_15, %c0_16] : memref<9x4x128xf32, #tpu.memory_space<vmem>>, vector<1x4x128xf32>
    %16 = vector.shape_cast %15 : vector<1x4x128xf32> to vector<4x128xf32>
    %cst_17 = arith.constant dense<0.000000e+00> : vector<512x128xf32>
    %17 = tpu.matmul %14, %16, %cst_17 {dimension_numbers = #tpu.dot_dimension_numbers<[1], [0], [0], [1], [0, 0, 1, 1], [], []>} : vector<512x4xf32>, vector<4x128xf32>, vector<512x128xf32> -> vector<512x128xf32>
    %18 = arith.addf %12, %17 : vector<512x128xf32>
    %c0_18 = arith.constant 0 : index
    %c18 = arith.constant 18 : index
    %c0_19 = arith.constant 0 : index
    %19 = vector.load %arg1[%c0_18, %c18, %c0_19] : memref<1x550x4xf32, #tpu.memory_space<vmem>>, vector<1x512x4xf32>
    %20 = vector.shape_cast %19 : vector<1x512x4xf32> to vector<512x4xf32>
    %c3 = arith.constant 3 : index
    %c0_20 = arith.constant 0 : index
    %c0_21 = arith.constant 0 : index
    %21 = vector.load %arg2[%c3, %c0_20, %c0_21] : memref<9x4x128xf32, #tpu.memory_space<vmem>>, vector<1x4x128xf32>
    %22 = vector.shape_cast %21 : vector<1x4x128xf32> to vector<4x128xf32>
    %cst_22 = arith.constant dense<0.000000e+00> : vector<512x128xf32>
    %23 = tpu.matmul %20, %22, %cst_22 {dimension_numbers = #tpu.dot_dimension_numbers<[1], [0], [0], [1], [0, 0, 1, 1], [], []>} : vector<512x4xf32>, vector<4x128xf32>, vector<512x128xf32> -> vector<512x128xf32>
    %24 = arith.addf %18, %23 : vector<512x128xf32>
    %c0_23 = arith.constant 0 : index
    %c19 = arith.constant 19 : index
    %c0_24 = arith.constant 0 : index
    %25 = vector.load %arg1[%c0_23, %c19, %c0_24] : memref<1x550x4xf32, #tpu.memory_space<vmem>>, vector<1x512x4xf32>
    %26 = vector.shape_cast %25 : vector<1x512x4xf32> to vector<512x4xf32>
    %c4 = arith.constant 4 : index
    %c0_25 = arith.constant 0 : index
    %c0_26 = arith.constant 0 : index
    %27 = vector.load %arg2[%c4, %c0_25, %c0_26] : memref<9x4x128xf32, #tpu.memory_space<vmem>>, vector<1x4x128xf32>
    %28 = vector.shape_cast %27 : vector<1x4x128xf32> to vector<4x128xf32>
    %cst_27 = arith.constant dense<0.000000e+00> : vector<512x128xf32>
    %29 = tpu.matmul %26, %28, %cst_27 {dimension_numbers = #tpu.dot_dimension_numbers<[1], [0], [0], [1], [0, 0, 1, 1], [], []>} : vector<512x4xf32>, vector<4x128xf32>, vector<512x128xf32> -> vector<512x128xf32>
    %30 = arith.addf %24, %29 : vector<512x128xf32>
    %c0_28 = arith.constant 0 : index
    %c20 = arith.constant 20 : index
    %c0_29 = arith.constant 0 : index
    %31 = vector.load %arg1[%c0_28, %c20, %c0_29] : memref<1x550x4xf32, #tpu.memory_space<vmem>>, vector<1x512x4xf32>
    %32 = vector.shape_cast %31 : vector<1x512x4xf32> to vector<512x4xf32>
    %c5 = arith.constant 5 : index
    %c0_30 = arith.constant 0 : index
    %c0_31 = arith.constant 0 : index
    %33 = vector.load %arg2[%c5, %c0_30, %c0_31] : memref<9x4x128xf32, #tpu.memory_space<vmem>>, vector<1x4x128xf32>
    %34 = vector.shape_cast %33 : vector<1x4x128xf32> to vector<4x128xf32>
    %cst_32 = arith.constant dense<0.000000e+00> : vector<512x128xf32>
    %35 = tpu.matmul %32, %34, %cst_32 {dimension_numbers = #tpu.dot_dimension_numbers<[1], [0], [0], [1], [0, 0, 1, 1], [], []>} : vector<512x4xf32>, vector<4x128xf32>, vector<512x128xf32> -> vector<512x128xf32>
    %36 = arith.addf %30, %35 : vector<512x128xf32>
    %c0_33 = arith.constant 0 : index
    %c36 = arith.constant 36 : index
    %c0_34 = arith.constant 0 : index
    %37 = vector.load %arg1[%c0_33, %c36, %c0_34] : memref<1x550x4xf32, #tpu.memory_space<vmem>>, vector<1x512x4xf32>
    %38 = vector.shape_cast %37 : vector<1x512x4xf32> to vector<512x4xf32>
    %c6 = arith.constant 6 : index
    %c0_35 = arith.constant 0 : index
    %c0_36 = arith.constant 0 : index
    %39 = vector.load %arg2[%c6, %c0_35, %c0_36] : memref<9x4x128xf32, #tpu.memory_space<vmem>>, vector<1x4x128xf32>
    %40 = vector.shape_cast %39 : vector<1x4x128xf32> to vector<4x128xf32>
    %cst_37 = arith.constant dense<0.000000e+00> : vector<512x128xf32>
    %41 = tpu.matmul %38, %40, %cst_37 {dimension_numbers = #tpu.dot_dimension_numbers<[1], [0], [0], [1], [0, 0, 1, 1], [], []>} : vector<512x4xf32>, vector<4x128xf32>, vector<512x128xf32> -> vector<512x128xf32>
    %42 = arith.addf %36, %41 : vector<512x128xf32>
    %c0_38 = arith.constant 0 : index
    %c37 = arith.constant 37 : index
    %c0_39 = arith.constant 0 : index
    %43 = vector.load %arg1[%c0_38, %c37, %c0_39] : memref<1x550x4xf32, #tpu.memory_space<vmem>>, vector<1x512x4xf32>
    %44 = vector.shape_cast %43 : vector<1x512x4xf32> to vector<512x4xf32>
    %c7 = arith.constant 7 : index
    %c0_40 = arith.constant 0 : index
    %c0_41 = arith.constant 0 : index
    %45 = vector.load %arg2[%c7, %c0_40, %c0_41] : memref<9x4x128xf32, #tpu.memory_space<vmem>>, vector<1x4x128xf32>
    %46 = vector.shape_cast %45 : vector<1x4x128xf32> to vector<4x128xf32>
    %cst_42 = arith.constant dense<0.000000e+00> : vector<512x128xf32>
    %47 = tpu.matmul %44, %46, %cst_42 {dimension_numbers = #tpu.dot_dimension_numbers<[1], [0], [0], [1], [0, 0, 1, 1], [], []>} : vector<512x4xf32>, vector<4x128xf32>, vector<512x128xf32> -> vector<512x128xf32>
    %48 = arith.addf %42, %47 : vector<512x128xf32>
    %c0_43 = arith.constant 0 : index
    %c38 = arith.constant 38 : index
    %c0_44 = arith.constant 0 : index
    %49 = vector.load %arg1[%c0_43, %c38, %c0_44] : memref<1x550x4xf32, #tpu.memory_space<vmem>>, vector<1x512x4xf32>
    %50 = vector.shape_cast %49 : vector<1x512x4xf32> to vector<512x4xf32>
    %c8 = arith.constant 8 : index
    %c0_45 = arith.constant 0 : index
    %c0_46 = arith.constant 0 : index
    %51 = vector.load %arg2[%c8, %c0_45, %c0_46] : memref<9x4x128xf32, #tpu.memory_space<vmem>>, vector<1x4x128xf32>
    %52 = vector.shape_cast %51 : vector<1x4x128xf32> to vector<4x128xf32>
    %cst_47 = arith.constant dense<0.000000e+00> : vector<512x128xf32>
    %53 = tpu.matmul %50, %52, %cst_47 {dimension_numbers = #tpu.dot_dimension_numbers<[1], [0], [0], [1], [0, 0, 1, 1], [], []>} : vector<512x4xf32>, vector<4x128xf32>, vector<512x128xf32> -> vector<512x128xf32>
    %54 = arith.addf %48, %53 : vector<512x128xf32>
    %c0_48 = arith.constant 0 : index
    %c0_49 = arith.constant 0 : index
    %55 = vector.load %arg4[%c0_48, %c0_49] : memref<512x128xf32, #tpu.memory_space<vmem>>, vector<512x128xf32>
    tpu.vector_store %arg4[%c0_48, %c0_49], %54 {strides = array<i32>} : memref<512x128xf32, #tpu.memory_space<vmem>>, vector<512x128xf32>,
    %c0_50 = arith.constant 0 : index
    %c0_51 = arith.constant 0 : index
    %56 = vector.load %arg3[%c0_50, %c0_51] : memref<512x1xf32, #tpu.memory_space<vmem>>, vector<512x1xf32>
    %57 = vector.broadcast %56 : vector<512x1xf32> to vector<512x128xf32>
    %58 = arith.mulf %54, %57 : vector<512x128xf32>
    %cst_52 = arith.constant dense<0.000000e+00> : vector<128xf32>
    %59 = vector.multi_reduction <add>, %58, %cst_52 [0] : vector<512x128xf32> to vector<128xf32>
    %60 = vector.shape_cast %59 : vector<128xf32> to vector<1x128xf32>
    %61 = arith.mulf %58, %54 : vector<512x128xf32>
    %cst_53 = arith.constant dense<0.000000e+00> : vector<128xf32>
    %62 = vector.multi_reduction <add>, %61, %cst_53 [0] : vector<512x128xf32> to vector<128xf32>
    %63 = vector.shape_cast %62 : vector<128xf32> to vector<1x128xf32>
    %64 = tpu.concatenate %60, %63 in 0 : vector<1x128xf32>, vector<1x128xf32> -> vector<2x128xf32>
    %c0_54 = arith.constant 0 : index
    %c0_55 = arith.constant 0 : index
    %c0_56 = arith.constant 0 : index
    %65 = vector.load %arg5[%c0_54, %c0_55, %c0_56] : memref<1x2x128xf32, #tpu.memory_space<vmem>>, vector<1x2x128xf32>
    %66 = vector.shape_cast %65 : vector<1x2x128xf32> to vector<2x128xf32>
    %67 = vector.shape_cast %64 : vector<2x128xf32> to vector<1x2x128xf32>
    tpu.vector_store %arg5[%c0_54, %c0_55, %c0_56], %67 {strides = array<i32>} : memref<1x2x128xf32, #tpu.memory_space<vmem>>, vector<1x2x128xf32>,
    return
  }
  func.func @transform_0(%arg0: i32) -> (i32, i32, i32) {
    %c0_i32 = arith.constant 0 : i32
    %c0_i32_0 = arith.constant 0 : i32
    %c0_i32_1 = arith.constant 0 : i32
    return %arg0, %c0_i32, %c0_i32_0 : i32, i32, i32
  }
  func.func @transform_1(%arg0: i32) -> (i32, i32, i32) {
    %c0_i32 = arith.constant 0 : i32
    %c0_i32_0 = arith.constant 0 : i32
    %c0_i32_1 = arith.constant 0 : i32
    %c0_i32_2 = arith.constant 0 : i32
    return %c0_i32, %c0_i32_0, %c0_i32_1 : i32, i32, i32
  }
  func.func @transform_2(%arg0: i32) -> (i32, i32) {
    %c0_i32 = arith.constant 0 : i32
    %c0_i32_0 = arith.constant 0 : i32
    return %arg0, %c0_i32 : i32, i32
  }
  func.func @transform_3(%arg0: i32) -> (i32, i32) {
    %c0_i32 = arith.constant 0 : i32
    %c0_i32_0 = arith.constant 0 : i32
    return %arg0, %c0_i32 : i32, i32
  }
  func.func @transform_4(%arg0: i32) -> (i32, i32, i32) {
    %c0_i32 = arith.constant 0 : i32
    %c0_i32_0 = arith.constant 0 : i32
    %c0_i32_1 = arith.constant 0 : i32
    return %arg0, %c0_i32, %c0_i32_0 : i32, i32, i32
  }
}

module attributes {stable_mosaic.version = 11 : i64} {
  func.func @kernel(%arg0: i32, %arg1: memref<512x128xf32, #tpu.memory_space<vmem>>, %arg2: memref<512x1xf32, #tpu.memory_space<vmem>>, %arg3: memref<1x128xf32, #tpu.memory_space<vmem>>, %arg4: memref<1x128xf32, #tpu.memory_space<vmem>>, %arg5: memref<512x128xf32, #tpu.memory_space<vmem>>) attributes {dimension_semantics = [#tpu.dimension_semantics<parallel>], iteration_bounds = array<i64: 2>, scalar_prefetch = 0 : i64, scratch_operands = 0 : i64, tpu.core_type = #tpu.core_type<tc>, window_params = [{transform_indices = @transform_0, window_bounds = array<i64: 512, 128>}, {transform_indices = @transform_1, window_bounds = array<i64: 512, 1>}, {pipeline_mode = #tpu.pipeline_mode<synchronous>, transform_indices = @transform_2, window_bounds = array<i64: 1, 128>}, {pipeline_mode = #tpu.pipeline_mode<synchronous>, transform_indices = @transform_3, window_bounds = array<i64: 1, 128>}, {transform_indices = @transform_4, window_bounds = array<i64: 512, 128>}]} {
    %c0 = arith.constant 0 : index
    %c0_0 = arith.constant 0 : index
    %0 = vector.load %arg1[%c0, %c0_0] : memref<512x128xf32, #tpu.memory_space<vmem>>, vector<512x128xf32>
    %c0_1 = arith.constant 0 : index
    %c0_2 = arith.constant 0 : index
    %1 = vector.load %arg3[%c0_1, %c0_2] : memref<1x128xf32, #tpu.memory_space<vmem>>, vector<1x128xf32>
    %2 = vector.broadcast %1 : vector<1x128xf32> to vector<512x128xf32>
    %3 = arith.mulf %0, %2 : vector<512x128xf32>
    %c0_3 = arith.constant 0 : index
    %c0_4 = arith.constant 0 : index
    %4 = vector.load %arg4[%c0_3, %c0_4] : memref<1x128xf32, #tpu.memory_space<vmem>>, vector<1x128xf32>
    %5 = vector.broadcast %4 : vector<1x128xf32> to vector<512x128xf32>
    %6 = arith.addf %3, %5 : vector<512x128xf32>
    %cst = arith.constant 0.000000e+00 : f32
    %7 = vector.broadcast %cst : f32 to vector<512x128xf32>
    %8 = arith.maximumf %6, %7 : vector<512x128xf32>
    %c0_5 = arith.constant 0 : index
    %c0_6 = arith.constant 0 : index
    %9 = vector.load %arg2[%c0_5, %c0_6] : memref<512x1xf32, #tpu.memory_space<vmem>>, vector<512x1xf32>
    %10 = vector.broadcast %9 : vector<512x1xf32> to vector<512x128xf32>
    %11 = arith.mulf %8, %10 : vector<512x128xf32>
    %c0_7 = arith.constant 0 : index
    %c0_8 = arith.constant 0 : index
    %12 = vector.load %arg5[%c0_7, %c0_8] : memref<512x128xf32, #tpu.memory_space<vmem>>, vector<512x128xf32>
    tpu.vector_store %arg5[%c0_7, %c0_8], %11 {strides = array<i32>} : memref<512x128xf32, #tpu.memory_space<vmem>>, vector<512x128xf32>,
    return
  }
  func.func @transform_0(%arg0: i32) -> (i32, i32) {
    %c0_i32 = arith.constant 0 : i32
    %c0_i32_0 = arith.constant 0 : i32
    return %arg0, %c0_i32 : i32, i32
  }
  func.func @transform_1(%arg0: i32) -> (i32, i32) {
    %c0_i32 = arith.constant 0 : i32
    %c0_i32_0 = arith.constant 0 : i32
    return %arg0, %c0_i32 : i32, i32
  }
  func.func @transform_2(%arg0: i32) -> (i32, i32) {
    %c0_i32 = arith.constant 0 : i32
    %c0_i32_0 = arith.constant 0 : i32
    %c0_i32_1 = arith.constant 0 : i32
    return %c0_i32, %c0_i32_0 : i32, i32
  }
  func.func @transform_3(%arg0: i32) -> (i32, i32) {
    %c0_i32 = arith.constant 0 : i32
    %c0_i32_0 = arith.constant 0 : i32
    %c0_i32_1 = arith.constant 0 : i32
    return %c0_i32, %c0_i32_0 : i32, i32
  }
  func.func @transform_4(%arg0: i32) -> (i32, i32) {
    %c0_i32 = arith.constant 0 : i32
    %c0_i32_0 = arith.constant 0 : i32
    return %arg0, %c0_i32 : i32, i32
  }
}

module attributes {stable_mosaic.version = 11 : i64} {
  func.func @kernel(%arg0: i32, %arg1: memref<1x550x128xf32, #tpu.memory_space<vmem>>, %arg2: memref<9x128x128xf32, #tpu.memory_space<vmem>>, %arg3: memref<512x1xf32, #tpu.memory_space<vmem>>, %arg4: memref<512x128xf32, #tpu.memory_space<vmem>>, %arg5: memref<1x2x128xf32, #tpu.memory_space<vmem>>) attributes {dimension_semantics = [#tpu.dimension_semantics<parallel>], iteration_bounds = array<i64: 2>, scalar_prefetch = 0 : i64, scratch_operands = 0 : i64, tpu.core_type = #tpu.core_type<tc>, window_params = [{transform_indices = @transform_0, window_bounds = array<i64: 1, 550, 128>}, {pipeline_mode = #tpu.pipeline_mode<synchronous>, transform_indices = @transform_1, window_bounds = array<i64: 9, 128, 128>}, {transform_indices = @transform_2, window_bounds = array<i64: 512, 1>}, {transform_indices = @transform_3, window_bounds = array<i64: 512, 128>}, {transform_indices = @transform_4, window_bounds = array<i64: 1, 2, 128>}]} {
    %cst = arith.constant 0.000000e+00 : f32
    %0 = vector.broadcast %cst : f32 to vector<512x128xf32>
    %c0 = arith.constant 0 : index
    %c0_0 = arith.constant 0 : index
    %c0_1 = arith.constant 0 : index
    %1 = vector.load %arg1[%c0, %c0_0, %c0_1] : memref<1x550x128xf32, #tpu.memory_space<vmem>>, vector<1x512x128xf32>
    %2 = vector.shape_cast %1 : vector<1x512x128xf32> to vector<512x128xf32>
    %c0_2 = arith.constant 0 : index
    %c0_3 = arith.constant 0 : index
    %c0_4 = arith.constant 0 : index
    %3 = vector.load %arg2[%c0_2, %c0_3, %c0_4] : memref<9x128x128xf32, #tpu.memory_space<vmem>>, vector<1x128x128xf32>
    %4 = vector.shape_cast %3 : vector<1x128x128xf32> to vector<128x128xf32>
    %cst_5 = arith.constant dense<0.000000e+00> : vector<512x128xf32>
    %5 = tpu.matmul %2, %4, %cst_5 {dimension_numbers = #tpu.dot_dimension_numbers<[1], [0], [0], [1], [0, 0, 1, 1], [], []>} : vector<512x128xf32>, vector<128x128xf32>, vector<512x128xf32> -> vector<512x128xf32>
    %6 = arith.addf %0, %5 : vector<512x128xf32>
    %c0_6 = arith.constant 0 : index
    %c1 = arith.constant 1 : index
    %c0_7 = arith.constant 0 : index
    %7 = vector.load %arg1[%c0_6, %c1, %c0_7] : memref<1x550x128xf32, #tpu.memory_space<vmem>>, vector<1x512x128xf32>
    %8 = vector.shape_cast %7 : vector<1x512x128xf32> to vector<512x128xf32>
    %c1_8 = arith.constant 1 : index
    %c0_9 = arith.constant 0 : index
    %c0_10 = arith.constant 0 : index
    %9 = vector.load %arg2[%c1_8, %c0_9, %c0_10] : memref<9x128x128xf32, #tpu.memory_space<vmem>>, vector<1x128x128xf32>
    %10 = vector.shape_cast %9 : vector<1x128x128xf32> to vector<128x128xf32>
    %cst_11 = arith.constant dense<0.000000e+00> : vector<512x128xf32>
    %11 = tpu.matmul %8, %10, %cst_11 {dimension_numbers = #tpu.dot_dimension_numbers<[1], [0], [0], [1], [0, 0, 1, 1], [], []>} : vector<512x128xf32>, vector<128x128xf32>, vector<512x128xf32> -> vector<512x128xf32>
    %12 = arith.addf %6, %11 : vector<512x128xf32>
    %c0_12 = arith.constant 0 : index
    %c2 = arith.constant 2 : index
    %c0_13 = arith.constant 0 : index
    %13 = vector.load %arg1[%c0_12, %c2, %c0_13] : memref<1x550x128xf32, #tpu.memory_space<vmem>>, vector<1x512x128xf32>
    %14 = vector.shape_cast %13 : vector<1x512x128xf32> to vector<512x128xf32>
    %c2_14 = arith.constant 2 : index
    %c0_15 = arith.constant 0 : index
    %c0_16 = arith.constant 0 : index
    %15 = vector.load %arg2[%c2_14, %c0_15, %c0_16] : memref<9x128x128xf32, #tpu.memory_space<vmem>>, vector<1x128x128xf32>
    %16 = vector.shape_cast %15 : vector<1x128x128xf32> to vector<128x128xf32>
    %cst_17 = arith.constant dense<0.000000e+00> : vector<512x128xf32>
    %17 = tpu.matmul %14, %16, %cst_17 {dimension_numbers = #tpu.dot_dimension_numbers<[1], [0], [0], [1], [0, 0, 1, 1], [], []>} : vector<512x128xf32>, vector<128x128xf32>, vector<512x128xf32> -> vector<512x128xf32>
    %18 = arith.addf %12, %17 : vector<512x128xf32>
    %c0_18 = arith.constant 0 : index
    %c18 = arith.constant 18 : index
    %c0_19 = arith.constant 0 : index
    %19 = vector.load %arg1[%c0_18, %c18, %c0_19] : memref<1x550x128xf32, #tpu.memory_space<vmem>>, vector<1x512x128xf32>
    %20 = vector.shape_cast %19 : vector<1x512x128xf32> to vector<512x128xf32>
    %c3 = arith.constant 3 : index
    %c0_20 = arith.constant 0 : index
    %c0_21 = arith.constant 0 : index
    %21 = vector.load %arg2[%c3, %c0_20, %c0_21] : memref<9x128x128xf32, #tpu.memory_space<vmem>>, vector<1x128x128xf32>
    %22 = vector.shape_cast %21 : vector<1x128x128xf32> to vector<128x128xf32>
    %cst_22 = arith.constant dense<0.000000e+00> : vector<512x128xf32>
    %23 = tpu.matmul %20, %22, %cst_22 {dimension_numbers = #tpu.dot_dimension_numbers<[1], [0], [0], [1], [0, 0, 1, 1], [], []>} : vector<512x128xf32>, vector<128x128xf32>, vector<512x128xf32> -> vector<512x128xf32>
    %24 = arith.addf %18, %23 : vector<512x128xf32>
    %c0_23 = arith.constant 0 : index
    %c19 = arith.constant 19 : index
    %c0_24 = arith.constant 0 : index
    %25 = vector.load %arg1[%c0_23, %c19, %c0_24] : memref<1x550x128xf32, #tpu.memory_space<vmem>>, vector<1x512x128xf32>
    %26 = vector.shape_cast %25 : vector<1x512x128xf32> to vector<512x128xf32>
    %c4 = arith.constant 4 : index
    %c0_25 = arith.constant 0 : index
    %c0_26 = arith.constant 0 : index
    %27 = vector.load %arg2[%c4, %c0_25, %c0_26] : memref<9x128x128xf32, #tpu.memory_space<vmem>>, vector<1x128x128xf32>
    %28 = vector.shape_cast %27 : vector<1x128x128xf32> to vector<128x128xf32>
    %cst_27 = arith.constant dense<0.000000e+00> : vector<512x128xf32>
    %29 = tpu.matmul %26, %28, %cst_27 {dimension_numbers = #tpu.dot_dimension_numbers<[1], [0], [0], [1], [0, 0, 1, 1], [], []>} : vector<512x128xf32>, vector<128x128xf32>, vector<512x128xf32> -> vector<512x128xf32>
    %30 = arith.addf %24, %29 : vector<512x128xf32>
    %c0_28 = arith.constant 0 : index
    %c20 = arith.constant 20 : index
    %c0_29 = arith.constant 0 : index
    %31 = vector.load %arg1[%c0_28, %c20, %c0_29] : memref<1x550x128xf32, #tpu.memory_space<vmem>>, vector<1x512x128xf32>
    %32 = vector.shape_cast %31 : vector<1x512x128xf32> to vector<512x128xf32>
    %c5 = arith.constant 5 : index
    %c0_30 = arith.constant 0 : index
    %c0_31 = arith.constant 0 : index
    %33 = vector.load %arg2[%c5, %c0_30, %c0_31] : memref<9x128x128xf32, #tpu.memory_space<vmem>>, vector<1x128x128xf32>
    %34 = vector.shape_cast %33 : vector<1x128x128xf32> to vector<128x128xf32>
    %cst_32 = arith.constant dense<0.000000e+00> : vector<512x128xf32>
    %35 = tpu.matmul %32, %34, %cst_32 {dimension_numbers = #tpu.dot_dimension_numbers<[1], [0], [0], [1], [0, 0, 1, 1], [], []>} : vector<512x128xf32>, vector<128x128xf32>, vector<512x128xf32> -> vector<512x128xf32>
    %36 = arith.addf %30, %35 : vector<512x128xf32>
    %c0_33 = arith.constant 0 : index
    %c36 = arith.constant 36 : index
    %c0_34 = arith.constant 0 : index
    %37 = vector.load %arg1[%c0_33, %c36, %c0_34] : memref<1x550x128xf32, #tpu.memory_space<vmem>>, vector<1x512x128xf32>
    %38 = vector.shape_cast %37 : vector<1x512x128xf32> to vector<512x128xf32>
    %c6 = arith.constant 6 : index
    %c0_35 = arith.constant 0 : index
    %c0_36 = arith.constant 0 : index
    %39 = vector.load %arg2[%c6, %c0_35, %c0_36] : memref<9x128x128xf32, #tpu.memory_space<vmem>>, vector<1x128x128xf32>
    %40 = vector.shape_cast %39 : vector<1x128x128xf32> to vector<128x128xf32>
    %cst_37 = arith.constant dense<0.000000e+00> : vector<512x128xf32>
    %41 = tpu.matmul %38, %40, %cst_37 {dimension_numbers = #tpu.dot_dimension_numbers<[1], [0], [0], [1], [0, 0, 1, 1], [], []>} : vector<512x128xf32>, vector<128x128xf32>, vector<512x128xf32> -> vector<512x128xf32>
    %42 = arith.addf %36, %41 : vector<512x128xf32>
    %c0_38 = arith.constant 0 : index
    %c37 = arith.constant 37 : index
    %c0_39 = arith.constant 0 : index
    %43 = vector.load %arg1[%c0_38, %c37, %c0_39] : memref<1x550x128xf32, #tpu.memory_space<vmem>>, vector<1x512x128xf32>
    %44 = vector.shape_cast %43 : vector<1x512x128xf32> to vector<512x128xf32>
    %c7 = arith.constant 7 : index
    %c0_40 = arith.constant 0 : index
    %c0_41 = arith.constant 0 : index
    %45 = vector.load %arg2[%c7, %c0_40, %c0_41] : memref<9x128x128xf32, #tpu.memory_space<vmem>>, vector<1x128x128xf32>
    %46 = vector.shape_cast %45 : vector<1x128x128xf32> to vector<128x128xf32>
    %cst_42 = arith.constant dense<0.000000e+00> : vector<512x128xf32>
    %47 = tpu.matmul %44, %46, %cst_42 {dimension_numbers = #tpu.dot_dimension_numbers<[1], [0], [0], [1], [0, 0, 1, 1], [], []>} : vector<512x128xf32>, vector<128x128xf32>, vector<512x128xf32> -> vector<512x128xf32>
    %48 = arith.addf %42, %47 : vector<512x128xf32>
    %c0_43 = arith.constant 0 : index
    %c38 = arith.constant 38 : index
    %c0_44 = arith.constant 0 : index
    %49 = vector.load %arg1[%c0_43, %c38, %c0_44] : memref<1x550x128xf32, #tpu.memory_space<vmem>>, vector<1x512x128xf32>
    %50 = vector.shape_cast %49 : vector<1x512x128xf32> to vector<512x128xf32>
    %c8 = arith.constant 8 : index
    %c0_45 = arith.constant 0 : index
    %c0_46 = arith.constant 0 : index
    %51 = vector.load %arg2[%c8, %c0_45, %c0_46] : memref<9x128x128xf32, #tpu.memory_space<vmem>>, vector<1x128x128xf32>
    %52 = vector.shape_cast %51 : vector<1x128x128xf32> to vector<128x128xf32>
    %cst_47 = arith.constant dense<0.000000e+00> : vector<512x128xf32>
    %53 = tpu.matmul %50, %52, %cst_47 {dimension_numbers = #tpu.dot_dimension_numbers<[1], [0], [0], [1], [0, 0, 1, 1], [], []>} : vector<512x128xf32>, vector<128x128xf32>, vector<512x128xf32> -> vector<512x128xf32>
    %54 = arith.addf %48, %53 : vector<512x128xf32>
    %c0_48 = arith.constant 0 : index
    %c0_49 = arith.constant 0 : index
    %55 = vector.load %arg4[%c0_48, %c0_49] : memref<512x128xf32, #tpu.memory_space<vmem>>, vector<512x128xf32>
    tpu.vector_store %arg4[%c0_48, %c0_49], %54 {strides = array<i32>} : memref<512x128xf32, #tpu.memory_space<vmem>>, vector<512x128xf32>,
    %c0_50 = arith.constant 0 : index
    %c0_51 = arith.constant 0 : index
    %56 = vector.load %arg3[%c0_50, %c0_51] : memref<512x1xf32, #tpu.memory_space<vmem>>, vector<512x1xf32>
    %57 = vector.broadcast %56 : vector<512x1xf32> to vector<512x128xf32>
    %58 = arith.mulf %54, %57 : vector<512x128xf32>
    %cst_52 = arith.constant dense<0.000000e+00> : vector<128xf32>
    %59 = vector.multi_reduction <add>, %58, %cst_52 [0] : vector<512x128xf32> to vector<128xf32>
    %60 = vector.shape_cast %59 : vector<128xf32> to vector<1x128xf32>
    %61 = arith.mulf %58, %54 : vector<512x128xf32>
    %cst_53 = arith.constant dense<0.000000e+00> : vector<128xf32>
    %62 = vector.multi_reduction <add>, %61, %cst_53 [0] : vector<512x128xf32> to vector<128xf32>
    %63 = vector.shape_cast %62 : vector<128xf32> to vector<1x128xf32>
    %64 = tpu.concatenate %60, %63 in 0 : vector<1x128xf32>, vector<1x128xf32> -> vector<2x128xf32>
    %c0_54 = arith.constant 0 : index
    %c0_55 = arith.constant 0 : index
    %c0_56 = arith.constant 0 : index
    %65 = vector.load %arg5[%c0_54, %c0_55, %c0_56] : memref<1x2x128xf32, #tpu.memory_space<vmem>>, vector<1x2x128xf32>
    %66 = vector.shape_cast %65 : vector<1x2x128xf32> to vector<2x128xf32>
    %67 = vector.shape_cast %64 : vector<2x128xf32> to vector<1x2x128xf32>
    tpu.vector_store %arg5[%c0_54, %c0_55, %c0_56], %67 {strides = array<i32>} : memref<1x2x128xf32, #tpu.memory_space<vmem>>, vector<1x2x128xf32>,
    return
  }
  func.func @transform_0(%arg0: i32) -> (i32, i32, i32) {
    %c0_i32 = arith.constant 0 : i32
    %c0_i32_0 = arith.constant 0 : i32
    %c0_i32_1 = arith.constant 0 : i32
    return %arg0, %c0_i32, %c0_i32_0 : i32, i32, i32
  }
  func.func @transform_1(%arg0: i32) -> (i32, i32, i32) {
    %c0_i32 = arith.constant 0 : i32
    %c0_i32_0 = arith.constant 0 : i32
    %c0_i32_1 = arith.constant 0 : i32
    %c0_i32_2 = arith.constant 0 : i32
    return %c0_i32, %c0_i32_0, %c0_i32_1 : i32, i32, i32
  }
  func.func @transform_2(%arg0: i32) -> (i32, i32) {
    %c0_i32 = arith.constant 0 : i32
    %c0_i32_0 = arith.constant 0 : i32
    return %arg0, %c0_i32 : i32, i32
  }
  func.func @transform_3(%arg0: i32) -> (i32, i32) {
    %c0_i32 = arith.constant 0 : i32
    %c0_i32_0 = arith.constant 0 : i32
    return %arg0, %c0_i32 : i32, i32
  }
  func.func @transform_4(%arg0: i32) -> (i32, i32, i32) {
    %c0_i32 = arith.constant 0 : i32
    %c0_i32_0 = arith.constant 0 : i32
    %c0_i32_1 = arith.constant 0 : i32
    return %arg0, %c0_i32, %c0_i32_0 : i32, i32, i32
  }
}

</mosaic_0001>

<bundles_post_ra>
// kernel: conv_block_forward.5
= control target key start
LH: loop header
LB: loop body
LE: loop exit
PB: predicated region body
PF: predicated region fallthrough
CT: control target
= control target key end

     0   :  { %s1133_s15 = smov 0   ;;  %s1494_s0 = inlined_call_operand.vmem [shape: f32[1024,128], index: 0, kind: input, shape index: {}]   ;;  %s1495_s1 = inlined_call_operand.vmem [shape: f32[1024,1], index: 1, kind: input, shape index: {}]   ;;  %s1496_s2 = inlined_call_operand.vmem [shape: f32[1,128], index: 2, kind: input, shape index: {}]   ;;  %s1497_s3 = inlined_call_operand.vmem [shape: f32[1,128], index: 3, kind: input, shape index: {}]   ;;  %s1498_s4 = inlined_call_operand.vmem [shape: f32[1024,128], index: 4, kind: output, shape index: {}]  }
   0x1 LB: > { %s1073_s16 = sadd.s32 4294967295, %s1105_s15   ;;  %p1077_p0 = scmp.ge.s32.totalorder %s1105_s15, 1  ;;  %s1105_s15 = sphi %s1133_s15, %s14_s15  }
   0x2   : > { %p174_p1 = scmp.lt.s32.totalorder %s1105_s15, 3 }
   0x4   : > { %p175_p2 = pnand %p1077_p0, %p174_p1 }
   0x5   : > { %s1078_s17 = sshll.u32 (!%p175_p2), %s1073_s16, 6 }
   0x6   : > { %178 = sbr.rel (%p175_p2) target bundleno = 266 (0x10a), region = 36  ;;  %p206_p3 = scmp.lt.s32.totalorder (!%p175_p2), %s1078_s17, 127 }
   0xb   : > { %v1107_v0 = vmov 0   ;;  %s1500_s17 = smov (!%p206_p3, %s1078_s17), 127  ;;  %v1214_v57 = vld [vmem:[%s1496_s2] ss:$0 sm:$0xff] }
   0xc   : > { %1098 = vset.pattern.permute.xlu1 %v1107_v0  ;;  %1097 = vset.pattern.permute.xlu0 %v1107_v0  ;;  %s1141_s18 = sshll.u32 %s1500_s17, 3  ;;  %v1225_v0 = vld [vmem:[%s1497_s3] ss:$0 sm:$0xff] }
   0xd   : > { %s1147_s21 = scalar_lea.vmem %s1495_s1, %s1141_s18  ;;  %s1209_s24 = scalar_lea.vmem %s1494_s0, %s1141_s18 }
   0xe   : > { %v495_v1 = vld [vmem:[%s1147_s21 + $0x10] sm:$0xff]  ;;  %v493_v2 = vld [vmem:[%s1147_s21] sm:$0xff]  ;;  %v496_v3 = vld [vmem:[%s1147_s21 + $0x18] sm:$0xff]  ;;  %s1251_s5 = scalar_lea.vmem %s1498_s4, %s1141_s18 }
   0xf   : > { %569 = vperm.xlu1 %1098, %v495_v1   ;;  %559 = vperm.xlu0 %1097, %v493_v2   ;;  %v494_v4 = vld [vmem:[%s1147_s21 + $0x8] sm:$0xff]  ;;  %v497_v6 = vld [vmem:[%s1147_s21 + $0x20] sm:$0xff]  ;;  %v500_v7 = vld [vmem:[%s1147_s21 + $0x38] sm:$0xff] }
  0x10   : > { %v498_v5 = vld [vmem:[%s1147_s21 + $0x28] sm:$0xff]  ;;  %v499_v8 = vld [vmem:[%s1147_s21 + $0x30] sm:$0xff]  ;;  %v501_v10 = vld [vmem:[%s1147_s21 + $0x40] sm:$0xff] }
  0x11   : > { %v502_v9 = vld [vmem:[%s1147_s21 + $0x48] sm:$0xff]  ;;  %v504_v11 = vld [vmem:[%s1147_s21 + $0x58] sm:$0xff]  ;;  %v503_v12 = vld [vmem:[%s1147_s21 + $0x50] sm:$0xff] }
  0x12   : > { %v506_v13 = vld [vmem:[%s1147_s21 + $0x68] sm:$0xff]  ;;  %v505_v14 = vld [vmem:[%s1147_s21 + $0x60] sm:$0xff]  ;;  %v508_v15 = vld [vmem:[%s1147_s21 + $0x78] sm:$0xff] }
  0x13   : > { %574 = vperm.xlu1 %1098, %v496_v3   ;;  %564 = vperm.xlu0 %1097, %v494_v4   ;;  %v507_v16 = vld [vmem:[%s1147_s21 + $0x70] sm:$0xff]  ;;  %v510_v17 = vld [vmem:[%s1147_s21 + $0x88] sm:$0xff]  ;;  %v509_v18 = vld [vmem:[%s1147_s21 + $0x80] sm:$0xff] }
  0x14   : > { %v512_v19 = vld [vmem:[%s1147_s21 + $0x98] sm:$0xff]  ;;  %v511_v20 = vld [vmem:[%s1147_s21 + $0x90] sm:$0xff]  ;;  %v514_v21 = vld [vmem:[%s1147_s21 + $0xa8] sm:$0xff] }
  0x15   : > { %v513_v22 = vld [vmem:[%s1147_s21 + $0xa0] sm:$0xff]  ;;  %v516_v23 = vld [vmem:[%s1147_s21 + $0xb8] sm:$0xff]  ;;  %v515_v24 = vld [vmem:[%s1147_s21 + $0xb0] sm:$0xff] }
  0x16   : > { %v518_v25 = vld [vmem:[%s1147_s21 + $0xc8] sm:$0xff]  ;;  %v517_v26 = vld [vmem:[%s1147_s21 + $0xc0] sm:$0xff]  ;;  %v520_v27 = vld [vmem:[%s1147_s21 + $0xd8] sm:$0xff] }
  0x17   : > { %584 = vperm.xlu1 %1098, %v498_v5   ;;  %579 = vperm.xlu0 %1097, %v497_v6   ;;  %v519_v28 = vld [vmem:[%s1147_s21 + $0xd0] sm:$0xff]  ;;  %v522_v29 = vld [vmem:[%s1147_s21 + $0xe8] sm:$0xff]  ;;  %v521_v30 = vld [vmem:[%s1147_s21 + $0xe0] sm:$0xff] }
  0x18   : > { %v524_v31 = vld [vmem:[%s1147_s21 + $0xf8] sm:$0xff]  ;;  %v523_v32 = vld [vmem:[%s1147_s21 + $0xf0] sm:$0xff]  ;;  %v526_v33 = vld [vmem:[%s1147_s21 + $0x108] sm:$0xff] }
  0x19   : > { %v525_v34 = vld [vmem:[%s1147_s21 + $0x100] sm:$0xff]  ;;  %v528_v35 = vld [vmem:[%s1147_s21 + $0x118] sm:$0xff]  ;;  %v527_v36 = vld [vmem:[%s1147_s21 + $0x110] sm:$0xff] }
  0x1a   : > { %v530_v37 = vld [vmem:[%s1147_s21 + $0x128] sm:$0xff]  ;;  %v529_v38 = vld [vmem:[%s1147_s21 + $0x120] sm:$0xff]  ;;  %v532_v39 = vld [vmem:[%s1147_s21 + $0x138] sm:$0xff] }
  0x1b   : > { %594 = vperm.xlu1 %1098, %v500_v7   ;;  %589 = vperm.xlu0 %1097, %v499_v8   ;;  %v531_v40 = vld [vmem:[%s1147_s21 + $0x130] sm:$0xff]  ;;  %v534_v41 = vld [vmem:[%s1147_s21 + $0x148] sm:$0xff]  ;;  %v533_v42 = vld [vmem:[%s1147_s21 + $0x140] sm:$0xff] }
  0x1c   : > { %v536_v43 = vld [vmem:[%s1147_s21 + $0x158] sm:$0xff]  ;;  %v535_v44 = vld [vmem:[%s1147_s21 + $0x150] sm:$0xff]  ;;  %v538_v45 = vld [vmem:[%s1147_s21 + $0x168] sm:$0xff] }
  0x1d   : > { %v537_v46 = vld [vmem:[%s1147_s21 + $0x160] sm:$0xff]  ;;  %v540_v47 = vld [vmem:[%s1147_s21 + $0x178] sm:$0xff]  ;;  %v539_v48 = vld [vmem:[%s1147_s21 + $0x170] sm:$0xff] }
  0x1e   : > { %v542_v49 = vld [vmem:[%s1147_s21 + $0x188] sm:$0xff]  ;;  %v541_v50 = vld [vmem:[%s1147_s21 + $0x180] sm:$0xff]  ;;  %v544_v51 = vld [vmem:[%s1147_s21 + $0x198] sm:$0xff] }
  0x1f   : > { %604 = vperm.xlu1 %1098, %v502_v9   ;;  %599 = vperm.xlu0 %1097, %v501_v10   ;;  %v543_v52 = vld [vmem:[%s1147_s21 + $0x190] sm:$0xff]  ;;  %v546_v53 = vld [vmem:[%s1147_s21 + $0x1a8] sm:$0xff]  ;;  %v545_v54 = vld [vmem:[%s1147_s21 + $0x1a0] sm:$0xff] }
  0x20   : > { %v548_v55 = vld [vmem:[%s1147_s21 + $0x1b8] sm:$0xff]  ;;  %v547_v56 = vld [vmem:[%s1147_s21 + $0x1b0] sm:$0xff]  ;;  %v550_v59 = vld [vmem:[%s1147_s21 + $0x1c8] sm:$0xff] }
  0x21   : > { %v225_v58 = vld [vmem:[%s1209_s24 + $0x10] sm:$0xff]  ;;  %v549_v60 = vld [vmem:[%s1147_s21 + $0x1c0] sm:$0xff]  ;;  %v552_v63 = vld [vmem:[%s1147_s21 + $0x1d8] sm:$0xff] }
  0x22   : > { %v223_v61 = vld [vmem:[%s1209_s24] sm:$0xff]  ;;  %v296_v62 = vmul.f32 %v1214_v57, %v225_v58  ;;  %v551_v2 = vld [vmem:[%s1147_s21 + $0x1d0] sm:$0xff]  ;;  %v226_v3 = vld [vmem:[%s1209_s24 + $0x18] sm:$0xff] }
  0x23   : > { %614 = vperm.xlu1 %1098, %v504_v11   ;;  %609 = vperm.xlu0 %1097, %v503_v12   ;;  %v294_v1 = vmul.f32 %v1214_v57, %v223_v61  ;;  %v224_v4 = vld [vmem:[%s1209_s24 + $0x8] sm:$0xff]  ;;  %v297_v7 = vmul.f32 %v1214_v57, %v226_v3  ;;  %v227_v10 = vld [vmem:[%s1209_s24 + $0x20] sm:$0xff] }
  0x24   : > { %v367_v5 = vadd.f32 %v1225_v0, %v296_v62  ;;  %v295_v8 = vmul.f32 %v1214_v57, %v224_v4  ;;  %v228_v9 = vld [vmem:[%s1209_s24 + $0x28] sm:$0xff]  ;;  %v553_v12 = vld [vmem:[%s1147_s21 + $0x1e0] sm:$0xff] }
  0x25   : > { %v365_v6 = vadd.f32 %v1225_v0, %v294_v1  ;;  %v554_v11 = vld [vmem:[%s1147_s21 + $0x1e8] sm:$0xff] }
  0x26   : > { %v236_v58 = vld [vmem:[%s1209_s24 + $0x68] sm:$0xff] }
  0x27   : > { %624 = vperm.xlu1 %1098, %v506_v13   ;;  %619 = vperm.xlu0 %1097, %v505_v14   ;;  %v299_v13 = vmul.f32 %v1214_v57, %v228_v9  ;;  %v298_v14 = vmul.f32 %v1214_v57, %v227_v10  ;;  %v307_v1 = vmul.f32 %v1214_v57, %v236_v58 }
  0x2b   : > { %634 = vperm.xlu1 %1098, %v508_v15   ;;  %629 = vperm.xlu0 %1097, %v507_v16   ;;  %v431_v15 = vmax.f32 %v367_v5, 0.0  ;;  %v429_v16 = vmax.f32 %v365_v6, 0.0 }
  0x2f   : > { %644 = vperm.xlu1 %1098, %v510_v17   ;;  %639 = vperm.xlu0 %1097, %v509_v18   ;;  %v368_v17 = vadd.f32 %v1225_v0, %v297_v7  ;;  %v366_v18 = vadd.f32 %v1225_v0, %v295_v8  ;;  %v238_v7 = vld [vmem:[%s1209_s24 + $0x78] sm:$0xff]  ;;  %v237_v8 = vld [vmem:[%s1209_s24 + $0x70] sm:$0xff] }
  0x33   : > { %654 = vperm.xlu1 %1098, %v512_v19   ;;  %649 = vperm.xlu0 %1097, %v511_v20   ;;  %v230_v19 = vld [vmem:[%s1209_s24 + $0x38] sm:$0xff]  ;;  %v229_v20 = vld [vmem:[%s1209_s24 + $0x30] sm:$0xff] }
  0x37   : > { %664 = vperm.xlu1 %1098, %v514_v21   ;;  %659 = vperm.xlu0 %1097, %v513_v22   ;;  %v556_v21 = vld [vmem:[%s1147_s21 + $0x1f8] sm:$0xff]  ;;  %v555_v22 = vld [vmem:[%s1147_s21 + $0x1f0] sm:$0xff] }
  0x3b   : > { %674 = vperm.xlu1 %1098, %v516_v23   ;;  %669 = vperm.xlu0 %1097, %v515_v24  }
  0x3f   : > { %684 = vperm.xlu1 %1098, %v518_v25   ;;  %679 = vperm.xlu0 %1097, %v517_v26   ;;  %v370_v25 = vadd.f32 %v1225_v0, %v299_v13  ;;  %v369_v26 = vadd.f32 %v1225_v0, %v298_v14  ;;  %v309_v13 = vmul.f32 %v1214_v57, %v238_v7 }
  0x40   : > { %v308_v14 = vmul.f32 %v1214_v57, %v237_v8 }
  0x43   : > { %694 = vperm.xlu1 %1098, %v520_v27   ;;  %689 = vperm.xlu0 %1097, %v519_v28   ;;  %v301_v27 = vmul.f32 %v1214_v57, %v230_v19  ;;  %v300_v28 = vmul.f32 %v1214_v57, %v229_v20  ;;  %v240_v19 = vld [vmem:[%s1209_s24 + $0x88] sm:$0xff]  ;;  %v239_v20 = vld [vmem:[%s1209_s24 + $0x80] sm:$0xff] }
  0x47   : > { %704 = vperm.xlu1 %1098, %v522_v29   ;;  %699 = vperm.xlu0 %1097, %v521_v30  }
  0x4b   : > { %714 = vperm.xlu1 %1098, %v524_v31   ;;  %709 = vperm.xlu0 %1097, %v523_v32   ;;  %v432_v31 = vmax.f32 %v368_v17, 0.0  ;;  %v430_v32 = vmax.f32 %v366_v18, 0.0 }
  0x4f   : > { %724 = vperm.xlu1 %1098, %v526_v33   ;;  %719 = vperm.xlu0 %1097, %v525_v34   ;;  %v232_v33 = vld [vmem:[%s1209_s24 + $0x48] sm:$0xff]  ;;  %v231_v34 = vld [vmem:[%s1209_s24 + $0x40] sm:$0xff] }
  0x53   : > { %734 = vperm.xlu1 %1098, %v528_v35   ;;  %729 = vperm.xlu0 %1097, %v527_v36  }
  0x57   : > { %744 = vperm.xlu1 %1098, %v530_v37   ;;  %739 = vperm.xlu0 %1097, %v529_v38   ;;  %v434_v37 = vmax.f32 %v370_v25, 0.0  ;;  %v372_v38 = vadd.f32 %v1225_v0, %v301_v27  ;;  %v379_v25 = vadd.f32 %v1225_v0, %v308_v14 }
  0x5b   : > { %754 = vperm.xlu1 %1098, %v532_v39   ;;  %749 = vperm.xlu0 %1097, %v531_v40   ;;  %v371_v39 = vadd.f32 %v1225_v0, %v300_v28  ;;  %v303_v40 = vmul.f32 %v1214_v57, %v232_v33 }
  0x5f   : > { %764 = vperm.xlu1 %1098, %v534_v41   ;;  %759 = vperm.xlu0 %1097, %v533_v42  }
  0x63   : > { %774 = vperm.xlu1 %1098, %v536_v43   ;;  %769 = vperm.xlu0 %1097, %v535_v44   ;;  %v433_v43 = vmax.f32 %v369_v26, 0.0  ;;  %v302_v44 = vmul.f32 %v1214_v57, %v231_v34  ;;  %v311_v26 = vmul.f32 %v1214_v57, %v240_v19 }
  0x67   : > { %784 = vperm.xlu1 %1098, %v538_v45   ;;  %779 = vperm.xlu0 %1097, %v537_v46   ;;  %v234_v45 = vld [vmem:[%s1209_s24 + $0x58] sm:$0xff]  ;;  %v233_v46 = vld [vmem:[%s1209_s24 + $0x50] sm:$0xff] }
  0x6b   : > { %794 = vperm.xlu1 %1098, %v540_v47   ;;  %789 = vperm.xlu0 %1097, %v539_v48  }
  0x6f   : > { %804 = vperm.xlu1 %1098, %v542_v49   ;;  %799 = vperm.xlu0 %1097, %v541_v50   ;;  %v436_v49 = vmax.f32 %v372_v38, 0.0  ;;  %v435_v50 = vmax.f32 %v371_v39, 0.0 }
  0x73   : > { %814 = vperm.xlu1 %1098, %v544_v51   ;;  %809 = vperm.xlu0 %1097, %v543_v52   ;;  %v374_v51 = vadd.f32 %v1225_v0, %v303_v40  ;;  %v305_v52 = vmul.f32 %v1214_v57, %v234_v45 }
  0x75   : > { %v438_v62 = vmax.f32 %v374_v51, 0.0 }
  0x77   : > { %824 = vperm.xlu1 %1098, %v546_v53   ;;  %819 = vperm.xlu0 %1097, %v545_v54  }
  0x7b   : > { %834 = vperm.xlu1 %1098, %v548_v55   ;;  %829 = vperm.xlu0 %1097, %v547_v56   ;;  %v373_v55 = vadd.f32 %v1225_v0, %v302_v44  ;;  %v304_v56 = vmul.f32 %v1214_v57, %v233_v46  ;;  %v243_v44 = vld [vmem:[%s1209_s24 + $0xa0] sm:$0xff] }
  0x7d   : > { %v437_v5 = vmax.f32 %v373_v55, 0.0  ;;  %v375_v6 = vadd.f32 %v1225_v0, %v304_v56  ;;  %v246_v55 = vld [vmem:[%s1209_s24 + $0xb8] sm:$0xff]  ;;  %v245_v56 = vld [vmem:[%s1209_s24 + $0xb0] sm:$0xff] }
  0x7f   : > { %844 = vperm.xlu1 %1098, %v550_v59   ;;  %839 = vperm.xlu0 %1097, %v549_v60   ;;  %v235_v59 = vld [vmem:[%s1209_s24 + $0x60] sm:$0xff]  ;;  %v439_v18 = vmax.f32 %v375_v6, 0.0 }
  0x80   : > { %v247_v6 = vld [vmem:[%s1209_s24 + $0xc0] sm:$0xff] }
  0x83   : > { %854 = vperm.xlu1 %1098, %v552_v63   ;;  %849 = vperm.xlu0 %1097, %v551_v2   ;;  %v376_v63 = vadd.f32 %v1225_v0, %v305_v52  ;;  %v306_v2 = vmul.f32 %v1214_v57, %v235_v59 }
  0x85   : > { %v440_v17 = vmax.f32 %v376_v63, 0.0  ;;  %v316_v63 = vmul.f32 %v1214_v57, %v245_v56 }
  0x87   : > { %864 = vperm.xlu1 %1098, %v554_v11   ;;  %859 = vperm.xlu0 %1097, %v553_v12   ;;  %v378_v11 = vadd.f32 %v1225_v0, %v307_v1  ;;  %v377_v12 = vadd.f32 %v1225_v0, %v306_v2 }
  0x8a   : > { %v570_v23 = vpop.permute.xlu1 %569  ;;  %v560_v24 = vpop.permute.xlu0 %559 }
  0x8b   : > { %v879_v29 = vmul.f32 %v570_v23, %v431_v15  ;;  %v877_v30 = vmul.f32 %v560_v24, %v429_v16  ;;  %874 = vperm.xlu1 %1098, %v556_v21   ;;  %869 = vperm.xlu0 %1097, %v555_v22   ;;  %v442_v23 = vmax.f32 %v378_v11, 0.0  ;;  %v380_v24 = vadd.f32 %v1225_v0, %v309_v13 }
  0x8d   : > { %943 = vst [vmem:[%s1251_s5 + $0x10] sm:$0xff] %v879_v29  ;;  %941 = vst [vmem:[%s1251_s5] sm:$0xff] %v877_v30  ;;  %v441_v29 = vmax.f32 %v377_v12, 0.0  ;;  %v310_v30 = vmul.f32 %v1214_v57, %v239_v20  ;;  %v318_v12 = vmul.f32 %v1214_v57, %v247_v6 }
  0x8e   : > { %v575_v35 = vpop.permute.xlu1 %574  ;;  %v565_v36 = vpop.permute.xlu0 %564 }
  0x8f   : > { %v880_v41 = vmul.f32 %v575_v35, %v432_v31  ;;  %v878_v42 = vmul.f32 %v565_v36, %v430_v32  ;;  %v242_v31 = vld [vmem:[%s1209_s24 + $0x98] sm:$0xff]  ;;  %v241_v32 = vld [vmem:[%s1209_s24 + $0x90] sm:$0xff]  ;;  %v444_v35 = vmax.f32 %v380_v24, 0.0  ;;  %v443_v36 = vmax.f32 %v379_v25, 0.0 }
  0x90   : > { %v313_v38 = vmul.f32 %v1214_v57, %v242_v31  ;;  %v389_v24 = vadd.f32 %v1225_v0, %v318_v12 }
  0x91   : > { %944 = vst [vmem:[%s1251_s5 + $0x18] sm:$0xff] %v880_v41  ;;  %942 = vst [vmem:[%s1251_s5 + $0x8] sm:$0xff] %v878_v42  ;;  %v381_v41 = vadd.f32 %v1225_v0, %v310_v30  ;;  %v312_v42 = vmul.f32 %v1214_v57, %v241_v32  ;;  %v251_v30 = vld [vmem:[%s1209_s24 + $0xe0] sm:$0xff] }
  0x92   : > { %v585_v47 = vpop.permute.xlu1 %584  ;;  %v580_v48 = vpop.permute.xlu0 %579 }
  0x93   : > { %v882_v53 = vmul.f32 %v585_v47, %v434_v37  ;;  %v881_v54 = vmul.f32 %v580_v48, %v433_v43  ;;  %v382_v37 = vadd.f32 %v1225_v0, %v311_v26  ;;  %v244_v43 = vld [vmem:[%s1209_s24 + $0xa8] sm:$0xff]  ;;  %v384_v48 = vadd.f32 %v1225_v0, %v313_v38 }
  0x95   : > { %946 = vst [vmem:[%s1251_s5 + $0x28] sm:$0xff] %v882_v53  ;;  %945 = vst [vmem:[%s1251_s5 + $0x20] sm:$0xff] %v881_v54  ;;  %v446_v47 = vmax.f32 %v382_v37, 0.0  ;;  %v445_v53 = vmax.f32 %v381_v41, 0.0  ;;  %v383_v54 = vadd.f32 %v1225_v0, %v312_v42  ;;  %v254_v41 = vld [vmem:[%s1209_s24 + $0xf8] sm:$0xff]  ;;  %v253_v42 = vld [vmem:[%s1209_s24 + $0xf0] sm:$0xff] }
  0x96   : > { %v595_v60 = vpop.permute.xlu1 %594  ;;  %v590_v61 = vpop.permute.xlu0 %589 }
  0x97   : > { %v884_v3 = vmul.f32 %v595_v60, %v436_v49  ;;  %v883_v4 = vmul.f32 %v590_v61, %v435_v50  ;;  %v315_v49 = vmul.f32 %v1214_v57, %v244_v43  ;;  %v314_v50 = vmul.f32 %v1214_v57, %v243_v44 }
  0x99   : > { %948 = vst [vmem:[%s1251_s5 + $0x38] sm:$0xff] %v884_v3  ;;  %947 = vst [vmem:[%s1251_s5 + $0x30] sm:$0xff] %v883_v4  ;;  %v386_v60 = vadd.f32 %v1225_v0, %v315_v49  ;;  %v385_v61 = vadd.f32 %v1225_v0, %v314_v50  ;;  %v448_v3 = vmax.f32 %v384_v48, 0.0  ;;  %v447_v4 = vmax.f32 %v383_v54, 0.0  ;;  %v255_v54 = vld [vmem:[%s1209_s24 + $0x100] sm:$0xff] }
  0x9a   : > { %v605_v9 = vpop.permute.xlu1 %604  ;;  %v600_v10 = vpop.permute.xlu0 %599  ;;  %v324_v48 = vmul.f32 %v1214_v57, %v253_v42 }
  0x9b   : > { %v886_v15 = vmul.f32 %v605_v9, %v438_v62  ;;  %v885_v16 = vmul.f32 %v600_v10, %v437_v5  ;;  %v317_v62 = vmul.f32 %v1214_v57, %v246_v55  ;;  %v248_v5 = vld [vmem:[%s1209_s24 + $0xc8] sm:$0xff]  ;;  %v387_v10 = vadd.f32 %v1225_v0, %v316_v63 }
  0x9c   : > { %v319_v11 = vmul.f32 %v1214_v57, %v248_v5 }
  0x9d   : > { %950 = vst [vmem:[%s1251_s5 + $0x48] sm:$0xff] %v886_v15  ;;  %949 = vst [vmem:[%s1251_s5 + $0x40] sm:$0xff] %v885_v16  ;;  %v388_v9 = vadd.f32 %v1225_v0, %v317_v62  ;;  %v450_v15 = vmax.f32 %v386_v60, 0.0  ;;  %v449_v16 = vmax.f32 %v385_v61, 0.0  ;;  %v395_v61 = vadd.f32 %v1225_v0, %v324_v48 }
  0x9e   : > { %v615_v21 = vpop.permute.xlu1 %614  ;;  %v610_v22 = vpop.permute.xlu0 %609 }
  0x9f   : > { %v888_v27 = vmul.f32 %v615_v21, %v440_v17  ;;  %v887_v28 = vmul.f32 %v610_v22, %v439_v18  ;;  %v250_v17 = vld [vmem:[%s1209_s24 + $0xd8] sm:$0xff]  ;;  %v249_v18 = vld [vmem:[%s1209_s24 + $0xd0] sm:$0xff]  ;;  %v452_v21 = vmax.f32 %v388_v9, 0.0  ;;  %v451_v22 = vmax.f32 %v387_v10, 0.0 }
  0xa1   : > { %952 = vst [vmem:[%s1251_s5 + $0x58] sm:$0xff] %v888_v27  ;;  %951 = vst [vmem:[%s1251_s5 + $0x50] sm:$0xff] %v887_v28  ;;  %v321_v27 = vmul.f32 %v1214_v57, %v250_v17  ;;  %v320_v28 = vmul.f32 %v1214_v57, %v249_v18 }
  0xa2   : > { %v625_v33 = vpop.permute.xlu1 %624  ;;  %v620_v34 = vpop.permute.xlu0 %619 }
  0xa3   : > { %v890_v39 = vmul.f32 %v625_v33, %v442_v23  ;;  %v889_v40 = vmul.f32 %v620_v34, %v441_v29  ;;  %v390_v23 = vadd.f32 %v1225_v0, %v319_v11  ;;  %v252_v29 = vld [vmem:[%s1209_s24 + $0xe8] sm:$0xff]  ;;  %v453_v34 = vmax.f32 %v389_v24, 0.0 }
  0xa5   : > { %954 = vst [vmem:[%s1251_s5 + $0x68] sm:$0xff] %v890_v39  ;;  %953 = vst [vmem:[%s1251_s5 + $0x60] sm:$0xff] %v889_v40  ;;  %v454_v33 = vmax.f32 %v390_v23, 0.0  ;;  %v392_v39 = vadd.f32 %v1225_v0, %v321_v27  ;;  %v391_v40 = vadd.f32 %v1225_v0, %v320_v28  ;;  %v262_v27 = vld [vmem:[%s1209_s24 + $0x138] sm:$0xff]  ;;  %v261_v28 = vld [vmem:[%s1209_s24 + $0x130] sm:$0xff] }
  0xa6   : > { %v635_v45 = vpop.permute.xlu1 %634  ;;  %v630_v46 = vpop.permute.xlu0 %629 }
  0xa7   : > { %v892_v51 = vmul.f32 %v635_v45, %v444_v35  ;;  %v891_v52 = vmul.f32 %v630_v46, %v443_v36  ;;  %v323_v35 = vmul.f32 %v1214_v57, %v252_v29  ;;  %v322_v36 = vmul.f32 %v1214_v57, %v251_v30 }
  0xa9   : > { %956 = vst [vmem:[%s1251_s5 + $0x78] sm:$0xff] %v892_v51  ;;  %955 = vst [vmem:[%s1251_s5 + $0x70] sm:$0xff] %v891_v52  ;;  %v394_v45 = vadd.f32 %v1225_v0, %v323_v35  ;;  %v393_v46 = vadd.f32 %v1225_v0, %v322_v36  ;;  %v456_v51 = vmax.f32 %v392_v39, 0.0  ;;  %v455_v52 = vmax.f32 %v391_v40, 0.0  ;;  %v264_v39 = vld [vmem:[%s1209_s24 + $0x148] sm:$0xff]  ;;  %v263_v40 = vld [vmem:[%s1209_s24 + $0x140] sm:$0xff] }
  0xaa   : > { %v645_v58 = vpop.permute.xlu1 %644  ;;  %v640_v59 = vpop.permute.xlu0 %639 }
  0xab   : > { %v894_v1 = vmul.f32 %v645_v58, %v446_v47  ;;  %v893_v2 = vmul.f32 %v640_v59, %v445_v53  ;;  %v325_v47 = vmul.f32 %v1214_v57, %v254_v41  ;;  %v256_v53 = vld [vmem:[%s1209_s24 + $0x108] sm:$0xff]  ;;  %v458_v58 = vmax.f32 %v394_v45, 0.0 }
  0xac   : > { %v457_v59 = vmax.f32 %v393_v46, 0.0  ;;  %v335_v45 = vmul.f32 %v1214_v57, %v264_v39  ;;  %v334_v46 = vmul.f32 %v1214_v57, %v263_v40 }
  0xad   : > { %958 = vst [vmem:[%s1251_s5 + $0x88] sm:$0xff] %v894_v1  ;;  %957 = vst [vmem:[%s1251_s5 + $0x80] sm:$0xff] %v893_v2  ;;  %v396_v60 = vadd.f32 %v1225_v0, %v325_v47  ;;  %v327_v1 = vmul.f32 %v1214_v57, %v256_v53  ;;  %v326_v2 = vmul.f32 %v1214_v57, %v255_v54 }
  0xae   : > { %v655_v7 = vpop.permute.xlu1 %654  ;;  %v650_v8 = vpop.permute.xlu0 %649 }
  0xaf   : > { %v896_v13 = vmul.f32 %v655_v7, %v448_v3  ;;  %v895_v14 = vmul.f32 %v650_v8, %v447_v4  ;;  %v258_v3 = vld [vmem:[%s1209_s24 + $0x118] sm:$0xff]  ;;  %v257_v4 = vld [vmem:[%s1209_s24 + $0x110] sm:$0xff]  ;;  %v460_v7 = vmax.f32 %v396_v60, 0.0  ;;  %v459_v8 = vmax.f32 %v395_v61, 0.0 }
  0xb0   : > { %v329_v9 = vmul.f32 %v1214_v57, %v258_v3  ;;  %v328_v10 = vmul.f32 %v1214_v57, %v257_v4 }
  0xb1   : > { %960 = vst [vmem:[%s1251_s5 + $0x98] sm:$0xff] %v896_v13  ;;  %959 = vst [vmem:[%s1251_s5 + $0x90] sm:$0xff] %v895_v14  ;;  %v398_v13 = vadd.f32 %v1225_v0, %v327_v1  ;;  %v397_v14 = vadd.f32 %v1225_v0, %v326_v2  ;;  %v268_v1 = vld [vmem:[%s1209_s24 + $0x168] sm:$0xff]  ;;  %v267_v2 = vld [vmem:[%s1209_s24 + $0x160] sm:$0xff] }
  0xb2   : > { %v665_v19 = vpop.permute.xlu1 %664  ;;  %v660_v20 = vpop.permute.xlu0 %659 }
  0xb3   : > { %v898_v25 = vmul.f32 %v665_v19, %v450_v15  ;;  %v897_v26 = vmul.f32 %v660_v20, %v449_v16  ;;  %v260_v15 = vld [vmem:[%s1209_s24 + $0x128] sm:$0xff]  ;;  %v259_v16 = vld [vmem:[%s1209_s24 + $0x120] sm:$0xff]  ;;  %v400_v19 = vadd.f32 %v1225_v0, %v329_v9  ;;  %v399_v20 = vadd.f32 %v1225_v0, %v328_v10 }
  0xb5   : > { %962 = vst [vmem:[%s1251_s5 + $0xa8] sm:$0xff] %v898_v25  ;;  %961 = vst [vmem:[%s1251_s5 + $0xa0] sm:$0xff] %v897_v26  ;;  %v462_v25 = vmax.f32 %v398_v13, 0.0  ;;  %v461_v26 = vmax.f32 %v397_v14, 0.0  ;;  %v270_v13 = vld [vmem:[%s1209_s24 + $0x178] sm:$0xff]  ;;  %v269_v14 = vld [vmem:[%s1209_s24 + $0x170] sm:$0xff] }
  0xb6   : > { %v675_v31 = vpop.permute.xlu1 %674  ;;  %v670_v32 = vpop.permute.xlu0 %669 }
  0xb7   : > { %v900_v37 = vmul.f32 %v675_v31, %v452_v21  ;;  %v899_v38 = vmul.f32 %v670_v32, %v451_v22  ;;  %v331_v21 = vmul.f32 %v1214_v57, %v260_v15  ;;  %v330_v22 = vmul.f32 %v1214_v57, %v259_v16 }
  0xb8   : > { %v464_v31 = vmax.f32 %v400_v19, 0.0  ;;  %v463_v32 = vmax.f32 %v399_v20, 0.0  ;;  %v341_v19 = vmul.f32 %v1214_v57, %v270_v13  ;;  %v340_v20 = vmul.f32 %v1214_v57, %v269_v14 }
  0xb9   : > { %964 = vst [vmem:[%s1251_s5 + $0xb8] sm:$0xff] %v900_v37  ;;  %963 = vst [vmem:[%s1251_s5 + $0xb0] sm:$0xff] %v899_v38  ;;  %v333_v37 = vmul.f32 %v1214_v57, %v262_v27  ;;  %v332_v38 = vmul.f32 %v1214_v57, %v261_v28 }
  0xba   : > { %v685_v43 = vpop.permute.xlu1 %684  ;;  %v680_v44 = vpop.permute.xlu0 %679 }
  0xbb   : > { %v902_v49 = vmul.f32 %v685_v43, %v454_v33  ;;  %v901_v50 = vmul.f32 %v680_v44, %v453_v34  ;;  %v402_v33 = vadd.f32 %v1225_v0, %v331_v21  ;;  %v401_v34 = vadd.f32 %v1225_v0, %v330_v22 }
  0xbd   : > { %966 = vst [vmem:[%s1251_s5 + $0xc8] sm:$0xff] %v902_v49  ;;  %965 = vst [vmem:[%s1251_s5 + $0xc0] sm:$0xff] %v901_v50  ;;  %v466_v43 = vmax.f32 %v402_v33, 0.0  ;;  %v465_v44 = vmax.f32 %v401_v34, 0.0  ;;  %v404_v49 = vadd.f32 %v1225_v0, %v333_v37  ;;  %v403_v50 = vadd.f32 %v1225_v0, %v332_v38  ;;  %v274_v37 = vld [vmem:[%s1209_s24 + $0x198] sm:$0xff]  ;;  %v273_v38 = vld [vmem:[%s1209_s24 + $0x190] sm:$0xff] }
  0xbe   : > { %v695_v55 = vpop.permute.xlu1 %694  ;;  %v690_v56 = vpop.permute.xlu0 %689 }
  0xbf   : > { %v904_v62 = vmul.f32 %v695_v55, %v456_v51  ;;  %v903_v63 = vmul.f32 %v690_v56, %v455_v52  ;;  %v266_v51 = vld [vmem:[%s1209_s24 + $0x158] sm:$0xff]  ;;  %v265_v52 = vld [vmem:[%s1209_s24 + $0x150] sm:$0xff]  ;;  %v406_v55 = vadd.f32 %v1225_v0, %v335_v45  ;;  %v405_v56 = vadd.f32 %v1225_v0, %v334_v46 }
  0xc1   : > { %968 = vst [vmem:[%s1251_s5 + $0xd8] sm:$0xff] %v904_v62  ;;  %967 = vst [vmem:[%s1251_s5 + $0xd0] sm:$0xff] %v903_v63  ;;  %v468_v62 = vmax.f32 %v404_v49, 0.0  ;;  %v467_v63 = vmax.f32 %v403_v50, 0.0  ;;  %v276_v49 = vld [vmem:[%s1209_s24 + $0x1a8] sm:$0xff]  ;;  %v275_v50 = vld [vmem:[%s1209_s24 + $0x1a0] sm:$0xff] }
  0xc2   : > { %v705_v5 = vpop.permute.xlu1 %704  ;;  %v700_v6 = vpop.permute.xlu0 %699 }
  0xc3   : > { %v906_v11 = vmul.f32 %v705_v5, %v458_v58  ;;  %v905_v12 = vmul.f32 %v700_v6, %v457_v59  ;;  %v337_v58 = vmul.f32 %v1214_v57, %v266_v51  ;;  %v336_v59 = vmul.f32 %v1214_v57, %v265_v52 }
  0xc4   : > { %v470_v5 = vmax.f32 %v406_v55, 0.0  ;;  %v469_v6 = vmax.f32 %v405_v56, 0.0  ;;  %v347_v55 = vmul.f32 %v1214_v57, %v276_v49  ;;  %v346_v56 = vmul.f32 %v1214_v57, %v275_v50 }
  0xc5   : > { %970 = vst [vmem:[%s1251_s5 + $0xe8] sm:$0xff] %v906_v11  ;;  %969 = vst [vmem:[%s1251_s5 + $0xe0] sm:$0xff] %v905_v12  ;;  %v339_v11 = vmul.f32 %v1214_v57, %v268_v1  ;;  %v338_v12 = vmul.f32 %v1214_v57, %v267_v2 }
  0xc6   : > { %v715_v17 = vpop.permute.xlu1 %714  ;;  %v710_v18 = vpop.permute.xlu0 %709 }
  0xc7   : > { %v908_v23 = vmul.f32 %v715_v17, %v460_v7  ;;  %v907_v24 = vmul.f32 %v710_v18, %v459_v8  ;;  %v408_v7 = vadd.f32 %v1225_v0, %v337_v58  ;;  %v407_v8 = vadd.f32 %v1225_v0, %v336_v59 }
  0xc9   : > { %972 = vst [vmem:[%s1251_s5 + $0xf8] sm:$0xff] %v908_v23  ;;  %971 = vst [vmem:[%s1251_s5 + $0xf0] sm:$0xff] %v907_v24  ;;  %v472_v17 = vmax.f32 %v408_v7, 0.0  ;;  %v471_v18 = vmax.f32 %v407_v8, 0.0  ;;  %v410_v23 = vadd.f32 %v1225_v0, %v339_v11  ;;  %v409_v24 = vadd.f32 %v1225_v0, %v338_v12  ;;  %v280_v11 = vld [vmem:[%s1209_s24 + $0x1c8] sm:$0xff]  ;;  %v279_v12 = vld [vmem:[%s1209_s24 + $0x1c0] sm:$0xff] }
  0xca   : > { %v725_v29 = vpop.permute.xlu1 %724  ;;  %v720_v30 = vpop.permute.xlu0 %719 }
  0xcb   : > { %v910_v35 = vmul.f32 %v725_v29, %v462_v25  ;;  %v909_v36 = vmul.f32 %v720_v30, %v461_v26  ;;  %v272_v25 = vld [vmem:[%s1209_s24 + $0x188] sm:$0xff]  ;;  %v271_v26 = vld [vmem:[%s1209_s24 + $0x180] sm:$0xff]  ;;  %v412_v29 = vadd.f32 %v1225_v0, %v341_v19  ;;  %v411_v30 = vadd.f32 %v1225_v0, %v340_v20 }
  0xcd   : > { %974 = vst [vmem:[%s1251_s5 + $0x108] sm:$0xff] %v910_v35  ;;  %973 = vst [vmem:[%s1251_s5 + $0x100] sm:$0xff] %v909_v36  ;;  %v474_v35 = vmax.f32 %v410_v23, 0.0  ;;  %v473_v36 = vmax.f32 %v409_v24, 0.0  ;;  %v282_v23 = vld [vmem:[%s1209_s24 + $0x1d8] sm:$0xff]  ;;  %v281_v24 = vld [vmem:[%s1209_s24 + $0x1d0] sm:$0xff] }
  0xce   : > { %v735_v41 = vpop.permute.xlu1 %734  ;;  %v730_v42 = vpop.permute.xlu0 %729 }
  0xcf   : > { %v912_v47 = vmul.f32 %v735_v41, %v464_v31  ;;  %v911_v48 = vmul.f32 %v730_v42, %v463_v32  ;;  %v343_v31 = vmul.f32 %v1214_v57, %v272_v25  ;;  %v342_v32 = vmul.f32 %v1214_v57, %v271_v26 }
  0xd0   : > { %v476_v41 = vmax.f32 %v412_v29, 0.0  ;;  %v475_v42 = vmax.f32 %v411_v30, 0.0  ;;  %v353_v29 = vmul.f32 %v1214_v57, %v282_v23  ;;  %v352_v30 = vmul.f32 %v1214_v57, %v281_v24 }
  0xd1   : > { %976 = vst [vmem:[%s1251_s5 + $0x118] sm:$0xff] %v912_v47  ;;  %975 = vst [vmem:[%s1251_s5 + $0x110] sm:$0xff] %v911_v48  ;;  %v345_v47 = vmul.f32 %v1214_v57, %v274_v37  ;;  %v344_v48 = vmul.f32 %v1214_v57, %v273_v38 }
  0xd2   : > { %v745_v53 = vpop.permute.xlu1 %744  ;;  %v740_v54 = vpop.permute.xlu0 %739 }
  0xd3   : > { %v914_v60 = vmul.f32 %v745_v53, %v466_v43  ;;  %v913_v61 = vmul.f32 %v740_v54, %v465_v44  ;;  %v414_v43 = vadd.f32 %v1225_v0, %v343_v31  ;;  %v413_v44 = vadd.f32 %v1225_v0, %v342_v32 }
  0xd5   : > { %978 = vst [vmem:[%s1251_s5 + $0x128] sm:$0xff] %v914_v60  ;;  %977 = vst [vmem:[%s1251_s5 + $0x120] sm:$0xff] %v913_v61  ;;  %v478_v53 = vmax.f32 %v414_v43, 0.0  ;;  %v477_v54 = vmax.f32 %v413_v44, 0.0  ;;  %v416_v60 = vadd.f32 %v1225_v0, %v345_v47  ;;  %v415_v61 = vadd.f32 %v1225_v0, %v344_v48  ;;  %v286_v47 = vld [vmem:[%s1209_s24 + $0x1f8] sm:$0xff]  ;;  %v285_v48 = vld [vmem:[%s1209_s24 + $0x1f0] sm:$0xff] }
  0xd6   : > { %v755_v3 = vpop.permute.xlu1 %754  ;;  %v750_v4 = vpop.permute.xlu0 %749 }
  0xd7   : > { %v916_v9 = vmul.f32 %v755_v3, %v468_v62  ;;  %v915_v10 = vmul.f32 %v750_v4, %v467_v63  ;;  %v278_v62 = vld [vmem:[%s1209_s24 + $0x1b8] sm:$0xff]  ;;  %v277_v63 = vld [vmem:[%s1209_s24 + $0x1b0] sm:$0xff]  ;;  %v418_v3 = vadd.f32 %v1225_v0, %v347_v55  ;;  %v417_v4 = vadd.f32 %v1225_v0, %v346_v56 }
  0xd9   : > { %980 = vst [vmem:[%s1251_s5 + $0x138] sm:$0xff] %v916_v9  ;;  %979 = vst [vmem:[%s1251_s5 + $0x130] sm:$0xff] %v915_v10  ;;  %v480_v9 = vmax.f32 %v416_v60, 0.0  ;;  %v479_v10 = vmax.f32 %v415_v61, 0.0 }
  0xda   : > { %v765_v15 = vpop.permute.xlu1 %764  ;;  %v760_v16 = vpop.permute.xlu0 %759 }
  0xdb   : > { %v918_v21 = vmul.f32 %v765_v15, %v470_v5  ;;  %v917_v22 = vmul.f32 %v760_v16, %v469_v6  ;;  %v349_v5 = vmul.f32 %v1214_v57, %v278_v62  ;;  %v348_v6 = vmul.f32 %v1214_v57, %v277_v63 }
  0xdc   : > { %v482_v15 = vmax.f32 %v418_v3, 0.0  ;;  %v481_v16 = vmax.f32 %v417_v4, 0.0 }
  0xdd   : > { %982 = vst [vmem:[%s1251_s5 + $0x148] sm:$0xff] %v918_v21  ;;  %981 = vst [vmem:[%s1251_s5 + $0x140] sm:$0xff] %v917_v22  ;;  %v351_v21 = vmul.f32 %v1214_v57, %v280_v11  ;;  %v350_v22 = vmul.f32 %v1214_v57, %v279_v12 }
  0xde   : > { %v775_v27 = vpop.permute.xlu1 %774  ;;  %v770_v28 = vpop.permute.xlu0 %769 }
  0xdf   : > { %v920_v33 = vmul.f32 %v775_v27, %v472_v17  ;;  %v919_v34 = vmul.f32 %v770_v28, %v471_v18  ;;  %v420_v17 = vadd.f32 %v1225_v0, %v349_v5  ;;  %v419_v18 = vadd.f32 %v1225_v0, %v348_v6 }
  0xe1   : > { %984 = vst [vmem:[%s1251_s5 + $0x158] sm:$0xff] %v920_v33  ;;  %983 = vst [vmem:[%s1251_s5 + $0x150] sm:$0xff] %v919_v34  ;;  %v484_v27 = vmax.f32 %v420_v17, 0.0  ;;  %v483_v28 = vmax.f32 %v419_v18, 0.0  ;;  %v422_v33 = vadd.f32 %v1225_v0, %v351_v21  ;;  %v421_v34 = vadd.f32 %v1225_v0, %v350_v22 }
  0xe2   : > { %v785_v39 = vpop.permute.xlu1 %784  ;;  %v780_v40 = vpop.permute.xlu0 %779 }
  0xe3   : > { %v922_v45 = vmul.f32 %v785_v39, %v474_v35  ;;  %v921_v46 = vmul.f32 %v780_v40, %v473_v36  ;;  %v284_v35 = vld [vmem:[%s1209_s24 + $0x1e8] sm:$0xff]  ;;  %v283_v36 = vld [vmem:[%s1209_s24 + $0x1e0] sm:$0xff]  ;;  %v424_v39 = vadd.f32 %v1225_v0, %v353_v29  ;;  %v423_v40 = vadd.f32 %v1225_v0, %v352_v30 }
  0xe5   : > { %986 = vst [vmem:[%s1251_s5 + $0x168] sm:$0xff] %v922_v45  ;;  %985 = vst [vmem:[%s1251_s5 + $0x160] sm:$0xff] %v921_v46  ;;  %v486_v45 = vmax.f32 %v422_v33, 0.0  ;;  %v485_v46 = vmax.f32 %v421_v34, 0.0 }
  0xe6   : > { %v795_v51 = vpop.permute.xlu1 %794  ;;  %v790_v52 = vpop.permute.xlu0 %789 }
  0xe7   : > { %v924_v58 = vmul.f32 %v795_v51, %v476_v41  ;;  %v923_v59 = vmul.f32 %v790_v52, %v475_v42  ;;  %v355_v41 = vmul.f32 %v1214_v57, %v284_v35  ;;  %v354_v42 = vmul.f32 %v1214_v57, %v283_v36 }
  0xe8   : > { %v488_v51 = vmax.f32 %v424_v39, 0.0  ;;  %v487_v52 = vmax.f32 %v423_v40, 0.0 }
  0xe9   : > { %988 = vst [vmem:[%s1251_s5 + $0x178] sm:$0xff] %v924_v58  ;;  %987 = vst [vmem:[%s1251_s5 + $0x170] sm:$0xff] %v923_v59  ;;  %v357_v58 = vmul.f32 %v1214_v57, %v286_v47  ;;  %v356_v59 = vmul.f32 %v1214_v57, %v285_v48 }
  0xea   : > { %v805_v1 = vpop.permute.xlu1 %804  ;;  %v800_v2 = vpop.permute.xlu0 %799 }
  0xeb   : > { %v926_v7 = vmul.f32 %v805_v1, %v478_v53  ;;  %v925_v8 = vmul.f32 %v800_v2, %v477_v54  ;;  %v426_v53 = vadd.f32 %v1225_v0, %v355_v41  ;;  %v425_v54 = vadd.f32 %v1225_v0, %v354_v42 }
  0xec   : > { %v428_v3 = vadd.f32 %v1225_v0, %v357_v58  ;;  %v427_v4 = vadd.f32 %v1225_v0, %v356_v59 }
  0xed   : > { %990 = vst [vmem:[%s1251_s5 + $0x188] sm:$0xff] %v926_v7  ;;  %989 = vst [vmem:[%s1251_s5 + $0x180] sm:$0xff] %v925_v8  ;;  %v490_v62 = vmax.f32 %v426_v53, 0.0  ;;  %v489_v63 = vmax.f32 %v425_v54, 0.0 }
  0xee   : > { %v815_v13 = vpop.permute.xlu1 %814  ;;  %v810_v14 = vpop.permute.xlu0 %809  ;;  %v492_v8 = vmax.f32 %v428_v3, 0.0 }
  0xef   : > { %v928_v19 = vmul.f32 %v815_v13, %v480_v9  ;;  %v927_v20 = vmul.f32 %v810_v14, %v479_v10  ;;  %v491_v9 = vmax.f32 %v427_v4, 0.0 }
  0xf1   : > { %992 = vst [vmem:[%s1251_s5 + $0x198] sm:$0xff] %v928_v19  ;;  %991 = vst [vmem:[%s1251_s5 + $0x190] sm:$0xff] %v927_v20 }
  0xf2   : > { %v825_v25 = vpop.permute.xlu1 %824  ;;  %v820_v26 = vpop.permute.xlu0 %819 }
  0xf3   : > { %v930_v31 = vmul.f32 %v825_v25, %v482_v15  ;;  %v929_v32 = vmul.f32 %v820_v26, %v481_v16 }
  0xf5   : > { %994 = vst [vmem:[%s1251_s5 + $0x1a8] sm:$0xff] %v930_v31  ;;  %993 = vst [vmem:[%s1251_s5 + $0x1a0] sm:$0xff] %v929_v32 }
  0xf6   : > { %v835_v37 = vpop.permute.xlu1 %834  ;;  %v830_v38 = vpop.permute.xlu0 %829 }
  0xf7   : > { %v932_v43 = vmul.f32 %v835_v37, %v484_v27  ;;  %v931_v44 = vmul.f32 %v830_v38, %v483_v28 }
  0xf9   : > { %996 = vst [vmem:[%s1251_s5 + $0x1b8] sm:$0xff] %v932_v43  ;;  %995 = vst [vmem:[%s1251_s5 + $0x1b0] sm:$0xff] %v931_v44 }
  0xfa   : > { %v845_v49 = vpop.permute.xlu1 %844  ;;  %v840_v50 = vpop.permute.xlu0 %839 }
  0xfb   : > { %v934_v55 = vmul.f32 %v845_v49, %v486_v45  ;;  %v933_v56 = vmul.f32 %v840_v50, %v485_v46 }
  0xfd   : > { %998 = vst [vmem:[%s1251_s5 + $0x1c8] sm:$0xff] %v934_v55  ;;  %997 = vst [vmem:[%s1251_s5 + $0x1c0] sm:$0xff] %v933_v56 }
  0xfe   : > { %v855_v60 = vpop.permute.xlu1 %854  ;;  %v850_v61 = vpop.permute.xlu0 %849 }
  0xff   : > { %v936_v1 = vmul.f32 %v855_v60, %v488_v51  ;;  %v935_v2 = vmul.f32 %v850_v61, %v487_v52 }
 0x101   : > { %1000 = vst [vmem:[%s1251_s5 + $0x1d8] sm:$0xff] %v936_v1  ;;  %999 = vst [vmem:[%s1251_s5 + $0x1d0] sm:$0xff] %v935_v2 }
 0x102   : > { %v865_v5 = vpop.permute.xlu1 %864  ;;  %v860_v57 = vpop.permute.xlu0 %859 }
 0x103   : > { %v938_v6 = vmul.f32 %v865_v5, %v490_v62  ;;  %v937_v7 = vmul.f32 %v860_v57, %v489_v63 }
 0x105   : > { %1002 = vst [vmem:[%s1251_s5 + $0x1e8] sm:$0xff] %v938_v6  ;;  %1001 = vst [vmem:[%s1251_s5 + $0x1e0] sm:$0xff] %v937_v7 }
 0x106   : > { %v875_v10 = vpop.permute.xlu1 %874  ;;  %v870_v11 = vpop.permute.xlu0 %869 }
 0x107   : > { %v940_v12 = vmul.f32 %v875_v10, %v492_v8  ;;  %v939_v13 = vmul.f32 %v870_v11, %v491_v9 }
 0x109   : > { %1004 = vst [vmem:[%s1251_s5 + $0x1f8] sm:$0xff] %v940_v12  ;;  %1003 = vst [vmem:[%s1251_s5 + $0x1f0] sm:$0xff] %v939_v13 }
 0x10a PF: > { %s14_s15 = sadd.s32 1, %s1105_s15  }
 0x10b   : > { %p11_p4 = scmp.ge.s32.totalorder %s14_s15, 4  }
 0x10d   :  { %13 = sbr.rel (!%p11_p4) target bundleno = 1 (0x1), region = 69 }

// kernel: conv_block_forward.4
= control target key start
LH: loop header
LB: loop body
LE: loop exit
PB: predicated region body
PF: predicated region fallthrough
CT: control target
= control target key end

     0   :  { %s9432_s15 = smov 0   ;;  %s11876_s0 = inlined_call_operand.vmem [shape: f32[2,550,4], index: 0, kind: input, shape index: {}]   ;;  %s11877_s1 = inlined_call_operand.vmem [shape: f32[9,4,128], index: 1, kind: input, shape index: {}]   ;;  %s11878_s2 = inlined_call_operand.vmem [shape: f32[1024,1], index: 2, kind: input, shape index: {}]   ;;  %s11879_s3 = inlined_call_operand.vmem [shape: f32[1024,128], index: 3, kind: output, shape index: {0}]   ;;  %s11880_s4 = inlined_call_operand.vmem [shape: f32[2,2,128], index: 4, kind: output, shape index: {1}]  }
   0x1 LB: > { %s9438_s16 = sadd.s32 4294967295, %s9404_s15   ;;  %p7315_p0 = scmp.ge.s32.totalorder %s9404_s15, 1  ;;  %s9404_s15 = sphi %s9432_s15, %s15_s15  }
   0x2   : > { %p176_p1 = scmp.lt.s32.totalorder %s9404_s15, 3 }
   0x4   : > { %p177_p2 = pnand %p7315_p0, %p176_p1 }
   0x6   : > { %180 = sbr.rel (%p177_p2) target bundleno = 815 (0x32f), region = 32 }
   0xb   : > { %v7322_v0 = vld [vmem:[%s11877_s1 + $0x4] sm:$0xf]  ;;  %vm556_vm0 = vcmask 1043456   ;;  %p211_p3 = scmp.lt.s32.totalorder %s9438_s16, 1  ;;  %v296_v1 = vld [vmem:[%s11877_s1] sm:$0xf] }
   0xc   : > { %9384 = vmatprep.subr.msk.mxu1 %vm556_vm0, %v7322_v0  ;;  %8502 = vmatprep.subr.msk.mxu0 %vm556_vm0, %v7322_v0  ;;  %v7453_v2 = vld [vmem:[%s11877_s1 + $0x8] sm:$0xf]  ;;  %vm363_vm1 = vcmask 31744   ;;  %v9480_v9 = vld [vmem:[%s11877_s1 + $0xc] sm:$0xf]  ;;  %s7317_s14 = sshll.u32 %s9438_s16, 6 }
   0xd   : > { %9385 = vmatpush3.msk.msra.mxu1 %vm556_vm0, %v7322_v0  ;;  %8503 = vmatpush3.msk.msra.mxu0 %vm556_vm0, %v7322_v0  ;;  %s9457_s23 = scalar_select %p211_p3, %s9438_s16, 1  ;;  %v9485_v10 = vld [vmem:[%s11877_s1 + $0x10] sm:$0xf]  ;;  %vm7209_vm2 = vcmask 1040384  }
   0xe   : > { %8600 = vmatprep.subr.msk.mxu1 %vm556_vm0, %v296_v1  ;;  %8698 = vmatprep.subr.msk.mxu0 %vm556_vm0, %v7453_v2  ;;  %p217_p4 = scmp.lt.s32.totalorder %s7317_s14, 127 }
   0xf   : > { %s9386_s24 = smul.u32 552, %s9457_s23 }
  0x10   : > { %s12116_s14 = smov (!%p217_p4, %s7317_s14), 127 }
  0x11   : > { %s9465_s27 = scalar_lea.vmem %s11876_s0, %s9386_s24  ;;  %s7318_s16 = sshll.u32 %s12116_s14, 3 }
  0x12   : > { %v297_v3 = vld [vmem:[%s9465_s27 + $0x1] sm:$0xff]  ;;  %v298_v5 = vld [vmem:[%s9465_s27 + $0x9] sm:$0xff]  ;;  %v299_v7 = vld [vmem:[%s9465_s27 + $0x11] sm:$0xff]  ;;  %s10400_s19 = scalar_lea.vmem %s11878_s2, %s7318_s16  ;;  %s11624_s22 = scalar_lea.vmem %s11879_s3, %s7318_s16 }
  0x13   : > { %v329_v4 = vld [vmem:[%s9465_s27 + $0x101] sm:$0xff]  ;;  %8504 = vmatprep.mubr.msk.f32.mxu0 %vm363_vm1, %v297_v3  ;;  %v330_v6 = vld [vmem:[%s9465_s27 + $0x109] sm:$0xff]  ;;  %v331_v8 = vld [vmem:[%s9465_s27 + $0x111] sm:$0xff]  ;;  %s7321_s24 = sshll.u32 %s9457_s23, 1 }
  0x14   : > { %8552 = vmatprep.mubr.msk.f32.mxu1 %vm363_vm1, %v329_v4  ;;  %8505 = vmatmul.mubr.msk.f32.vlgmr.msra.gmra.mxu0 %vm363_vm1, %v298_v5  ;;  %v300_v11 = vld [vmem:[%s9465_s27 + $0x19] sm:$0xff]  ;;  %v301_v13 = vld [vmem:[%s9465_s27 + $0x21] sm:$0xff]  ;;  %v302_v15 = vld [vmem:[%s9465_s27 + $0x29] sm:$0xff] }
  0x15   : > { %8553 = vmatmul.mubr.msk.f32.vlgmr.msra.gmra.mxu1 %vm363_vm1, %v330_v6  ;;  %8699 = vmatpush3.msk.msra.mxu0 %vm556_vm0, %v7453_v2  ;;  %v332_v12 = vld [vmem:[%s9465_s27 + $0x119] sm:$0xff]  ;;  %v333_v14 = vld [vmem:[%s9465_s27 + $0x121] sm:$0xff]  ;;  %v334_v16 = vld [vmem:[%s9465_s27 + $0x129] sm:$0xff] }
  0x16   : > { %8601 = vmatpush3.msk.msra.mxu1 %vm556_vm0, %v296_v1  ;;  %8507 = vmatprep.mubr.msk.f32.mxu0 %vm363_vm1, %v299_v7  ;;  %v303_v17 = vld [vmem:[%s9465_s27 + $0x31] sm:$0xff]  ;;  %v304_v19 = vld [vmem:[%s9465_s27 + $0x39] sm:$0xff]  ;;  %v305_v21 = vld [vmem:[%s9465_s27 + $0x41] sm:$0xff] }
  0x17   : > { %8555 = vmatprep.mubr.msk.f32.mxu1 %vm363_vm1, %v331_v8  ;;  %8796 = vmatprep.subr.msk.mxu1 %vm556_vm0, %v9480_v9  ;;  %v335_v18 = vld [vmem:[%s9465_s27 + $0x131] sm:$0xff]  ;;  %v336_v20 = vld [vmem:[%s9465_s27 + $0x139] sm:$0xff]  ;;  %v337_v22 = vld [vmem:[%s9465_s27 + $0x141] sm:$0xff] }
  0x18   : > { %8894 = vmatprep.subr.msk.mxu0 %vm556_vm0, %v9485_v10  ;;  %8508 = vmatmul.mubr.msk.f32.gmra.mxu0 %vm363_vm1, %v300_v11  ;;  %v306_v23 = vld [vmem:[%s9465_s27 + $0x49] sm:$0xff]  ;;  %v307_v25 = vld [vmem:[%s9465_s27 + $0x51] sm:$0xff]  ;;  %v308_v27 = vld [vmem:[%s9465_s27 + $0x59] sm:$0xff] }
  0x19   : > { %8556 = vmatmul.mubr.msk.f32.gmra.mxu1 %vm363_vm1, %v332_v12  ;;  %8510 = vmatprep.mubr.msk.f32.mxu0 %vm363_vm1, %v301_v13  ;;  %v338_v24 = vld [vmem:[%s9465_s27 + $0x149] sm:$0xff]  ;;  %v339_v26 = vld [vmem:[%s9465_s27 + $0x151] sm:$0xff]  ;;  %v340_v28 = vld [vmem:[%s9465_s27 + $0x159] sm:$0xff] }
  0x1a   : > { %8558 = vmatprep.mubr.msk.f32.mxu1 %vm363_vm1, %v333_v14  ;;  %v309_v29 = vld [vmem:[%s9465_s27 + $0x61] sm:$0xff]  ;;  %v310_v31 = vld [vmem:[%s9465_s27 + $0x69] sm:$0xff]  ;;  %v311_v33 = vld [vmem:[%s9465_s27 + $0x71] sm:$0xff] }
  0x1b   : > { %v341_v30 = vld [vmem:[%s9465_s27 + $0x161] sm:$0xff]  ;;  %v342_v32 = vld [vmem:[%s9465_s27 + $0x169] sm:$0xff]  ;;  %v343_v34 = vld [vmem:[%s9465_s27 + $0x171] sm:$0xff] }
  0x1c   : > { %8511 = vmatmul.mubr.msk.f32.gmra.mxu0 %vm363_vm1, %v302_v15  ;;  %v312_v35 = vld [vmem:[%s9465_s27 + $0x79] sm:$0xff]  ;;  %v313_v37 = vld [vmem:[%s9465_s27 + $0x81] sm:$0xff]  ;;  %v314_v39 = vld [vmem:[%s9465_s27 + $0x89] sm:$0xff] }
  0x1d   : > { %8559 = vmatmul.mubr.msk.f32.gmra.mxu1 %vm363_vm1, %v334_v16  ;;  %8513 = vmatprep.mubr.msk.f32.mxu0 %vm363_vm1, %v303_v17  ;;  %v344_v36 = vld [vmem:[%s9465_s27 + $0x179] sm:$0xff]  ;;  %v345_v38 = vld [vmem:[%s9465_s27 + $0x181] sm:$0xff]  ;;  %v346_v40 = vld [vmem:[%s9465_s27 + $0x189] sm:$0xff] }
  0x1e   : > { %8561 = vmatprep.mubr.msk.f32.mxu1 %vm363_vm1, %v335_v18  ;;  %v315_v41 = vld [vmem:[%s9465_s27 + $0x91] sm:$0xff]  ;;  %v316_v43 = vld [vmem:[%s9465_s27 + $0x99] sm:$0xff]  ;;  %v317_v45 = vld [vmem:[%s9465_s27 + $0xa1] sm:$0xff] }
  0x1f   : > { %v347_v42 = vld [vmem:[%s9465_s27 + $0x191] sm:$0xff]  ;;  %v348_v44 = vld [vmem:[%s9465_s27 + $0x199] sm:$0xff]  ;;  %v349_v46 = vld [vmem:[%s9465_s27 + $0x1a1] sm:$0xff] }
  0x20   : > { %8514 = vmatmul.mubr.msk.f32.gmra.mxu0 %vm363_vm1, %v304_v19  ;;  %v318_v47 = vld [vmem:[%s9465_s27 + $0xa9] sm:$0xff]  ;;  %v319_v49 = vld [vmem:[%s9465_s27 + $0xb1] sm:$0xff]  ;;  %v320_v51 = vld [vmem:[%s9465_s27 + $0xb9] sm:$0xff] }
  0x21   : > { %8562 = vmatmul.mubr.msk.f32.gmra.mxu1 %vm363_vm1, %v336_v20  ;;  %8516 = vmatprep.mubr.msk.f32.mxu0 %vm363_vm1, %v305_v21  ;;  %v350_v48 = vld [vmem:[%s9465_s27 + $0x1a9] sm:$0xff]  ;;  %v351_v50 = vld [vmem:[%s9465_s27 + $0x1b1] sm:$0xff]  ;;  %v352_v52 = vld [vmem:[%s9465_s27 + $0x1b9] sm:$0xff] }
  0x22   : > { %8564 = vmatprep.mubr.msk.f32.mxu1 %vm363_vm1, %v337_v22  ;;  %v321_v53 = vld [vmem:[%s9465_s27 + $0xc1] sm:$0xff]  ;;  %v322_v55 = vld [vmem:[%s9465_s27 + $0xc9] sm:$0xff]  ;;  %v323_v57 = vld [vmem:[%s9465_s27 + $0xd1] sm:$0xff] }
  0x23   : > { %v353_v54 = vld [vmem:[%s9465_s27 + $0x1c1] sm:$0xff]  ;;  %v354_v56 = vld [vmem:[%s9465_s27 + $0x1c9] sm:$0xff]  ;;  %v355_v58 = vld [vmem:[%s9465_s27 + $0x1d1] sm:$0xff] }
  0x24   : > { %8517 = vmatmul.mubr.msk.f32.gmra.mxu0 %vm363_vm1, %v306_v23  ;;  %v324_v59 = vld [vmem:[%s9465_s27 + $0xd9] sm:$0xff]  ;;  %v325_v61 = vld [vmem:[%s9465_s27 + $0xe1] sm:$0xff]  ;;  %v326_v63 = vld [vmem:[%s9465_s27 + $0xe9] sm:$0xff] }
  0x25   : > { %8565 = vmatmul.mubr.msk.f32.gmra.mxu1 %vm363_vm1, %v338_v24  ;;  %8519 = vmatprep.mubr.msk.f32.mxu0 %vm363_vm1, %v307_v25  ;;  %v356_v60 = vld [vmem:[%s9465_s27 + $0x1d9] sm:$0xff]  ;;  %v357_v62 = vld [vmem:[%s9465_s27 + $0x1e1] sm:$0xff]  ;;  %v358_v0 = vld [vmem:[%s9465_s27 + $0x1e9] sm:$0xff] }
  0x26   : > { %8567 = vmatprep.mubr.msk.f32.mxu1 %vm363_vm1, %v339_v26  ;;  %v327_v1 = vld [vmem:[%s9465_s27 + $0xf1] sm:$0xff]  ;;  %v328_v3 = vld [vmem:[%s9465_s27 + $0xf9] sm:$0xff]  ;;  %v1525_v6 = vld [vmem:[%s9465_s27 + $0x2] sm:$0xff] }
  0x27   : > { %v359_v2 = vld [vmem:[%s9465_s27 + $0x1f1] sm:$0xff]  ;;  %v360_v4 = vld [vmem:[%s9465_s27 + $0x1f9] sm:$0xff]  ;;  %v233_v7 = vld [vmem:[%s9465_s27 + $0x8] sm:$0xff] }
  0x28   : > { %8520 = vmatmul.mubr.msk.f32.gmra.mxu0 %vm363_vm1, %v308_v27  ;;  %v232_v5 = vld [vmem:[%s9465_s27] sm:$0xff]  ;;  %v1526_v8 = vld [vmem:[%s9465_s27 + $0xa] sm:$0xff]  ;;  %v9619_v12 = vld [vmem:[%s9465_s27 + $0x12] sm:$0xff] }
  0x29   : > { %8568 = vmatmul.mubr.msk.f32.gmra.mxu1 %vm363_vm1, %v340_v28  ;;  %8522 = vmatprep.mubr.msk.f32.mxu0 %vm363_vm1, %v309_v29  ;;  %v234_v11 = vld [vmem:[%s9465_s27 + $0x10] sm:$0xff]  ;;  %v235_v14 = vld [vmem:[%s9465_s27 + $0x18] sm:$0xff]  ;;  %v9646_v17 = vld [vmem:[%s9465_s27 + $0x22] sm:$0xff] }
  0x2a   : > { %8570 = vmatprep.mubr.msk.f32.mxu1 %vm363_vm1, %v341_v30  ;;  %v9626_v13 = vld [vmem:[%s11877_s1 + $0x14] sm:$0xf]  ;;  %v9634_v15 = vld [vmem:[%s9465_s27 + $0x1a] sm:$0xff]  ;;  %v9660_v18 = vld [vmem:[%s9465_s27 + $0x2a] sm:$0xff] }
  0x2b   : > { %v9639_v16 = vld [vmem:[%s11877_s1 + $0x18] sm:$0xf]  ;;  %v238_v19 = vld [vmem:[%s9465_s27 + $0x30] sm:$0xff]  ;;  %v240_v23 = vld [vmem:[%s9465_s27 + $0x40] sm:$0xff] }
  0x2c   : > { %8523 = vmatmul.mubr.msk.f32.gmra.mxu0 %vm363_vm1, %v310_v31  ;;  %v9664_v20 = vld [vmem:[%s9465_s27 + $0x32] sm:$0xff]  ;;  %v9674_v22 = vld [vmem:[%s9465_s27 + $0x3a] sm:$0xff]  ;;  %v9678_v24 = vld [vmem:[%s9465_s27 + $0x42] sm:$0xff] }
  0x2d   : > { %8571 = vmatmul.mubr.msk.f32.gmra.mxu1 %vm363_vm1, %v342_v32  ;;  %8525 = vmatprep.mubr.msk.f32.mxu0 %vm363_vm1, %v311_v33  ;;  %v239_v21 = vld [vmem:[%s9465_s27 + $0x38] sm:$0xff]  ;;  %v241_v25 = vld [vmem:[%s9465_s27 + $0x48] sm:$0xff]  ;;  %v242_v27 = vld [vmem:[%s9465_s27 + $0x50] sm:$0xff] }
  0x2e   : > { %8573 = vmatprep.mubr.msk.f32.mxu1 %vm363_vm1, %v343_v34  ;;  %v9688_v26 = vld [vmem:[%s9465_s27 + $0x4a] sm:$0xff]  ;;  %v9692_v28 = vld [vmem:[%s9465_s27 + $0x52] sm:$0xff]  ;;  %v9702_v30 = vld [vmem:[%s9465_s27 + $0x5a] sm:$0xff] }
  0x2f   : > { %v243_v29 = vld [vmem:[%s9465_s27 + $0x58] sm:$0xff]  ;;  %v244_v31 = vld [vmem:[%s9465_s27 + $0x60] sm:$0xff]  ;;  %v245_v33 = vld [vmem:[%s9465_s27 + $0x68] sm:$0xff] }
  0x30   : > { %8526 = vmatmul.mubr.msk.f32.gmra.mxu0 %vm363_vm1, %v312_v35  ;;  %v9706_v32 = vld [vmem:[%s9465_s27 + $0x62] sm:$0xff]  ;;  %v9716_v34 = vld [vmem:[%s9465_s27 + $0x6a] sm:$0xff] }
  0x31   : > { %8574 = vmatmul.mubr.msk.f32.gmra.mxu1 %vm363_vm1, %v344_v36  ;;  %8528 = vmatprep.mubr.msk.f32.mxu0 %vm363_vm1, %v313_v37  ;;  %v246_v35 = vld [vmem:[%s9465_s27 + $0x70] sm:$0xff]  ;;  %v247_v37 = vld [vmem:[%s9465_s27 + $0x78] sm:$0xff] }
  0x32   : > { %8576 = vmatprep.mubr.msk.f32.mxu1 %vm363_vm1, %v345_v38  ;;  %v9720_v36 = vld [vmem:[%s9465_s27 + $0x72] sm:$0xff]  ;;  %v9730_v38 = vld [vmem:[%s9465_s27 + $0x7a] sm:$0xff] }
  0x34   : > { %8529 = vmatmul.mubr.msk.f32.gmra.mxu0 %vm363_vm1, %v314_v39  ;;  %v248_v39 = vld [vmem:[%s9465_s27 + $0x80] sm:$0xff] }
  0x35   : > { %8577 = vmatmul.mubr.msk.f32.gmra.mxu1 %vm363_vm1, %v346_v40  ;;  %8531 = vmatprep.mubr.msk.f32.mxu0 %vm363_vm1, %v315_v41  ;;  %v9734_v40 = vld [vmem:[%s9465_s27 + $0x82] sm:$0xff] }
  0x36   : > { %8579 = vmatprep.mubr.msk.f32.mxu1 %vm363_vm1, %v347_v42  ;;  %v249_v41 = vld [vmem:[%s9465_s27 + $0x88] sm:$0xff] }
  0x37   : > { %v9744_v42 = vld [vmem:[%s9465_s27 + $0x8a] sm:$0xff] }
  0x38   : > { %8532 = vmatmul.mubr.msk.f32.gmra.mxu0 %vm363_vm1, %v316_v43  ;;  %v250_v43 = vld [vmem:[%s9465_s27 + $0x90] sm:$0xff] }
  0x39   : > { %8580 = vmatmul.mubr.msk.f32.gmra.mxu1 %vm363_vm1, %v348_v44  ;;  %8534 = vmatprep.mubr.msk.f32.mxu0 %vm363_vm1, %v317_v45  ;;  %v9748_v44 = vld [vmem:[%s9465_s27 + $0x92] sm:$0xff] }
  0x3a   : > { %8582 = vmatprep.mubr.msk.f32.mxu1 %vm363_vm1, %v349_v46  ;;  %v251_v45 = vld [vmem:[%s9465_s27 + $0x98] sm:$0xff] }
  0x3b   : > { %v9758_v46 = vld [vmem:[%s9465_s27 + $0x9a] sm:$0xff] }
  0x3c   : > { %8535 = vmatmul.mubr.msk.f32.gmra.mxu0 %vm363_vm1, %v318_v47  ;;  %v252_v47 = vld [vmem:[%s9465_s27 + $0xa0] sm:$0xff] }
  0x3d   : > { %8583 = vmatmul.mubr.msk.f32.gmra.mxu1 %vm363_vm1, %v350_v48  ;;  %8537 = vmatprep.mubr.msk.f32.mxu0 %vm363_vm1, %v319_v49  ;;  %v9762_v48 = vld [vmem:[%s9465_s27 + $0xa2] sm:$0xff] }
  0x3e   : > { %8585 = vmatprep.mubr.msk.f32.mxu1 %vm363_vm1, %v351_v50  ;;  %v253_v49 = vld [vmem:[%s9465_s27 + $0xa8] sm:$0xff] }
  0x3f   : > { %v9772_v50 = vld [vmem:[%s9465_s27 + $0xaa] sm:$0xff] }
  0x40   : > { %8538 = vmatmul.mubr.msk.f32.gmra.mxu0 %vm363_vm1, %v320_v51  ;;  %v254_v51 = vld [vmem:[%s9465_s27 + $0xb0] sm:$0xff] }
  0x41   : > { %8586 = vmatmul.mubr.msk.f32.gmra.mxu1 %vm363_vm1, %v352_v52  ;;  %8540 = vmatprep.mubr.msk.f32.mxu0 %vm363_vm1, %v321_v53  ;;  %v9776_v52 = vld [vmem:[%s9465_s27 + $0xb2] sm:$0xff] }
  0x42   : > { %8588 = vmatprep.mubr.msk.f32.mxu1 %vm363_vm1, %v353_v54  ;;  %v255_v53 = vld [vmem:[%s9465_s27 + $0xb8] sm:$0xff] }
  0x43   : > { %v9786_v54 = vld [vmem:[%s9465_s27 + $0xba] sm:$0xff] }
  0x44   : > { %8541 = vmatmul.mubr.msk.f32.gmra.mxu0 %vm363_vm1, %v322_v55  ;;  %v256_v55 = vld [vmem:[%s9465_s27 + $0xc0] sm:$0xff] }
  0x45   : > { %8589 = vmatmul.mubr.msk.f32.gmra.mxu1 %vm363_vm1, %v354_v56  ;;  %8543 = vmatprep.mubr.msk.f32.mxu0 %vm363_vm1, %v323_v57  ;;  %v9790_v56 = vld [vmem:[%s9465_s27 + $0xc2] sm:$0xff] }
  0x46   : > { %8591 = vmatprep.mubr.msk.f32.mxu1 %vm363_vm1, %v355_v58  ;;  %v257_v57 = vld [vmem:[%s9465_s27 + $0xc8] sm:$0xff] }
  0x47   : > { %v9800_v58 = vld [vmem:[%s9465_s27 + $0xca] sm:$0xff] }
  0x48   : > { %8544 = vmatmul.mubr.msk.f32.gmra.mxu0 %vm363_vm1, %v324_v59  ;;  %v258_v59 = vld [vmem:[%s9465_s27 + $0xd0] sm:$0xff] }
  0x49   : > { %8592 = vmatmul.mubr.msk.f32.gmra.mxu1 %vm363_vm1, %v356_v60  ;;  %8546 = vmatprep.mubr.msk.f32.mxu0 %vm363_vm1, %v325_v61  ;;  %v9804_v60 = vld [vmem:[%s9465_s27 + $0xd2] sm:$0xff] }
  0x4a   : > { %8594 = vmatprep.mubr.msk.f32.mxu1 %vm363_vm1, %v357_v62  ;;  %v259_v61 = vld [vmem:[%s9465_s27 + $0xd8] sm:$0xff] }
  0x4b   : > { %v9814_v62 = vld [vmem:[%s9465_s27 + $0xda] sm:$0xff] }
  0x4c   : > { %8547 = vmatmul.mubr.msk.f32.gmra.mxu0 %vm363_vm1, %v326_v63  ;;  %v260_v63 = vld [vmem:[%s9465_s27 + $0xe0] sm:$0xff] }
  0x4d   : > { %8595 = vmatmul.mubr.msk.f32.gmra.mxu1 %vm363_vm1, %v358_v0  ;;  %8549 = vmatprep.mubr.msk.f32.mxu0 %vm363_vm1, %v327_v1  ;;  %v9818_v0 = vld [vmem:[%s9465_s27 + $0xe2] sm:$0xff] }
  0x4e   : > { %8597 = vmatprep.mubr.msk.f32.mxu1 %vm363_vm1, %v359_v2  ;;  %v261_v1 = vld [vmem:[%s9465_s27 + $0xe8] sm:$0xff] }
  0x4f   : > { %v9828_v2 = vld [vmem:[%s9465_s27 + $0xea] sm:$0xff] }
  0x50   : > { %8550 = vmatmul.mubr.msk.f32.gmra.mxu0 %vm363_vm1, %v328_v3  ;;  %v262_v3 = vld [vmem:[%s9465_s27 + $0xf0] sm:$0xff] }
  0x51   : > { %8598 = vmatmul.mubr.msk.f32.gmra.mxu1 %vm363_vm1, %v360_v4  ;;  %8700 = vmatprep.mubr.msk.f32.mxu0 %vm363_vm1, %v1525_v6  ;;  %v9832_v4 = vld [vmem:[%s9465_s27 + $0xf2] sm:$0xff]  ;;  %v9842_v6 = vld [vmem:[%s9465_s27 + $0xfa] sm:$0xff] }
  0x52   : > { %8602 = vmatprep.mubr.msk.f32.mxu1 %vm363_vm1, %v232_v5  ;;  %v263_v5 = vld [vmem:[%s9465_s27 + $0xf8] sm:$0xff] }
  0x54   : > { %8701 = vmatmul.mubr.msk.f32.vlgmr.msra.gmra.mxu0 %vm363_vm1, %v1526_v8  ;;  %v9846_v8 = vld [vmem:[%s9465_s27 + $0x102] sm:$0xff] }
  0x55   : > { %8603 = vmatmul.mubr.msk.f32.vlgmr.msra.gmra.mxu1 %vm363_vm1, %v233_v7  ;;  %8895 = vmatpush3.msk.msra.mxu0 %vm556_vm0, %v9485_v10  ;;  %v237_v10 = vld [vmem:[%s9465_s27 + $0x28] sm:$0xff]  ;;  %v264_v7 = vld [vmem:[%s9465_s27 + $0x100] sm:$0xff] }
  0x56   : > { %8797 = vmatpush3.msk.msra.mxu1 %vm556_vm0, %v9480_v9  ;;  %8605 = vmatprep.mubr.msk.f32.mxu1 %vm363_vm1, %v234_v11  ;;  %v236_v9 = vld [vmem:[%s9465_s27 + $0x20] sm:$0xff]  ;;  %v265_v11 = vld [vmem:[%s9465_s27 + $0x108] sm:$0xff] }
  0x57   : > { %8703 = vmatprep.mubr.msk.f32.mxu0 %vm363_vm1, %v9619_v12  ;;  %8992 = vmatprep.subr.msk.mxu1 %vm556_vm0, %v9626_v13 }
  0x58   : > { %9090 = vmatprep.subr.msk.mxu0 %vm556_vm0, %v9639_v16  ;;  %8704 = vmatmul.mubr.msk.f32.gmra.mxu0 %vm363_vm1, %v9634_v15 }
  0x59   : > { %8606 = vmatmul.mubr.msk.f32.gmra.mxu1 %vm363_vm1, %v235_v14  ;;  %8706 = vmatprep.mubr.msk.f32.mxu0 %vm363_vm1, %v9646_v17  ;;  %v9856_v14 = vld [vmem:[%s9465_s27 + $0x10a] sm:$0xff] }
  0x5a   : > { %8608 = vmatprep.mubr.msk.f32.mxu1 %vm363_vm1, %v236_v9  ;;  %v266_v9 = vld [vmem:[%s9465_s27 + $0x110] sm:$0xff] }
  0x5c   : > { %8707 = vmatmul.mubr.msk.f32.gmra.mxu0 %vm363_vm1, %v9660_v18 }
  0x5d   : > { %8609 = vmatmul.mubr.msk.f32.gmra.mxu1 %vm363_vm1, %v237_v10  ;;  %8709 = vmatprep.mubr.msk.f32.mxu0 %vm363_vm1, %v9664_v20  ;;  %v9860_v10 = vld [vmem:[%s9465_s27 + $0x112] sm:$0xff] }
  0x5e   : > { %8611 = vmatprep.mubr.msk.f32.mxu1 %vm363_vm1, %v238_v19  ;;  %v267_v19 = vld [vmem:[%s9465_s27 + $0x118] sm:$0xff] }
  0x60   : > { %8710 = vmatmul.mubr.msk.f32.gmra.mxu0 %vm363_vm1, %v9674_v22 }
  0x61   : > { %8612 = vmatmul.mubr.msk.f32.gmra.mxu1 %vm363_vm1, %v239_v21  ;;  %8712 = vmatprep.mubr.msk.f32.mxu0 %vm363_vm1, %v9678_v24  ;;  %v9870_v21 = vld [vmem:[%s9465_s27 + $0x11a] sm:$0xff] }
  0x62   : > { %8614 = vmatprep.mubr.msk.f32.mxu1 %vm363_vm1, %v240_v23  ;;  %v268_v23 = vld [vmem:[%s9465_s27 + $0x120] sm:$0xff] }
  0x64   : > { %8713 = vmatmul.mubr.msk.f32.gmra.mxu0 %vm363_vm1, %v9688_v26 }
  0x65   : > { %8615 = vmatmul.mubr.msk.f32.gmra.mxu1 %vm363_vm1, %v241_v25  ;;  %8715 = vmatprep.mubr.msk.f32.mxu0 %vm363_vm1, %v9692_v28  ;;  %v9874_v25 = vld [vmem:[%s9465_s27 + $0x122] sm:$0xff] }
  0x66   : > { %8617 = vmatprep.mubr.msk.f32.mxu1 %vm363_vm1, %v242_v27  ;;  %v269_v27 = vld [vmem:[%s9465_s27 + $0x128] sm:$0xff] }
  0x68   : > { %8716 = vmatmul.mubr.msk.f32.gmra.mxu0 %vm363_vm1, %v9702_v30 }
  0x69   : > { %8618 = vmatmul.mubr.msk.f32.gmra.mxu1 %vm363_vm1, %v243_v29  ;;  %8718 = vmatprep.mubr.msk.f32.mxu0 %vm363_vm1, %v9706_v32  ;;  %v9884_v29 = vld [vmem:[%s9465_s27 + $0x12a] sm:$0xff] }
  0x6a   : > { %8620 = vmatprep.mubr.msk.f32.mxu1 %vm363_vm1, %v244_v31  ;;  %v270_v31 = vld [vmem:[%s9465_s27 + $0x130] sm:$0xff] }
  0x6c   : > { %8719 = vmatmul.mubr.msk.f32.gmra.mxu0 %vm363_vm1, %v9716_v34 }
  0x6d   : > { %8621 = vmatmul.mubr.msk.f32.gmra.mxu1 %vm363_vm1, %v245_v33  ;;  %8721 = vmatprep.mubr.msk.f32.mxu0 %vm363_vm1, %v9720_v36  ;;  %v9888_v33 = vld [vmem:[%s9465_s27 + $0x132] sm:$0xff] }
  0x6e   : > { %8623 = vmatprep.mubr.msk.f32.mxu1 %vm363_vm1, %v246_v35  ;;  %v271_v35 = vld [vmem:[%s9465_s27 + $0x138] sm:$0xff] }
  0x70   : > { %8722 = vmatmul.mubr.msk.f32.gmra.mxu0 %vm363_vm1, %v9730_v38 }
  0x71   : > { %8624 = vmatmul.mubr.msk.f32.gmra.mxu1 %vm363_vm1, %v247_v37  ;;  %8724 = vmatprep.mubr.msk.f32.mxu0 %vm363_vm1, %v9734_v40  ;;  %v9898_v37 = vld [vmem:[%s9465_s27 + $0x13a] sm:$0xff] }
  0x72   : > { %8626 = vmatprep.mubr.msk.f32.mxu1 %vm363_vm1, %v248_v39  ;;  %v272_v39 = vld [vmem:[%s9465_s27 + $0x140] sm:$0xff] }
  0x74   : > { %8725 = vmatmul.mubr.msk.f32.gmra.mxu0 %vm363_vm1, %v9744_v42 }
  0x75   : > { %8627 = vmatmul.mubr.msk.f32.gmra.mxu1 %vm363_vm1, %v249_v41  ;;  %8727 = vmatprep.mubr.msk.f32.mxu0 %vm363_vm1, %v9748_v44  ;;  %v9902_v41 = vld [vmem:[%s9465_s27 + $0x142] sm:$0xff] }
  0x76   : > { %8629 = vmatprep.mubr.msk.f32.mxu1 %vm363_vm1, %v250_v43  ;;  %v273_v43 = vld [vmem:[%s9465_s27 + $0x148] sm:$0xff] }
  0x78   : > { %8728 = vmatmul.mubr.msk.f32.gmra.mxu0 %vm363_vm1, %v9758_v46 }
  0x79   : > { %8630 = vmatmul.mubr.msk.f32.gmra.mxu1 %vm363_vm1, %v251_v45  ;;  %8730 = vmatprep.mubr.msk.f32.mxu0 %vm363_vm1, %v9762_v48  ;;  %v9912_v45 = vld [vmem:[%s9465_s27 + $0x14a] sm:$0xff] }
  0x7a   : > { %8632 = vmatprep.mubr.msk.f32.mxu1 %vm363_vm1, %v252_v47  ;;  %v274_v47 = vld [vmem:[%s9465_s27 + $0x150] sm:$0xff] }
  0x7c   : > { %8731 = vmatmul.mubr.msk.f32.gmra.mxu0 %vm363_vm1, %v9772_v50 }
  0x7d   : > { %8633 = vmatmul.mubr.msk.f32.gmra.mxu1 %vm363_vm1, %v253_v49  ;;  %8733 = vmatprep.mubr.msk.f32.mxu0 %vm363_vm1, %v9776_v52  ;;  %v9916_v49 = vld [vmem:[%s9465_s27 + $0x152] sm:$0xff] }
  0x7e   : > { %8635 = vmatprep.mubr.msk.f32.mxu1 %vm363_vm1, %v254_v51  ;;  %v275_v51 = vld [vmem:[%s9465_s27 + $0x158] sm:$0xff] }
  0x80   : > { %8734 = vmatmul.mubr.msk.f32.gmra.mxu0 %vm363_vm1, %v9786_v54 }
  0x81   : > { %8636 = vmatmul.mubr.msk.f32.gmra.mxu1 %vm363_vm1, %v255_v53  ;;  %8736 = vmatprep.mubr.msk.f32.mxu0 %vm363_vm1, %v9790_v56  ;;  %v9926_v53 = vld [vmem:[%s9465_s27 + $0x15a] sm:$0xff] }
  0x82   : > { %8638 = vmatprep.mubr.msk.f32.mxu1 %vm363_vm1, %v256_v55  ;;  %v276_v55 = vld [vmem:[%s9465_s27 + $0x160] sm:$0xff] }
  0x84   : > { %8737 = vmatmul.mubr.msk.f32.gmra.mxu0 %vm363_vm1, %v9800_v58 }
  0x85   : > { %8639 = vmatmul.mubr.msk.f32.gmra.mxu1 %vm363_vm1, %v257_v57  ;;  %8739 = vmatprep.mubr.msk.f32.mxu0 %vm363_vm1, %v9804_v60  ;;  %v9930_v57 = vld [vmem:[%s9465_s27 + $0x162] sm:$0xff] }
  0x86   : > { %8641 = vmatprep.mubr.msk.f32.mxu1 %vm363_vm1, %v258_v59  ;;  %v277_v59 = vld [vmem:[%s9465_s27 + $0x168] sm:$0xff] }
  0x88   : > { %8740 = vmatmul.mubr.msk.f32.gmra.mxu0 %vm363_vm1, %v9814_v62 }
  0x89   : > { %8642 = vmatmul.mubr.msk.f32.gmra.mxu1 %vm363_vm1, %v259_v61  ;;  %8742 = vmatprep.mubr.msk.f32.mxu0 %vm363_vm1, %v9818_v0  ;;  %v9940_v61 = vld [vmem:[%s9465_s27 + $0x16a] sm:$0xff] }
  0x8a   : > { %8644 = vmatprep.mubr.msk.f32.mxu1 %vm363_vm1, %v260_v63  ;;  %v278_v63 = vld [vmem:[%s9465_s27 + $0x170] sm:$0xff] }
  0x8c   : > { %8743 = vmatmul.mubr.msk.f32.gmra.mxu0 %vm363_vm1, %v9828_v2 }
  0x8d   : > { %8645 = vmatmul.mubr.msk.f32.gmra.mxu1 %vm363_vm1, %v261_v1  ;;  %8745 = vmatprep.mubr.msk.f32.mxu0 %vm363_vm1, %v9832_v4  ;;  %v9944_v1 = vld [vmem:[%s9465_s27 + $0x172] sm:$0xff] }
  0x8e   : > { %8647 = vmatprep.mubr.msk.f32.mxu1 %vm363_vm1, %v262_v3  ;;  %v279_v3 = vld [vmem:[%s9465_s27 + $0x178] sm:$0xff] }
  0x90   : > { %8746 = vmatmul.mubr.msk.f32.gmra.mxu0 %vm363_vm1, %v9842_v6 }
  0x91   : > { %8648 = vmatmul.mubr.msk.f32.gmra.mxu1 %vm363_vm1, %v263_v5  ;;  %8748 = vmatprep.mubr.msk.f32.mxu0 %vm363_vm1, %v9846_v8  ;;  %v9954_v5 = vld [vmem:[%s9465_s27 + $0x17a] sm:$0xff] }
  0x92   : > { %8650 = vmatprep.mubr.msk.f32.mxu1 %vm363_vm1, %v264_v7  ;;  %v280_v7 = vld [vmem:[%s9465_s27 + $0x180] sm:$0xff] }
  0x94   : > { %8749 = vmatmul.mubr.msk.f32.gmra.mxu0 %vm363_vm1, %v9856_v14 }
  0x95   : > { %8651 = vmatmul.mubr.msk.f32.gmra.mxu1 %vm363_vm1, %v265_v11  ;;  %8751 = vmatprep.mubr.msk.f32.mxu0 %vm363_vm1, %v9860_v10  ;;  %v9958_v11 = vld [vmem:[%s9465_s27 + $0x182] sm:$0xff] }
  0x96   : > { %8653 = vmatprep.mubr.msk.f32.mxu1 %vm363_vm1, %v266_v9  ;;  %v281_v9 = vld [vmem:[%s9465_s27 + $0x188] sm:$0xff] }
  0x98   : > { %8752 = vmatmul.mubr.msk.f32.gmra.mxu0 %vm363_vm1, %v9870_v21 }
  0x99   : > { %8654 = vmatmul.mubr.msk.f32.gmra.mxu1 %vm363_vm1, %v267_v19  ;;  %8754 = vmatprep.mubr.msk.f32.mxu0 %vm363_vm1, %v9874_v25  ;;  %v9968_v19 = vld [vmem:[%s9465_s27 + $0x18a] sm:$0xff] }
  0x9a   : > { %8656 = vmatprep.mubr.msk.f32.mxu1 %vm363_vm1, %v268_v23  ;;  %v282_v23 = vld [vmem:[%s9465_s27 + $0x190] sm:$0xff] }
  0x9c   : > { %8755 = vmatmul.mubr.msk.f32.gmra.mxu0 %vm363_vm1, %v9884_v29 }
  0x9d   : > { %8657 = vmatmul.mubr.msk.f32.gmra.mxu1 %vm363_vm1, %v269_v27  ;;  %8757 = vmatprep.mubr.msk.f32.mxu0 %vm363_vm1, %v9888_v33  ;;  %v9972_v27 = vld [vmem:[%s9465_s27 + $0x192] sm:$0xff] }
  0x9e   : > { %8659 = vmatprep.mubr.msk.f32.mxu1 %vm363_vm1, %v270_v31  ;;  %v283_v31 = vld [vmem:[%s9465_s27 + $0x198] sm:$0xff] }
  0xa0   : > { %8758 = vmatmul.mubr.msk.f32.gmra.mxu0 %vm363_vm1, %v9898_v37 }
  0xa1   : > { %8660 = vmatmul.mubr.msk.f32.gmra.mxu1 %vm363_vm1, %v271_v35  ;;  %8760 = vmatprep.mubr.msk.f32.mxu0 %vm363_vm1, %v9902_v41  ;;  %v9982_v35 = vld [vmem:[%s9465_s27 + $0x19a] sm:$0xff] }
  0xa2   : > { %8662 = vmatprep.mubr.msk.f32.mxu1 %vm363_vm1, %v272_v39  ;;  %v284_v39 = vld [vmem:[%s9465_s27 + $0x1a0] sm:$0xff] }
  0xa4   : > { %8761 = vmatmul.mubr.msk.f32.gmra.mxu0 %vm363_vm1, %v9912_v45 }
  0xa5   : > { %8663 = vmatmul.mubr.msk.f32.gmra.mxu1 %vm363_vm1, %v273_v43  ;;  %8763 = vmatprep.mubr.msk.f32.mxu0 %vm363_vm1, %v9916_v49  ;;  %v9986_v43 = vld [vmem:[%s9465_s27 + $0x1a2] sm:$0xff] }
  0xa6   : > { %8665 = vmatprep.mubr.msk.f32.mxu1 %vm363_vm1, %v274_v47  ;;  %v285_v47 = vld [vmem:[%s9465_s27 + $0x1a8] sm:$0xff] }
  0xa8   : > { %8764 = vmatmul.mubr.msk.f32.gmra.mxu0 %vm363_vm1, %v9926_v53 }
  0xa9   : > { %8666 = vmatmul.mubr.msk.f32.gmra.mxu1 %vm363_vm1, %v275_v51  ;;  %8766 = vmatprep.mubr.msk.f32.mxu0 %vm363_vm1, %v9930_v57  ;;  %v9996_v51 = vld [vmem:[%s9465_s27 + $0x1aa] sm:$0xff] }
  0xaa   : > { %8668 = vmatprep.mubr.msk.f32.mxu1 %vm363_vm1, %v276_v55  ;;  %v286_v55 = vld [vmem:[%s9465_s27 + $0x1b0] sm:$0xff] }
  0xac   : > { %8767 = vmatmul.mubr.msk.f32.gmra.mxu0 %vm363_vm1, %v9940_v61 }
  0xad   : > { %8669 = vmatmul.mubr.msk.f32.gmra.mxu1 %vm363_vm1, %v277_v59  ;;  %8769 = vmatprep.mubr.msk.f32.mxu0 %vm363_vm1, %v9944_v1  ;;  %v10000_v59 = vld [vmem:[%s9465_s27 + $0x1b2] sm:$0xff] }
  0xae   : > { %8671 = vmatprep.mubr.msk.f32.mxu1 %vm363_vm1, %v278_v63  ;;  %v287_v63 = vld [vmem:[%s9465_s27 + $0x1b8] sm:$0xff] }
  0xb0   : > { %8770 = vmatmul.mubr.msk.f32.gmra.mxu0 %vm363_vm1, %v9954_v5 }
  0xb1   : > { %8672 = vmatmul.mubr.msk.f32.gmra.mxu1 %vm363_vm1, %v279_v3  ;;  %8772 = vmatprep.mubr.msk.f32.mxu0 %vm363_vm1, %v9958_v11  ;;  %v10010_v3 = vld [vmem:[%s9465_s27 + $0x1ba] sm:$0xff] }
  0xb2   : > { %8674 = vmatprep.mubr.msk.f32.mxu1 %vm363_vm1, %v280_v7  ;;  %v288_v7 = vld [vmem:[%s9465_s27 + $0x1c0] sm:$0xff] }
  0xb4   : > { %8773 = vmatmul.mubr.msk.f32.gmra.mxu0 %vm363_vm1, %v9968_v19 }
  0xb5   : > { %8675 = vmatmul.mubr.msk.f32.gmra.mxu1 %vm363_vm1, %v281_v9  ;;  %8775 = vmatprep.mubr.msk.f32.mxu0 %vm363_vm1, %v9972_v27  ;;  %v10014_v9 = vld [vmem:[%s9465_s27 + $0x1c2] sm:$0xff] }
  0xb6   : > { %8677 = vmatprep.mubr.msk.f32.mxu1 %vm363_vm1, %v282_v23  ;;  %11889 = vst [vmem:[#allocation2_spill] sm:$0xff] %v10014_v9  ;;  %v289_v23 = vld [vmem:[%s9465_s27 + $0x1c8] sm:$0xff] }
  0xb8   : > { %8776 = vmatmul.mubr.msk.f32.gmra.mxu0 %vm363_vm1, %v9982_v35 }
  0xb9   : > { %8678 = vmatmul.mubr.msk.f32.gmra.mxu1 %vm363_vm1, %v283_v31  ;;  %8778 = vmatprep.mubr.msk.f32.mxu0 %vm363_vm1, %v9986_v43  ;;  %v10024_v31 = vld [vmem:[%s9465_s27 + $0x1ca] sm:$0xff] }
  0xba   : > { %8680 = vmatprep.mubr.msk.f32.mxu1 %vm363_vm1, %v284_v39  ;;  %11890 = vst [vmem:[#allocation3_spill] sm:$0xff] %v10024_v31  ;;  %v290_v39 = vld [vmem:[%s9465_s27 + $0x1d0] sm:$0xff] }
  0xbc   : > { %8779 = vmatmul.mubr.msk.f32.gmra.mxu0 %vm363_vm1, %v9996_v51 }
  0xbd   : > { %8681 = vmatmul.mubr.msk.f32.gmra.mxu1 %vm363_vm1, %v285_v47  ;;  %8781 = vmatprep.mubr.msk.f32.mxu0 %vm363_vm1, %v10000_v59  ;;  %v10028_v47 = vld [vmem:[%s9465_s27 + $0x1d2] sm:$0xff] }
  0xbe   : > { %8683 = vmatprep.mubr.msk.f32.mxu1 %vm363_vm1, %v286_v55  ;;  %11891 = vst [vmem:[#allocation4_spill] sm:$0xff] %v10028_v47  ;;  %v291_v55 = vld [vmem:[%s9465_s27 + $0x1d8] sm:$0xff] }
  0xc0   : > { %8782 = vmatmul.mubr.msk.f32.gmra.mxu0 %vm363_vm1, %v10010_v3 }
  0xc1   : > { %8684 = vmatmul.mubr.msk.f32.gmra.mxu1 %vm363_vm1, %v287_v63  ;;  %8784 = vmatprep.mubr.msk.f32.mxu0 %vm363_vm1, %v10014_v9  ;;  %v10038_v63 = vld [vmem:[%s9465_s27 + $0x1da] sm:$0xff]  ;;  %v10042_v9 = vld [vmem:[%s9465_s27 + $0x1e2] sm:$0xff] }
  0xc2   : > { %8686 = vmatprep.mubr.msk.f32.mxu1 %vm363_vm1, %v288_v7  ;;  %v292_v7 = vld [vmem:[%s9465_s27 + $0x1e0] sm:$0xff]  ;;  %11892 = vst [vmem:[#allocation5_spill] sm:$0xff] %v10042_v9 }
  0xc4   : > { %8785 = vmatmul.mubr.msk.f32.gmra.mxu0 %vm363_vm1, %v10024_v31  ;;  %v10056_v31 = vld [vmem:[%s9465_s27 + $0x1f2] sm:$0xff] }
  0xc5   : > { %8687 = vmatmul.mubr.msk.f32.gmra.mxu1 %vm363_vm1, %v289_v23  ;;  %8787 = vmatprep.mubr.msk.f32.mxu0 %vm363_vm1, %v10028_v47  ;;  %v293_v23 = vld [vmem:[%s9465_s27 + $0x1e8] sm:$0xff]  ;;  %v294_v47 = vld [vmem:[%s9465_s27 + $0x1f0] sm:$0xff]  ;;  %11894 = vst [vmem:[#allocation7_spill] sm:$0xff] %v10056_v31 }
  0xc6   : > { %8689 = vmatprep.mubr.msk.f32.mxu1 %vm363_vm1, %v290_v39  ;;  %v10052_v39 = vld [vmem:[%s9465_s27 + $0x1ea] sm:$0xff] }
  0xc7   : > { %11893 = vst [vmem:[#allocation6_spill] sm:$0xff] %v10052_v39 }
  0xc8   : > { %8788 = vmatmul.mubr.msk.f32.gmra.mxu0 %vm363_vm1, %v10038_v63 }
  0xc9   : > { %8690 = vmatmul.mubr.msk.f32.gmra.mxu1 %vm363_vm1, %v291_v55  ;;  %8790 = vmatprep.mubr.msk.f32.mxu0 %vm363_vm1, %v10042_v9  ;;  %v295_v55 = vld [vmem:[%s9465_s27 + $0x1f8] sm:$0xff] }
  0xca   : > { %8692 = vmatprep.mubr.msk.f32.mxu1 %vm363_vm1, %v292_v7  ;;  %v10066_v7 = vld [vmem:[%s9465_s27 + $0x1fa] sm:$0xff] }
  0xcb   : > { %v2945_v9 = vld [vmem:[%s9465_s27 + $0x13] sm:$0xff] }
  0xcc   : > { %8791 = vmatmul.mubr.msk.f32.gmra.mxu0 %vm363_vm1, %v10052_v39 }
  0xcd   : > { %8693 = vmatmul.mubr.msk.f32.gmra.mxu1 %vm363_vm1, %v293_v23  ;;  %8793 = vmatprep.mubr.msk.f32.mxu0 %vm363_vm1, %v10056_v31  ;;  %v2947_v23 = vld [vmem:[%s9465_s27 + $0x23] sm:$0xff] }
  0xce   : > { %8695 = vmatprep.mubr.msk.f32.mxu1 %vm363_vm1, %v294_v47  ;;  %v2946_v47 = vld [vmem:[%s9465_s27 + $0x1b] sm:$0xff] }
  0xd0   : > { %8794 = vmatmul.mubr.msk.f32.gmra.mxu0 %vm363_vm1, %v10066_v7 }
  0xd1   : > { %8696 = vmatmul.mubr.msk.f32.gmra.mxu1 %vm363_vm1, %v295_v55  ;;  %8896 = vmatprep.mubr.msk.f32.mxu0 %vm363_vm1, %v2945_v9  ;;  %v10092_v9 = vld [vmem:[%s11877_s1 + $0x1c] sm:$0xf] }
  0xd2   : > { %8798 = vmatprep.mubr.msk.f32.mxu1 %vm363_vm1, %v9619_v12  ;;  %v2948_v12 = vld [vmem:[%s9465_s27 + $0x2b] sm:$0xff]  ;;  %11896 = vst [vmem:[#allocation9_spill] sm:$0xff] %v10092_v9 }
  0xd4   : > { %v10077_v39 = vpop.f32.mrf.mxu0  ;;  %8897 = vmatmul.mubr.msk.f32.vlgmr.msra.gmra.mxu0 %vm363_vm1, %v2946_v47 }
  0xd5   : > { %v10079_v31 = vpop.f32.mrf.mxu1  ;;  %8799 = vmatmul.mubr.msk.f32.vlgmr.msra.gmra.mxu1 %vm363_vm1, %v9634_v15  ;;  %9091 = vmatpush3.msk.msra.mxu0 %vm556_vm0, %v9639_v16  ;;  %v10107_v15 = vld [vmem:[%s11877_s1 + $0x20] sm:$0xf] }
  0xd6   : > { %11895 = vst [vmem:[#allocation8_spill] sm:$0xff] %v10079_v31  ;;  %8993 = vmatpush3.msk.msra.mxu1 %vm556_vm0, %v9626_v13  ;;  %v10094_v55 = vpop.f32.mrf.mxu0  ;;  %8801 = vmatprep.mubr.msk.f32.mxu1 %vm363_vm1, %v9646_v17  ;;  %v2949_v13 = vld [vmem:[%s9465_s27 + $0x33] sm:$0xff]  ;;  %11898 = vst [vmem:[#allocation11_spill] sm:$0xff] %v10107_v15  ;;  %v2950_v17 = vld [vmem:[%s9465_s27 + $0x3b] sm:$0xff] }
  0xd7   : > { %v10096_v31 = vpop.f32.mrf.mxu1  ;;  %8899 = vmatprep.mubr.msk.f32.mxu0 %vm363_vm1, %v2947_v23  ;;  %9188 = vmatprep.subr.msk.mxu1 %vm556_vm0, %v10092_v9  ;;  %v2951_v9 = vld [vmem:[%s9465_s27 + $0x43] sm:$0xff] }
  0xd8   : > { %11897 = vst [vmem:[#allocation10_spill] sm:$0xff] %v10096_v31  ;;  %v10109_v16 = vpop.f32.mrf.mxu0  ;;  %8900 = vmatmul.mubr.msk.f32.gmra.mxu0 %vm363_vm1, %v2948_v12  ;;  %9286 = vmatprep.subr.msk.mxu0 %vm556_vm0, %v10107_v15 }
  0xd9   : > { %v10111_v47 = vpop.f32.mrf.mxu1  ;;  %8802 = vmatmul.mubr.msk.f32.gmra.mxu1 %vm363_vm1, %v9660_v18  ;;  %8902 = vmatprep.mubr.msk.f32.mxu0 %vm363_vm1, %v2949_v13 }
  0xda   : > { %11899 = vst [vmem:[#allocation12_spill] sm:$0xff] %v10111_v47  ;;  %8804 = vmatprep.mubr.msk.f32.mxu1 %vm363_vm1, %v9664_v20  ;;  %v10120_v23 = vpop.f32.mrf.mxu0  ;;  %v2952_v20 = vld [vmem:[%s9465_s27 + $0x4b] sm:$0xff] }
  0xdb   : > { %v10122_v31 = vpop.f32.mrf.mxu1 }
  0xdc   : > { %11900 = vst [vmem:[#allocation13_spill] sm:$0xff] %v10122_v31  ;;  %v10127_v47 = vpop.f32.mrf.mxu0  ;;  %8903 = vmatmul.mubr.msk.f32.gmra.mxu0 %vm363_vm1, %v2950_v17  ;;  %v2953_v31 = vld [vmem:[%s9465_s27 + $0x53] sm:$0xff]  ;;  %v2955_v17 = vld [vmem:[%s9465_s27 + $0x63] sm:$0xff] }
  0xdd   : > { %v10129_v18 = vpop.f32.mrf.mxu1  ;;  %8805 = vmatmul.mubr.msk.f32.gmra.mxu1 %vm363_vm1, %v9674_v22  ;;  %8905 = vmatprep.mubr.msk.f32.mxu0 %vm363_vm1, %v2951_v9  ;;  %v2954_v22 = vld [vmem:[%s9465_s27 + $0x5b] sm:$0xff] }
  0xde   : > { %11901 = vst [vmem:[#allocation14_spill] sm:$0xff] %v10129_v18  ;;  %8807 = vmatprep.mubr.msk.f32.mxu1 %vm363_vm1, %v9678_v24  ;;  %v10138_v12 = vpop.f32.mrf.mxu0 }
  0xdf   : > { %v10140_v13 = vpop.f32.mrf.mxu1 }
  0xe0   : > { %11902 = vst [vmem:[#allocation15_spill] sm:$0xff] %v10140_v13  ;;  %v10143_v15 = vpop.f32.mrf.mxu0  ;;  %8906 = vmatmul.mubr.msk.f32.gmra.mxu0 %vm363_vm1, %v2952_v20  ;;  %v2957_v20 = vld [vmem:[%s9465_s27 + $0x73] sm:$0xff] }
  0xe1   : > { %v10145_v18 = vpop.f32.mrf.mxu1  ;;  %8808 = vmatmul.mubr.msk.f32.gmra.mxu1 %vm363_vm1, %v9688_v26  ;;  %8908 = vmatprep.mubr.msk.f32.mxu0 %vm363_vm1, %v2953_v31  ;;  %v2956_v26 = vld [vmem:[%s9465_s27 + $0x6b] sm:$0xff] }
  0xe2   : > { %11903 = vst [vmem:[#allocation16_spill] sm:$0xff] %v10145_v18  ;;  %8810 = vmatprep.mubr.msk.f32.mxu1 %vm363_vm1, %v9692_v28  ;;  %v10154_v24 = vpop.f32.mrf.mxu0 }
  0xe3   : > { %v10156_v9 = vpop.f32.mrf.mxu1 }
  0xe4   : > { %11904 = vst [vmem:[#allocation17_spill] sm:$0xff] %v10156_v9  ;;  %v10159_v13 = vpop.f32.mrf.mxu0  ;;  %8909 = vmatmul.mubr.msk.f32.gmra.mxu0 %vm363_vm1, %v2954_v22 }
  0xe5   : > { %v10161_v18 = vpop.f32.mrf.mxu1  ;;  %8811 = vmatmul.mubr.msk.f32.gmra.mxu1 %vm363_vm1, %v9702_v30  ;;  %8911 = vmatprep.mubr.msk.f32.mxu0 %vm363_vm1, %v2955_v17  ;;  %v2958_v30 = vld [vmem:[%s9465_s27 + $0x7b] sm:$0xff]  ;;  %v2959_v17 = vld [vmem:[%s9465_s27 + $0x83] sm:$0xff] }
  0xe6   : > { %11905 = vst [vmem:[#allocation18_spill] sm:$0xff] %v10161_v18  ;;  %8813 = vmatprep.mubr.msk.f32.mxu1 %vm363_vm1, %v9706_v32  ;;  %v10170_v28 = vpop.f32.mrf.mxu0 }
  0xe7   : > { %v10172_v31 = vpop.f32.mrf.mxu1 }
  0xe8   : > { %11906 = vst [vmem:[#allocation19_spill] sm:$0xff] %v10172_v31  ;;  %v10175_v9 = vpop.f32.mrf.mxu0  ;;  %8912 = vmatmul.mubr.msk.f32.gmra.mxu0 %vm363_vm1, %v2956_v26 }
  0xe9   : > { %v10177_v18 = vpop.f32.mrf.mxu1  ;;  %8814 = vmatmul.mubr.msk.f32.gmra.mxu1 %vm363_vm1, %v9716_v34  ;;  %8914 = vmatprep.mubr.msk.f32.mxu0 %vm363_vm1, %v2957_v20  ;;  %v2960_v34 = vld [vmem:[%s9465_s27 + $0x8b] sm:$0xff]  ;;  %v2961_v20 = vld [vmem:[%s9465_s27 + $0x93] sm:$0xff] }
  0xea   : > { %11907 = vst [vmem:[#allocation20_spill] sm:$0xff] %v10177_v18  ;;  %8816 = vmatprep.mubr.msk.f32.mxu1 %vm363_vm1, %v9720_v36  ;;  %v10186_v32 = vpop.f32.mrf.mxu0 }
  0xeb   : > { %v10188_v22 = vpop.f32.mrf.mxu1 }
  0xec   : > { %11908 = vst [vmem:[#allocation21_spill] sm:$0xff] %v10188_v22  ;;  %v10191_v31 = vpop.f32.mrf.mxu0  ;;  %8915 = vmatmul.mubr.msk.f32.gmra.mxu0 %vm363_vm1, %v2958_v30 }
  0xed   : > { %v10193_v18 = vpop.f32.mrf.mxu1  ;;  %8817 = vmatmul.mubr.msk.f32.gmra.mxu1 %vm363_vm1, %v9730_v38  ;;  %8917 = vmatprep.mubr.msk.f32.mxu0 %vm363_vm1, %v2959_v17  ;;  %v2962_v38 = vld [vmem:[%s9465_s27 + $0x9b] sm:$0xff]  ;;  %v2963_v17 = vld [vmem:[%s9465_s27 + $0xa3] sm:$0xff] }
  0xee   : > { %11909 = vst [vmem:[#allocation22_spill] sm:$0xff] %v10193_v18  ;;  %8819 = vmatprep.mubr.msk.f32.mxu1 %vm363_vm1, %v9734_v40  ;;  %v10202_v36 = vpop.f32.mrf.mxu0 }
  0xef   : > { %v10204_v26 = vpop.f32.mrf.mxu1 }
  0xf0   : > { %11910 = vst [vmem:[#allocation23_spill] sm:$0xff] %v10204_v26  ;;  %v10207_v22 = vpop.f32.mrf.mxu0  ;;  %8918 = vmatmul.mubr.msk.f32.gmra.mxu0 %vm363_vm1, %v2960_v34 }
  0xf1   : > { %v10209_v18 = vpop.f32.mrf.mxu1  ;;  %8820 = vmatmul.mubr.msk.f32.gmra.mxu1 %vm363_vm1, %v9744_v42  ;;  %8920 = vmatprep.mubr.msk.f32.mxu0 %vm363_vm1, %v2961_v20  ;;  %v2964_v42 = vld [vmem:[%s9465_s27 + $0xab] sm:$0xff]  ;;  %v2965_v20 = vld [vmem:[%s9465_s27 + $0xb3] sm:$0xff] }
  0xf2   : > { %11911 = vst [vmem:[#allocation24_spill] sm:$0xff] %v10209_v18  ;;  %8822 = vmatprep.mubr.msk.f32.mxu1 %vm363_vm1, %v9748_v44  ;;  %v10218_v40 = vpop.f32.mrf.mxu0 }
  0xf3   : > { %v10220_v30 = vpop.f32.mrf.mxu1 }
  0xf4   : > { %11912 = vst [vmem:[#allocation25_spill] sm:$0xff] %v10220_v30  ;;  %v10223_v26 = vpop.f32.mrf.mxu0  ;;  %8921 = vmatmul.mubr.msk.f32.gmra.mxu0 %vm363_vm1, %v2962_v38 }
  0xf5   : > { %v10225_v18 = vpop.f32.mrf.mxu1  ;;  %8823 = vmatmul.mubr.msk.f32.gmra.mxu1 %vm363_vm1, %v9758_v46  ;;  %8923 = vmatprep.mubr.msk.f32.mxu0 %vm363_vm1, %v2963_v17  ;;  %v2966_v46 = vld [vmem:[%s9465_s27 + $0xbb] sm:$0xff]  ;;  %v2967_v17 = vld [vmem:[%s9465_s27 + $0xc3] sm:$0xff] }
  0xf6   : > { %11913 = vst [vmem:[#allocation26_spill] sm:$0xff] %v10225_v18  ;;  %8825 = vmatprep.mubr.msk.f32.mxu1 %vm363_vm1, %v9762_v48  ;;  %v10234_v44 = vpop.f32.mrf.mxu0 }
  0xf7   : > { %v10236_v34 = vpop.f32.mrf.mxu1 }
  0xf8   : > { %11914 = vst [vmem:[#allocation27_spill] sm:$0xff] %v10236_v34  ;;  %v10239_v30 = vpop.f32.mrf.mxu0  ;;  %8924 = vmatmul.mubr.msk.f32.gmra.mxu0 %vm363_vm1, %v2964_v42 }
  0xf9   : > { %v10241_v18 = vpop.f32.mrf.mxu1  ;;  %8826 = vmatmul.mubr.msk.f32.gmra.mxu1 %vm363_vm1, %v9772_v50  ;;  %8926 = vmatprep.mubr.msk.f32.mxu0 %vm363_vm1, %v2965_v20  ;;  %v2968_v50 = vld [vmem:[%s9465_s27 + $0xcb] sm:$0xff]  ;;  %v2969_v20 = vld [vmem:[%s9465_s27 + $0xd3] sm:$0xff] }
  0xfa   : > { %11915 = vst [vmem:[#allocation28_spill] sm:$0xff] %v10241_v18  ;;  %8828 = vmatprep.mubr.msk.f32.mxu1 %vm363_vm1, %v9776_v52  ;;  %v10250_v48 = vpop.f32.mrf.mxu0 }
  0xfb   : > { %v10252_v38 = vpop.f32.mrf.mxu1 }
  0xfc   : > { %11916 = vst [vmem:[#allocation29_spill] sm:$0xff] %v10252_v38  ;;  %v10255_v34 = vpop.f32.mrf.mxu0  ;;  %8927 = vmatmul.mubr.msk.f32.gmra.mxu0 %vm363_vm1, %v2966_v46 }
  0xfd   : > { %v10257_v18 = vpop.f32.mrf.mxu1  ;;  %8829 = vmatmul.mubr.msk.f32.gmra.mxu1 %vm363_vm1, %v9786_v54  ;;  %8929 = vmatprep.mubr.msk.f32.mxu0 %vm363_vm1, %v2967_v17  ;;  %v2970_v54 = vld [vmem:[%s9465_s27 + $0xdb] sm:$0xff]  ;;  %v2971_v17 = vld [vmem:[%s9465_s27 + $0xe3] sm:$0xff] }
  0xfe   : > { %11917 = vst [vmem:[#allocation30_spill] sm:$0xff] %v10257_v18  ;;  %8831 = vmatprep.mubr.msk.f32.mxu1 %vm363_vm1, %v9790_v56  ;;  %v10266_v52 = vpop.f32.mrf.mxu0 }
  0xff   : > { %v10268_v42 = vpop.f32.mrf.mxu1 }
 0x100   : > { %11918 = vst [vmem:[#allocation31_spill] sm:$0xff] %v10268_v42  ;;  %v10271_v38 = vpop.f32.mrf.mxu0  ;;  %8930 = vmatmul.mubr.msk.f32.gmra.mxu0 %vm363_vm1, %v2968_v50 }
 0x101   : > { %v10273_v18 = vpop.f32.mrf.mxu1  ;;  %8832 = vmatmul.mubr.msk.f32.gmra.mxu1 %vm363_vm1, %v9800_v58  ;;  %8932 = vmatprep.mubr.msk.f32.mxu0 %vm363_vm1, %v2969_v20  ;;  %v2972_v58 = vld [vmem:[%s9465_s27 + $0xeb] sm:$0xff]  ;;  %v2973_v20 = vld [vmem:[%s9465_s27 + $0xf3] sm:$0xff] }
 0x102   : > { %11919 = vst [vmem:[#allocation32_spill] sm:$0xff] %v10273_v18  ;;  %8834 = vmatprep.mubr.msk.f32.mxu1 %vm363_vm1, %v9804_v60  ;;  %v10282_v56 = vpop.f32.mrf.mxu0 }
 0x103   : > { %v10284_v46 = vpop.f32.mrf.mxu1 }
 0x104   : > { %11920 = vst [vmem:[#allocation33_spill] sm:$0xff] %v10284_v46  ;;  %v10287_v42 = vpop.f32.mrf.mxu0  ;;  %8933 = vmatmul.mubr.msk.f32.gmra.mxu0 %vm363_vm1, %v2970_v54 }
 0x105   : > { %v10289_v18 = vpop.f32.mrf.mxu1  ;;  %8835 = vmatmul.mubr.msk.f32.gmra.mxu1 %vm363_vm1, %v9814_v62  ;;  %8935 = vmatprep.mubr.msk.f32.mxu0 %vm363_vm1, %v2971_v17  ;;  %v2974_v62 = vld [vmem:[%s9465_s27 + $0xfb] sm:$0xff]  ;;  %v2975_v17 = vld [vmem:[%s9465_s27 + $0x103] sm:$0xff] }
 0x106   : > { %11921 = vst [vmem:[#allocation34_spill] sm:$0xff] %v10289_v18  ;;  %8837 = vmatprep.mubr.msk.f32.mxu1 %vm363_vm1, %v9818_v0  ;;  %v10298_v60 = vpop.f32.mrf.mxu0 }
 0x107   : > { %v10300_v50 = vpop.f32.mrf.mxu1 }
 0x108   : > { %11922 = vst [vmem:[#allocation35_spill] sm:$0xff] %v10300_v50  ;;  %v10303_v46 = vpop.f32.mrf.mxu0  ;;  %8936 = vmatmul.mubr.msk.f32.gmra.mxu0 %vm363_vm1, %v2972_v58 }
 0x109   : > { %v10305_v18 = vpop.f32.mrf.mxu1  ;;  %8838 = vmatmul.mubr.msk.f32.gmra.mxu1 %vm363_vm1, %v9828_v2  ;;  %8938 = vmatprep.mubr.msk.f32.mxu0 %vm363_vm1, %v2973_v20  ;;  %v2976_v2 = vld [vmem:[%s9465_s27 + $0x10b] sm:$0xff]  ;;  %v2977_v20 = vld [vmem:[%s9465_s27 + $0x113] sm:$0xff] }
 0x10a   : > { %11923 = vst [vmem:[#allocation36_spill] sm:$0xff] %v10305_v18  ;;  %8840 = vmatprep.mubr.msk.f32.mxu1 %vm363_vm1, %v9832_v4  ;;  %v10314_v0 = vpop.f32.mrf.mxu0 }
 0x10b   : > { %v10316_v54 = vpop.f32.mrf.mxu1 }
 0x10c   : > { %11924 = vst [vmem:[#allocation37_spill] sm:$0xff] %v10316_v54  ;;  %v10319_v50 = vpop.f32.mrf.mxu0  ;;  %8939 = vmatmul.mubr.msk.f32.gmra.mxu0 %vm363_vm1, %v2974_v62 }
 0x10d   : > { %v10321_v18 = vpop.f32.mrf.mxu1  ;;  %8841 = vmatmul.mubr.msk.f32.gmra.mxu1 %vm363_vm1, %v9842_v6  ;;  %8941 = vmatprep.mubr.msk.f32.mxu0 %vm363_vm1, %v2975_v17  ;;  %v2978_v6 = vld [vmem:[%s9465_s27 + $0x11b] sm:$0xff]  ;;  %v2979_v17 = vld [vmem:[%s9465_s27 + $0x123] sm:$0xff] }
 0x10e   : > { %11925 = vst [vmem:[#allocation38_spill] sm:$0xff] %v10321_v18  ;;  %8843 = vmatprep.mubr.msk.f32.mxu1 %vm363_vm1, %v9846_v8  ;;  %v10330_v4 = vpop.f32.mrf.mxu0 }
 0x10f   : > { %v10332_v58 = vpop.f32.mrf.mxu1 }
 0x110   : > { %11926 = vst [vmem:[#allocation39_spill] sm:$0xff] %v10332_v58  ;;  %v10335_v54 = vpop.f32.mrf.mxu0  ;;  %8942 = vmatmul.mubr.msk.f32.gmra.mxu0 %vm363_vm1, %v2976_v2 }
 0x111   : > { %11927 = vst [vmem:[#allocation40_spill] sm:$0xff] %v10335_v54  ;;  %v10337_v18 = vpop.f32.mrf.mxu1  ;;  %8844 = vmatmul.mubr.msk.f32.gmra.mxu1 %vm363_vm1, %v9856_v14  ;;  %8944 = vmatprep.mubr.msk.f32.mxu0 %vm363_vm1, %v2977_v20 }
 0x112   : > { %11928 = vst [vmem:[#allocation41_spill] sm:$0xff] %v10337_v18  ;;  %8846 = vmatprep.mubr.msk.f32.mxu1 %vm363_vm1, %v9860_v10  ;;  %v10346_v8 = vpop.f32.mrf.mxu0  ;;  %v2980_v10 = vld [vmem:[%s9465_s27 + $0x12b] sm:$0xff] }
 0x113   : > { %11929 = vst [vmem:[#allocation42_spill] sm:$0xff] %v10346_v8  ;;  %v10348_v62 = vpop.f32.mrf.mxu1 }
 0x114   : > { %11930 = vst [vmem:[#allocation43_spill] sm:$0xff] %v10348_v62  ;;  %v8702_v18 = vpop.f32.mrf.mxu0  ;;  %8945 = vmatmul.mubr.msk.f32.gmra.mxu0 %vm363_vm1, %v2978_v6  ;;  %v2981_v62 = vld [vmem:[%s9465_s27 + $0x133] sm:$0xff] }
 0x115   : > { %v8604_v58 = vpop.f32.mrf.mxu1  ;;  %8847 = vmatmul.mubr.msk.f32.gmra.mxu1 %vm363_vm1, %v9870_v21  ;;  %8947 = vmatprep.mubr.msk.f32.mxu0 %vm363_vm1, %v2979_v17  ;;  %v2983_v17 = vld [vmem:[%s9465_s27 + $0x143] sm:$0xff] }
 0x116   : > { %v1212_v14 = vadd.f32 %v8604_v58, %v10077_v39  ;;  %8849 = vmatprep.mubr.msk.f32.mxu1 %vm363_vm1, %v9874_v25  ;;  %v1852_v20 = vpop.f32.mrf.mxu0 }
 0x117   : > { %v1206_v2 = vpop.f32.mrf.mxu1 }
 0x118   : > { %v10360_v8 = vadd.f32 %v8702_v18, %v1212_v14  ;;  %v1207_v21 = vadd.f32 %v1206_v2, %v10094_v55  ;;  %v8705_v6 = vpop.f32.mrf.mxu0  ;;  %8948 = vmatmul.mubr.msk.f32.gmra.mxu0 %vm363_vm1, %v2980_v10  ;;  %v2982_v18 = vld [vmem:[%s9465_s27 + $0x13b] sm:$0xff] }
 0x119   : > { %v8607_v54 = vpop.f32.mrf.mxu1  ;;  %8850 = vmatmul.mubr.msk.f32.gmra.mxu1 %vm363_vm1, %v9884_v29  ;;  %8950 = vmatprep.mubr.msk.f32.mxu0 %vm363_vm1, %v2981_v62 }
 0x11a   : > { %v10366_v25 = vadd.f32 %v1852_v20, %v1207_v21  ;;  %v1222_v39 = vadd.f32 %v8607_v54, %v10109_v16  ;;  %8852 = vmatprep.mubr.msk.f32.mxu1 %vm363_vm1, %v9888_v33  ;;  %v1862_v58 = vpop.f32.mrf.mxu0 }
 0x11b   : > { %v1216_v55 = vpop.f32.mrf.mxu1 }
 0x11c   : > { %v10375_v29 = vadd.f32 %v8705_v6, %v1222_v39  ;;  %v1217_v14 = vadd.f32 %v1216_v55, %v10120_v23  ;;  %v8708_v2 = vpop.f32.mrf.mxu0  ;;  %8951 = vmatmul.mubr.msk.f32.gmra.mxu0 %vm363_vm1, %v2982_v18  ;;  %v2984_v23 = vld [vmem:[%s9465_s27 + $0x14b] sm:$0xff]  ;;  %v6559_v6 = vld [vmem:[%s10400_s19] sm:$0xff] }
 0x11d   : > { %v8610_v10 = vpop.f32.mrf.mxu1  ;;  %8853 = vmatmul.mubr.msk.f32.gmra.mxu1 %vm363_vm1, %v9898_v37  ;;  %8953 = vmatprep.mubr.msk.f32.mxu0 %vm363_vm1, %v2983_v17  ;;  %v2985_v37 = vld [vmem:[%s9465_s27 + $0x153] sm:$0xff]  ;;  %v2987_v17 = vld [vmem:[%s9465_s27 + $0x163] sm:$0xff] }
 0x11e   : > { %v10383_v33 = vadd.f32 %v1862_v58, %v1217_v14  ;;  %v1232_v16 = vadd.f32 %v8610_v10, %v10127_v47  ;;  %8855 = vmatprep.mubr.msk.f32.mxu1 %vm363_vm1, %v9902_v41  ;;  %v1872_v62 = vpop.f32.mrf.mxu0  ;;  %v9406_v14 = vmov 0  }
 0x11f   : > { %v1226_v54 = vpop.f32.mrf.mxu1  ;;  %9396 = vset.pattern.permute.xlu0 %v9406_v14  ;;  %9397 = vset.pattern.permute.xlu1 %v9406_v14 }
 0x120   : > { %v10392_v20 = vadd.f32 %v8708_v2, %v1232_v16  ;;  %v1227_v21 = vadd.f32 %v1226_v54, %v10138_v12  ;;  %v8711_v47 = vpop.f32.mrf.mxu0  ;;  %8954 = vmatmul.mubr.msk.f32.gmra.mxu0 %vm363_vm1, %v2984_v23  ;;  %v2986_v12 = vld [vmem:[%s9465_s27 + $0x15b] sm:$0xff]  ;;  %6625 = vperm.xlu0 %9396, %v6559_v6   ;;  %v6561_v2 = vld [vmem:[%s10400_s19 + $0x10] sm:$0xff]  ;;  %v6560_v16 = vld [vmem:[%s10400_s19 + $0x8] sm:$0xff] }
 0x121   : > { %v8613_v41 = vpop.f32.mrf.mxu1  ;;  %8856 = vmatmul.mubr.msk.f32.gmra.mxu1 %vm363_vm1, %v9912_v45  ;;  %8956 = vmatprep.mubr.msk.f32.mxu0 %vm363_vm1, %v2985_v37  ;;  %v6563_v6 = vld [vmem:[%s10400_s19 + $0x20] sm:$0xff] }
 0x122   : > { %v10406_v39 = vadd.f32 %v1872_v62, %v1227_v21  ;;  %v1242_v18 = vadd.f32 %v8613_v41, %v10143_v15  ;;  %8858 = vmatprep.mubr.msk.f32.mxu1 %vm363_vm1, %v9916_v49  ;;  %v1882_v58 = vpop.f32.mrf.mxu0  ;;  %6635 = vperm.xlu1 %9397, %v6561_v2  }
 0x123   : > { %v1236_v55 = vpop.f32.mrf.mxu1 }
 0x124   : > { %v10414_v45 = vadd.f32 %v8711_v47, %v1242_v18  ;;  %v1237_v15 = vadd.f32 %v1236_v55, %v10154_v24  ;;  %v8714_v49 = vpop.f32.mrf.mxu0  ;;  %8957 = vmatmul.mubr.msk.f32.gmra.mxu0 %vm363_vm1, %v2986_v12  ;;  %v2988_v24 = vld [vmem:[%s9465_s27 + $0x16b] sm:$0xff]  ;;  %6630 = vperm.xlu0 %9396, %v6560_v16  }
 0x125   : > { %v8616_v10 = vpop.f32.mrf.mxu1  ;;  %8859 = vmatmul.mubr.msk.f32.gmra.mxu1 %vm363_vm1, %v9926_v53  ;;  %8959 = vmatprep.mubr.msk.f32.mxu0 %vm363_vm1, %v2987_v17  ;;  %v2989_v53 = vld [vmem:[%s9465_s27 + $0x173] sm:$0xff] }
 0x126   : > { %v10422_v23 = vadd.f32 %v1882_v58, %v1237_v15  ;;  %v1252_v54 = vadd.f32 %v8616_v10, %v10159_v13  ;;  %8861 = vmatprep.mubr.msk.f32.mxu1 %vm363_vm1, %v9930_v57  ;;  %v1892_v37 = vpop.f32.mrf.mxu0  ;;  %v6562_v57 = vld [vmem:[%s10400_s19 + $0x18] sm:$0xff]  ;;  %v6565_v10 = vld [vmem:[%s10400_s19 + $0x30] sm:$0xff] }
 0x127   : > { %v1246_v62 = vpop.f32.mrf.mxu1  ;;  %6640 = vperm.xlu1 %9397, %v6562_v57  }
 0x128   : > { %v10430_v21 = vadd.f32 %v8714_v49, %v1252_v54  ;;  %v1247_v41 = vadd.f32 %v1246_v62, %v10170_v28  ;;  %v8717_v13 = vpop.f32.mrf.mxu0  ;;  %8960 = vmatmul.mubr.msk.f32.gmra.mxu0 %vm363_vm1, %v2988_v24  ;;  %v2990_v28 = vld [vmem:[%s9465_s27 + $0x17b] sm:$0xff]  ;;  %6645 = vperm.xlu0 %9396, %v6563_v6  }
 0x129   : > { %v8619_v47 = vpop.f32.mrf.mxu1  ;;  %8862 = vmatmul.mubr.msk.f32.gmra.mxu1 %vm363_vm1, %v9940_v61  ;;  %8962 = vmatprep.mubr.msk.f32.mxu0 %vm363_vm1, %v2989_v53  ;;  %v2991_v61 = vld [vmem:[%s9465_s27 + $0x183] sm:$0xff] }
 0x12a   : > { %v10438_v18 = vadd.f32 %v1892_v37, %v1247_v41  ;;  %v1262_v12 = vadd.f32 %v8619_v47, %v10175_v9  ;;  %8864 = vmatprep.mubr.msk.f32.mxu1 %vm363_vm1, %v9944_v1  ;;  %v1902_v58 = vpop.f32.mrf.mxu0  ;;  %v6564_v1 = vld [vmem:[%s10400_s19 + $0x28] sm:$0xff]  ;;  %v6567_v53 = vld [vmem:[%s10400_s19 + $0x40] sm:$0xff] }
 0x12b   : > { %v1256_v55 = vpop.f32.mrf.mxu1  ;;  %6650 = vperm.xlu1 %9397, %v6564_v1  }
 0x12c   : > { %v10446_v17 = vadd.f32 %v8717_v13, %v1262_v12  ;;  %v1257_v14 = vadd.f32 %v1256_v55, %v10186_v32  ;;  %v8720_v9 = vpop.f32.mrf.mxu0  ;;  %8963 = vmatmul.mubr.msk.f32.gmra.mxu0 %vm363_vm1, %v2990_v28  ;;  %v2992_v32 = vld [vmem:[%s9465_s27 + $0x18b] sm:$0xff]  ;;  %6655 = vperm.xlu0 %9396, %v6565_v10  }
 0x12d   : > { %v8622_v15 = vpop.f32.mrf.mxu1  ;;  %8865 = vmatmul.mubr.msk.f32.gmra.mxu1 %vm363_vm1, %v9954_v5  ;;  %8965 = vmatprep.mubr.msk.f32.mxu0 %vm363_vm1, %v2991_v61  ;;  %v2993_v5 = vld [vmem:[%s9465_s27 + $0x193] sm:$0xff] }
 0x12e   : > { %v10454_v49 = vadd.f32 %v1902_v58, %v1257_v14  ;;  %v1272_v2 = vadd.f32 %v8622_v15, %v10191_v31  ;;  %8867 = vmatprep.mubr.msk.f32.mxu1 %vm363_vm1, %v9958_v11  ;;  %v1912_v54 = vpop.f32.mrf.mxu0  ;;  %v6566_v11 = vld [vmem:[%s10400_s19 + $0x38] sm:$0xff]  ;;  %v6569_v55 = vld [vmem:[%s10400_s19 + $0x50] sm:$0xff] }
 0x12f   : > { %v1266_v16 = vpop.f32.mrf.mxu1  ;;  %6660 = vperm.xlu1 %9397, %v6566_v11   ;;  %v6573_v11 = vld [vmem:[%s10400_s19 + $0x70] sm:$0xff] }
 0x130   : > { %v10462_v24 = vadd.f32 %v8720_v9, %v1272_v2  ;;  %v1267_v62 = vadd.f32 %v1266_v16, %v10202_v36  ;;  %v8723_v31 = vpop.f32.mrf.mxu0  ;;  %8966 = vmatmul.mubr.msk.f32.gmra.mxu0 %vm363_vm1, %v2992_v32  ;;  %v2994_v36 = vld [vmem:[%s9465_s27 + $0x19b] sm:$0xff]  ;;  %6665 = vperm.xlu0 %9396, %v6567_v53  }
 0x131   : > { %v8625_v37 = vpop.f32.mrf.mxu1  ;;  %8868 = vmatmul.mubr.msk.f32.gmra.mxu1 %vm363_vm1, %v9968_v19  ;;  %8968 = vmatprep.mubr.msk.f32.mxu0 %vm363_vm1, %v2993_v5  ;;  %v2995_v19 = vld [vmem:[%s9465_s27 + $0x1a3] sm:$0xff] }
 0x132   : > { %v10470_v41 = vadd.f32 %v1912_v54, %v1267_v62  ;;  %v1282_v47 = vadd.f32 %v8625_v37, %v10207_v22  ;;  %8870 = vmatprep.mubr.msk.f32.mxu1 %vm363_vm1, %v9972_v27  ;;  %v1922_v57 = vpop.f32.mrf.mxu0  ;;  %v6568_v27 = vld [vmem:[%s10400_s19 + $0x48] sm:$0xff]  ;;  %v6571_v2 = vld [vmem:[%s10400_s19 + $0x60] sm:$0xff] }
 0x133   : > { %v1276_v13 = vpop.f32.mrf.mxu1  ;;  %6670 = vperm.xlu1 %9397, %v6568_v27   ;;  %v6574_v27 = vld [vmem:[%s10400_s19 + $0x78] sm:$0xff] }
 0x134   : > { %v10478_v6 = vadd.f32 %v8723_v31, %v1282_v47  ;;  %v1277_v12 = vadd.f32 %v1276_v13, %v10218_v40  ;;  %v8726_v22 = vpop.f32.mrf.mxu0  ;;  %8969 = vmatmul.mubr.msk.f32.gmra.mxu0 %vm363_vm1, %v2994_v36  ;;  %v2996_v40 = vld [vmem:[%s9465_s27 + $0x1ab] sm:$0xff]  ;;  %6675 = vperm.xlu0 %9396, %v6569_v55   ;;  %v11931_v36 = vld [vmem:[#allocation2_spill] sm:$0xff] }
 0x135   : > { %v8628_v28 = vpop.f32.mrf.mxu1  ;;  %8871 = vmatmul.mubr.msk.f32.gmra.mxu1 %vm363_vm1, %v9982_v35  ;;  %8971 = vmatprep.mubr.msk.f32.mxu0 %vm363_vm1, %v2995_v19  ;;  %v2997_v35 = vld [vmem:[%s9465_s27 + $0x1b3] sm:$0xff]  ;;  %v6575_v55 = vld [vmem:[%s10400_s19 + $0x80] sm:$0xff] }
 0x136   : > { %v10486_v58 = vadd.f32 %v1922_v57, %v1277_v12  ;;  %v1292_v61 = vadd.f32 %v8628_v28, %v10223_v26  ;;  %8873 = vmatprep.mubr.msk.f32.mxu1 %vm363_vm1, %v9986_v43  ;;  %v1932_v15 = vpop.f32.mrf.mxu0  ;;  %v6570_v43 = vld [vmem:[%s10400_s19 + $0x58] sm:$0xff] }
 0x137   : > { %v1286_v14 = vpop.f32.mrf.mxu1  ;;  %6680 = vperm.xlu1 %9397, %v6570_v43  }
 0x138   : > { %v10494_v9 = vadd.f32 %v8726_v22, %v1292_v61  ;;  %v1287_v1 = vadd.f32 %v1286_v14, %v10234_v44  ;;  %v8729_v26 = vpop.f32.mrf.mxu0  ;;  %8972 = vmatmul.mubr.msk.f32.gmra.mxu0 %vm363_vm1, %v2996_v40  ;;  %v2998_v44 = vld [vmem:[%s9465_s27 + $0x1bb] sm:$0xff]  ;;  %6685 = vperm.xlu0 %9396, %v6571_v2   ;;  %v11932_v22 = vld [vmem:[#allocation3_spill] sm:$0xff]  ;;  %v11933_v14 = vld [vmem:[#allocation4_spill] sm:$0xff] }
 0x139   : > { %v8631_v10 = vpop.f32.mrf.mxu1  ;;  %8874 = vmatmul.mubr.msk.f32.gmra.mxu1 %vm363_vm1, %v9996_v51  ;;  %8974 = vmatprep.mubr.msk.f32.mxu0 %vm363_vm1, %v2997_v35  ;;  %v2999_v51 = vld [vmem:[%s9465_s27 + $0x1c3] sm:$0xff] }
 0x13a   : > { %v10502_v32 = vadd.f32 %v1932_v15, %v1287_v1  ;;  %v1302_v16 = vadd.f32 %v8631_v10, %v10239_v30  ;;  %8876 = vmatprep.mubr.msk.f32.mxu1 %vm363_vm1, %v10000_v59  ;;  %v1942_v5 = vpop.f32.mrf.mxu0  ;;  %v6572_v59 = vld [vmem:[%s10400_s19 + $0x68] sm:$0xff] }
 0x13b   : > { %v1296_v54 = vpop.f32.mrf.mxu1  ;;  %6690 = vperm.xlu1 %9397, %v6572_v59   ;;  %v3003_v1 = vld [vmem:[%s9465_s27 + $0x1e3] sm:$0xff] }
 0x13c   : > { %v10510_v62 = vadd.f32 %v8729_v26, %v1302_v16  ;;  %v1297_v37 = vadd.f32 %v1296_v54, %v10250_v48  ;;  %v8732_v30 = vpop.f32.mrf.mxu0  ;;  %8975 = vmatmul.mubr.msk.f32.gmra.mxu0 %vm363_vm1, %v2998_v44  ;;  %v3000_v48 = vld [vmem:[%s9465_s27 + $0x1cb] sm:$0xff]  ;;  %6695 = vperm.xlu0 %9396, %v6573_v11   ;;  %v11935_v11 = vld [vmem:[#allocation6_spill] sm:$0xff] }
 0x13d   : > { %v8634_v31 = vpop.f32.mrf.mxu1  ;;  %8877 = vmatmul.mubr.msk.f32.gmra.mxu1 %vm363_vm1, %v10010_v3  ;;  %8977 = vmatprep.mubr.msk.f32.mxu0 %vm363_vm1, %v2999_v51  ;;  %v3001_v3 = vld [vmem:[%s9465_s27 + $0x1d3] sm:$0xff]  ;;  %v6576_v2 = vld [vmem:[%s10400_s19 + $0x88] sm:$0xff] }
 0x13e   : > { %v10518_v53 = vadd.f32 %v1942_v5, %v1297_v37  ;;  %v1312_v47 = vadd.f32 %v8634_v31, %v10255_v34  ;;  %8879 = vmatprep.mubr.msk.f32.mxu1 %vm363_vm1, %v11931_v36  ;;  %v1952_v57 = vpop.f32.mrf.mxu0  ;;  %v6577_v16 = vld [vmem:[%s10400_s19 + $0x90] sm:$0xff]  ;;  %v11934_v5 = vld [vmem:[#allocation5_spill] sm:$0xff]  ;;  %v6579_v36 = vld [vmem:[%s10400_s19 + $0xa0] sm:$0xff] }
 0x13f   : > { %v1306_v13 = vpop.f32.mrf.mxu1  ;;  %6700 = vperm.xlu1 %9397, %v6574_v27  }
 0x140   : > { %v10526_v19 = vadd.f32 %v8732_v30, %v1312_v47  ;;  %v1307_v12 = vadd.f32 %v1306_v13, %v10266_v52  ;;  %v8735_v34 = vpop.f32.mrf.mxu0  ;;  %8978 = vmatmul.mubr.msk.f32.gmra.mxu0 %vm363_vm1, %v3000_v48  ;;  %v3002_v52 = vld [vmem:[%s9465_s27 + $0x1db] sm:$0xff]  ;;  %6705 = vperm.xlu0 %9396, %v6575_v55  }
 0x141   : > { %v8637_v28 = vpop.f32.mrf.mxu1  ;;  %8880 = vmatmul.mubr.msk.f32.gmra.mxu1 %vm363_vm1, %v11932_v22  ;;  %8980 = vmatprep.mubr.msk.f32.mxu0 %vm363_vm1, %v3001_v3  ;;  %v6578_v47 = vld [vmem:[%s10400_s19 + $0x98] sm:$0xff] }
 0x142   : > { %v10534_v61 = vadd.f32 %v1952_v57, %v1307_v12  ;;  %v1322_v40 = vadd.f32 %v8637_v28, %v10271_v38  ;;  %8882 = vmatprep.mubr.msk.f32.mxu1 %vm363_vm1, %v11933_v14  ;;  %v1962_v35 = vpop.f32.mrf.mxu0  ;;  %v11936_v57 = vld [vmem:[#allocation7_spill] sm:$0xff]  ;;  %v6581_v14 = vld [vmem:[%s10400_s19 + $0xb0] sm:$0xff] }
 0x143   : > { %v1316_v15 = vpop.f32.mrf.mxu1  ;;  %6710 = vperm.xlu1 %9397, %v6576_v2   ;;  %v2297_v28 = vld [vmem:[%s9465_s27 + $0x202] sm:$0xff] }
 0x144   : > { %v10542_v10 = vadd.f32 %v8735_v34, %v1322_v40  ;;  %v1317_v26 = vadd.f32 %v1316_v15, %v10282_v56  ;;  %v8738_v38 = vpop.f32.mrf.mxu0  ;;  %8981 = vmatmul.mubr.msk.f32.gmra.mxu0 %vm363_vm1, %v3002_v52  ;;  %v3004_v56 = vld [vmem:[%s9465_s27 + $0x1eb] sm:$0xff]  ;;  %6715 = vperm.xlu0 %9396, %v6577_v16   ;;  %v3007_v34 = vld [vmem:[%s9465_s27 + $0x203] sm:$0xff] }
 0x145   : > { %v8640_v43 = vpop.f32.mrf.mxu1  ;;  %8883 = vmatmul.mubr.msk.f32.gmra.mxu1 %vm363_vm1, %v10038_v63  ;;  %8983 = vmatprep.mubr.msk.f32.mxu0 %vm363_vm1, %v3003_v1  ;;  %v3005_v63 = vld [vmem:[%s9465_s27 + $0x1f3] sm:$0xff]  ;;  %v6580_v40 = vld [vmem:[%s10400_s19 + $0xa8] sm:$0xff] }
 0x146   : > { %v10550_v44 = vadd.f32 %v1962_v35, %v1317_v26  ;;  %v1332_v54 = vadd.f32 %v8640_v43, %v10287_v42  ;;  %8885 = vmatprep.mubr.msk.f32.mxu1 %vm363_vm1, %v11934_v5  ;;  %v1972_v37 = vpop.f32.mrf.mxu0  ;;  %v3008_v35 = vld [vmem:[%s9465_s27 + $0x20b] sm:$0xff]  ;;  %v3655_v43 = vld [vmem:[%s9465_s27 + $0x14] sm:$0xff]  ;;  %v6583_v5 = vld [vmem:[%s10400_s19 + $0xc0] sm:$0xff] }
 0x147   : > { %v1326_v51 = vpop.f32.mrf.mxu1  ;;  %6720 = vperm.xlu1 %9397, %v6578_v47  }
 0x148   : > { %v10558_v31 = vadd.f32 %v8738_v38, %v1332_v54  ;;  %v1327_v30 = vadd.f32 %v1326_v51, %v10298_v60  ;;  %v8741_v59 = vpop.f32.mrf.mxu0  ;;  %8984 = vmatmul.mubr.msk.f32.gmra.mxu0 %vm363_vm1, %v3004_v56  ;;  %v3006_v60 = vld [vmem:[%s9465_s27 + $0x1fb] sm:$0xff]  ;;  %6725 = vperm.xlu0 %9396, %v6579_v36   ;;  %v11937_v51 = vld [vmem:[#allocation40_spill] sm:$0xff] }
 0x149   : > { %v8643_v42 = vpop.f32.mrf.mxu1  ;;  %8886 = vmatmul.mubr.msk.f32.gmra.mxu1 %vm363_vm1, %v11935_v11  ;;  %8986 = vmatprep.mubr.msk.f32.mxu0 %vm363_vm1, %v3005_v63  ;;  %v6582_v54 = vld [vmem:[%s10400_s19 + $0xb8] sm:$0xff]  ;;  %v4366_v63 = vld [vmem:[%s9465_s27 + $0x2c] sm:$0xff]  ;;  %v11938_v11 = vld [vmem:[#allocation42_spill] sm:$0xff] }
 0x14a   : > { %v10566_v48 = vadd.f32 %v1972_v37, %v1327_v30  ;;  %v1342_v13 = vadd.f32 %v8643_v42, %v10303_v46  ;;  %8888 = vmatprep.mubr.msk.f32.mxu1 %vm363_vm1, %v11936_v57  ;;  %v1982_v12 = vpop.f32.mrf.mxu0  ;;  %v4367_v36 = vld [vmem:[%s9465_s27 + $0x34] sm:$0xff] }
 0x14b   : > { %v1336_v3 = vpop.f32.mrf.mxu1  ;;  %6730 = vperm.xlu1 %9397, %v6580_v40  }
 0x14c   : > { %v10575_v22 = vadd.f32 %v8741_v59, %v1342_v13  ;;  %v1337_v27 = vadd.f32 %v1336_v3, %v10314_v0  ;;  %v8744_v55 = vpop.f32.mrf.mxu0  ;;  %8987 = vmatmul.mubr.msk.f32.gmra.mxu0 %vm363_vm1, %v3006_v60  ;;  %v2298_v0 = vld [vmem:[%s9465_s27 + $0x20a] sm:$0xff]  ;;  %6735 = vperm.xlu0 %9396, %v6581_v14  }
 0x14d   : > { %v8646_v46 = vpop.f32.mrf.mxu1  ;;  %8889 = vmatmul.mubr.msk.f32.gmra.mxu1 %vm363_vm1, %v10066_v7  ;;  %8989 = vmatprep.mubr.msk.f32.mxu0 %vm363_vm1, %v3007_v34  ;;  %v4365_v7 = vld [vmem:[%s9465_s27 + $0x24] sm:$0xff]  ;;  %v6585_v3 = vld [vmem:[%s10400_s19 + $0xd0] sm:$0xff] }
 0x14e   : > { %v10583_v52 = vadd.f32 %v1982_v12, %v1337_v27  ;;  %v1352_v15 = vadd.f32 %v8646_v46, %v10319_v50  ;;  %8891 = vmatprep.mubr.msk.f32.mxu1 %vm363_vm1, %v2297_v28  ;;  %v1992_v26 = vpop.f32.mrf.mxu0  ;;  %v6584_v60 = vld [vmem:[%s10400_s19 + $0xc8] sm:$0xff]  ;;  %v11939_v28 = vld [vmem:[#allocation8_spill] sm:$0xff]  ;;  %v11940_v27 = vld [vmem:[#allocation9_spill] sm:$0xff] }
 0x14f   : > { %v1346_v1 = vpop.f32.mrf.mxu1  ;;  %6740 = vperm.xlu1 %9397, %v6582_v54   ;;  %v11941_v46 = vld [vmem:[#allocation11_spill] sm:$0xff] }
 0x150   : > { %v10592_v38 = vadd.f32 %v8744_v55, %v1352_v15  ;;  %v1347_v2 = vadd.f32 %v1346_v1, %v10330_v4  ;;  %v8747_v16 = vpop.f32.mrf.mxu0  ;;  %8990 = vmatmul.mubr.msk.f32.gmra.mxu0 %vm363_vm1, %v3008_v35  ;;  %v3656_v4 = vld [vmem:[%s9465_s27 + $0x1c] sm:$0xff]  ;;  %6745 = vperm.xlu0 %9396, %v6583_v5   ;;  %v4369_v15 = vld [vmem:[%s9465_s27 + $0x44] sm:$0xff]  ;;  %v4370_v5 = vld [vmem:[%s9465_s27 + $0x4c] sm:$0xff] }
 0x151   : > { %v8649_v50 = vpop.f32.mrf.mxu1  ;;  %8892 = vmatmul.mubr.msk.f32.gmra.mxu1 %vm363_vm1, %v2298_v0  ;;  %9092 = vmatprep.mubr.msk.f32.mxu0 %vm363_vm1, %v4365_v7  ;;  %v4368_v55 = vld [vmem:[%s9465_s27 + $0x3c] sm:$0xff] }
 0x152   : > { %v10599_v56 = vadd.f32 %v1992_v26, %v1347_v2  ;;  %v1362_v37 = vadd.f32 %v8649_v50, %v11937_v51  ;;  %8994 = vmatprep.mubr.msk.f32.mxu1 %vm363_vm1, %v3655_v43  ;;  %v2002_v42 = vpop.f32.mrf.mxu0  ;;  %v11942_v35 = vld [vmem:[#allocation10_spill] sm:$0xff]  ;;  %v6586_v2 = vld [vmem:[%s10400_s19 + $0xd8] sm:$0xff] }
 0x153   : > { %v1356_v30 = vpop.f32.mrf.mxu1  ;;  %6750 = vperm.xlu1 %9397, %v6584_v60   ;;  %v6587_v50 = vld [vmem:[%s10400_s19 + $0xe0] sm:$0xff] }
 0x154   : > { %v10606_v59 = vadd.f32 %v8747_v16, %v1362_v37  ;;  %v1357_v47 = vadd.f32 %v1356_v30, %v11938_v11  ;;  %v8750_v57 = vpop.f32.mrf.mxu0  ;;  %9093 = vmatmul.mubr.msk.f32.vlgmr.msra.gmra.mxu0 %vm363_vm1, %v4366_v63  ;;  %6755 = vperm.xlu0 %9396, %v6585_v3   ;;  %v11943_v16 = vld [vmem:[#allocation12_spill] sm:$0xff]  ;;  %v11944_v30 = vld [vmem:[#allocation13_spill] sm:$0xff]  ;;  %v11945_v60 = vld [vmem:[#allocation14_spill] sm:$0xff] }
 0x155   : > { %v8652_v13 = vpop.f32.mrf.mxu1  ;;  %8995 = vmatmul.mubr.msk.f32.vlgmr.msra.gmra.mxu1 %vm363_vm1, %v3656_v4  ;;  %9287 = vmatpush3.msk.msra.mxu0 %vm556_vm0, %v11941_v46  ;;  %v4371_v4 = vld [vmem:[%s9465_s27 + $0x54] sm:$0xff]  ;;  %v4373_v46 = vld [vmem:[%s9465_s27 + $0x64] sm:$0xff] }
 0x156   : > { %v10614_v12 = vadd.f32 %v2002_v42, %v1357_v47  ;;  %v1372_v34 = vadd.f32 %v8652_v13, %v11939_v28  ;;  %9189 = vmatpush3.msk.msra.mxu1 %vm556_vm0, %v11940_v27  ;;  %v2012_v14 = vpop.f32.mrf.mxu0  ;;  %8997 = vmatprep.mubr.msk.f32.mxu1 %vm363_vm1, %v4365_v7  ;;  %v6589_v13 = vld [vmem:[%s10400_s19 + $0xf0] sm:$0xff]  ;;  %v4372_v28 = vld [vmem:[%s9465_s27 + $0x5c] sm:$0xff] }
 0x157   : > { %v1366_v40 = vpop.f32.mrf.mxu1  ;;  %9095 = vmatprep.mubr.msk.f32.mxu0 %vm363_vm1, %v4367_v36  ;;  %6760 = vperm.xlu1 %9397, %v6586_v2   ;;  %v11947_v2 = vld [vmem:[#allocation16_spill] sm:$0xff] }
 0x158   : > { %v10625_v0 = vadd.f32 %v8750_v57, %v1372_v34  ;;  %v1367_v1 = vadd.f32 %v1366_v40, %v11942_v35  ;;  %v8753_v43 = vpop.f32.mrf.mxu0  ;;  %9096 = vmatmul.mubr.msk.f32.gmra.mxu0 %vm363_vm1, %v4368_v55  ;;  %6765 = vperm.xlu0 %9396, %v6587_v50   ;;  %v11946_v40 = vld [vmem:[#allocation15_spill] sm:$0xff] }
 0x159   : > { %v8655_v26 = vpop.f32.mrf.mxu1  ;;  %8998 = vmatmul.mubr.msk.f32.gmra.mxu1 %vm363_vm1, %v4366_v63  ;;  %9098 = vmatprep.mubr.msk.f32.mxu0 %vm363_vm1, %v4369_v15 }
 0x15a   : > { %v10632_v7 = vadd.f32 %v2012_v14, %v1367_v1  ;;  %v1382_v54 = vadd.f32 %v8655_v26, %v11943_v16  ;;  %9000 = vmatprep.mubr.msk.f32.mxu1 %vm363_vm1, %v4367_v36  ;;  %v2022_v37 = vpop.f32.mrf.mxu0  ;;  %v6588_v36 = vld [vmem:[%s10400_s19 + $0xe8] sm:$0xff]  ;;  %v6591_v26 = vld [vmem:[%s10400_s19 + $0x100] sm:$0xff] }
 0x15b   : > { %v1376_v51 = vpop.f32.mrf.mxu1  ;;  %6770 = vperm.xlu1 %9397, %v6588_v36   ;;  %v4374_v16 = vld [vmem:[%s9465_s27 + $0x6c] sm:$0xff] }
 0x15c   : > { %v10639_v63 = vadd.f32 %v8753_v43, %v1382_v54  ;;  %v1377_v42 = vadd.f32 %v1376_v51, %v11944_v30  ;;  %v8756_v47 = vpop.f32.mrf.mxu0  ;;  %9099 = vmatmul.mubr.msk.f32.gmra.mxu0 %vm363_vm1, %v4370_v5  ;;  %6775 = vperm.xlu0 %9396, %v6589_v13   ;;  %v11948_v30 = vld [vmem:[#allocation17_spill] sm:$0xff]  ;;  %v6593_v36 = vld [vmem:[%s10400_s19 + $0x110] sm:$0xff] }
 0x15d   : > { %v8658_v11 = vpop.f32.mrf.mxu1  ;;  %9001 = vmatmul.mubr.msk.f32.gmra.mxu1 %vm363_vm1, %v4368_v55  ;;  %9101 = vmatprep.mubr.msk.f32.mxu0 %vm363_vm1, %v4371_v4 }
 0x15e   : > { %v10646_v57 = vadd.f32 %v2022_v37, %v1377_v42  ;;  %v1392_v3 = vadd.f32 %v8658_v11, %v11945_v60  ;;  %9003 = vmatprep.mubr.msk.f32.mxu1 %vm363_vm1, %v4369_v15  ;;  %v2032_v27 = vpop.f32.mrf.mxu0  ;;  %v6590_v15 = vld [vmem:[%s10400_s19 + $0xf8] sm:$0xff]  ;;  %v11949_v60 = vld [vmem:[#allocation18_spill] sm:$0xff] }
 0x15f   : > { %v1386_v34 = vpop.f32.mrf.mxu1  ;;  %v4375_v37 = vld [vmem:[%s9465_s27 + $0x74] sm:$0xff]  ;;  %6780 = vperm.xlu1 %9397, %v6590_v15  }
 0x160   : > { %v10653_v55 = vadd.f32 %v8756_v47, %v1392_v3  ;;  %v1387_v14 = vadd.f32 %v1386_v34, %v11946_v40  ;;  %v8759_v1 = vpop.f32.mrf.mxu0  ;;  %9102 = vmatmul.mubr.msk.f32.gmra.mxu0 %vm363_vm1, %v4372_v28  ;;  %6785 = vperm.xlu0 %9396, %v6591_v26   ;;  %v4376_v34 = vld [vmem:[%s9465_s27 + $0x7c] sm:$0xff] }
 0x161   : > { %v8661_v35 = vpop.f32.mrf.mxu1  ;;  %9004 = vmatmul.mubr.msk.f32.gmra.mxu1 %vm363_vm1, %v4370_v5  ;;  %9104 = vmatprep.mubr.msk.f32.mxu0 %vm363_vm1, %v4373_v46 }
 0x162   : > { %v10660_v43 = vadd.f32 %v2032_v27, %v1387_v14  ;;  %v1402_v50 = vadd.f32 %v8661_v35, %v11947_v2  ;;  %9006 = vmatprep.mubr.msk.f32.mxu1 %vm363_vm1, %v4371_v4  ;;  %v2042_v51 = vpop.f32.mrf.mxu0  ;;  %v6592_v4 = vld [vmem:[%s10400_s19 + $0x108] sm:$0xff]  ;;  %v6595_v2 = vld [vmem:[%s10400_s19 + $0x120] sm:$0xff] }
 0x163   : > { %v1396_v54 = vpop.f32.mrf.mxu1  ;;  %v4377_v14 = vld [vmem:[%s9465_s27 + $0x84] sm:$0xff]  ;;  %6790 = vperm.xlu1 %9397, %v6592_v4   ;;  %v11952_v4 = vld [vmem:[#allocation21_spill] sm:$0xff] }
 0x164   : > { %v10667_v5 = vadd.f32 %v8759_v1, %v1402_v50  ;;  %v1397_v42 = vadd.f32 %v1396_v54, %v11948_v30  ;;  %v8762_v47 = vpop.f32.mrf.mxu0  ;;  %9105 = vmatmul.mubr.msk.f32.gmra.mxu0 %vm363_vm1, %v4374_v16  ;;  %v11950_v35 = vld [vmem:[#allocation19_spill] sm:$0xff]  ;;  %6795 = vperm.xlu0 %9396, %v6593_v36   ;;  %v11951_v54 = vld [vmem:[#allocation20_spill] sm:$0xff] }
 0x165   : > { %v8664_v11 = vpop.f32.mrf.mxu1  ;;  %9007 = vmatmul.mubr.msk.f32.gmra.mxu1 %vm363_vm1, %v4372_v28  ;;  %9107 = vmatprep.mubr.msk.f32.mxu0 %vm363_vm1, %v4375_v37  ;;  %v4378_v30 = vld [vmem:[%s9465_s27 + $0x8c] sm:$0xff] }
 0x166   : > { %v10674_v13 = vadd.f32 %v2042_v51, %v1397_v42  ;;  %v1412_v3 = vadd.f32 %v8664_v11, %v11949_v60  ;;  %9009 = vmatprep.mubr.msk.f32.mxu1 %vm363_vm1, %v4373_v46  ;;  %v2052_v40 = vpop.f32.mrf.mxu0  ;;  %v6594_v46 = vld [vmem:[%s10400_s19 + $0x118] sm:$0xff] }
 0x167   : > { %v1406_v27 = vpop.f32.mrf.mxu1  ;;  %6800 = vperm.xlu1 %9397, %v6594_v46  }
 0x168   : > { %v10681_v28 = vadd.f32 %v8762_v47, %v1412_v3  ;;  %v1407_v1 = vadd.f32 %v1406_v27, %v11950_v35  ;;  %v8765_v26 = vpop.f32.mrf.mxu0  ;;  %9108 = vmatmul.mubr.msk.f32.gmra.mxu0 %vm363_vm1, %v4376_v34  ;;  %v4379_v47 = vld [vmem:[%s9465_s27 + $0x94] sm:$0xff]  ;;  %6805 = vperm.xlu0 %9396, %v6595_v2   ;;  %v11953_v35 = vld [vmem:[#allocation22_spill] sm:$0xff] }
 0x169   : > { %v8667_v15 = vpop.f32.mrf.mxu1  ;;  %9010 = vmatmul.mubr.msk.f32.gmra.mxu1 %vm363_vm1, %v4374_v16  ;;  %9110 = vmatprep.mubr.msk.f32.mxu0 %vm363_vm1, %v4377_v14  ;;  %v6597_v27 = vld [vmem:[%s10400_s19 + $0x130] sm:$0xff]  ;;  %v4381_v2 = vld [vmem:[%s9465_s27 + $0xa4] sm:$0xff] }
 0x16a   : > { %v10688_v50 = vadd.f32 %v2052_v40, %v1407_v1  ;;  %v1422_v51 = vadd.f32 %v8667_v15, %v11951_v54  ;;  %9012 = vmatprep.mubr.msk.f32.mxu1 %vm363_vm1, %v4375_v37  ;;  %v2062_v11 = vpop.f32.mrf.mxu0  ;;  %v6596_v37 = vld [vmem:[%s10400_s19 + $0x128] sm:$0xff]  ;;  %v4380_v15 = vld [vmem:[%s9465_s27 + $0x9c] sm:$0xff] }
 0x16b   : > { %v1416_v42 = vpop.f32.mrf.mxu1  ;;  %v11955_v54 = vld [vmem:[#allocation23_spill] sm:$0xff]  ;;  %6810 = vperm.xlu1 %9397, %v6596_v37  }
 0x16c   : > { %v10695_v16 = vadd.f32 %v8765_v26, %v1422_v51  ;;  %v1417_v36 = vadd.f32 %v1416_v42, %v11952_v4  ;;  %v8768_v3 = vpop.f32.mrf.mxu0  ;;  %9111 = vmatmul.mubr.msk.f32.gmra.mxu0 %vm363_vm1, %v4378_v30  ;;  %6815 = vperm.xlu0 %9396, %v6597_v27   ;;  %v6599_v4 = vld [vmem:[%s10400_s19 + $0x140] sm:$0xff] }
 0x16d   : > { %v8670_v60 = vpop.f32.mrf.mxu1  ;;  %9013 = vmatmul.mubr.msk.f32.gmra.mxu1 %vm363_vm1, %v4376_v34  ;;  %9113 = vmatprep.mubr.msk.f32.mxu0 %vm363_vm1, %v4379_v47 }
 0x16e   : > { %v10702_v40 = vadd.f32 %v2062_v11, %v1417_v36  ;;  %v1432_v1 = vadd.f32 %v8670_v60, %v11953_v35  ;;  %9015 = vmatprep.mubr.msk.f32.mxu1 %vm363_vm1, %v4377_v14  ;;  %v2072_v46 = vpop.f32.mrf.mxu0  ;;  %v6598_v14 = vld [vmem:[%s10400_s19 + $0x138] sm:$0xff]  ;;  %v11957_v60 = vld [vmem:[#allocation24_spill] sm:$0xff] }
 0x16f   : > { %v1426_v26 = vpop.f32.mrf.mxu1  ;;  %6820 = vperm.xlu1 %9397, %v6598_v14  }
 0x170   : > { %v10709_v34 = vadd.f32 %v8768_v3, %v1432_v1  ;;  %v1427_v51 = vadd.f32 %v1426_v26, %v11955_v54  ;;  %v8771_v11 = vpop.f32.mrf.mxu0  ;;  %9114 = vmatmul.mubr.msk.f32.gmra.mxu0 %vm363_vm1, %v4380_v15  ;;  %v4382_v3 = vld [vmem:[%s9465_s27 + $0xac] sm:$0xff]  ;;  %v4383_v1 = vld [vmem:[%s9465_s27 + $0xb4] sm:$0xff]  ;;  %6825 = vperm.xlu0 %9396, %v6599_v4  }
 0x171   : > { %v8673_v42 = vpop.f32.mrf.mxu1  ;;  %9016 = vmatmul.mubr.msk.f32.gmra.mxu1 %vm363_vm1, %v4378_v30  ;;  %9116 = vmatprep.mubr.msk.f32.mxu0 %vm363_vm1, %v4381_v2  ;;  %v11959_v26 = vld [vmem:[#allocation25_spill] sm:$0xff] }
 0x172   : > { %11954 = vst [vmem:[#allocation2_spill] sm:$0xff] %v10709_v34  ;;  %v10716_v36 = vadd.f32 %v2072_v46, %v1427_v51  ;;  %v1442_v35 = vadd.f32 %v8673_v42, %v11957_v60  ;;  %9018 = vmatprep.mubr.msk.f32.mxu1 %vm363_vm1, %v4379_v47  ;;  %v2082_v27 = vpop.f32.mrf.mxu0  ;;  %v6600_v47 = vld [vmem:[%s10400_s19 + $0x148] sm:$0xff]  ;;  %v6601_v42 = vld [vmem:[%s10400_s19 + $0x150] sm:$0xff] }
 0x173   : > { %v1436_v37 = vpop.f32.mrf.mxu1  ;;  %6830 = vperm.xlu1 %9397, %v6600_v47  }
 0x174   : > { %11956 = vst [vmem:[#allocation3_spill] sm:$0xff] %v10716_v36  ;;  %v10723_v30 = vadd.f32 %v8771_v11, %v1442_v35  ;;  %v1437_v54 = vadd.f32 %v1436_v37, %v11959_v26  ;;  %v8774_v51 = vpop.f32.mrf.mxu0  ;;  %9117 = vmatmul.mubr.msk.f32.gmra.mxu0 %vm363_vm1, %v4382_v3  ;;  %v11961_v36 = vld [vmem:[#allocation26_spill] sm:$0xff]  ;;  %v11963_v37 = vld [vmem:[#allocation27_spill] sm:$0xff]  ;;  %6835 = vperm.xlu0 %9396, %v6601_v42   ;;  %v4387_v42 = vld [vmem:[%s9465_s27 + $0xd4] sm:$0xff] }
 0x175   : > { %v8676_v46 = vpop.f32.mrf.mxu1  ;;  %9019 = vmatmul.mubr.msk.f32.gmra.mxu1 %vm363_vm1, %v4380_v15  ;;  %9119 = vmatprep.mubr.msk.f32.mxu0 %vm363_vm1, %v4383_v1  ;;  %v4384_v11 = vld [vmem:[%s9465_s27 + $0xbc] sm:$0xff]  ;;  %v4385_v35 = vld [vmem:[%s9465_s27 + $0xc4] sm:$0xff] }
 0x176   : > { %11958 = vst [vmem:[#allocation4_spill] sm:$0xff] %v10723_v30  ;;  %v10730_v60 = vadd.f32 %v2082_v27, %v1437_v54  ;;  %v1452_v34 = vadd.f32 %v8676_v46, %v11961_v36  ;;  %9021 = vmatprep.mubr.msk.f32.mxu1 %vm363_vm1, %v4381_v2  ;;  %v2092_v4 = vpop.f32.mrf.mxu0  ;;  %v6602_v2 = vld [vmem:[%s10400_s19 + $0x158] sm:$0xff]  ;;  %v6603_v36 = vld [vmem:[%s10400_s19 + $0x160] sm:$0xff] }
 0x177   : > { %v1446_v14 = vpop.f32.mrf.mxu1  ;;  %6840 = vperm.xlu1 %9397, %v6602_v2  }
 0x178   : > { %11960 = vst [vmem:[#allocation5_spill] sm:$0xff] %v10730_v60  ;;  %v10737_v15 = vadd.f32 %v8774_v51, %v1452_v34  ;;  %v1447_v26 = vadd.f32 %v1446_v14, %v11963_v37  ;;  %v8777_v54 = vpop.f32.mrf.mxu0  ;;  %9120 = vmatmul.mubr.msk.f32.gmra.mxu0 %vm363_vm1, %v4384_v11  ;;  %v11965_v60 = vld [vmem:[#allocation28_spill] sm:$0xff]  ;;  %v11967_v14 = vld [vmem:[#allocation29_spill] sm:$0xff]  ;;  %6845 = vperm.xlu0 %9396, %v6603_v36   ;;  %v4389_v36 = vld [vmem:[%s9465_s27 + $0xe4] sm:$0xff] }
 0x179   : > { %v8679_v27 = vpop.f32.mrf.mxu1  ;;  %9022 = vmatmul.mubr.msk.f32.gmra.mxu1 %vm363_vm1, %v4382_v3  ;;  %9122 = vmatprep.mubr.msk.f32.mxu0 %vm363_vm1, %v4385_v35  ;;  %v4386_v34 = vld [vmem:[%s9465_s27 + $0xcc] sm:$0xff] }
 0x17a   : > { %11962 = vst [vmem:[#allocation6_spill] sm:$0xff] %v10737_v15  ;;  %v10744_v46 = vadd.f32 %v2092_v4, %v1447_v26  ;;  %v1462_v30 = vadd.f32 %v8679_v27, %v11965_v60  ;;  %9024 = vmatprep.mubr.msk.f32.mxu1 %vm363_vm1, %v4383_v1  ;;  %v2102_v47 = vpop.f32.mrf.mxu0  ;;  %v6604_v1 = vld [vmem:[%s10400_s19 + $0x168] sm:$0xff]  ;;  %v6605_v60 = vld [vmem:[%s10400_s19 + $0x170] sm:$0xff] }
 0x17b   : > { %v1456_v51 = vpop.f32.mrf.mxu1  ;;  %6850 = vperm.xlu1 %9397, %v6604_v1  }
 0x17c   : > { %11964 = vst [vmem:[#allocation7_spill] sm:$0xff] %v10744_v46  ;;  %v10751_v3 = vadd.f32 %v8777_v54, %v1462_v30  ;;  %v1457_v37 = vadd.f32 %v1456_v51, %v11967_v14  ;;  %v8780_v26 = vpop.f32.mrf.mxu0  ;;  %9123 = vmatmul.mubr.msk.f32.gmra.mxu0 %vm363_vm1, %v4386_v34  ;;  %v11969_v46 = vld [vmem:[#allocation30_spill] sm:$0xff]  ;;  %v11971_v51 = vld [vmem:[#allocation31_spill] sm:$0xff]  ;;  %6855 = vperm.xlu0 %9396, %v6605_v60   ;;  %v4391_v60 = vld [vmem:[%s9465_s27 + $0xf4] sm:$0xff] }
 0x17d   : > { %v8682_v4 = vpop.f32.mrf.mxu1  ;;  %9025 = vmatmul.mubr.msk.f32.gmra.mxu1 %vm363_vm1, %v4384_v11  ;;  %9125 = vmatprep.mubr.msk.f32.mxu0 %vm363_vm1, %v4387_v42  ;;  %v4388_v30 = vld [vmem:[%s9465_s27 + $0xdc] sm:$0xff] }
 0x17e   : > { %11966 = vst [vmem:[#allocation40_spill] sm:$0xff] %v10751_v3  ;;  %v10758_v27 = vadd.f32 %v2102_v47, %v1457_v37  ;;  %v1472_v15 = vadd.f32 %v8682_v4, %v11969_v46  ;;  %9027 = vmatprep.mubr.msk.f32.mxu1 %vm363_vm1, %v4385_v35  ;;  %v2112_v2 = vpop.f32.mrf.mxu0  ;;  %v6606_v35 = vld [vmem:[%s10400_s19 + $0x178] sm:$0xff]  ;;  %v6607_v46 = vld [vmem:[%s10400_s19 + $0x180] sm:$0xff] }
 0x17f   : > { %v1466_v54 = vpop.f32.mrf.mxu1  ;;  %6860 = vperm.xlu1 %9397, %v6606_v35  }
 0x180   : > { %11968 = vst [vmem:[#allocation42_spill] sm:$0xff] %v10758_v27  ;;  %v10765_v11 = vadd.f32 %v8780_v26, %v1472_v15  ;;  %v1467_v14 = vadd.f32 %v1466_v54, %v11971_v51  ;;  %v8783_v37 = vpop.f32.mrf.mxu0  ;;  %9126 = vmatmul.mubr.msk.f32.gmra.mxu0 %vm363_vm1, %v4388_v30  ;;  %v11973_v27 = vld [vmem:[#allocation32_spill] sm:$0xff]  ;;  %v11975_v54 = vld [vmem:[#allocation33_spill] sm:$0xff]  ;;  %6865 = vperm.xlu0 %9396, %v6607_v46   ;;  %v4393_v46 = vld [vmem:[%s9465_s27 + $0x104] sm:$0xff] }
 0x181   : > { %v8685_v47 = vpop.f32.mrf.mxu1  ;;  %9028 = vmatmul.mubr.msk.f32.gmra.mxu1 %vm363_vm1, %v4386_v34  ;;  %9128 = vmatprep.mubr.msk.f32.mxu0 %vm363_vm1, %v4389_v36  ;;  %v4390_v15 = vld [vmem:[%s9465_s27 + $0xec] sm:$0xff] }
 0x182   : > { %11970 = vst [vmem:[#allocation8_spill] sm:$0xff] %v10765_v11  ;;  %v10772_v4 = vadd.f32 %v2112_v2, %v1467_v14  ;;  %v1482_v3 = vadd.f32 %v8685_v47, %v11973_v27  ;;  %9030 = vmatprep.mubr.msk.f32.mxu1 %vm363_vm1, %v4387_v42  ;;  %v2122_v1 = vpop.f32.mrf.mxu0  ;;  %v6608_v42 = vld [vmem:[%s10400_s19 + $0x188] sm:$0xff]  ;;  %v6609_v27 = vld [vmem:[%s10400_s19 + $0x190] sm:$0xff] }
 0x183   : > { %v1476_v26 = vpop.f32.mrf.mxu1  ;;  %6870 = vperm.xlu1 %9397, %v6608_v42  }
 0x184   : > { %11972 = vst [vmem:[#allocation9_spill] sm:$0xff] %v10772_v4  ;;  %v10779_v34 = vadd.f32 %v8783_v37, %v1482_v3  ;;  %v1477_v51 = vadd.f32 %v1476_v26, %v11975_v54  ;;  %v8786_v14 = vpop.f32.mrf.mxu0  ;;  %9129 = vmatmul.mubr.msk.f32.gmra.mxu0 %vm363_vm1, %v4390_v15  ;;  %v11977_v4 = vld [vmem:[#allocation34_spill] sm:$0xff]  ;;  %v11979_v26 = vld [vmem:[#allocation35_spill] sm:$0xff]  ;;  %6875 = vperm.xlu0 %9396, %v6609_v27   ;;  %v4395_v27 = vld [vmem:[%s9465_s27 + $0x114] sm:$0xff] }
 0x185   : > { %v8688_v2 = vpop.f32.mrf.mxu1  ;;  %9031 = vmatmul.mubr.msk.f32.gmra.mxu1 %vm363_vm1, %v4388_v30  ;;  %9131 = vmatprep.mubr.msk.f32.mxu0 %vm363_vm1, %v4391_v60  ;;  %v4392_v3 = vld [vmem:[%s9465_s27 + $0xfc] sm:$0xff] }
 0x186   : > { %11974 = vst [vmem:[#allocation11_spill] sm:$0xff] %v10779_v34  ;;  %v10786_v47 = vadd.f32 %v2122_v1, %v1477_v51  ;;  %v1492_v11 = vadd.f32 %v8688_v2, %v11977_v4  ;;  %9033 = vmatprep.mubr.msk.f32.mxu1 %vm363_vm1, %v4389_v36  ;;  %v2132_v35 = vpop.f32.mrf.mxu0  ;;  %v6610_v36 = vld [vmem:[%s10400_s19 + $0x198] sm:$0xff]  ;;  %v6611_v4 = vld [vmem:[%s10400_s19 + $0x1a0] sm:$0xff] }
 0x187   : > { %v1486_v37 = vpop.f32.mrf.mxu1  ;;  %6880 = vperm.xlu1 %9397, %v6610_v36  }
 0x188   : > { %11976 = vst [vmem:[#allocation10_spill] sm:$0xff] %v10786_v47  ;;  %v10793_v30 = vadd.f32 %v8786_v14, %v1492_v11  ;;  %v1487_v54 = vadd.f32 %v1486_v37, %v11979_v26  ;;  %v8789_v51 = vpop.f32.mrf.mxu0  ;;  %9132 = vmatmul.mubr.msk.f32.gmra.mxu0 %vm363_vm1, %v4392_v3  ;;  %v11981_v47 = vld [vmem:[#allocation36_spill] sm:$0xff]  ;;  %v11983_v37 = vld [vmem:[#allocation37_spill] sm:$0xff]  ;;  %6885 = vperm.xlu0 %9396, %v6611_v4   ;;  %v4397_v4 = vld [vmem:[%s9465_s27 + $0x124] sm:$0xff] }
 0x189   : > { %v8691_v1 = vpop.f32.mrf.mxu1  ;;  %9034 = vmatmul.mubr.msk.f32.gmra.mxu1 %vm363_vm1, %v4390_v15  ;;  %9134 = vmatprep.mubr.msk.f32.mxu0 %vm363_vm1, %v4393_v46  ;;  %v4394_v11 = vld [vmem:[%s9465_s27 + $0x10c] sm:$0xff] }
 0x18a   : > { %11978 = vst [vmem:[#allocation12_spill] sm:$0xff] %v10793_v30  ;;  %v10800_v2 = vadd.f32 %v2132_v35, %v1487_v54  ;;  %v1502_v34 = vadd.f32 %v8691_v1, %v11981_v47  ;;  %9036 = vmatprep.mubr.msk.f32.mxu1 %vm363_vm1, %v4391_v60  ;;  %v2142_v42 = vpop.f32.mrf.mxu0  ;;  %v6612_v60 = vld [vmem:[%s10400_s19 + $0x1a8] sm:$0xff]  ;;  %v6613_v47 = vld [vmem:[%s10400_s19 + $0x1b0] sm:$0xff] }
 0x18b   : > { %v1496_v14 = vpop.f32.mrf.mxu1  ;;  %6890 = vperm.xlu1 %9397, %v6612_v60  }
 0x18c   : > { %11980 = vst [vmem:[#allocation13_spill] sm:$0xff] %v10800_v2  ;;  %v10807_v15 = vadd.f32 %v8789_v51, %v1502_v34  ;;  %v1497_v26 = vadd.f32 %v1496_v14, %v11983_v37  ;;  %v8792_v54 = vpop.f32.mrf.mxu0  ;;  %9135 = vmatmul.mubr.msk.f32.gmra.mxu0 %vm363_vm1, %v4394_v11  ;;  %v11985_v2 = vld [vmem:[#allocation38_spill] sm:$0xff]  ;;  %v11986_v14 = vld [vmem:[#allocation39_spill] sm:$0xff]  ;;  %6895 = vperm.xlu0 %9396, %v6613_v47   ;;  %v4399_v47 = vld [vmem:[%s9465_s27 + $0x134] sm:$0xff] }
 0x18d   : > { %v8694_v35 = vpop.f32.mrf.mxu1  ;;  %9037 = vmatmul.mubr.msk.f32.gmra.mxu1 %vm363_vm1, %v4392_v3  ;;  %9137 = vmatprep.mubr.msk.f32.mxu0 %vm363_vm1, %v4395_v27  ;;  %v4396_v34 = vld [vmem:[%s9465_s27 + $0x11c] sm:$0xff] }
 0x18e   : > { %11982 = vst [vmem:[#allocation14_spill] sm:$0xff] %v10807_v15  ;;  %v10814_v1 = vadd.f32 %v2142_v42, %v1497_v26  ;;  %v1512_v30 = vadd.f32 %v8694_v35, %v11985_v2  ;;  %9039 = vmatprep.mubr.msk.f32.mxu1 %vm363_vm1, %v4393_v46  ;;  %v2152_v36 = vpop.f32.mrf.mxu0  ;;  %v6614_v46 = vld [vmem:[%s10400_s19 + $0x1b8] sm:$0xff]  ;;  %v6615_v2 = vld [vmem:[%s10400_s19 + $0x1c0] sm:$0xff] }
 0x18f   : > { %v1506_v51 = vpop.f32.mrf.mxu1  ;;  %6900 = vperm.xlu1 %9397, %v6614_v46  }
 0x190   : > { %11984 = vst [vmem:[#allocation15_spill] sm:$0xff] %v10814_v1  ;;  %v10821_v3 = vadd.f32 %v8792_v54, %v1512_v30  ;;  %v1507_v37 = vadd.f32 %v1506_v51, %v11986_v14  ;;  %v8795_v26 = vpop.f32.mrf.mxu0  ;;  %9138 = vmatmul.mubr.msk.f32.gmra.mxu0 %vm363_vm1, %v4396_v34  ;;  %v11988_v1 = vld [vmem:[#allocation41_spill] sm:$0xff]  ;;  %v4398_v30 = vld [vmem:[%s9465_s27 + $0x12c] sm:$0xff]  ;;  %6905 = vperm.xlu0 %9396, %v6615_v2   ;;  %v4401_v2 = vld [vmem:[%s9465_s27 + $0x144] sm:$0xff] }
 0x191   : > { %v8697_v42 = vpop.f32.mrf.mxu1  ;;  %9040 = vmatmul.mubr.msk.f32.gmra.mxu1 %vm363_vm1, %v4394_v11  ;;  %9140 = vmatprep.mubr.msk.f32.mxu0 %vm363_vm1, %v4397_v4  ;;  %v11989_v51 = vld [vmem:[#allocation43_spill] sm:$0xff] }
 0x192   : > { %v10828_v35 = vadd.f32 %v2152_v36, %v1507_v37  ;;  %v1522_v15 = vadd.f32 %v8697_v42, %v11988_v1  ;;  %9042 = vmatprep.mubr.msk.f32.mxu1 %vm363_vm1, %v4395_v27  ;;  %v2162_v60 = vpop.f32.mrf.mxu0  ;;  %v6616_v27 = vld [vmem:[%s10400_s19 + $0x1c8] sm:$0xff]  ;;  %v6617_v1 = vld [vmem:[%s10400_s19 + $0x1d0] sm:$0xff] }
 0x193   : > { %v1516_v54 = vpop.f32.mrf.mxu1  ;;  %6910 = vperm.xlu1 %9397, %v6616_v27   ;;  %v4403_v27 = vld [vmem:[%s9465_s27 + $0x154] sm:$0xff] }
 0x194   : > { %11987 = vst [vmem:[#allocation16_spill] sm:$0xff] %v10828_v35  ;;  %v10835_v11 = vadd.f32 %v8795_v26, %v1522_v15  ;;  %v1517_v14 = vadd.f32 %v1516_v54, %v11989_v51  ;;  %v8898_v37 = vpop.f32.mrf.mxu0  ;;  %9141 = vmatmul.mubr.msk.f32.gmra.mxu0 %vm363_vm1, %v4398_v30  ;;  %v4400_v15 = vld [vmem:[%s9465_s27 + $0x13c] sm:$0xff]  ;;  %6915 = vperm.xlu0 %9396, %v6617_v1  }
 0x195   : > { %v8800_v36 = vpop.f32.mrf.mxu1  ;;  %9043 = vmatmul.mubr.msk.f32.gmra.mxu1 %vm363_vm1, %v4396_v34  ;;  %9143 = vmatprep.mubr.msk.f32.mxu0 %vm363_vm1, %v4399_v47 }
 0x196   : > { %v10842_v42 = vadd.f32 %v2162_v60, %v1517_v14  ;;  %v2882_v35 = vadd.f32 %v8800_v36, %v10360_v8  ;;  %9045 = vmatprep.mubr.msk.f32.mxu1 %vm363_vm1, %v4397_v4  ;;  %v3272_v46 = vpop.f32.mrf.mxu0  ;;  %v6618_v8 = vld [vmem:[%s10400_s19 + $0x1d8] sm:$0xff]  ;;  %v6619_v4 = vld [vmem:[%s10400_s19 + $0x1e0] sm:$0xff] }
 0x197   : > { %v2562_v26 = vpop.f32.mrf.mxu1  ;;  %6920 = vperm.xlu1 %9397, %v6618_v8  }
 0x198   : > { %v10849_v34 = vadd.f32 %v8898_v37, %v2882_v35  ;;  %v2881_v54 = vadd.f32 %v2562_v26, %v10366_v25  ;;  %v8901_v51 = vpop.f32.mrf.mxu0  ;;  %9144 = vmatmul.mubr.msk.f32.gmra.mxu0 %vm363_vm1, %v4400_v15  ;;  %v4402_v25 = vld [vmem:[%s9465_s27 + $0x14c] sm:$0xff]  ;;  %6925 = vperm.xlu0 %9396, %v6619_v4   ;;  %v4405_v4 = vld [vmem:[%s9465_s27 + $0x164] sm:$0xff] }
 0x199   : > { %v8803_v60 = vpop.f32.mrf.mxu1  ;;  %9046 = vmatmul.mubr.msk.f32.gmra.mxu1 %vm363_vm1, %v4398_v30  ;;  %9146 = vmatprep.mubr.msk.f32.mxu0 %vm363_vm1, %v4401_v2 }
 0x19a   : > { %v10856_v14 = vadd.f32 %v3272_v46, %v2881_v54  ;;  %v2884_v36 = vadd.f32 %v8803_v60, %v10375_v29  ;;  %9048 = vmatprep.mubr.msk.f32.mxu1 %vm363_vm1, %v4399_v47  ;;  %v3282_v37 = vpop.f32.mrf.mxu0  ;;  %v6620_v29 = vld [vmem:[%s10400_s19 + $0x1e8] sm:$0xff]  ;;  %v6621_v47 = vld [vmem:[%s10400_s19 + $0x1f0] sm:$0xff] }
 0x19b   : > { %v2572_v35 = vpop.f32.mrf.mxu1  ;;  %6930 = vperm.xlu1 %9397, %v6620_v29   ;;  %v4407_v29 = vld [vmem:[%s9465_s27 + $0x174] sm:$0xff] }
 0x19c   : > { %v10863_v30 = vadd.f32 %v8901_v51, %v2884_v36  ;;  %v2883_v1 = vadd.f32 %v2572_v35, %v10383_v33  ;;  %v8904_v46 = vpop.f32.mrf.mxu0  ;;  %9147 = vmatmul.mubr.msk.f32.gmra.mxu0 %vm363_vm1, %v4402_v25  ;;  %v4404_v33 = vld [vmem:[%s9465_s27 + $0x15c] sm:$0xff]  ;;  %6935 = vperm.xlu0 %9396, %v6621_v47  }
 0x19d   : > { %v8806_v26 = vpop.f32.mrf.mxu1  ;;  %9049 = vmatmul.mubr.msk.f32.gmra.mxu1 %vm363_vm1, %v4400_v15  ;;  %9149 = vmatprep.mubr.msk.f32.mxu0 %vm363_vm1, %v4403_v27 }
 0x19e   : > { %v10870_v54 = vadd.f32 %v3282_v37, %v2883_v1  ;;  %v2886_v60 = vadd.f32 %v8806_v26, %v10392_v20  ;;  %9051 = vmatprep.mubr.msk.f32.mxu1 %vm363_vm1, %v4401_v2  ;;  %v3292_v8 = vpop.f32.mrf.mxu0  ;;  %v6622_v20 = vld [vmem:[%s10400_s19 + $0x1f8] sm:$0xff]  ;;  %v4406_v26 = vld [vmem:[%s9465_s27 + $0x16c] sm:$0xff] }
 0x19f   : > { %v2582_v51 = vpop.f32.mrf.mxu1  ;;  %6940 = vperm.xlu1 %9397, %v6622_v20  }
 0x1a0   : > { %v10877_v36 = vadd.f32 %v8904_v46, %v2886_v60  ;;  %v2885_v15 = vadd.f32 %v2582_v51, %v10406_v39  ;;  %v8907_v37 = vpop.f32.mrf.mxu0  ;;  %9150 = vmatmul.mubr.msk.f32.gmra.mxu0 %vm363_vm1, %v4404_v33 }
 0x1a1   : > { %v8809_v35 = vpop.f32.mrf.mxu1  ;;  %9052 = vmatmul.mubr.msk.f32.gmra.mxu1 %vm363_vm1, %v4402_v25  ;;  %9152 = vmatprep.mubr.msk.f32.mxu0 %vm363_vm1, %v4405_v4 }
 0x1a2   : > { %v10883_v2 = vadd.f32 %v3292_v8, %v2885_v15  ;;  %v2888_v1 = vadd.f32 %v8809_v35, %v10414_v45  ;;  %9054 = vmatprep.mubr.msk.f32.mxu1 %vm363_vm1, %v4403_v27  ;;  %v3302_v46 = vpop.f32.mrf.mxu0  ;;  %v4408_v8 = vld [vmem:[%s9465_s27 + $0x17c] sm:$0xff]  ;;  %v4409_v35 = vld [vmem:[%s9465_s27 + $0x184] sm:$0xff] }
 0x1a3   : > { %v2592_v39 = vpop.f32.mrf.mxu1 }
 0x1a4   : > { %v10890_v47 = vadd.f32 %v8907_v37, %v2888_v1  ;;  %v2887_v25 = vadd.f32 %v2592_v39, %v10422_v23  ;;  %v8910_v51 = vpop.f32.mrf.mxu0  ;;  %9153 = vmatmul.mubr.msk.f32.gmra.mxu0 %vm363_vm1, %v4406_v26  ;;  %v4410_v39 = vld [vmem:[%s9465_s27 + $0x18c] sm:$0xff] }
 0x1a5   : > { %v8812_v60 = vpop.f32.mrf.mxu1  ;;  %9055 = vmatmul.mubr.msk.f32.gmra.mxu1 %vm363_vm1, %v4404_v33  ;;  %9155 = vmatprep.mubr.msk.f32.mxu0 %vm363_vm1, %v4407_v29 }
 0x1a6   : > { %v10895_v45 = vadd.f32 %v3302_v46, %v2887_v25  ;;  %v2890_v27 = vadd.f32 %v8812_v60, %v10430_v21  ;;  %9057 = vmatprep.mubr.msk.f32.mxu1 %vm363_vm1, %v4405_v4  ;;  %v3312_v23 = vpop.f32.mrf.mxu0 }
 0x1a7   : > { %v2602_v15 = vpop.f32.mrf.mxu1 }
 0x1a8   : > { %v10902_v37 = vadd.f32 %v8910_v51, %v2890_v27  ;;  %v2889_v33 = vadd.f32 %v2602_v15, %v10438_v18  ;;  %v8913_v1 = vpop.f32.mrf.mxu0  ;;  %9156 = vmatmul.mubr.msk.f32.gmra.mxu0 %vm363_vm1, %v4408_v8  ;;  %v4411_v18 = vld [vmem:[%s9465_s27 + $0x194] sm:$0xff]  ;;  %v4412_v15 = vld [vmem:[%s9465_s27 + $0x19c] sm:$0xff] }
 0x1a9   : > { %v8815_v20 = vpop.f32.mrf.mxu1  ;;  %9058 = vmatmul.mubr.msk.f32.gmra.mxu1 %vm363_vm1, %v4406_v26  ;;  %9158 = vmatprep.mubr.msk.f32.mxu0 %vm363_vm1, %v4409_v35 }
 0x1aa   : > { %v10907_v21 = vadd.f32 %v3312_v23, %v2889_v33  ;;  %v2892_v4 = vadd.f32 %v8815_v20, %v10446_v17  ;;  %9060 = vmatprep.mubr.msk.f32.mxu1 %vm363_vm1, %v4407_v29  ;;  %v3322_v25 = vpop.f32.mrf.mxu0 }
 0x1ab   : > { %v2612_v46 = vpop.f32.mrf.mxu1 }
 0x1ac   : > { %v10914_v60 = vadd.f32 %v8913_v1, %v2892_v4  ;;  %v2891_v26 = vadd.f32 %v2612_v46, %v10454_v49  ;;  %v8916_v27 = vpop.f32.mrf.mxu0  ;;  %9159 = vmatmul.mubr.msk.f32.gmra.mxu0 %vm363_vm1, %v4410_v39  ;;  %v4413_v49 = vld [vmem:[%s9465_s27 + $0x1a4] sm:$0xff]  ;;  %v4414_v46 = vld [vmem:[%s9465_s27 + $0x1ac] sm:$0xff] }
 0x1ad   : > { %v8818_v51 = vpop.f32.mrf.mxu1  ;;  %9061 = vmatmul.mubr.msk.f32.gmra.mxu1 %vm363_vm1, %v4408_v8  ;;  %9161 = vmatprep.mubr.msk.f32.mxu0 %vm363_vm1, %v4411_v18 }
 0x1ae   : > { %v10919_v17 = vadd.f32 %v3322_v25, %v2891_v26  ;;  %v2894_v29 = vadd.f32 %v8818_v51, %v10462_v24  ;;  %9063 = vmatprep.mubr.msk.f32.mxu1 %vm363_vm1, %v4409_v35  ;;  %v3332_v33 = vpop.f32.mrf.mxu0 }
 0x1af   : > { %v2622_v23 = vpop.f32.mrf.mxu1 }
 0x1b0   : > { %v10926_v20 = vadd.f32 %v8916_v27, %v2894_v29  ;;  %v2893_v8 = vadd.f32 %v2622_v23, %v10470_v41  ;;  %v8919_v4 = vpop.f32.mrf.mxu0  ;;  %9162 = vmatmul.mubr.msk.f32.gmra.mxu0 %vm363_vm1, %v4412_v15  ;;  %v4415_v41 = vld [vmem:[%s9465_s27 + $0x1b4] sm:$0xff]  ;;  %v4416_v23 = vld [vmem:[%s9465_s27 + $0x1bc] sm:$0xff] }
 0x1b1   : > { %v8821_v1 = vpop.f32.mrf.mxu1  ;;  %9064 = vmatmul.mubr.msk.f32.gmra.mxu1 %vm363_vm1, %v4410_v39  ;;  %9164 = vmatprep.mubr.msk.f32.mxu0 %vm363_vm1, %v4413_v49 }
 0x1b2   : > { %v10931_v24 = vadd.f32 %v3332_v33, %v2893_v8  ;;  %v2896_v35 = vadd.f32 %v8821_v1, %v10478_v6  ;;  %9066 = vmatprep.mubr.msk.f32.mxu1 %vm363_vm1, %v4411_v18  ;;  %v3342_v26 = vpop.f32.mrf.mxu0 }
 0x1b3   : > { %v2632_v25 = vpop.f32.mrf.mxu1 }
 0x1b4   : > { %v10938_v51 = vadd.f32 %v8919_v4, %v2896_v35  ;;  %v2895_v39 = vadd.f32 %v2632_v25, %v10486_v58  ;;  %v8922_v29 = vpop.f32.mrf.mxu0  ;;  %9165 = vmatmul.mubr.msk.f32.gmra.mxu0 %vm363_vm1, %v4414_v46  ;;  %v4417_v58 = vld [vmem:[%s9465_s27 + $0x1c4] sm:$0xff]  ;;  %v4418_v25 = vld [vmem:[%s9465_s27 + $0x1cc] sm:$0xff] }
 0x1b5   : > { %v8824_v27 = vpop.f32.mrf.mxu1  ;;  %9067 = vmatmul.mubr.msk.f32.gmra.mxu1 %vm363_vm1, %v4412_v15  ;;  %9167 = vmatprep.mubr.msk.f32.mxu0 %vm363_vm1, %v4415_v41 }
 0x1b6   : > { %v10943_v6 = vadd.f32 %v3342_v26, %v2895_v39  ;;  %v2898_v18 = vadd.f32 %v8824_v27, %v10494_v9  ;;  %9069 = vmatprep.mubr.msk.f32.mxu1 %vm363_vm1, %v4413_v49  ;;  %v3352_v8 = vpop.f32.mrf.mxu0 }
 0x1b7   : > { %v2642_v33 = vpop.f32.mrf.mxu1 }
 0x1b8   : > { %v10950_v1 = vadd.f32 %v8922_v29, %v2898_v18  ;;  %v2897_v15 = vadd.f32 %v2642_v33, %v10502_v32  ;;  %v8925_v35 = vpop.f32.mrf.mxu0  ;;  %9168 = vmatmul.mubr.msk.f32.gmra.mxu0 %vm363_vm1, %v4416_v23  ;;  %v4419_v32 = vld [vmem:[%s9465_s27 + $0x1d4] sm:$0xff]  ;;  %v4420_v33 = vld [vmem:[%s9465_s27 + $0x1dc] sm:$0xff] }
 0x1b9   : > { %v8827_v4 = vpop.f32.mrf.mxu1  ;;  %9070 = vmatmul.mubr.msk.f32.gmra.mxu1 %vm363_vm1, %v4414_v46  ;;  %9170 = vmatprep.mubr.msk.f32.mxu0 %vm363_vm1, %v4417_v58 }
 0x1ba   : > { %v10955_v9 = vadd.f32 %v3352_v8, %v2897_v15  ;;  %v2900_v49 = vadd.f32 %v8827_v4, %v10510_v62  ;;  %9072 = vmatprep.mubr.msk.f32.mxu1 %vm363_vm1, %v4415_v41  ;;  %v3362_v39 = vpop.f32.mrf.mxu0 }
 0x1bb   : > { %v2652_v26 = vpop.f32.mrf.mxu1 }
 0x1bc   : > { %v10962_v27 = vadd.f32 %v8925_v35, %v2900_v49  ;;  %v2899_v46 = vadd.f32 %v2652_v26, %v10518_v53  ;;  %v8928_v18 = vpop.f32.mrf.mxu0  ;;  %9171 = vmatmul.mubr.msk.f32.gmra.mxu0 %vm363_vm1, %v4418_v25  ;;  %v4421_v53 = vld [vmem:[%s9465_s27 + $0x1e4] sm:$0xff]  ;;  %v4422_v26 = vld [vmem:[%s9465_s27 + $0x1ec] sm:$0xff] }
 0x1bd   : > { %v8830_v29 = vpop.f32.mrf.mxu1  ;;  %9073 = vmatmul.mubr.msk.f32.gmra.mxu1 %vm363_vm1, %v4416_v23  ;;  %9173 = vmatprep.mubr.msk.f32.mxu0 %vm363_vm1, %v4419_v32 }
 0x1be   : > { %v10967_v62 = vadd.f32 %v3362_v39, %v2899_v46  ;;  %v2902_v41 = vadd.f32 %v8830_v29, %v10526_v19  ;;  %9075 = vmatprep.mubr.msk.f32.mxu1 %vm363_vm1, %v4417_v58  ;;  %v3372_v15 = vpop.f32.mrf.mxu0 }
 0x1bf   : > { %v2662_v8 = vpop.f32.mrf.mxu1 }
 0x1c0   : > { %v10974_v4 = vadd.f32 %v8928_v18, %v2902_v41  ;;  %v2901_v23 = vadd.f32 %v2662_v8, %v10534_v61  ;;  %v8931_v49 = vpop.f32.mrf.mxu0  ;;  %9174 = vmatmul.mubr.msk.f32.gmra.mxu0 %vm363_vm1, %v4420_v33  ;;  %v4423_v61 = vld [vmem:[%s9465_s27 + $0x1f4] sm:$0xff]  ;;  %v4424_v8 = vld [vmem:[%s9465_s27 + $0x1fc] sm:$0xff] }
 0x1c1   : > { %v8833_v35 = vpop.f32.mrf.mxu1  ;;  %9076 = vmatmul.mubr.msk.f32.gmra.mxu1 %vm363_vm1, %v4418_v25  ;;  %9176 = vmatprep.mubr.msk.f32.mxu0 %vm363_vm1, %v4421_v53 }
 0x1c2   : > { %v10979_v19 = vadd.f32 %v3372_v15, %v2901_v23  ;;  %v2904_v58 = vadd.f32 %v8833_v35, %v10542_v10  ;;  %9078 = vmatprep.mubr.msk.f32.mxu1 %vm363_vm1, %v4419_v32  ;;  %v3382_v46 = vpop.f32.mrf.mxu0 }
 0x1c3   : > { %v2672_v39 = vpop.f32.mrf.mxu1 }
 0x1c4   : > { %v10986_v29 = vadd.f32 %v8931_v49, %v2904_v58  ;;  %v2903_v25 = vadd.f32 %v2672_v39, %v10550_v44  ;;  %v8934_v41 = vpop.f32.mrf.mxu0  ;;  %9177 = vmatmul.mubr.msk.f32.gmra.mxu0 %vm363_vm1, %v4422_v26  ;;  %v4425_v44 = vld [vmem:[%s9465_s27 + $0x204] sm:$0xff]  ;;  %v4426_v39 = vld [vmem:[%s9465_s27 + $0x20c] sm:$0xff] }
 0x1c5   : > { %v8836_v18 = vpop.f32.mrf.mxu1  ;;  %9079 = vmatmul.mubr.msk.f32.gmra.mxu1 %vm363_vm1, %v4420_v33  ;;  %9179 = vmatprep.mubr.msk.f32.mxu0 %vm363_vm1, %v4423_v61 }
 0x1c6   : > { %v10991_v10 = vadd.f32 %v3382_v46, %v2903_v25  ;;  %v2906_v32 = vadd.f32 %v8836_v18, %v10558_v31  ;;  %9081 = vmatprep.mubr.msk.f32.mxu1 %vm363_vm1, %v4421_v53  ;;  %v3392_v23 = vpop.f32.mrf.mxu0 }
 0x1c7   : > { %v2682_v15 = vpop.f32.mrf.mxu1 }
 0x1c8   : > { %v10998_v35 = vadd.f32 %v8934_v41, %v2906_v32  ;;  %v2905_v33 = vadd.f32 %v2682_v15, %v10566_v48  ;;  %v8937_v58 = vpop.f32.mrf.mxu0  ;;  %9180 = vmatmul.mubr.msk.f32.gmra.mxu0 %vm363_vm1, %v4424_v8  ;;  %v4427_v48 = vld [vmem:[%s9465_s27 + $0x214] sm:$0xff]  ;;  %v4428_v15 = vld [vmem:[%s9465_s27 + $0x21c] sm:$0xff] }
 0x1c9   : > { %v8839_v49 = vpop.f32.mrf.mxu1  ;;  %9082 = vmatmul.mubr.msk.f32.gmra.mxu1 %vm363_vm1, %v4422_v26  ;;  %9182 = vmatprep.mubr.msk.f32.mxu0 %vm363_vm1, %v4425_v44 }
 0x1ca   : > { %v11003_v31 = vadd.f32 %v3392_v23, %v2905_v33  ;;  %v2908_v53 = vadd.f32 %v8839_v49, %v10575_v22  ;;  %9084 = vmatprep.mubr.msk.f32.mxu1 %vm363_vm1, %v4423_v61  ;;  %v3402_v25 = vpop.f32.mrf.mxu0  ;;  %v5785_v49 = vld [vmem:[%s9465_s27 + $0x26] sm:$0xff] }
 0x1cb   : > { %v2692_v46 = vpop.f32.mrf.mxu1 }
 0x1cc   : > { %v11010_v18 = vadd.f32 %v8937_v58, %v2908_v53  ;;  %v2907_v26 = vadd.f32 %v2692_v46, %v10583_v52  ;;  %v8940_v32 = vpop.f32.mrf.mxu0  ;;  %9183 = vmatmul.mubr.msk.f32.gmra.mxu0 %vm363_vm1, %v4426_v39  ;;  %v5075_v52 = vld [vmem:[%s9465_s27 + $0x25] sm:$0xff] }
 0x1cd   : > { %v8842_v41 = vpop.f32.mrf.mxu1  ;;  %9085 = vmatmul.mubr.msk.f32.gmra.mxu1 %vm363_vm1, %v4424_v8  ;;  %9185 = vmatprep.mubr.msk.f32.mxu0 %vm363_vm1, %v4427_v48  ;;  %v5786_v48 = vld [vmem:[%s9465_s27 + $0x2e] sm:$0xff] }
 0x1ce   : > { %v11015_v22 = vadd.f32 %v3402_v25, %v2907_v26  ;;  %v2910_v61 = vadd.f32 %v8842_v41, %v10592_v38  ;;  %9087 = vmatprep.mubr.msk.f32.mxu1 %vm363_vm1, %v4425_v44  ;;  %v3412_v33 = vpop.f32.mrf.mxu0  ;;  %v5076_v25 = vld [vmem:[%s9465_s27 + $0x2d] sm:$0xff]  ;;  %v5077_v41 = vld [vmem:[%s9465_s27 + $0x35] sm:$0xff] }
 0x1cf   : > { %v2702_v23 = vpop.f32.mrf.mxu1 }
 0x1d0   : > { %v11023_v8 = vadd.f32 %v8940_v32, %v2910_v61  ;;  %v2909_v58 = vadd.f32 %v2702_v23, %v10599_v56  ;;  %v8943_v46 = vpop.f32.mrf.mxu0  ;;  %9186 = vmatmul.mubr.msk.f32.gmra.mxu0 %vm363_vm1, %v4428_v15  ;;  %v5787_v32 = vld [vmem:[%s9465_s27 + $0x36] sm:$0xff] }
 0x1d1   : > { %v8845_v53 = vpop.f32.mrf.mxu1  ;;  %9088 = vmatmul.mubr.msk.f32.gmra.mxu1 %vm363_vm1, %v4426_v39  ;;  %9288 = vmatprep.mubr.msk.f32.mxu0 %vm363_vm1, %v5785_v49  ;;  %v5788_v49 = vld [vmem:[%s9465_s27 + $0x3e] sm:$0xff] }
 0x1d2   : > { %v11028_v38 = vadd.f32 %v3412_v33, %v2909_v58  ;;  %v2912_v44 = vadd.f32 %v8845_v53, %v10606_v59  ;;  %9190 = vmatprep.mubr.msk.f32.mxu1 %vm363_vm1, %v5075_v52  ;;  %v3422_v56 = vpop.f32.mrf.mxu0  ;;  %v5078_v52 = vld [vmem:[%s9465_s27 + $0x3d] sm:$0xff]  ;;  %v5079_v53 = vld [vmem:[%s9465_s27 + $0x45] sm:$0xff] }
 0x1d3   : > { %v2712_v26 = vpop.f32.mrf.mxu1 }
 0x1d4   : > { %v11037_v39 = vadd.f32 %v8943_v46, %v2912_v44  ;;  %v2911_v61 = vadd.f32 %v2712_v26, %v10614_v12  ;;  %v8946_v59 = vpop.f32.mrf.mxu0  ;;  %9289 = vmatmul.mubr.msk.f32.vlgmr.msra.gmra.mxu0 %vm363_vm1, %v5786_v48  ;;  %v5789_v46 = vld [vmem:[%s9465_s27 + $0x46] sm:$0xff] }
 0x1d5   : > { %v8848_v15 = vpop.f32.mrf.mxu1  ;;  %9191 = vmatmul.mubr.msk.f32.vlgmr.msra.gmra.mxu1 %vm363_vm1, %v5076_v25  ;;  %9291 = vmatprep.mubr.msk.f32.mxu0 %vm363_vm1, %v5787_v32  ;;  %v5790_v32 = vld [vmem:[%s9465_s27 + $0x4e] sm:$0xff] }
 0x1d6   : > { %v11042_v23 = vadd.f32 %v3422_v56, %v2911_v61  ;;  %v2914_v33 = vadd.f32 %v8848_v15, %v10625_v0  ;;  %9193 = vmatprep.mubr.msk.f32.mxu1 %vm363_vm1, %v5077_v41  ;;  %v3432_v12 = vpop.f32.mrf.mxu0  ;;  %v5080_v41 = vld [vmem:[%s9465_s27 + $0x4d] sm:$0xff]  ;;  %v5081_v15 = vld [vmem:[%s9465_s27 + $0x55] sm:$0xff] }
 0x1d7   : > { %v2722_v58 = vpop.f32.mrf.mxu1 }
 0x1d8   : > { %v11051_v44 = vadd.f32 %v8946_v59, %v2914_v33  ;;  %v2913_v25 = vadd.f32 %v2722_v58, %v10632_v7  ;;  %v8949_v0 = vpop.f32.mrf.mxu0  ;;  %9292 = vmatmul.mubr.msk.f32.gmra.mxu0 %vm363_vm1, %v5788_v49  ;;  %v5791_v59 = vld [vmem:[%s9465_s27 + $0x56] sm:$0xff] }
 0x1d9   : > { %v8851_v48 = vpop.f32.mrf.mxu1  ;;  %9194 = vmatmul.mubr.msk.f32.gmra.mxu1 %vm363_vm1, %v5078_v52  ;;  %9294 = vmatprep.mubr.msk.f32.mxu0 %vm363_vm1, %v5789_v46  ;;  %v5792_v46 = vld [vmem:[%s9465_s27 + $0x5e] sm:$0xff] }
 0x1da   : > { %v11056_v26 = vadd.f32 %v3432_v12, %v2913_v25  ;;  %v2916_v56 = vadd.f32 %v8851_v48, %v10639_v63  ;;  %9196 = vmatprep.mubr.msk.f32.mxu1 %vm363_vm1, %v5079_v53  ;;  %v3442_v7 = vpop.f32.mrf.mxu0  ;;  %v5082_v53 = vld [vmem:[%s9465_s27 + $0x5d] sm:$0xff]  ;;  %v5083_v48 = vld [vmem:[%s9465_s27 + $0x65] sm:$0xff] }
 0x1db   : > { %v2732_v61 = vpop.f32.mrf.mxu1 }
 0x1dc   : > { %v11065_v33 = vadd.f32 %v8949_v0, %v2916_v56  ;;  %v2915_v52 = vadd.f32 %v2732_v61, %v10646_v57  ;;  %v8952_v63 = vpop.f32.mrf.mxu0  ;;  %9295 = vmatmul.mubr.msk.f32.gmra.mxu0 %vm363_vm1, %v5790_v32  ;;  %v5793_v0 = vld [vmem:[%s9465_s27 + $0x66] sm:$0xff] }
 0x1dd   : > { %v8854_v49 = vpop.f32.mrf.mxu1  ;;  %9197 = vmatmul.mubr.msk.f32.gmra.mxu1 %vm363_vm1, %v5080_v41  ;;  %9297 = vmatprep.mubr.msk.f32.mxu0 %vm363_vm1, %v5791_v59  ;;  %v5794_v59 = vld [vmem:[%s9465_s27 + $0x6e] sm:$0xff] }
 0x1de   : > { %v11070_v58 = vadd.f32 %v3442_v7, %v2915_v52  ;;  %v2918_v12 = vadd.f32 %v8854_v49, %v10653_v55  ;;  %9199 = vmatprep.mubr.msk.f32.mxu1 %vm363_vm1, %v5081_v15  ;;  %v3452_v57 = vpop.f32.mrf.mxu0  ;;  %v5084_v15 = vld [vmem:[%s9465_s27 + $0x6d] sm:$0xff]  ;;  %v5085_v49 = vld [vmem:[%s9465_s27 + $0x75] sm:$0xff] }
 0x1df   : > { %v2742_v25 = vpop.f32.mrf.mxu1 }
 0x1e0   : > { %v11079_v56 = vadd.f32 %v8952_v63, %v2918_v12  ;;  %v2917_v41 = vadd.f32 %v2742_v25, %v10660_v43  ;;  %v8955_v55 = vpop.f32.mrf.mxu0  ;;  %9298 = vmatmul.mubr.msk.f32.gmra.mxu0 %vm363_vm1, %v5792_v46  ;;  %v5795_v63 = vld [vmem:[%s9465_s27 + $0x76] sm:$0xff] }
 0x1e1   : > { %v8857_v32 = vpop.f32.mrf.mxu1  ;;  %9200 = vmatmul.mubr.msk.f32.gmra.mxu1 %vm363_vm1, %v5082_v53  ;;  %9300 = vmatprep.mubr.msk.f32.mxu0 %vm363_vm1, %v5793_v0  ;;  %v5796_v0 = vld [vmem:[%s9465_s27 + $0x7e] sm:$0xff] }
 0x1e2   : > { %v11084_v61 = vadd.f32 %v3452_v57, %v2917_v41  ;;  %v2920_v7 = vadd.f32 %v8857_v32, %v10667_v5  ;;  %9202 = vmatprep.mubr.msk.f32.mxu1 %vm363_vm1, %v5083_v48  ;;  %v3462_v43 = vpop.f32.mrf.mxu0  ;;  %v5086_v48 = vld [vmem:[%s9465_s27 + $0x7d] sm:$0xff]  ;;  %v5087_v32 = vld [vmem:[%s9465_s27 + $0x85] sm:$0xff] }
 0x1e3   : > { %v2752_v52 = vpop.f32.mrf.mxu1 }
 0x1e4   : > { %v11093_v12 = vadd.f32 %v8955_v55, %v2920_v7  ;;  %v2919_v53 = vadd.f32 %v2752_v52, %v10674_v13  ;;  %v8958_v5 = vpop.f32.mrf.mxu0  ;;  %9301 = vmatmul.mubr.msk.f32.gmra.mxu0 %vm363_vm1, %v5794_v59  ;;  %v5797_v55 = vld [vmem:[%s9465_s27 + $0x86] sm:$0xff] }
 0x1e5   : > { %v8860_v46 = vpop.f32.mrf.mxu1  ;;  %9203 = vmatmul.mubr.msk.f32.gmra.mxu1 %vm363_vm1, %v5084_v15  ;;  %9303 = vmatprep.mubr.msk.f32.mxu0 %vm363_vm1, %v5795_v63  ;;  %v5798_v63 = vld [vmem:[%s9465_s27 + $0x8e] sm:$0xff] }
 0x1e6   : > { %v11098_v25 = vadd.f32 %v3462_v43, %v2919_v53  ;;  %v2922_v57 = vadd.f32 %v8860_v46, %v10681_v28  ;;  %9205 = vmatprep.mubr.msk.f32.mxu1 %vm363_vm1, %v5085_v49  ;;  %v3472_v13 = vpop.f32.mrf.mxu0  ;;  %v5088_v49 = vld [vmem:[%s9465_s27 + $0x8d] sm:$0xff]  ;;  %v5089_v46 = vld [vmem:[%s9465_s27 + $0x95] sm:$0xff] }
 0x1e7   : > { %v2762_v41 = vpop.f32.mrf.mxu1 }
 0x1e8   : > { %v11107_v7 = vadd.f32 %v8958_v5, %v2922_v57  ;;  %v2921_v15 = vadd.f32 %v2762_v41, %v10688_v50  ;;  %v8961_v28 = vpop.f32.mrf.mxu0  ;;  %9304 = vmatmul.mubr.msk.f32.gmra.mxu0 %vm363_vm1, %v5796_v0  ;;  %v5799_v5 = vld [vmem:[%s9465_s27 + $0x96] sm:$0xff] }
 0x1e9   : > { %v8863_v59 = vpop.f32.mrf.mxu1  ;;  %9206 = vmatmul.mubr.msk.f32.gmra.mxu1 %vm363_vm1, %v5086_v48  ;;  %9306 = vmatprep.mubr.msk.f32.mxu0 %vm363_vm1, %v5797_v55  ;;  %v5090_v55 = vld [vmem:[%s9465_s27 + $0x9d] sm:$0xff] }
 0x1ea   : > { %v11112_v52 = vadd.f32 %v3472_v13, %v2921_v15  ;;  %v2924_v43 = vadd.f32 %v8863_v59, %v10695_v16  ;;  %9208 = vmatprep.mubr.msk.f32.mxu1 %vm363_vm1, %v5087_v32  ;;  %v3482_v50 = vpop.f32.mrf.mxu0  ;;  %v11990_v13 = vld [vmem:[#allocation2_spill] sm:$0xff] }
 0x1eb   : > { %v2772_v53 = vpop.f32.mrf.mxu1  ;;  %v5800_v15 = vld [vmem:[%s9465_s27 + $0x9e] sm:$0xff] }
 0x1ec   : > { %v11121_v57 = vadd.f32 %v8961_v28, %v2924_v43  ;;  %v2923_v48 = vadd.f32 %v2772_v53, %v10702_v40  ;;  %v8964_v16 = vpop.f32.mrf.mxu0  ;;  %9307 = vmatmul.mubr.msk.f32.gmra.mxu0 %vm363_vm1, %v5798_v63  ;;  %v5091_v28 = vld [vmem:[%s9465_s27 + $0xa5] sm:$0xff] }
 0x1ed   : > { %v8866_v0 = vpop.f32.mrf.mxu1  ;;  %9209 = vmatmul.mubr.msk.f32.gmra.mxu1 %vm363_vm1, %v5088_v49  ;;  %9309 = vmatprep.mubr.msk.f32.mxu0 %vm363_vm1, %v5799_v5  ;;  %v5801_v43 = vld [vmem:[%s9465_s27 + $0xa6] sm:$0xff]  ;;  %v11994_v5 = vld [vmem:[#allocation4_spill] sm:$0xff] }
 0x1ee   : > { %v11126_v41 = vadd.f32 %v3482_v50, %v2923_v48  ;;  %v2926_v32 = vadd.f32 %v8866_v0, %v11990_v13  ;;  %9211 = vmatprep.mubr.msk.f32.mxu1 %vm363_vm1, %v5089_v46  ;;  %v3492_v40 = vpop.f32.mrf.mxu0  ;;  %v11992_v63 = vld [vmem:[#allocation3_spill] sm:$0xff] }
 0x1ef   : > { %v2782_v59 = vpop.f32.mrf.mxu1  ;;  %v5092_v13 = vld [vmem:[%s9465_s27 + $0xad] sm:$0xff] }
 0x1f0   : > { %v11135_v49 = vadd.f32 %v8964_v16, %v2926_v32  ;;  %v2925_v53 = vadd.f32 %v2782_v59, %v11992_v63  ;;  %v8967_v48 = vpop.f32.mrf.mxu0  ;;  %9310 = vmatmul.mubr.msk.f32.gmra.mxu0 %vm363_vm1, %v5800_v15  ;;  %v5802_v16 = vld [vmem:[%s9465_s27 + $0xae] sm:$0xff]  ;;  %v11996_v15 = vld [vmem:[#allocation5_spill] sm:$0xff] }
 0x1f1   : > { %v8869_v50 = vpop.f32.mrf.mxu1  ;;  %9212 = vmatmul.mubr.msk.f32.gmra.mxu1 %vm363_vm1, %v5090_v55  ;;  %9312 = vmatprep.mubr.msk.f32.mxu0 %vm363_vm1, %v5801_v43  ;;  %v5093_v63 = vld [vmem:[%s9465_s27 + $0xb5] sm:$0xff]  ;;  %v11998_v43 = vld [vmem:[#allocation6_spill] sm:$0xff] }
 0x1f2   : > { %11991 = vst [vmem:[#allocation17_spill] sm:$0xff] %v11135_v49  ;;  %v11140_v46 = vadd.f32 %v3492_v40, %v2925_v53  ;;  %v2928_v0 = vadd.f32 %v8869_v50, %v11994_v5  ;;  %9214 = vmatprep.mubr.msk.f32.mxu1 %vm363_vm1, %v5091_v28  ;;  %v3502_v59 = vpop.f32.mrf.mxu0  ;;  %v5803_v49 = vld [vmem:[%s9465_s27 + $0xb6] sm:$0xff] }
 0x1f3   : > { %v2792_v32 = vpop.f32.mrf.mxu1 }
 0x1f4   : > { %11993 = vst [vmem:[#allocation18_spill] sm:$0xff] %v11140_v46  ;;  %v11149_v55 = vadd.f32 %v8967_v48, %v2928_v0  ;;  %v2927_v40 = vadd.f32 %v2792_v32, %v11996_v15  ;;  %v8970_v50 = vpop.f32.mrf.mxu0  ;;  %9313 = vmatmul.mubr.msk.f32.gmra.mxu0 %vm363_vm1, %v5802_v16  ;;  %v5094_v46 = vld [vmem:[%s9465_s27 + $0xbd] sm:$0xff]  ;;  %v5095_v15 = vld [vmem:[%s9465_s27 + $0xc5] sm:$0xff] }
 0x1f5   : > { %v8872_v53 = vpop.f32.mrf.mxu1  ;;  %9215 = vmatmul.mubr.msk.f32.gmra.mxu1 %vm363_vm1, %v5092_v13  ;;  %9315 = vmatprep.mubr.msk.f32.mxu0 %vm363_vm1, %v5803_v49  ;;  %v5804_v48 = vld [vmem:[%s9465_s27 + $0xbe] sm:$0xff]  ;;  %v12000_v16 = vld [vmem:[#allocation7_spill] sm:$0xff] }
 0x1f6   : > { %11995 = vst [vmem:[#allocation19_spill] sm:$0xff] %v11149_v55  ;;  %v11154_v28 = vadd.f32 %v3502_v59, %v2927_v40  ;;  %v2930_v5 = vadd.f32 %v8872_v53, %v11998_v43  ;;  %9217 = vmatprep.mubr.msk.f32.mxu1 %vm363_vm1, %v5093_v63  ;;  %v3512_v32 = vpop.f32.mrf.mxu0  ;;  %v5805_v55 = vld [vmem:[%s9465_s27 + $0xc6] sm:$0xff]  ;;  %v12002_v63 = vld [vmem:[#allocation40_spill] sm:$0xff] }
 0x1f7   : > { %v2802_v0 = vpop.f32.mrf.mxu1 }
 0x1f8   : > { %11997 = vst [vmem:[#allocation20_spill] sm:$0xff] %v11154_v28  ;;  %v11163_v13 = vadd.f32 %v8970_v50, %v2930_v5  ;;  %v2929_v59 = vadd.f32 %v2802_v0, %v12000_v16  ;;  %v8973_v53 = vpop.f32.mrf.mxu0  ;;  %9316 = vmatmul.mubr.msk.f32.gmra.mxu0 %vm363_vm1, %v5804_v48  ;;  %v5096_v28 = vld [vmem:[%s9465_s27 + $0xcd] sm:$0xff]  ;;  %v5097_v16 = vld [vmem:[%s9465_s27 + $0xd5] sm:$0xff]  ;;  %v12004_v48 = vld [vmem:[#allocation42_spill] sm:$0xff] }
 0x1f9   : > { %v8875_v40 = vpop.f32.mrf.mxu1  ;;  %9218 = vmatmul.mubr.msk.f32.gmra.mxu1 %vm363_vm1, %v5094_v46  ;;  %9318 = vmatprep.mubr.msk.f32.mxu0 %vm363_vm1, %v5805_v55  ;;  %v5806_v50 = vld [vmem:[%s9465_s27 + $0xce] sm:$0xff] }
 0x1fa   : > { %11999 = vst [vmem:[#allocation21_spill] sm:$0xff] %v11163_v13  ;;  %v11168_v49 = vadd.f32 %v3512_v32, %v2929_v59  ;;  %v2932_v43 = vadd.f32 %v8875_v40, %v12002_v63  ;;  %9220 = vmatprep.mubr.msk.f32.mxu1 %vm363_vm1, %v5095_v15  ;;  %v3522_v0 = vpop.f32.mrf.mxu0  ;;  %v5807_v13 = vld [vmem:[%s9465_s27 + $0xd6] sm:$0xff] }
 0x1fb   : > { %v2812_v5 = vpop.f32.mrf.mxu1  ;;  %v12006_v15 = vld [vmem:[#allocation8_spill] sm:$0xff] }
 0x1fc   : > { %12001 = vst [vmem:[#allocation22_spill] sm:$0xff] %v11168_v49  ;;  %v11177_v46 = vadd.f32 %v8973_v53, %v2932_v43  ;;  %v2931_v32 = vadd.f32 %v2812_v5, %v12004_v48  ;;  %v8976_v40 = vpop.f32.mrf.mxu0  ;;  %9319 = vmatmul.mubr.msk.f32.gmra.mxu0 %vm363_vm1, %v5806_v50  ;;  %v5098_v49 = vld [vmem:[%s9465_s27 + $0xdd] sm:$0xff]  ;;  %v5099_v48 = vld [vmem:[%s9465_s27 + $0xe5] sm:$0xff] }
 0x1fd   : > { %v8878_v59 = vpop.f32.mrf.mxu1  ;;  %9221 = vmatmul.mubr.msk.f32.gmra.mxu1 %vm363_vm1, %v5096_v28  ;;  %9321 = vmatprep.mubr.msk.f32.mxu0 %vm363_vm1, %v5807_v13  ;;  %v5808_v53 = vld [vmem:[%s9465_s27 + $0xde] sm:$0xff] }
 0x1fe   : > { %12003 = vst [vmem:[#allocation23_spill] sm:$0xff] %v11177_v46  ;;  %v11182_v55 = vadd.f32 %v3522_v0, %v2931_v32  ;;  %v2934_v63 = vadd.f32 %v8878_v59, %v12006_v15  ;;  %9223 = vmatprep.mubr.msk.f32.mxu1 %vm363_vm1, %v5097_v16  ;;  %v3532_v5 = vpop.f32.mrf.mxu0  ;;  %v5809_v46 = vld [vmem:[%s9465_s27 + $0xe6] sm:$0xff]  ;;  %v12008_v50 = vld [vmem:[#allocation9_spill] sm:$0xff] }
 0x1ff   : > { %v2822_v43 = vpop.f32.mrf.mxu1  ;;  %v12010_v16 = vld [vmem:[#allocation11_spill] sm:$0xff] }
 0x200   : > { %12005 = vst [vmem:[#allocation24_spill] sm:$0xff] %v11182_v55  ;;  %v11191_v28 = vadd.f32 %v8976_v40, %v2934_v63  ;;  %v2933_v0 = vadd.f32 %v2822_v43, %v12008_v50  ;;  %v8979_v59 = vpop.f32.mrf.mxu0  ;;  %9322 = vmatmul.mubr.msk.f32.gmra.mxu0 %vm363_vm1, %v5808_v53  ;;  %v5100_v55 = vld [vmem:[%s9465_s27 + $0xed] sm:$0xff]  ;;  %v5101_v50 = vld [vmem:[%s9465_s27 + $0xf5] sm:$0xff]  ;;  %v12012_v53 = vld [vmem:[#allocation10_spill] sm:$0xff] }
 0x201   : > { %v8881_v32 = vpop.f32.mrf.mxu1  ;;  %9224 = vmatmul.mubr.msk.f32.gmra.mxu1 %vm363_vm1, %v5098_v49  ;;  %9324 = vmatprep.mubr.msk.f32.mxu0 %vm363_vm1, %v5809_v46  ;;  %v5810_v40 = vld [vmem:[%s9465_s27 + $0xee] sm:$0xff] }
 0x202   : > { %12007 = vst [vmem:[#allocation25_spill] sm:$0xff] %v11191_v28  ;;  %v11196_v13 = vadd.f32 %v3532_v5, %v2933_v0  ;;  %v2936_v15 = vadd.f32 %v8881_v32, %v12010_v16  ;;  %9226 = vmatprep.mubr.msk.f32.mxu1 %vm363_vm1, %v5099_v48  ;;  %v3542_v43 = vpop.f32.mrf.mxu0  ;;  %v5811_v28 = vld [vmem:[%s9465_s27 + $0xf6] sm:$0xff] }
 0x203   : > { %v2832_v63 = vpop.f32.mrf.mxu1  ;;  %v12014_v48 = vld [vmem:[#allocation12_spill] sm:$0xff] }
 0x204   : > { %12009 = vst [vmem:[#allocation26_spill] sm:$0xff] %v11196_v13  ;;  %v11205_v49 = vadd.f32 %v8979_v59, %v2936_v15  ;;  %v2935_v5 = vadd.f32 %v2832_v63, %v12012_v53  ;;  %v8982_v32 = vpop.f32.mrf.mxu0  ;;  %9325 = vmatmul.mubr.msk.f32.gmra.mxu0 %vm363_vm1, %v5810_v40  ;;  %v5102_v13 = vld [vmem:[%s9465_s27 + $0xfd] sm:$0xff]  ;;  %v5103_v53 = vld [vmem:[%s9465_s27 + $0x105] sm:$0xff] }
 0x205   : > { %v8884_v0 = vpop.f32.mrf.mxu1  ;;  %9227 = vmatmul.mubr.msk.f32.gmra.mxu1 %vm363_vm1, %v5100_v55  ;;  %9327 = vmatprep.mubr.msk.f32.mxu0 %vm363_vm1, %v5811_v28  ;;  %v5812_v59 = vld [vmem:[%s9465_s27 + $0xfe] sm:$0xff] }
 0x206   : > { %12011 = vst [vmem:[#allocation27_spill] sm:$0xff] %v11205_v49  ;;  %v11210_v46 = vadd.f32 %v3542_v43, %v2935_v5  ;;  %v2938_v16 = vadd.f32 %v8884_v0, %v12014_v48  ;;  %9229 = vmatprep.mubr.msk.f32.mxu1 %vm363_vm1, %v5101_v50  ;;  %v3552_v63 = vpop.f32.mrf.mxu0  ;;  %v5813_v49 = vld [vmem:[%s9465_s27 + $0x106] sm:$0xff]  ;;  %v12016_v40 = vld [vmem:[#allocation13_spill] sm:$0xff] }
 0x207   : > { %v2842_v15 = vpop.f32.mrf.mxu1  ;;  %v12017_v50 = vld [vmem:[#allocation14_spill] sm:$0xff] }
 0x208   : > { %12013 = vst [vmem:[#allocation28_spill] sm:$0xff] %v11210_v46  ;;  %v11219_v55 = vadd.f32 %v8982_v32, %v2938_v16  ;;  %v2937_v43 = vadd.f32 %v2842_v15, %v12016_v40  ;;  %v8985_v0 = vpop.f32.mrf.mxu0  ;;  %9328 = vmatmul.mubr.msk.f32.gmra.mxu0 %vm363_vm1, %v5812_v59  ;;  %v5104_v46 = vld [vmem:[%s9465_s27 + $0x10d] sm:$0xff]  ;;  %v5105_v40 = vld [vmem:[%s9465_s27 + $0x115] sm:$0xff] }
 0x209   : > { %v8887_v5 = vpop.f32.mrf.mxu1  ;;  %9230 = vmatmul.mubr.msk.f32.gmra.mxu1 %vm363_vm1, %v5102_v13  ;;  %9330 = vmatprep.mubr.msk.f32.mxu0 %vm363_vm1, %v5813_v49  ;;  %v5814_v32 = vld [vmem:[%s9465_s27 + $0x10e] sm:$0xff] }
 0x20a   : > { %12015 = vst [vmem:[#allocation29_spill] sm:$0xff] %v11219_v55  ;;  %v11224_v28 = vadd.f32 %v3552_v63, %v2937_v43  ;;  %v2940_v48 = vadd.f32 %v8887_v5, %v12017_v50  ;;  %9232 = vmatprep.mubr.msk.f32.mxu1 %vm363_vm1, %v5103_v53  ;;  %v3562_v15 = vpop.f32.mrf.mxu0  ;;  %v5815_v55 = vld [vmem:[%s9465_s27 + $0x116] sm:$0xff]  ;;  %v12019_v59 = vld [vmem:[#allocation15_spill] sm:$0xff] }
 0x20b   : > { %v2852_v16 = vpop.f32.mrf.mxu1  ;;  %v5106_v50 = vld [vmem:[%s9465_s27 + $0x11d] sm:$0xff] }
 0x20c   : > { %v11233_v13 = vadd.f32 %v8985_v0, %v2940_v48  ;;  %v2939_v63 = vadd.f32 %v2852_v16, %v12019_v59  ;;  %v8988_v5 = vpop.f32.mrf.mxu0  ;;  %9331 = vmatmul.mubr.msk.f32.gmra.mxu0 %vm363_vm1, %v5814_v32  ;;  %v5816_v0 = vld [vmem:[%s9465_s27 + $0x11e] sm:$0xff]  ;;  %v12021_v32 = vld [vmem:[#allocation16_spill] sm:$0xff] }
 0x20d   : > { %v8890_v43 = vpop.f32.mrf.mxu1  ;;  %9233 = vmatmul.mubr.msk.f32.gmra.mxu1 %vm363_vm1, %v5104_v46  ;;  %9333 = vmatprep.mubr.msk.f32.mxu0 %vm363_vm1, %v5815_v55  ;;  %v5107_v59 = vld [vmem:[%s9465_s27 + $0x125] sm:$0xff] }
 0x20e   : > { %12018 = vst [vmem:[#allocation30_spill] sm:$0xff] %v11233_v13  ;;  %v11238_v49 = vadd.f32 %v3562_v15, %v2939_v63  ;;  %v2942_v53 = vadd.f32 %v8890_v43, %v10821_v3  ;;  %9235 = vmatprep.mubr.msk.f32.mxu1 %vm363_vm1, %v5105_v40  ;;  %v3572_v16 = vpop.f32.mrf.mxu0  ;;  %v5817_v13 = vld [vmem:[%s9465_s27 + $0x126] sm:$0xff] }
 0x20f   : > { %v2862_v48 = vpop.f32.mrf.mxu1  ;;  %v5108_v43 = vld [vmem:[%s9465_s27 + $0x12d] sm:$0xff] }
 0x210   : > { %v11247_v46 = vadd.f32 %v8988_v5, %v2942_v53  ;;  %v2941_v15 = vadd.f32 %v2862_v48, %v12021_v32  ;;  %v8991_v3 = vpop.f32.mrf.mxu0  ;;  %9334 = vmatmul.mubr.msk.f32.gmra.mxu0 %vm363_vm1, %v5816_v0  ;;  %v5818_v5 = vld [vmem:[%s9465_s27 + $0x12e] sm:$0xff] }
 0x211   : > { %v8893_v63 = vpop.f32.mrf.mxu1  ;;  %9236 = vmatmul.mubr.msk.f32.gmra.mxu1 %vm363_vm1, %v5106_v50  ;;  %9336 = vmatprep.mubr.msk.f32.mxu0 %vm363_vm1, %v5817_v13  ;;  %v5109_v32 = vld [vmem:[%s9465_s27 + $0x135] sm:$0xff] }
 0x212   : > { %12020 = vst [vmem:[#allocation31_spill] sm:$0xff] %v11247_v46  ;;  %v11252_v55 = vadd.f32 %v3572_v16, %v2941_v15  ;;  %v2944_v40 = vadd.f32 %v8893_v63, %v10835_v11  ;;  %9238 = vmatprep.mubr.msk.f32.mxu1 %vm363_vm1, %v5107_v59  ;;  %v3582_v48 = vpop.f32.mrf.mxu0  ;;  %v5819_v46 = vld [vmem:[%s9465_s27 + $0x136] sm:$0xff]  ;;  %v5820_v63 = vld [vmem:[%s9465_s27 + $0x13e] sm:$0xff] }
 0x213   : > { %v2872_v53 = vpop.f32.mrf.mxu1  ;;  %v5110_v15 = vld [vmem:[%s9465_s27 + $0x13d] sm:$0xff] }
 0x214   : > { %v11261_v50 = vadd.f32 %v8991_v3, %v2944_v40  ;;  %v2943_v0 = vadd.f32 %v2872_v53, %v10842_v42  ;;  %v9094_v11 = vpop.f32.mrf.mxu0  ;;  %9337 = vmatmul.mubr.msk.f32.gmra.mxu0 %vm363_vm1, %v5818_v5  ;;  %v5111_v40 = vld [vmem:[%s9465_s27 + $0x145] sm:$0xff] }
 0x215   : > { %v8996_v16 = vpop.f32.mrf.mxu1  ;;  %9239 = vmatmul.mubr.msk.f32.gmra.mxu1 %vm363_vm1, %v5108_v43  ;;  %9339 = vmatprep.mubr.msk.f32.mxu0 %vm363_vm1, %v5819_v46  ;;  %v5821_v53 = vld [vmem:[%s9465_s27 + $0x146] sm:$0xff] }
 0x216   : > { %v11266_v13 = vadd.f32 %v3582_v48, %v2943_v0  ;;  %v4302_v59 = vadd.f32 %v8996_v16, %v10849_v34  ;;  %9241 = vmatprep.mubr.msk.f32.mxu1 %vm363_vm1, %v5109_v32  ;;  %v4692_v42 = vpop.f32.mrf.mxu0  ;;  %v5112_v0 = vld [vmem:[%s9465_s27 + $0x14d] sm:$0xff] }
 0x217   : > { %v3982_v3 = vpop.f32.mrf.mxu1  ;;  %v5822_v16 = vld [vmem:[%s9465_s27 + $0x14e] sm:$0xff] }
 0x218   : > { %v11275_v43 = vadd.f32 %v9094_v11, %v4302_v59  ;;  %v4301_v5 = vadd.f32 %v3982_v3, %v10856_v14  ;;  %v9097_v34 = vpop.f32.mrf.mxu0  ;;  %9340 = vmatmul.mubr.msk.f32.gmra.mxu0 %vm363_vm1, %v5820_v63  ;;  %v5113_v59 = vld [vmem:[%s9465_s27 + $0x155] sm:$0xff] }
 0x219   : > { %v8999_v48 = vpop.f32.mrf.mxu1  ;;  %9242 = vmatmul.mubr.msk.f32.gmra.mxu1 %vm363_vm1, %v5110_v15  ;;  %9342 = vmatprep.mubr.msk.f32.mxu0 %vm363_vm1, %v5821_v53  ;;  %v5823_v3 = vld [vmem:[%s9465_s27 + $0x156] sm:$0xff] }
 0x21a   : > { %v11280_v46 = vadd.f32 %v4692_v42, %v4301_v5  ;;  %v4304_v32 = vadd.f32 %v8999_v48, %v10863_v30  ;;  %9244 = vmatprep.mubr.msk.f32.mxu1 %vm363_vm1, %v5111_v40  ;;  %v4702_v14 = vpop.f32.mrf.mxu0  ;;  %v5114_v5 = vld [vmem:[%s9465_s27 + $0x15d] sm:$0xff] }
 0x21b   : > { %v3992_v11 = vpop.f32.mrf.mxu1  ;;  %v5824_v48 = vld [vmem:[%s9465_s27 + $0x15e] sm:$0xff] }
 0x21c   : > { %v11289_v15 = vadd.f32 %v9097_v34, %v4304_v32  ;;  %v4303_v63 = vadd.f32 %v3992_v11, %v10870_v54  ;;  %v9100_v30 = vpop.f32.mrf.mxu0  ;;  %9343 = vmatmul.mubr.msk.f32.gmra.mxu0 %vm363_vm1, %v5822_v16  ;;  %v5115_v32 = vld [vmem:[%s9465_s27 + $0x165] sm:$0xff] }
 0x21d   : > { %v9002_v42 = vpop.f32.mrf.mxu1  ;;  %9245 = vmatmul.mubr.msk.f32.gmra.mxu1 %vm363_vm1, %v5112_v0  ;;  %9345 = vmatprep.mubr.msk.f32.mxu0 %vm363_vm1, %v5823_v3  ;;  %v5825_v11 = vld [vmem:[%s9465_s27 + $0x166] sm:$0xff] }
 0x21e   : > { %v11294_v40 = vadd.f32 %v4702_v14, %v4303_v63  ;;  %v4306_v53 = vadd.f32 %v9002_v42, %v10877_v36  ;;  %9247 = vmatprep.mubr.msk.f32.mxu1 %vm363_vm1, %v5113_v59  ;;  %v4712_v54 = vpop.f32.mrf.mxu0  ;;  %v5116_v63 = vld [vmem:[%s9465_s27 + $0x16d] sm:$0xff] }
 0x21f   : > { %v4002_v34 = vpop.f32.mrf.mxu1  ;;  %v5826_v42 = vld [vmem:[%s9465_s27 + $0x16e] sm:$0xff] }
 0x220   : > { %v11303_v0 = vadd.f32 %v9100_v30, %v4306_v53  ;;  %v4305_v16 = vadd.f32 %v4002_v34, %v10883_v2  ;;  %v9103_v36 = vpop.f32.mrf.mxu0  ;;  %9346 = vmatmul.mubr.msk.f32.gmra.mxu0 %vm363_vm1, %v5824_v48  ;;  %v5117_v53 = vld [vmem:[%s9465_s27 + $0x175] sm:$0xff] }
 0x221   : > { %v9005_v14 = vpop.f32.mrf.mxu1  ;;  %9248 = vmatmul.mubr.msk.f32.gmra.mxu1 %vm363_vm1, %v5114_v5  ;;  %9348 = vmatprep.mubr.msk.f32.mxu0 %vm363_vm1, %v5825_v11  ;;  %v5827_v34 = vld [vmem:[%s9465_s27 + $0x176] sm:$0xff] }
 0x222   : > { %v11308_v59 = vadd.f32 %v4712_v54, %v4305_v16  ;;  %v4308_v3 = vadd.f32 %v9005_v14, %v10890_v47  ;;  %9250 = vmatprep.mubr.msk.f32.mxu1 %vm363_vm1, %v5115_v32  ;;  %v4722_v2 = vpop.f32.mrf.mxu0  ;;  %v5118_v16 = vld [vmem:[%s9465_s27 + $0x17d] sm:$0xff] }
 0x223   : > { %v4012_v30 = vpop.f32.mrf.mxu1  ;;  %v5828_v14 = vld [vmem:[%s9465_s27 + $0x17e] sm:$0xff] }
 0x224   : > { %v11317_v5 = vadd.f32 %v9103_v36, %v4308_v3  ;;  %v4307_v48 = vadd.f32 %v4012_v30, %v10895_v45  ;;  %v9106_v47 = vpop.f32.mrf.mxu0  ;;  %9349 = vmatmul.mubr.msk.f32.gmra.mxu0 %vm363_vm1, %v5826_v42  ;;  %v5119_v3 = vld [vmem:[%s9465_s27 + $0x185] sm:$0xff] }
 0x225   : > { %v9008_v54 = vpop.f32.mrf.mxu1  ;;  %9251 = vmatmul.mubr.msk.f32.gmra.mxu1 %vm363_vm1, %v5116_v63  ;;  %9351 = vmatprep.mubr.msk.f32.mxu0 %vm363_vm1, %v5827_v34  ;;  %v5829_v30 = vld [vmem:[%s9465_s27 + $0x186] sm:$0xff] }
 0x226   : > { %v11322_v32 = vadd.f32 %v4722_v2, %v4307_v48  ;;  %v4310_v11 = vadd.f32 %v9008_v54, %v10902_v37  ;;  %9253 = vmatprep.mubr.msk.f32.mxu1 %vm363_vm1, %v5117_v53  ;;  %v4732_v45 = vpop.f32.mrf.mxu0  ;;  %v5120_v48 = vld [vmem:[%s9465_s27 + $0x18d] sm:$0xff] }
 0x227   : > { %v4022_v36 = vpop.f32.mrf.mxu1  ;;  %v5830_v54 = vld [vmem:[%s9465_s27 + $0x18e] sm:$0xff] }
 0x228   : > { %v11331_v63 = vadd.f32 %v9106_v47, %v4310_v11  ;;  %v4309_v42 = vadd.f32 %v4022_v36, %v10907_v21  ;;  %v9109_v37 = vpop.f32.mrf.mxu0  ;;  %9352 = vmatmul.mubr.msk.f32.gmra.mxu0 %vm363_vm1, %v5828_v14  ;;  %v5121_v11 = vld [vmem:[%s9465_s27 + $0x195] sm:$0xff] }
 0x229   : > { %v9011_v2 = vpop.f32.mrf.mxu1  ;;  %9254 = vmatmul.mubr.msk.f32.gmra.mxu1 %vm363_vm1, %v5118_v16  ;;  %9354 = vmatprep.mubr.msk.f32.mxu0 %vm363_vm1, %v5829_v30  ;;  %v5831_v36 = vld [vmem:[%s9465_s27 + $0x196] sm:$0xff] }
 0x22a   : > { %v11336_v53 = vadd.f32 %v4732_v45, %v4309_v42  ;;  %v4312_v34 = vadd.f32 %v9011_v2, %v10914_v60  ;;  %9256 = vmatprep.mubr.msk.f32.mxu1 %vm363_vm1, %v5119_v3  ;;  %v4742_v21 = vpop.f32.mrf.mxu0  ;;  %v5122_v42 = vld [vmem:[%s9465_s27 + $0x19d] sm:$0xff] }
 0x22b   : > { %v4032_v47 = vpop.f32.mrf.mxu1  ;;  %v5832_v2 = vld [vmem:[%s9465_s27 + $0x19e] sm:$0xff] }
 0x22c   : > { %v11345_v16 = vadd.f32 %v9109_v37, %v4312_v34  ;;  %v4311_v14 = vadd.f32 %v4032_v47, %v10919_v17  ;;  %v9112_v60 = vpop.f32.mrf.mxu0  ;;  %9355 = vmatmul.mubr.msk.f32.gmra.mxu0 %vm363_vm1, %v5830_v54  ;;  %v5123_v34 = vld [vmem:[%s9465_s27 + $0x1a5] sm:$0xff] }
 0x22d   : > { %v9014_v45 = vpop.f32.mrf.mxu1  ;;  %9257 = vmatmul.mubr.msk.f32.gmra.mxu1 %vm363_vm1, %v5120_v48  ;;  %9357 = vmatprep.mubr.msk.f32.mxu0 %vm363_vm1, %v5831_v36  ;;  %v5833_v47 = vld [vmem:[%s9465_s27 + $0x1a6] sm:$0xff] }
 0x22e   : > { %v11350_v3 = vadd.f32 %v4742_v21, %v4311_v14  ;;  %v4314_v30 = vadd.f32 %v9014_v45, %v10926_v20  ;;  %9259 = vmatprep.mubr.msk.f32.mxu1 %vm363_vm1, %v5121_v11  ;;  %v4752_v17 = vpop.f32.mrf.mxu0  ;;  %v5124_v14 = vld [vmem:[%s9465_s27 + $0x1ad] sm:$0xff] }
 0x22f   : > { %v4042_v37 = vpop.f32.mrf.mxu1  ;;  %v5834_v45 = vld [vmem:[%s9465_s27 + $0x1ae] sm:$0xff] }
 0x230   : > { %v11359_v48 = vadd.f32 %v9112_v60, %v4314_v30  ;;  %v4313_v54 = vadd.f32 %v4042_v37, %v10931_v24  ;;  %v9115_v20 = vpop.f32.mrf.mxu0  ;;  %9358 = vmatmul.mubr.msk.f32.gmra.mxu0 %vm363_vm1, %v5832_v2  ;;  %v5125_v30 = vld [vmem:[%s9465_s27 + $0x1b5] sm:$0xff] }
 0x231   : > { %v9017_v21 = vpop.f32.mrf.mxu1  ;;  %9260 = vmatmul.mubr.msk.f32.gmra.mxu1 %vm363_vm1, %v5122_v42  ;;  %9360 = vmatprep.mubr.msk.f32.mxu0 %vm363_vm1, %v5833_v47  ;;  %v5835_v37 = vld [vmem:[%s9465_s27 + $0x1b6] sm:$0xff] }
 0x232   : > { %v11364_v11 = vadd.f32 %v4752_v17, %v4313_v54  ;;  %v4316_v36 = vadd.f32 %v9017_v21, %v10938_v51  ;;  %9262 = vmatprep.mubr.msk.f32.mxu1 %vm363_vm1, %v5123_v34  ;;  %v4762_v24 = vpop.f32.mrf.mxu0  ;;  %v5126_v54 = vld [vmem:[%s9465_s27 + $0x1bd] sm:$0xff] }
 0x233   : > { %v4052_v60 = vpop.f32.mrf.mxu1  ;;  %v5836_v21 = vld [vmem:[%s9465_s27 + $0x1be] sm:$0xff] }
 0x234   : > { %v11373_v42 = vadd.f32 %v9115_v20, %v4316_v36  ;;  %v4315_v2 = vadd.f32 %v4052_v60, %v10943_v6  ;;  %v9118_v51 = vpop.f32.mrf.mxu0  ;;  %9361 = vmatmul.mubr.msk.f32.gmra.mxu0 %vm363_vm1, %v5834_v45  ;;  %v5127_v36 = vld [vmem:[%s9465_s27 + $0x1c5] sm:$0xff] }
 0x235   : > { %v9020_v17 = vpop.f32.mrf.mxu1  ;;  %9263 = vmatmul.mubr.msk.f32.gmra.mxu1 %vm363_vm1, %v5124_v14  ;;  %9363 = vmatprep.mubr.msk.f32.mxu0 %vm363_vm1, %v5835_v37  ;;  %v5837_v60 = vld [vmem:[%s9465_s27 + $0x1c6] sm:$0xff] }
 0x236   : > { %v11378_v34 = vadd.f32 %v4762_v24, %v4315_v2  ;;  %v4318_v47 = vadd.f32 %v9020_v17, %v10950_v1  ;;  %9265 = vmatprep.mubr.msk.f32.mxu1 %vm363_vm1, %v5125_v30  ;;  %v4772_v6 = vpop.f32.mrf.mxu0  ;;  %v5128_v2 = vld [vmem:[%s9465_s27 + $0x1cd] sm:$0xff] }
 0x237   : > { %v4062_v20 = vpop.f32.mrf.mxu1  ;;  %v5838_v17 = vld [vmem:[%s9465_s27 + $0x1ce] sm:$0xff] }
 0x238   : > { %v11387_v14 = vadd.f32 %v9118_v51, %v4318_v47  ;;  %v4317_v45 = vadd.f32 %v4062_v20, %v10955_v9  ;;  %v9121_v1 = vpop.f32.mrf.mxu0  ;;  %9364 = vmatmul.mubr.msk.f32.gmra.mxu0 %vm363_vm1, %v5836_v21  ;;  %v5129_v47 = vld [vmem:[%s9465_s27 + $0x1d5] sm:$0xff] }
 0x239   : > { %v9023_v24 = vpop.f32.mrf.mxu1  ;;  %9266 = vmatmul.mubr.msk.f32.gmra.mxu1 %vm363_vm1, %v5126_v54  ;;  %9366 = vmatprep.mubr.msk.f32.mxu0 %vm363_vm1, %v5837_v60  ;;  %v5839_v20 = vld [vmem:[%s9465_s27 + $0x1d6] sm:$0xff] }
 0x23a   : > { %v11392_v30 = vadd.f32 %v4772_v6, %v4317_v45  ;;  %v4320_v37 = vadd.f32 %v9023_v24, %v10962_v27  ;;  %9268 = vmatprep.mubr.msk.f32.mxu1 %vm363_vm1, %v5127_v36  ;;  %v4782_v9 = vpop.f32.mrf.mxu0  ;;  %v5130_v45 = vld [vmem:[%s9465_s27 + $0x1dd] sm:$0xff] }
 0x23b   : > { %v4072_v51 = vpop.f32.mrf.mxu1  ;;  %v5840_v24 = vld [vmem:[%s9465_s27 + $0x1de] sm:$0xff] }
 0x23c   : > { %v11401_v54 = vadd.f32 %v9121_v1, %v4320_v37  ;;  %v4319_v21 = vadd.f32 %v4072_v51, %v10967_v62  ;;  %v9124_v27 = vpop.f32.mrf.mxu0  ;;  %9367 = vmatmul.mubr.msk.f32.gmra.mxu0 %vm363_vm1, %v5838_v17  ;;  %v5131_v37 = vld [vmem:[%s9465_s27 + $0x1e5] sm:$0xff] }
 0x23d   : > { %v9026_v6 = vpop.f32.mrf.mxu1  ;;  %9269 = vmatmul.mubr.msk.f32.gmra.mxu1 %vm363_vm1, %v5128_v2  ;;  %9369 = vmatprep.mubr.msk.f32.mxu0 %vm363_vm1, %v5839_v20  ;;  %v5841_v51 = vld [vmem:[%s9465_s27 + $0x1e6] sm:$0xff] }
 0x23e   : > { %v11406_v36 = vadd.f32 %v4782_v9, %v4319_v21  ;;  %v4322_v60 = vadd.f32 %v9026_v6, %v10974_v4  ;;  %9271 = vmatprep.mubr.msk.f32.mxu1 %vm363_vm1, %v5129_v47  ;;  %v4792_v62 = vpop.f32.mrf.mxu0  ;;  %v5132_v21 = vld [vmem:[%s9465_s27 + $0x1ed] sm:$0xff] }
 0x23f   : > { %v4082_v1 = vpop.f32.mrf.mxu1  ;;  %v5842_v6 = vld [vmem:[%s9465_s27 + $0x1ee] sm:$0xff] }
 0x240   : > { %v11415_v2 = vadd.f32 %v9124_v27, %v4322_v60  ;;  %v4321_v17 = vadd.f32 %v4082_v1, %v10979_v19  ;;  %v9127_v4 = vpop.f32.mrf.mxu0  ;;  %9370 = vmatmul.mubr.msk.f32.gmra.mxu0 %vm363_vm1, %v5840_v24  ;;  %v5133_v60 = vld [vmem:[%s9465_s27 + $0x1f5] sm:$0xff] }
 0x241   : > { %v9029_v9 = vpop.f32.mrf.mxu1  ;;  %9272 = vmatmul.mubr.msk.f32.gmra.mxu1 %vm363_vm1, %v5130_v45  ;;  %9372 = vmatprep.mubr.msk.f32.mxu0 %vm363_vm1, %v5841_v51  ;;  %v5843_v1 = vld [vmem:[%s9465_s27 + $0x1f6] sm:$0xff] }
 0x242   : > { %v11420_v47 = vadd.f32 %v4792_v62, %v4321_v17  ;;  %v4324_v20 = vadd.f32 %v9029_v9, %v10986_v29  ;;  %9274 = vmatprep.mubr.msk.f32.mxu1 %vm363_vm1, %v5131_v37  ;;  %v4802_v19 = vpop.f32.mrf.mxu0  ;;  %v5134_v17 = vld [vmem:[%s9465_s27 + $0x1fd] sm:$0xff] }
 0x243   : > { %v4092_v27 = vpop.f32.mrf.mxu1  ;;  %v5844_v9 = vld [vmem:[%s9465_s27 + $0x1fe] sm:$0xff] }
 0x244   : > { %v11429_v45 = vadd.f32 %v9127_v4, %v4324_v20  ;;  %v4323_v24 = vadd.f32 %v4092_v27, %v10991_v10  ;;  %v9130_v29 = vpop.f32.mrf.mxu0  ;;  %9373 = vmatmul.mubr.msk.f32.gmra.mxu0 %vm363_vm1, %v5842_v6  ;;  %v5135_v20 = vld [vmem:[%s9465_s27 + $0x205] sm:$0xff] }
 0x245   : > { %v9032_v62 = vpop.f32.mrf.mxu1  ;;  %9275 = vmatmul.mubr.msk.f32.gmra.mxu1 %vm363_vm1, %v5132_v21  ;;  %9375 = vmatprep.mubr.msk.f32.mxu0 %vm363_vm1, %v5843_v1  ;;  %v5845_v27 = vld [vmem:[%s9465_s27 + $0x206] sm:$0xff] }
 0x246   : > { %v11434_v37 = vadd.f32 %v4802_v19, %v4323_v24  ;;  %v4326_v51 = vadd.f32 %v9032_v62, %v10998_v35  ;;  %9277 = vmatprep.mubr.msk.f32.mxu1 %vm363_vm1, %v5133_v60  ;;  %v4812_v10 = vpop.f32.mrf.mxu0  ;;  %v5136_v24 = vld [vmem:[%s9465_s27 + $0x20d] sm:$0xff] }
 0x247   : > { %v4102_v4 = vpop.f32.mrf.mxu1  ;;  %v5846_v62 = vld [vmem:[%s9465_s27 + $0x20e] sm:$0xff] }
 0x248   : > { %v11443_v21 = vadd.f32 %v9130_v29, %v4326_v51  ;;  %v4325_v6 = vadd.f32 %v4102_v4, %v11003_v31  ;;  %v9133_v35 = vpop.f32.mrf.mxu0  ;;  %9376 = vmatmul.mubr.msk.f32.gmra.mxu0 %vm363_vm1, %v5844_v9  ;;  %v5137_v51 = vld [vmem:[%s9465_s27 + $0x215] sm:$0xff] }
 0x249   : > { %v9035_v19 = vpop.f32.mrf.mxu1  ;;  %9278 = vmatmul.mubr.msk.f32.gmra.mxu1 %vm363_vm1, %v5134_v17  ;;  %9378 = vmatprep.mubr.msk.f32.mxu0 %vm363_vm1, %v5845_v27  ;;  %v5847_v4 = vld [vmem:[%s9465_s27 + $0x216] sm:$0xff] }
 0x24a   : > { %12022 = vst [vmem:[#allocation32_spill] sm:$0xff] %v11443_v21  ;;  %v11448_v60 = vadd.f32 %v4812_v10, %v4325_v6  ;;  %v4328_v1 = vadd.f32 %v9035_v19, %v11010_v18  ;;  %9280 = vmatprep.mubr.msk.f32.mxu1 %vm363_vm1, %v5135_v20  ;;  %v4822_v31 = vpop.f32.mrf.mxu0  ;;  %v5138_v27 = vld [vmem:[%s9465_s27 + $0x21d] sm:$0xff] }
 0x24b   : > { %v4112_v29 = vpop.f32.mrf.mxu1  ;;  %v5848_v6 = vld [vmem:[%s9465_s27 + $0x21e] sm:$0xff]  ;;  %s231_s27 = scalar_lea.vmem %s11880_s4, %s7321_s24 }
 0x24c   : > { %v11457_v21 = vadd.f32 %v9133_v35, %v4328_v1  ;;  %v4327_v17 = vadd.f32 %v4112_v29, %v11015_v22  ;;  %v9136_v10 = vpop.f32.mrf.mxu0  ;;  %9379 = vmatmul.mubr.msk.f32.gmra.mxu0 %vm363_vm1, %v5846_v62 }
 0x24d   : > { %v9038_v9 = vpop.f32.mrf.mxu1  ;;  %9281 = vmatmul.mubr.msk.f32.gmra.mxu1 %vm363_vm1, %v5136_v24  ;;  %9381 = vmatprep.mubr.msk.f32.mxu0 %vm363_vm1, %v5847_v4 }
 0x24e   : > { %12023 = vst [vmem:[#allocation33_spill] sm:$0xff] %v11457_v21  ;;  %v11462_v18 = vadd.f32 %v4822_v31, %v4327_v17  ;;  %v4330_v20 = vadd.f32 %v9038_v9, %v11023_v8  ;;  %9283 = vmatprep.mubr.msk.f32.mxu1 %vm363_vm1, %v5137_v51  ;;  %v4832_v35 = vpop.f32.mrf.mxu0 }
 0x24f   : > { %v4122_v19 = vpop.f32.mrf.mxu1 }
 0x250   : > { %12024 = vst [vmem:[#allocation34_spill] sm:$0xff] %v11462_v18  ;;  %v11469_v1 = vadd.f32 %v9136_v10, %v4330_v20  ;;  %v4329_v22 = vadd.f32 %v4122_v19, %v11028_v38  ;;  %v9139_v24 = vpop.f32.mrf.mxu0  ;;  %9382 = vmatmul.mubr.msk.f32.gmra.mxu0 %vm363_vm1, %v5848_v6 }
 0x251   : > { %v9041_v29 = vpop.f32.mrf.mxu1  ;;  %9284 = vmatmul.mubr.msk.f32.gmra.mxu1 %vm363_vm1, %v5138_v27 }
 0x252   : > { %12025 = vst [vmem:[#allocation35_spill] sm:$0xff] %v11469_v1  ;;  %v11474_v62 = vadd.f32 %v4832_v35, %v4329_v22  ;;  %v4332_v8 = vadd.f32 %v9041_v29, %v11037_v39  ;;  %v4842_v51 = vpop.f32.mrf.mxu0 }
 0x253   : > { %v4132_v31 = vpop.f32.mrf.mxu1 }
 0x254   : > { %12026 = vst [vmem:[#allocation36_spill] sm:$0xff] %v11474_v62  ;;  %v11477_v4 = vadd.f32 %v9139_v24, %v4332_v8  ;;  %v4331_v17 = vadd.f32 %v4132_v31, %v11042_v23  ;;  %v9142_v10 = vpop.f32.mrf.mxu0  ;;  %v11489_v8 = vpop.permute.xlu0 %6625 }
 0x255   : > { %v9044_v9 = vpop.f32.mrf.mxu1 }
 0x256   : > { %12027 = vst [vmem:[#allocation37_spill] sm:$0xff] %v11477_v4  ;;  %v11480_v20 = vadd.f32 %v4842_v51, %v4331_v17  ;;  %v4334_v38 = vadd.f32 %v9044_v9, %v11051_v44  ;;  %v4852_v27 = vpop.f32.mrf.mxu0  ;;  %v11494_v9 = vpop.permute.xlu1 %6635 }
 0x257   : > { %v4142_v19 = vpop.f32.mrf.mxu1 }
 0x258   : > { %12028 = vst [vmem:[#allocation38_spill] sm:$0xff] %v11480_v20  ;;  %v11483_v1 = vadd.f32 %v9142_v10, %v4334_v38  ;;  %v4333_v6 = vadd.f32 %v4142_v19, %v11056_v26  ;;  %v9145_v39 = vpop.f32.mrf.mxu0 }
 0x259   : > { %v9047_v35 = vpop.f32.mrf.mxu1 }
 0x25a   : > { %12029 = vst [vmem:[#allocation39_spill] sm:$0xff] %v11483_v1  ;;  %v11486_v22 = vadd.f32 %v4852_v27, %v4333_v6  ;;  %v4336_v29 = vadd.f32 %v9047_v35, %v11065_v33  ;;  %v4862_v23 = vpop.f32.mrf.mxu0 }
 0x25b   : > { %v4152_v24 = vpop.f32.mrf.mxu1 }
 0x25c   : > { %12030 = vst [vmem:[#allocation41_spill] sm:$0xff] %v11486_v22  ;;  %v11491_v31 = vadd.f32 %v9145_v39, %v4336_v29  ;;  %v4335_v44 = vadd.f32 %v4152_v24, %v11070_v58  ;;  %v9148_v17 = vpop.f32.mrf.mxu0  ;;  %v11502_v39 = vpop.permute.xlu0 %6630 }
 0x25d   : > { %v9050_v51 = vpop.f32.mrf.mxu1 }
 0x25e   : > { %12031 = vst [vmem:[#allocation43_spill] sm:$0xff] %v11491_v31  ;;  %v11496_v10 = vadd.f32 %v4862_v23, %v4335_v44  ;;  %v4338_v26 = vadd.f32 %v9050_v51, %v11079_v56  ;;  %v4872_v19 = vpop.f32.mrf.mxu0  ;;  %v11507_v23 = vpop.permute.xlu1 %6640 }
 0x25f   : > { %v4162_v38 = vpop.f32.mrf.mxu1 }
 0x260   : > { %12032 = vst [vmem:[#allocation2_spill] sm:$0xff] %v11496_v10  ;;  %v11499_v27 = vadd.f32 %v9148_v17, %v4338_v26  ;;  %v4337_v33 = vadd.f32 %v4162_v38, %v11084_v61  ;;  %v9151_v35 = vpop.f32.mrf.mxu0 }
 0x261   : > { %v9053_v6 = vpop.f32.mrf.mxu1 }
 0x262   : > { %12033 = vst [vmem:[#allocation3_spill] sm:$0xff] %v11499_v27  ;;  %v11504_v29 = vadd.f32 %v4872_v19, %v4337_v33  ;;  %v4340_v58 = vadd.f32 %v9053_v6, %v11093_v12  ;;  %v4882_v31 = vpop.f32.mrf.mxu0  ;;  %v11515_v19 = vpop.permute.xlu0 %6645 }
 0x263   : > { %v4172_v24 = vpop.f32.mrf.mxu1 }
 0x264   : > { %12034 = vst [vmem:[#allocation4_spill] sm:$0xff] %v11504_v29  ;;  %v11509_v44 = vadd.f32 %v9151_v35, %v4340_v58  ;;  %v4339_v56 = vadd.f32 %v4172_v24, %v11098_v25  ;;  %v9154_v17 = vpop.f32.mrf.mxu0  ;;  %v11520_v35 = vpop.permute.xlu1 %6650 }
 0x265   : > { %v9056_v51 = vpop.f32.mrf.mxu1 }
 0x266   : > { %12035 = vst [vmem:[#allocation5_spill] sm:$0xff] %v11509_v44  ;;  %v11512_v26 = vadd.f32 %v4882_v31, %v4339_v56  ;;  %v4342_v61 = vadd.f32 %v9056_v51, %v11107_v7  ;;  %v4892_v27 = vpop.f32.mrf.mxu0 }
 0x267   : > { %v4182_v38 = vpop.f32.mrf.mxu1 }
 0x268   : > { %12036 = vst [vmem:[#allocation6_spill] sm:$0xff] %v11512_v26  ;;  %v11517_v33 = vadd.f32 %v9154_v17, %v4342_v61  ;;  %v4341_v12 = vadd.f32 %v4182_v38, %v11112_v52  ;;  %v9157_v29 = vpop.f32.mrf.mxu0  ;;  %v11528_v17 = vpop.permute.xlu0 %6655  ;;  %v12041_v52 = vld [vmem:[#allocation17_spill] sm:$0xff] }
 0x269   : > { %v9059_v6 = vpop.f32.mrf.mxu1 }
 0x26a   : > { %12037 = vst [vmem:[#allocation7_spill] sm:$0xff] %v11517_v33  ;;  %v11522_v58 = vadd.f32 %v4892_v27, %v4341_v12  ;;  %v4344_v25 = vadd.f32 %v9059_v6, %v11121_v57  ;;  %v4902_v24 = vpop.f32.mrf.mxu0  ;;  %v11533_v27 = vpop.permute.xlu1 %6660  ;;  %v12043_v57 = vld [vmem:[#allocation18_spill] sm:$0xff] }
 0x26b   : > { %v4192_v31 = vpop.f32.mrf.mxu1 }
 0x26c   : > { %12038 = vst [vmem:[#allocation40_spill] sm:$0xff] %v11522_v58  ;;  %v11525_v56 = vadd.f32 %v9157_v29, %v4344_v25  ;;  %v4343_v7 = vadd.f32 %v4192_v31, %v11126_v41  ;;  %v9160_v26 = vpop.f32.mrf.mxu0  ;;  %v12045_v41 = vld [vmem:[#allocation19_spill] sm:$0xff] }
 0x26d   : > { %v9062_v51 = vpop.f32.mrf.mxu1 }
 0x26e   : > { %12039 = vst [vmem:[#allocation42_spill] sm:$0xff] %v11525_v56  ;;  %v11530_v61 = vadd.f32 %v4902_v24, %v4343_v7  ;;  %v4346_v38 = vadd.f32 %v9062_v51, %v12041_v52  ;;  %v4912_v44 = vpop.f32.mrf.mxu0  ;;  %v11541_v24 = vpop.permute.xlu0 %6665  ;;  %v12047_v51 = vld [vmem:[#allocation20_spill] sm:$0xff] }
 0x26f   : > { %v4202_v33 = vpop.f32.mrf.mxu1 }
 0x270   : > { %12040 = vst [vmem:[#allocation8_spill] sm:$0xff] %v11530_v61  ;;  %v11535_v12 = vadd.f32 %v9160_v26, %v4346_v38  ;;  %v4345_v6 = vadd.f32 %v4202_v33, %v12043_v57  ;;  %v9163_v25 = vpop.f32.mrf.mxu0  ;;  %v11546_v26 = vpop.permute.xlu1 %6670  ;;  %v12049_v33 = vld [vmem:[#allocation21_spill] sm:$0xff] }
 0x271   : > { %v9065_v29 = vpop.f32.mrf.mxu1 }
 0x272   : > { %12042 = vst [vmem:[#allocation9_spill] sm:$0xff] %v11535_v12  ;;  %v11538_v56 = vadd.f32 %v4912_v44, %v4345_v6  ;;  %v4348_v31 = vadd.f32 %v9065_v29, %v12045_v41  ;;  %v4922_v10 = vpop.f32.mrf.mxu0  ;;  %v12051_v29 = vld [vmem:[#allocation22_spill] sm:$0xff] }
 0x273   : > { %v4212_v58 = vpop.f32.mrf.mxu1 }
 0x274   : > { %12044 = vst [vmem:[#allocation11_spill] sm:$0xff] %v11538_v56  ;;  %v11543_v7 = vadd.f32 %v9163_v25, %v4348_v31  ;;  %v4347_v52 = vadd.f32 %v4212_v58, %v12047_v51  ;;  %v9166_v22 = vpop.f32.mrf.mxu0  ;;  %v11554_v25 = vpop.permute.xlu0 %6675  ;;  %v12053_v58 = vld [vmem:[#allocation23_spill] sm:$0xff] }
 0x275   : > { %v9068_v61 = vpop.f32.mrf.mxu1 }
 0x276   : > { %12046 = vst [vmem:[#allocation10_spill] sm:$0xff] %v11543_v7  ;;  %v11548_v38 = vadd.f32 %v4922_v10, %v4347_v52  ;;  %v4350_v57 = vadd.f32 %v9068_v61, %v12049_v33  ;;  %v4932_v6 = vpop.f32.mrf.mxu0  ;;  %v11559_v10 = vpop.permute.xlu1 %6680  ;;  %v12055_v61 = vld [vmem:[#allocation24_spill] sm:$0xff] }
 0x277   : > { %v4222_v44 = vpop.f32.mrf.mxu1 }
 0x278   : > { %12048 = vst [vmem:[#allocation12_spill] sm:$0xff] %v11548_v38  ;;  %v11551_v56 = vadd.f32 %v9166_v22, %v4350_v57  ;;  %v4349_v41 = vadd.f32 %v4222_v44, %v12051_v29  ;;  %v9169_v1 = vpop.f32.mrf.mxu0  ;;  %v12057_v44 = vld [vmem:[#allocation25_spill] sm:$0xff] }
 0x279   : > { %v9071_v12 = vpop.f32.mrf.mxu1 }
 0x27a   : > { %12050 = vst [vmem:[#allocation13_spill] sm:$0xff] %v11551_v56  ;;  %v11556_v31 = vadd.f32 %v4932_v6, %v4349_v41  ;;  %v4352_v51 = vadd.f32 %v9071_v12, %v12053_v58  ;;  %v4942_v20 = vpop.f32.mrf.mxu0  ;;  %v11567_v6 = vpop.permute.xlu0 %6685  ;;  %v12059_v12 = vld [vmem:[#allocation26_spill] sm:$0xff] }
 0x27b   : > { %v4232_v7 = vpop.f32.mrf.mxu1 }
 0x27c   : > { %12052 = vst [vmem:[#allocation14_spill] sm:$0xff] %v11556_v31  ;;  %v11561_v52 = vadd.f32 %v9169_v1, %v4352_v51  ;;  %v4351_v33 = vadd.f32 %v4232_v7, %v12055_v61  ;;  %v9172_v57 = vpop.f32.mrf.mxu0  ;;  %v11572_v1 = vpop.permute.xlu1 %6690  ;;  %v12061_v7 = vld [vmem:[#allocation27_spill] sm:$0xff] }
 0x27d   : > { %v9074_v22 = vpop.f32.mrf.mxu1 }
 0x27e   : > { %12054 = vst [vmem:[#allocation15_spill] sm:$0xff] %v11561_v52  ;;  %v11564_v56 = vadd.f32 %v4942_v20, %v4351_v33  ;;  %v4354_v29 = vadd.f32 %v9074_v22, %v12057_v44  ;;  %v4952_v4 = vpop.f32.mrf.mxu0  ;;  %v12063_v22 = vld [vmem:[#allocation28_spill] sm:$0xff] }
 0x27f   : > { %v4242_v38 = vpop.f32.mrf.mxu1 }
 0x280   : > { %12056 = vst [vmem:[#allocation16_spill] sm:$0xff] %v11564_v56  ;;  %v11569_v41 = vadd.f32 %v9172_v57, %v4354_v29  ;;  %v4353_v58 = vadd.f32 %v4242_v38, %v12059_v12  ;;  %v9175_v62 = vpop.f32.mrf.mxu0  ;;  %v11580_v57 = vpop.permute.xlu0 %6695  ;;  %v12065_v38 = vld [vmem:[#allocation29_spill] sm:$0xff] }
 0x281   : > { %v9077_v31 = vpop.f32.mrf.mxu1 }
 0x282   : > { %12058 = vst [vmem:[#allocation17_spill] sm:$0xff] %v11569_v41  ;;  %v11574_v51 = vadd.f32 %v4952_v4, %v4353_v58  ;;  %v4356_v61 = vadd.f32 %v9077_v31, %v12061_v7  ;;  %v4962_v33 = vpop.f32.mrf.mxu0  ;;  %v11585_v4 = vpop.permute.xlu1 %6700 }
 0x283   : > { %v4252_v20 = vpop.f32.mrf.mxu1 }
 0x284   : > { %12060 = vst [vmem:[#allocation18_spill] sm:$0xff] %v11574_v51  ;;  %v11577_v56 = vadd.f32 %v9175_v62, %v4356_v61  ;;  %v4355_v44 = vadd.f32 %v4252_v20, %v12063_v22  ;;  %v9178_v18 = vpop.f32.mrf.mxu0  ;;  %v12068_v20 = vld [vmem:[#allocation30_spill] sm:$0xff] }
 0x285   : > { %v9080_v52 = vpop.f32.mrf.mxu1 }
 0x286   : > { %12062 = vst [vmem:[#allocation19_spill] sm:$0xff] %v11577_v56  ;;  %v11582_v29 = vadd.f32 %v4962_v33, %v4355_v44  ;;  %v4358_v12 = vadd.f32 %v9080_v52, %v12065_v38  ;;  %v4972_v21 = vpop.f32.mrf.mxu0  ;;  %v11593_v33 = vpop.permute.xlu0 %6705 }
 0x287   : > { %v4262_v41 = vpop.f32.mrf.mxu1 }
 0x288   : > { %12064 = vst [vmem:[#allocation20_spill] sm:$0xff] %v11582_v29  ;;  %v11587_v58 = vadd.f32 %v9178_v18, %v4358_v12  ;;  %v4357_v31 = vadd.f32 %v4262_v41, %v11224_v28  ;;  %v9181_v7 = vpop.f32.mrf.mxu0  ;;  %v11598_v18 = vpop.permute.xlu1 %6710  ;;  %v12071_v28 = vld [vmem:[#allocation31_spill] sm:$0xff] }
 0x289   : > { %v9083_v62 = vpop.f32.mrf.mxu1 }
 0x28a   : > { %12066 = vst [vmem:[#allocation21_spill] sm:$0xff] %v11587_v58  ;;  %v11590_v61 = vadd.f32 %v4972_v21, %v4357_v31  ;;  %v4360_v22 = vadd.f32 %v9083_v62, %v12068_v20  ;;  %v4982_v51 = vpop.f32.mrf.mxu0 }
 0x28b   : > { %v4272_v56 = vpop.f32.mrf.mxu1 }
 0x28c   : > { %12067 = vst [vmem:[#allocation22_spill] sm:$0xff] %v11590_v61  ;;  %v11595_v44 = vadd.f32 %v9181_v7, %v4360_v22  ;;  %v4359_v52 = vadd.f32 %v4272_v56, %v11238_v49  ;;  %v9184_v29 = vpop.f32.mrf.mxu0  ;;  %v11606_v22 = vpop.permute.xlu0 %6715 }
 0x28d   : > { %v9086_v38 = vpop.f32.mrf.mxu1 }
 0x28e   : > { %12069 = vst [vmem:[#allocation23_spill] sm:$0xff] %v11595_v44  ;;  %v11600_v12 = vadd.f32 %v4982_v51, %v4359_v52  ;;  %v4362_v41 = vadd.f32 %v9086_v38, %v12071_v28  ;;  %v4992_v31 = vpop.f32.mrf.mxu0  ;;  %v11611_v52 = vpop.permute.xlu1 %6720 }
 0x28f   : > { %v4282_v21 = vpop.f32.mrf.mxu1 }
 0x290   : > { %12070 = vst [vmem:[#allocation24_spill] sm:$0xff] %v11600_v12  ;;  %v11603_v61 = vadd.f32 %v9184_v29, %v4362_v41  ;;  %v4361_v62 = vadd.f32 %v4282_v21, %v11252_v55  ;;  %v9187_v7 = vpop.f32.mrf.mxu0 }
 0x291   : > { %v9089_v20 = vpop.f32.mrf.mxu1 }
 0x292   : > { %12072 = vst [vmem:[#allocation25_spill] sm:$0xff] %v11603_v61  ;;  %v11608_v49 = vadd.f32 %v4992_v31, %v4361_v62  ;;  %v4364_v56 = vadd.f32 %v9089_v20, %v11261_v50  ;;  %v5002_v51 = vpop.f32.mrf.mxu0  ;;  %v11626_v31 = vpop.permute.xlu0 %6725 }
 0x293   : > { %v4292_v44 = vpop.f32.mrf.mxu1 }
 0x294   : > { %12073 = vst [vmem:[#allocation26_spill] sm:$0xff] %v11608_v49  ;;  %v11613_v38 = vadd.f32 %v9187_v7, %v4364_v56  ;;  %v4363_v29 = vadd.f32 %v4292_v44, %v11266_v13  ;;  %v9290_v41 = vpop.f32.mrf.mxu0  ;;  %v11629_v7 = vpop.permute.xlu1 %6730 }
 0x295   : > { %v9192_v28 = vpop.f32.mrf.mxu1 }
 0x296   : > { %12074 = vst [vmem:[#allocation27_spill] sm:$0xff] %v11613_v38  ;;  %v11616_v61 = vadd.f32 %v5002_v51, %v4363_v29  ;;  %v5722_v55 = vadd.f32 %v9192_v28, %v11275_v43  ;;  %v6112_v21 = vpop.f32.mrf.mxu0 }
 0x297   : > { %v5402_v50 = vpop.f32.mrf.mxu1 }
 0x298   : > { %12075 = vst [vmem:[#allocation28_spill] sm:$0xff] %v11616_v61  ;;  %v6432_v62 = vadd.f32 %v9290_v41, %v5722_v55  ;;  %v5721_v13 = vadd.f32 %v5402_v50, %v11280_v46  ;;  %v9293_v20 = vpop.f32.mrf.mxu0  ;;  %v11637_v50 = vpop.permute.xlu0 %6735 }
 0x299   : > { %v9195_v44 = vpop.f32.mrf.mxu1 }
 0x29a   : > { %6496 = vst [vmem:[%s11624_s22 + $0x8] sm:$0xff] %v6432_v62  ;;  %v6944_v43 = vmul.f32 %v11502_v39, %v6432_v62  ;;  %v6431_v56 = vadd.f32 %v6112_v21, %v5721_v13  ;;  %v5724_v51 = vadd.f32 %v9195_v44, %v11289_v15  ;;  %v6122_v28 = vpop.f32.mrf.mxu0  ;;  %v11642_v44 = vpop.permute.xlu1 %6740 }
 0x29b   : > { %v5412_v29 = vpop.f32.mrf.mxu1 }
 0x29c   : > { %6495 = vst [vmem:[%s11624_s22] sm:$0xff] %v6431_v56  ;;  %v6943_v61 = vmul.f32 %v11489_v8, %v6431_v56  ;;  %v6434_v38 = vadd.f32 %v9293_v20, %v5724_v51  ;;  %v5723_v46 = vadd.f32 %v5412_v29, %v11294_v40  ;;  %v9296_v55 = vpop.f32.mrf.mxu0  ;;  %v7077_v49 = vmul.f32 %v6944_v43, %v6432_v62 }
 0x29d   : > { %v9198_v41 = vpop.f32.mrf.mxu1 }
 0x29e   : > { %v7007_v12 = vadd.f32 %v6944_v43, %v6943_v61  ;;  %v7076_v58 = vmul.f32 %v6943_v61, %v6431_v56  ;;  %6498 = vst [vmem:[%s11624_s22 + $0x18] sm:$0xff] %v6434_v38  ;;  %v6433_v39 = vadd.f32 %v6122_v28, %v5723_v46  ;;  %v6946_v15 = vmul.f32 %v11507_v23, %v6434_v38  ;;  %v6132_v8 = vpop.f32.mrf.mxu0 }
 0x29f   : > { %v5726_v21 = vadd.f32 %v9198_v41, %v11303_v0  ;;  %v5422_v13 = vpop.f32.mrf.mxu1  ;;  %v11650_v41 = vpop.permute.xlu0 %6745 }
 0x2a0   : > { %v7140_v20 = vadd.f32 %v7077_v49, %v7076_v58  ;;  %6497 = vst [vmem:[%s11624_s22 + $0x10] sm:$0xff] %v6433_v39  ;;  %v6945_v40 = vmul.f32 %v11494_v9, %v6433_v39  ;;  %v5725_v62 = vadd.f32 %v5422_v13, %v11308_v59  ;;  %v9299_v56 = vpop.f32.mrf.mxu0  ;;  %v7079_v28 = vmul.f32 %v6946_v15, %v6434_v38  ;;  %v11655_v38 = vpop.permute.xlu1 %6750 }
 0x2a1   : > { %v6436_v43 = vadd.f32 %v9296_v55, %v5726_v21  ;;  %v9201_v61 = vpop.f32.mrf.mxu1 }
 0x2a2   : > { %v7008_v51 = vadd.f32 %v7007_v12, %v6945_v40  ;;  %v7078_v29 = vmul.f32 %v6945_v40, %v6433_v39  ;;  %v6435_v23 = vadd.f32 %v6132_v8, %v5725_v62  ;;  %v5728_v0 = vadd.f32 %v9201_v61, %v11317_v5  ;;  %v6142_v49 = vpop.f32.mrf.mxu0 }
 0x2a3   : > { %6500 = vst [vmem:[%s11624_s22 + $0x28] sm:$0xff] %v6436_v43  ;;  %v6948_v46 = vmul.f32 %v11520_v35, %v6436_v43  ;;  %v5432_v58 = vpop.f32.mrf.mxu1 }
 0x2a4   : > { %v7141_v9 = vadd.f32 %v7140_v20, %v7078_v29  ;;  %6499 = vst [vmem:[%s11624_s22 + $0x20] sm:$0xff] %v6435_v23  ;;  %v6947_v59 = vmul.f32 %v11515_v19, %v6435_v23  ;;  %v7009_v55 = vadd.f32 %v7008_v51, %v6946_v15  ;;  %v6438_v21 = vadd.f32 %v9299_v56, %v5728_v0  ;;  %v9302_v5 = vpop.f32.mrf.mxu0 }
 0x2a5   : > { %v5727_v12 = vadd.f32 %v5432_v58, %v11322_v32  ;;  %v9204_v39 = vpop.f32.mrf.mxu1  ;;  %v7081_v29 = vmul.f32 %v6948_v46, %v6436_v43  ;;  %v11663_v58 = vpop.permute.xlu0 %6755 }
 0x2a6   : > { %v7010_v13 = vadd.f32 %v7009_v55, %v6947_v59  ;;  %v7080_v35 = vmul.f32 %v6947_v59, %v6435_v23  ;;  %v7142_v8 = vadd.f32 %v7141_v9, %v7079_v28  ;;  %6502 = vst [vmem:[%s11624_s22 + $0x38] sm:$0xff] %v6438_v21  ;;  %v5730_v62 = vadd.f32 %v9204_v39, %v11331_v63  ;;  %v6152_v61 = vpop.f32.mrf.mxu0 }
 0x2a7   : > { %v6437_v40 = vadd.f32 %v6142_v49, %v5727_v12  ;;  %v5442_v20 = vpop.f32.mrf.mxu1  ;;  %v6950_v56 = vmul.f32 %v11533_v27, %v6438_v21  ;;  %v11667_v27 = vpop.permute.xlu1 %6760 }
 0x2a8   : > { %v7143_v19 = vadd.f32 %v7142_v8, %v7080_v35  ;;  %v7011_v15 = vadd.f32 %v7010_v13, %v6948_v46  ;;  %v5729_v32 = vadd.f32 %v5442_v20, %v11336_v53  ;;  %v6440_v23 = vadd.f32 %v9302_v5, %v5730_v62  ;;  %v9305_v28 = vpop.f32.mrf.mxu0 }
 0x2a9   : > { %6501 = vst [vmem:[%s11624_s22 + $0x30] sm:$0xff] %v6437_v40  ;;  %v6949_v51 = vmul.f32 %v11528_v17, %v6437_v40  ;;  %v9207_v0 = vpop.f32.mrf.mxu1  ;;  %v7083_v39 = vmul.f32 %v6950_v56, %v6438_v21 }
 0x2aa   : > { %v7144_v63 = vadd.f32 %v7143_v19, %v7081_v29  ;;  %v6439_v49 = vadd.f32 %v6152_v61, %v5729_v32  ;;  %v5732_v43 = vadd.f32 %v9207_v0, %v11345_v16  ;;  %6504 = vst [vmem:[%s11624_s22 + $0x48] sm:$0xff] %v6440_v23  ;;  %v6162_v46 = vpop.f32.mrf.mxu0  ;;  %v6952_v13 = vmul.f32 %v11546_v26, %v6440_v23 }
 0x2ab   : > { %v7012_v9 = vadd.f32 %v7011_v15, %v6949_v51  ;;  %v7082_v59 = vmul.f32 %v6949_v51, %v6437_v40  ;;  %v5452_v53 = vpop.f32.mrf.mxu1  ;;  %v11675_v15 = vpop.permute.xlu0 %6765 }
 0x2ac   : > { %6503 = vst [vmem:[%s11624_s22 + $0x40] sm:$0xff] %v6439_v49  ;;  %v6951_v17 = vmul.f32 %v11541_v24, %v6439_v49  ;;  %v6442_v55 = vadd.f32 %v9305_v28, %v5732_v43  ;;  %v5731_v12 = vadd.f32 %v5452_v53, %v11350_v3  ;;  %v9308_v8 = vpop.f32.mrf.mxu0  ;;  %v7085_v32 = vmul.f32 %v6952_v13, %v6440_v23 }
 0x2ad   : > { %v7145_v5 = vadd.f32 %v7144_v63, %v7082_v59  ;;  %v7013_v16 = vadd.f32 %v7012_v9, %v6950_v56  ;;  %v9210_v35 = vpop.f32.mrf.mxu1  ;;  %v11681_v63 = vpop.permute.xlu1 %6770 }
 0x2ae   : > { %v7084_v40 = vmul.f32 %v6951_v17, %v6439_v49  ;;  %6506 = vst [vmem:[%s11624_s22 + $0x58] sm:$0xff] %v6442_v55  ;;  %v6441_v62 = vadd.f32 %v6162_v46, %v5731_v12  ;;  %v5734_v20 = vadd.f32 %v9210_v35, %v11359_v48  ;;  %v6172_v19 = vpop.f32.mrf.mxu0  ;;  %v6954_v51 = vmul.f32 %v11559_v10, %v6442_v55 }
 0x2af   : > { %v7014_v61 = vadd.f32 %v7013_v16, %v6951_v17  ;;  %v7146_v29 = vadd.f32 %v7145_v5, %v7083_v39  ;;  %v5462_v24 = vpop.f32.mrf.mxu1 }
 0x2b0   : > { %6505 = vst [vmem:[%s11624_s22 + $0x50] sm:$0xff] %v6441_v62  ;;  %v6953_v3 = vmul.f32 %v11554_v25, %v6441_v62  ;;  %v6444_v21 = vadd.f32 %v9308_v8, %v5734_v20  ;;  %v5733_v26 = vadd.f32 %v5462_v24, %v11364_v11  ;;  %v9311_v28 = vpop.f32.mrf.mxu0  ;;  %v7087_v17 = vmul.f32 %v6954_v51, %v6442_v55 }
 0x2b1   : > { %v7147_v56 = vadd.f32 %v7146_v29, %v7084_v40  ;;  %v7015_v0 = vadd.f32 %v7014_v61, %v6952_v13  ;;  %v9213_v48 = vpop.f32.mrf.mxu1  ;;  %v11693_v55 = vpop.permute.xlu1 %6780 }
 0x2b2   : > { %v7086_v49 = vmul.f32 %v6953_v3, %v6441_v62  ;;  %6508 = vst [vmem:[%s11624_s22 + $0x68] sm:$0xff] %v6444_v21  ;;  %v6443_v43 = vadd.f32 %v6172_v19, %v5733_v26  ;;  %v5736_v9 = vadd.f32 %v9213_v48, %v11373_v42  ;;  %v6182_v11 = vpop.f32.mrf.mxu0  ;;  %v6956_v39 = vmul.f32 %v11572_v1, %v6444_v21  ;;  %v11689_v42 = vpop.permute.xlu0 %6775 }
 0x2b3   : > { %v7016_v59 = vadd.f32 %v7015_v0, %v6953_v3  ;;  %v7148_v25 = vadd.f32 %v7147_v56, %v7085_v32  ;;  %v5472_v53 = vpop.f32.mrf.mxu1 }
 0x2b4   : > { %6507 = vst [vmem:[%s11624_s22 + $0x60] sm:$0xff] %v6443_v43  ;;  %v6955_v23 = vmul.f32 %v11567_v6, %v6443_v43  ;;  %v6446_v46 = vadd.f32 %v9311_v28, %v5736_v9  ;;  %v5735_v10 = vadd.f32 %v5472_v53, %v11378_v34  ;;  %v9314_v16 = vpop.f32.mrf.mxu0  ;;  %v7089_v24 = vmul.f32 %v6956_v39, %v6444_v21 }
 0x2b5   : > { %v7149_v12 = vadd.f32 %v7148_v25, %v7086_v49  ;;  %v7017_v5 = vadd.f32 %v7016_v59, %v6954_v51  ;;  %v9216_v13 = vpop.f32.mrf.mxu1 }
 0x2b6   : > { %v7088_v35 = vmul.f32 %v6955_v23, %v6443_v43  ;;  %6510 = vst [vmem:[%s11624_s22 + $0x78] sm:$0xff] %v6446_v46  ;;  %v6445_v8 = vadd.f32 %v6182_v11, %v5735_v10  ;;  %v5738_v40 = vadd.f32 %v9216_v13, %v11387_v14  ;;  %v6192_v34 = vpop.f32.mrf.mxu0  ;;  %v6958_v3 = vmul.f32 %v11585_v4, %v6446_v46  ;;  %v11701_v43 = vpop.permute.xlu0 %6785 }
 0x2b7   : > { %v7018_v62 = vadd.f32 %v7017_v5, %v6955_v23  ;;  %v7150_v6 = vadd.f32 %v7149_v12, %v7087_v17  ;;  %v5482_v20 = vpop.f32.mrf.mxu1  ;;  %v11707_v23 = vpop.permute.xlu1 %6790 }
 0x2b8   : > { %6509 = vst [vmem:[%s11624_s22 + $0x70] sm:$0xff] %v6445_v8  ;;  %v6957_v1 = vmul.f32 %v11580_v57, %v6445_v8  ;;  %v6448_v61 = vadd.f32 %v9314_v16, %v5738_v40  ;;  %v5737_v29 = vadd.f32 %v5482_v20, %v11392_v30  ;;  %v9317_v32 = vpop.f32.mrf.mxu0  ;;  %v7091_v9 = vmul.f32 %v6958_v3, %v6446_v46 }
 0x2b9   : > { %v7151_v19 = vadd.f32 %v7150_v6, %v7088_v35  ;;  %v7019_v26 = vadd.f32 %v7018_v62, %v6956_v39  ;;  %v9219_v14 = vpop.f32.mrf.mxu1 }
 0x2ba   : > { %v7090_v56 = vmul.f32 %v6957_v1, %v6445_v8  ;;  %6512 = vst [vmem:[%s11624_s22 + $0x88] sm:$0xff] %v6448_v61  ;;  %v6447_v51 = vadd.f32 %v6192_v34, %v5737_v29  ;;  %v5740_v0 = vadd.f32 %v9219_v14, %v11401_v54  ;;  %v6202_v49 = vpop.f32.mrf.mxu0  ;;  %v6960_v25 = vmul.f32 %v11598_v18, %v6448_v61 }
 0x2bb   : > { %v7020_v48 = vadd.f32 %v7019_v26, %v6957_v1  ;;  %v7152_v28 = vadd.f32 %v7151_v19, %v7089_v24  ;;  %v5492_v57 = vpop.f32.mrf.mxu1 }
 0x2bc   : > { %6511 = vst [vmem:[%s11624_s22 + $0x80] sm:$0xff] %v6447_v51  ;;  %v6959_v30 = vmul.f32 %v11593_v33, %v6447_v51  ;;  %v6450_v21 = vadd.f32 %v9317_v32, %v5740_v0  ;;  %v5739_v4 = vadd.f32 %v5492_v57, %v11406_v36  ;;  %v9320_v11 = vpop.f32.mrf.mxu0  ;;  %v7093_v16 = vmul.f32 %v6960_v25, %v6448_v61  ;;  %v11719_v61 = vpop.permute.xlu1 %6800 }
 0x2bd   : > { %v7153_v59 = vadd.f32 %v7152_v28, %v7090_v56  ;;  %v7021_v53 = vadd.f32 %v7020_v48, %v6958_v3  ;;  %v9222_v54 = vpop.f32.mrf.mxu1  ;;  %v12076_v28 = vld [vmem:[#allocation32_spill] sm:$0xff] }
 0x2be   : > { %v7092_v10 = vmul.f32 %v6959_v30, %v6447_v51  ;;  %6514 = vst [vmem:[%s11624_s22 + $0x98] sm:$0xff] %v6450_v21  ;;  %v6449_v17 = vadd.f32 %v6202_v49, %v5739_v4  ;;  %v5742_v12 = vadd.f32 %v9222_v54, %v11415_v2  ;;  %v6212_v36 = vpop.f32.mrf.mxu0  ;;  %v6962_v8 = vmul.f32 %v11611_v52, %v6450_v21  ;;  %v11715_v2 = vpop.permute.xlu0 %6795 }
 0x2bf   : > { %v7022_v39 = vadd.f32 %v7021_v53, %v6959_v30  ;;  %v7154_v33 = vadd.f32 %v7153_v59, %v7091_v9  ;;  %v5502_v5 = vpop.f32.mrf.mxu1 }
 0x2c0   : > { %6513 = vst [vmem:[%s11624_s22 + $0x90] sm:$0xff] %v6449_v17  ;;  %v6961_v46 = vmul.f32 %v11606_v22, %v6449_v17  ;;  %v6452_v13 = vadd.f32 %v9320_v11, %v5742_v12  ;;  %v5741_v18 = vadd.f32 %v5502_v5, %v11420_v47  ;;  %v9323_v6 = vpop.f32.mrf.mxu0  ;;  %v7095_v26 = vmul.f32 %v6962_v8, %v6450_v21 }
 0x2c1   : > { %v7155_v35 = vadd.f32 %v7154_v33, %v7092_v10  ;;  %v7023_v40 = vadd.f32 %v7022_v39, %v6960_v25  ;;  %v9225_v62 = vpop.f32.mrf.mxu1  ;;  %v12077_v33 = vld [vmem:[#allocation33_spill] sm:$0xff] }
 0x2c2   : > { %v7094_v20 = vmul.f32 %v6961_v46, %v6449_v17  ;;  %6516 = vst [vmem:[%s11624_s22 + $0xa8] sm:$0xff] %v6452_v13  ;;  %v6451_v34 = vadd.f32 %v6212_v36, %v5741_v18  ;;  %v5744_v1 = vadd.f32 %v9225_v62, %v11429_v45  ;;  %v6222_v47 = vpop.f32.mrf.mxu0  ;;  %v6964_v32 = vmul.f32 %v11629_v7, %v6452_v13  ;;  %v11727_v9 = vpop.permute.xlu0 %6805 }
 0x2c3   : > { %v7024_v29 = vadd.f32 %v7023_v40, %v6961_v46  ;;  %v7156_v22 = vadd.f32 %v7155_v35, %v7093_v16  ;;  %v5512_v24 = vpop.f32.mrf.mxu1  ;;  %v11733_v17 = vpop.permute.xlu1 %6810 }
 0x2c4   : > { %6515 = vst [vmem:[%s11624_s22 + $0xa0] sm:$0xff] %v6451_v34  ;;  %v6963_v52 = vmul.f32 %v11626_v31, %v6451_v34  ;;  %v6454_v19 = vadd.f32 %v9323_v6, %v5744_v1  ;;  %v5743_v3 = vadd.f32 %v5512_v24, %v11434_v37  ;;  %v9326_v51 = vpop.f32.mrf.mxu0  ;;  %v7097_v59 = vmul.f32 %v6964_v32, %v6452_v13 }
 0x2c5   : > { %v7157_v14 = vadd.f32 %v7156_v22, %v7094_v20  ;;  %v7025_v56 = vadd.f32 %v7024_v29, %v6962_v8  ;;  %v9228_v45 = vpop.f32.mrf.mxu1  ;;  %v12079_v22 = vld [vmem:[#allocation35_spill] sm:$0xff] }
 0x2c6   : > { %v7096_v0 = vmul.f32 %v6963_v52, %v6451_v34  ;;  %6518 = vst [vmem:[%s11624_s22 + $0xb8] sm:$0xff] %v6454_v19  ;;  %v6453_v48 = vadd.f32 %v6222_v47, %v5743_v3  ;;  %v5746_v57 = vadd.f32 %v9228_v45, %v12076_v28  ;;  %v6232_v4 = vpop.f32.mrf.mxu0  ;;  %v6966_v53 = vmul.f32 %v11642_v44, %v6454_v19  ;;  %v12078_v44 = vld [vmem:[#allocation34_spill] sm:$0xff]  ;;  %v11741_v34 = vpop.permute.xlu0 %6815 }
 0x2c7   : > { %v7026_v49 = vadd.f32 %v7025_v56, %v6963_v52  ;;  %v7158_v30 = vadd.f32 %v7157_v14, %v7095_v26  ;;  %v5522_v31 = vpop.f32.mrf.mxu1  ;;  %v12080_v14 = vld [vmem:[#allocation36_spill] sm:$0xff] }
 0x2c8   : > { %6517 = vst [vmem:[%s11624_s22 + $0xb0] sm:$0xff] %v6453_v48  ;;  %v6965_v37 = vmul.f32 %v11637_v50, %v6453_v48  ;;  %v6456_v21 = vadd.f32 %v9326_v51, %v5746_v57  ;;  %v5745_v7 = vadd.f32 %v5522_v31, %v11448_v60  ;;  %v9329_v10 = vpop.f32.mrf.mxu0  ;;  %v7099_v35 = vmul.f32 %v6966_v53, %v6454_v19  ;;  %v11745_v19 = vpop.permute.xlu1 %6820 }
 0x2c9   : > { %v7159_v25 = vadd.f32 %v7158_v30, %v7096_v0  ;;  %v7027_v54 = vadd.f32 %v7026_v49, %v6964_v32  ;;  %v9231_v11 = vpop.f32.mrf.mxu1  ;;  %v12081_v30 = vld [vmem:[#allocation37_spill] sm:$0xff] }
 0x2ca   : > { %v7098_v12 = vmul.f32 %v6965_v37, %v6453_v48  ;;  %6520 = vst [vmem:[%s11624_s22 + $0xc8] sm:$0xff] %v6456_v21  ;;  %v6455_v39 = vadd.f32 %v6232_v4, %v5745_v7  ;;  %v5748_v5 = vadd.f32 %v9231_v11, %v12077_v33  ;;  %v6242_v60 = vpop.f32.mrf.mxu0  ;;  %v6968_v40 = vmul.f32 %v11655_v38, %v6456_v21 }
 0x2cb   : > { %v7028_v36 = vadd.f32 %v7027_v54, %v6965_v37  ;;  %v7160_v50 = vadd.f32 %v7159_v25, %v7097_v59  ;;  %v5532_v46 = vpop.f32.mrf.mxu1  ;;  %v11753_v59 = vpop.permute.xlu0 %6825 }
 0x2cc   : > { %6519 = vst [vmem:[%s11624_s22 + $0xc0] sm:$0xff] %v6455_v39  ;;  %v6967_v13 = vmul.f32 %v11650_v41, %v6455_v39  ;;  %v6458_v18 = vadd.f32 %v9329_v10, %v5748_v5  ;;  %v5747_v16 = vadd.f32 %v5532_v46, %v12078_v44  ;;  %v9332_v20 = vpop.f32.mrf.mxu0  ;;  %v7101_v56 = vmul.f32 %v6968_v40, %v6456_v21  ;;  %v11759_v5 = vpop.permute.xlu1 %6830  ;;  %v12083_v46 = vld [vmem:[#allocation39_spill] sm:$0xff] }
 0x2cd   : > { %v7161_v8 = vadd.f32 %v7160_v50, %v7098_v12  ;;  %v7029_v62 = vadd.f32 %v7028_v36, %v6966_v53  ;;  %v9234_v6 = vpop.f32.mrf.mxu1 }
 0x2ce   : > { %v7100_v1 = vmul.f32 %v6967_v13, %v6455_v39  ;;  %6522 = vst [vmem:[%s11624_s22 + $0xd8] sm:$0xff] %v6458_v18  ;;  %v6457_v29 = vadd.f32 %v6242_v60, %v5747_v16  ;;  %v5750_v24 = vadd.f32 %v9234_v6, %v12079_v22  ;;  %v6252_v3 = vpop.f32.mrf.mxu0  ;;  %v6970_v51 = vmul.f32 %v11667_v27, %v6458_v18  ;;  %v12082_v27 = vld [vmem:[#allocation38_spill] sm:$0xff] }
 0x2cf   : > { %v7030_v47 = vadd.f32 %v7029_v62, %v6967_v13  ;;  %v7162_v41 = vadd.f32 %v7161_v8, %v7099_v35  ;;  %v5542_v52 = vpop.f32.mrf.mxu1  ;;  %v11767_v22 = vpop.permute.xlu0 %6835 }
 0x2d0   : > { %6521 = vst [vmem:[%s11624_s22 + $0xd0] sm:$0xff] %v6457_v29  ;;  %v6969_v38 = vmul.f32 %v11663_v58, %v6457_v29  ;;  %v6460_v26 = vadd.f32 %v9332_v20, %v5750_v24  ;;  %v5749_v32 = vadd.f32 %v5542_v52, %v12080_v14  ;;  %v9335_v28 = vpop.f32.mrf.mxu0  ;;  %v7103_v54 = vmul.f32 %v6970_v51, %v6458_v18 }
 0x2d1   : > { %v7163_v45 = vadd.f32 %v7162_v41, %v7100_v1  ;;  %v7031_v0 = vadd.f32 %v7030_v47, %v6968_v40  ;;  %v9237_v48 = vpop.f32.mrf.mxu1  ;;  %v12085_v41 = vld [vmem:[#allocation43_spill] sm:$0xff] }
 0x2d2   : > { %v7102_v57 = vmul.f32 %v6969_v38, %v6457_v29  ;;  %6524 = vst [vmem:[%s11624_s22 + $0xe8] sm:$0xff] %v6460_v26  ;;  %v6459_v49 = vadd.f32 %v6252_v3, %v5749_v32  ;;  %v5752_v31 = vadd.f32 %v9237_v48, %v12081_v30  ;;  %v6262_v7 = vpop.f32.mrf.mxu0  ;;  %v6972_v10 = vmul.f32 %v11681_v63, %v6460_v26  ;;  %v12084_v63 = vld [vmem:[#allocation41_spill] sm:$0xff] }
 0x2d3   : > { %v7032_v4 = vadd.f32 %v7031_v0, %v6969_v38  ;;  %v7164_v37 = vadd.f32 %v7163_v45, %v7101_v56  ;;  %v5552_v58 = vpop.f32.mrf.mxu1  ;;  %v12086_v56 = vld [vmem:[#allocation2_spill] sm:$0xff] }
 0x2d4   : > { %6523 = vst [vmem:[%s11624_s22 + $0xe0] sm:$0xff] %v6459_v49  ;;  %v6971_v21 = vmul.f32 %v11675_v15, %v6459_v49  ;;  %v6462_v25 = vadd.f32 %v9335_v28, %v5752_v31  ;;  %v5751_v53 = vadd.f32 %v5552_v58, %v12082_v27  ;;  %v9338_v33 = vpop.f32.mrf.mxu0  ;;  %v7105_v40 = vmul.f32 %v6972_v10, %v6460_v26  ;;  %v11771_v26 = vpop.permute.xlu1 %6840 }
 0x2d5   : > { %v7165_v11 = vadd.f32 %v7164_v37, %v7102_v57  ;;  %v7033_v12 = vadd.f32 %v7032_v4, %v6970_v51  ;;  %v9240_v39 = vpop.f32.mrf.mxu1  ;;  %v12087_v4 = vld [vmem:[#allocation3_spill] sm:$0xff]  ;;  %v11779_v27 = vpop.permute.xlu0 %6845 }
 0x2d6   : > { %v7104_v36 = vmul.f32 %v6971_v21, %v6459_v49  ;;  %6526 = vst [vmem:[%s11624_s22 + $0xf8] sm:$0xff] %v6462_v25  ;;  %v6461_v50 = vadd.f32 %v6262_v7, %v5751_v53  ;;  %v5754_v60 = vadd.f32 %v9240_v39, %v12083_v46  ;;  %v6272_v16 = vpop.f32.mrf.mxu0  ;;  %v6974_v6 = vmul.f32 %v11693_v55, %v6462_v25 }
 0x2d7   : > { %v7034_v13 = vadd.f32 %v7033_v12, %v6971_v21  ;;  %v7166_v15 = vadd.f32 %v7165_v11, %v7103_v54  ;;  %v5562_v44 = vpop.f32.mrf.mxu1 }
 0x2d8   : > { %6525 = vst [vmem:[%s11624_s22 + $0xf0] sm:$0xff] %v6461_v50  ;;  %v6973_v18 = vmul.f32 %v11689_v42, %v6461_v50  ;;  %v6464_v35 = vadd.f32 %v9338_v33, %v5754_v60  ;;  %v5753_v8 = vadd.f32 %v5562_v44, %v12084_v63  ;;  %v9341_v29 = vpop.f32.mrf.mxu0  ;;  %v7107_v51 = vmul.f32 %v6974_v6, %v6462_v25 }
 0x2d9   : > { %v7167_v62 = vadd.f32 %v7166_v15, %v7104_v36  ;;  %v7035_v20 = vadd.f32 %v7034_v13, %v6972_v10  ;;  %v9243_v1 = vpop.f32.mrf.mxu1  ;;  %v12089_v13 = vld [vmem:[#allocation5_spill] sm:$0xff] }
 0x2da   : > { %v7106_v24 = vmul.f32 %v6973_v18, %v6461_v50  ;;  %6528 = vst [vmem:[%s11624_s22 + $0x108] sm:$0xff] %v6464_v35  ;;  %v6463_v47 = vadd.f32 %v6272_v16, %v5753_v8  ;;  %v5756_v52 = vadd.f32 %v9243_v1, %v12085_v41  ;;  %v6282_v14 = vpop.f32.mrf.mxu0  ;;  %v6976_v48 = vmul.f32 %v11707_v23, %v6464_v35  ;;  %v12088_v23 = vld [vmem:[#allocation4_spill] sm:$0xff]  ;;  %v11785_v50 = vpop.permute.xlu1 %6850 }
 0x2db   : > { %v7036_v3 = vadd.f32 %v7035_v20, %v6973_v18  ;;  %v7168_v42 = vadd.f32 %v7167_v62, %v7105_v40  ;;  %v5572_v38 = vpop.f32.mrf.mxu1 }
 0x2dc   : > { %6527 = vst [vmem:[%s11624_s22 + $0x100] sm:$0xff] %v6463_v47  ;;  %v6975_v55 = vmul.f32 %v11701_v43, %v6463_v47  ;;  %v6466_v32 = vadd.f32 %v9341_v29, %v5756_v52  ;;  %v5755_v45 = vadd.f32 %v5572_v38, %v12086_v56  ;;  %v9344_v49 = vpop.f32.mrf.mxu0  ;;  %v7109_v11 = vmul.f32 %v6976_v48, %v6464_v35  ;;  %v12091_v52 = vld [vmem:[#allocation7_spill] sm:$0xff]  ;;  %v12092_v56 = vld [vmem:[#allocation40_spill] sm:$0xff] }
 0x2dd   : > { %v7169_v0 = vadd.f32 %v7168_v42, %v7106_v24  ;;  %v7037_v28 = vadd.f32 %v7036_v3, %v6974_v6  ;;  %v9246_v57 = vpop.f32.mrf.mxu1  ;;  %v11793_v24 = vpop.permute.xlu0 %6855 }
 0x2de   : > { %v7108_v30 = vmul.f32 %v6975_v55, %v6463_v47  ;;  %6530 = vst [vmem:[%s11624_s22 + $0x118] sm:$0xff] %v6466_v32  ;;  %v6465_v31 = vadd.f32 %v6282_v14, %v5755_v45  ;;  %v5758_v37 = vadd.f32 %v9246_v57, %v12087_v4  ;;  %v6292_v21 = vpop.f32.mrf.mxu0  ;;  %v6978_v12 = vmul.f32 %v11719_v61, %v6466_v32  ;;  %v12090_v61 = vld [vmem:[#allocation6_spill] sm:$0xff] }
 0x2df   : > { %v7038_v58 = vadd.f32 %v7037_v28, %v6975_v55  ;;  %v7170_v7 = vadd.f32 %v7169_v0, %v7107_v51  ;;  %v5582_v43 = vpop.f32.mrf.mxu1  ;;  %v11797_v55 = vpop.permute.xlu1 %6860  ;;  %v12093_v4 = vld [vmem:[#allocation42_spill] sm:$0xff] }
 0x2e0   : > { %6529 = vst [vmem:[%s11624_s22 + $0x110] sm:$0xff] %v6465_v31  ;;  %v6977_v25 = vmul.f32 %v11715_v2, %v6465_v31  ;;  %v6468_v53 = vadd.f32 %v9344_v49, %v5758_v37  ;;  %v5757_v54 = vadd.f32 %v5582_v43, %v12088_v23  ;;  %v9347_v36 = vpop.f32.mrf.mxu0  ;;  %v7111_v40 = vmul.f32 %v6978_v12, %v6466_v32 }
 0x2e1   : > { %v7171_v10 = vadd.f32 %v7170_v7, %v7108_v30  ;;  %v7039_v39 = vadd.f32 %v7038_v58, %v6976_v48  ;;  %v9249_v33 = vpop.f32.mrf.mxu1 }
 0x2e2   : > { %v7110_v46 = vmul.f32 %v6977_v25, %v6465_v31  ;;  %6532 = vst [vmem:[%s11624_s22 + $0x128] sm:$0xff] %v6468_v53  ;;  %v6467_v60 = vadd.f32 %v6292_v21, %v5757_v54  ;;  %v5760_v15 = vadd.f32 %v9249_v33, %v12089_v13  ;;  %v6302_v18 = vpop.f32.mrf.mxu0  ;;  %v6980_v6 = vmul.f32 %v11733_v17, %v6468_v53  ;;  %v11805_v21 = vpop.permute.xlu0 %6865  ;;  %v12095_v13 = vld [vmem:[#allocation9_spill] sm:$0xff] }
 0x2e3   : > { %v7040_v44 = vadd.f32 %v7039_v39, %v6977_v25  ;;  %v7172_v2 = vadd.f32 %v7171_v10, %v7109_v11  ;;  %v5592_v16 = vpop.f32.mrf.mxu1 }
 0x2e4   : > { %6531 = vst [vmem:[%s11624_s22 + $0x120] sm:$0xff] %v6467_v60  ;;  %v6979_v35 = vmul.f32 %v11727_v9, %v6467_v60  ;;  %v6470_v63 = vadd.f32 %v9347_v36, %v5760_v15  ;;  %v5759_v8 = vadd.f32 %v5592_v16, %v12090_v61  ;;  %v9350_v29 = vpop.f32.mrf.mxu0  ;;  %v7113_v51 = vmul.f32 %v6980_v6, %v6468_v53  ;;  %v11811_v36 = vpop.permute.xlu1 %6870 }
 0x2e5   : > { %v7173_v62 = vadd.f32 %v7172_v2, %v7110_v46  ;;  %v7041_v20 = vadd.f32 %v7040_v44, %v6978_v12  ;;  %v9252_v1 = vpop.f32.mrf.mxu1 }
 0x2e6   : > { %v7112_v47 = vmul.f32 %v6979_v35, %v6467_v60  ;;  %6534 = vst [vmem:[%s11624_s22 + $0x138] sm:$0xff] %v6470_v63  ;;  %v6469_v41 = vadd.f32 %v6302_v18, %v5759_v8  ;;  %v5762_v3 = vadd.f32 %v9252_v1, %v12091_v52  ;;  %v6312_v14 = vpop.f32.mrf.mxu0  ;;  %v6982_v48 = vmul.f32 %v11745_v19, %v6470_v63  ;;  %v12094_v19 = vld [vmem:[#allocation8_spill] sm:$0xff]  ;;  %v11819_v1 = vpop.permute.xlu0 %6875 }
 0x2e7   : > { %v7042_v42 = vadd.f32 %v7041_v20, %v6979_v35  ;;  %v7174_v9 = vadd.f32 %v7173_v62, %v7111_v40  ;;  %v5602_v38 = vpop.f32.mrf.mxu1 }
 0x2e8   : > { %6533 = vst [vmem:[%s11624_s22 + $0x130] sm:$0xff] %v6469_v41  ;;  %v6981_v17 = vmul.f32 %v11741_v34, %v6469_v41  ;;  %v6472_v32 = vadd.f32 %v9350_v29, %v5762_v3  ;;  %v5761_v45 = vadd.f32 %v5602_v38, %v12092_v56  ;;  %v9353_v49 = vpop.f32.mrf.mxu0  ;;  %v7115_v54 = vmul.f32 %v6982_v48, %v6470_v63  ;;  %v11823_v38 = vpop.permute.xlu1 %6880 }
 0x2e9   : > { %v7175_v0 = vadd.f32 %v7174_v9, %v7112_v47  ;;  %v7043_v28 = vadd.f32 %v7042_v42, %v6980_v6  ;;  %v9255_v57 = vpop.f32.mrf.mxu1 }
 0x2ea   : > { %v7114_v30 = vmul.f32 %v6981_v17, %v6469_v41  ;;  %6536 = vst [vmem:[%s11624_s22 + $0x148] sm:$0xff] %v6472_v32  ;;  %v6471_v31 = vadd.f32 %v6312_v14, %v5761_v45  ;;  %v5764_v37 = vadd.f32 %v9255_v57, %v12093_v4  ;;  %v6322_v43 = vpop.f32.mrf.mxu0  ;;  %v6984_v10 = vmul.f32 %v11759_v5, %v6472_v32  ;;  %v12096_v5 = vld [vmem:[#allocation11_spill] sm:$0xff]  ;;  %v12097_v41 = vld [vmem:[#allocation10_spill] sm:$0xff] }
 0x2eb   : > { %v7044_v58 = vadd.f32 %v7043_v28, %v6981_v17  ;;  %v7176_v7 = vadd.f32 %v7175_v0, %v7113_v51  ;;  %v5612_v34 = vpop.f32.mrf.mxu1  ;;  %v12098_v17 = vld [vmem:[#allocation12_spill] sm:$0xff] }
 0x2ec   : > { %6535 = vst [vmem:[%s11624_s22 + $0x140] sm:$0xff] %v6471_v31  ;;  %v6983_v25 = vmul.f32 %v11753_v59, %v6471_v31  ;;  %v6474_v53 = vadd.f32 %v9353_v49, %v5764_v37  ;;  %v5763_v23 = vadd.f32 %v5612_v34, %v12094_v19  ;;  %v9356_v33 = vpop.f32.mrf.mxu0  ;;  %v7117_v61 = vmul.f32 %v6984_v10, %v6472_v32 }
 0x2ed   : > { %v7177_v11 = vadd.f32 %v7176_v7, %v7114_v30  ;;  %v7045_v12 = vadd.f32 %v7044_v58, %v6982_v48  ;;  %v9258_v39 = vpop.f32.mrf.mxu1  ;;  %v12099_v30 = vld [vmem:[#allocation13_spill] sm:$0xff]  ;;  %v6886_v7 = vpop.permute.xlu0 %6885 }
 0x2ee   : > { %v7116_v46 = vmul.f32 %v6983_v25, %v6471_v31  ;;  %6538 = vst [vmem:[%s11624_s22 + $0x158] sm:$0xff] %v6474_v53  ;;  %v6473_v60 = vadd.f32 %v6322_v43, %v5763_v23  ;;  %v5766_v15 = vadd.f32 %v9258_v39, %v12095_v13  ;;  %v6332_v16 = vpop.f32.mrf.mxu0  ;;  %v6986_v40 = vmul.f32 %v11771_v26, %v6474_v53 }
 0x2ef   : > { %v7046_v44 = vadd.f32 %v7045_v12, %v6983_v25  ;;  %v7178_v59 = vadd.f32 %v7177_v11, %v7115_v54  ;;  %v5622_v2 = vpop.f32.mrf.mxu1  ;;  %v12100_v25 = vld [vmem:[#allocation14_spill] sm:$0xff]  ;;  %v6891_v12 = vpop.permute.xlu1 %6890 }
 0x2f0   : > { %6537 = vst [vmem:[%s11624_s22 + $0x150] sm:$0xff] %v6473_v60  ;;  %v6985_v18 = vmul.f32 %v11767_v22, %v6473_v60  ;;  %v6476_v35 = vadd.f32 %v9356_v33, %v5766_v15  ;;  %v5765_v63 = vadd.f32 %v5622_v2, %v12096_v5  ;;  %v9359_v20 = vpop.f32.mrf.mxu0  ;;  %v7119_v56 = vmul.f32 %v6986_v40, %v6474_v53 }
 0x2f1   : > { %v7179_v8 = vadd.f32 %v7178_v59, %v7116_v46  ;;  %v7047_v62 = vadd.f32 %v7046_v44, %v6984_v10  ;;  %v9261_v6 = vpop.f32.mrf.mxu1  ;;  %v12101_v46 = vld [vmem:[#allocation15_spill] sm:$0xff] }
 0x2f2   : > { %v7118_v29 = vmul.f32 %v6985_v18, %v6473_v60  ;;  %6540 = vst [vmem:[%s11624_s22 + $0x168] sm:$0xff] %v6476_v35  ;;  %v6475_v47 = vadd.f32 %v6332_v16, %v5765_v63  ;;  %v5768_v52 = vadd.f32 %v9261_v6, %v12097_v41  ;;  %v6342_v9 = vpop.f32.mrf.mxu0  ;;  %v6988_v51 = vmul.f32 %v11785_v50, %v6476_v35  ;;  %v12102_v16 = vld [vmem:[#allocation16_spill] sm:$0xff] }
 0x2f3   : > { %v7048_v3 = vadd.f32 %v7047_v62, %v6985_v18  ;;  %v7180_v22 = vadd.f32 %v7179_v8, %v7117_v61  ;;  %v5632_v42 = vpop.f32.mrf.mxu1 }
 0x2f4   : > { %6539 = vst [vmem:[%s11624_s22 + $0x160] sm:$0xff] %v6475_v47  ;;  %v6987_v26 = vmul.f32 %v11779_v27, %v6475_v47  ;;  %v6478_v14 = vadd.f32 %v9359_v20, %v5768_v52  ;;  %v5767_v32 = vadd.f32 %v5632_v42, %v12098_v17  ;;  %v9362_v28 = vpop.f32.mrf.mxu0  ;;  %v7121_v53 = vmul.f32 %v6988_v51, %v6476_v35  ;;  %v12103_v20 = vld [vmem:[#allocation17_spill] sm:$0xff] }
 0x2f5   : > { %v7181_v45 = vadd.f32 %v7180_v22, %v7118_v29  ;;  %v7049_v0 = vadd.f32 %v7048_v3, %v6986_v40  ;;  %v9264_v48 = vpop.f32.mrf.mxu1  ;;  %v6896_v40 = vpop.permute.xlu0 %6895 }
 0x2f6   : > { %v7120_v57 = vmul.f32 %v6987_v26, %v6475_v47  ;;  %6542 = vst [vmem:[%s11624_s22 + $0x178] sm:$0xff] %v6478_v14  ;;  %v6477_v49 = vadd.f32 %v6342_v9, %v5767_v32  ;;  %v5770_v31 = vadd.f32 %v9264_v48, %v12099_v30  ;;  %v6352_v58 = vpop.f32.mrf.mxu0  ;;  %v6990_v23 = vmul.f32 %v11797_v55, %v6478_v14  ;;  %v6901_v3 = vpop.permute.xlu1 %6900  ;;  %v12105_v48 = vld [vmem:[#allocation19_spill] sm:$0xff] }
 0x2f7   : > { %v7050_v4 = vadd.f32 %v7049_v0, %v6987_v26  ;;  %v7182_v37 = vadd.f32 %v7181_v45, %v7119_v56  ;;  %v5642_v27 = vpop.f32.mrf.mxu1 }
 0x2f8   : > { %6541 = vst [vmem:[%s11624_s22 + $0x170] sm:$0xff] %v6477_v49  ;;  %v6989_v34 = vmul.f32 %v11793_v24, %v6477_v49  ;;  %v6480_v43 = vadd.f32 %v9362_v28, %v5770_v31  ;;  %v5769_v50 = vadd.f32 %v5642_v27, %v12100_v25  ;;  %v9365_v10 = vpop.f32.mrf.mxu0  ;;  %v7123_v18 = vmul.f32 %v6990_v23, %v6478_v14  ;;  %v12106_v27 = vld [vmem:[#allocation20_spill] sm:$0xff] }
 0x2f9   : > { %v7183_v19 = vadd.f32 %v7182_v37, %v7120_v57  ;;  %v7051_v54 = vadd.f32 %v7050_v4, %v6988_v51  ;;  %v9267_v11 = vpop.f32.mrf.mxu1  ;;  %v6906_v31 = vpop.permute.xlu0 %6905 }
 0x2fa   : > { %v7122_v39 = vmul.f32 %v6989_v34, %v6477_v49  ;;  %6544 = vst [vmem:[%s11624_s22 + $0x188] sm:$0xff] %v6480_v43  ;;  %v6479_v33 = vadd.f32 %v6352_v58, %v5769_v50  ;;  %v5772_v60 = vadd.f32 %v9267_v11, %v12101_v46  ;;  %v6362_v44 = vpop.f32.mrf.mxu0  ;;  %v6992_v5 = vmul.f32 %v11811_v36, %v6480_v43  ;;  %v12104_v36 = vld [vmem:[#allocation18_spill] sm:$0xff]  ;;  %v12107_v11 = vld [vmem:[#allocation21_spill] sm:$0xff] }
 0x2fb   : > { %v7052_v13 = vadd.f32 %v7051_v54, %v6989_v34  ;;  %v7184_v24 = vadd.f32 %v7183_v19, %v7121_v53  ;;  %v5652_v15 = vpop.f32.mrf.mxu1  ;;  %v6911_v19 = vpop.permute.xlu1 %6910 }
 0x2fc   : > { %6543 = vst [vmem:[%s11624_s22 + $0x180] sm:$0xff] %v6479_v33  ;;  %v6991_v59 = vmul.f32 %v11805_v21, %v6479_v33  ;;  %v6482_v2 = vadd.f32 %v9365_v10, %v5772_v60  ;;  %v5771_v55 = vadd.f32 %v5652_v15, %v12102_v16  ;;  %v9368_v8 = vpop.f32.mrf.mxu0  ;;  %v7125_v26 = vmul.f32 %v6992_v5, %v6480_v43 }
 0x2fd   : > { %v7185_v35 = vadd.f32 %v7184_v24, %v7122_v39  ;;  %v7053_v63 = vadd.f32 %v7052_v13, %v6990_v23  ;;  %v9270_v61 = vpop.f32.mrf.mxu1  ;;  %v12108_v24 = vld [vmem:[#allocation22_spill] sm:$0xff] }
 0x2fe   : > { %v7124_v62 = vmul.f32 %v6991_v59, %v6479_v33  ;;  %6546 = vst [vmem:[%s11624_s22 + $0x198] sm:$0xff] %v6482_v2  ;;  %v6481_v6 = vadd.f32 %v6362_v44, %v5771_v55  ;;  %v5774_v29 = vadd.f32 %v9270_v61, %v12103_v20  ;;  %v6372_v52 = vpop.f32.mrf.mxu0  ;;  %v6994_v17 = vmul.f32 %v11823_v38, %v6482_v2 }
 0x2ff   : > { %v7054_v47 = vadd.f32 %v7053_v63, %v6991_v59  ;;  %v7186_v21 = vadd.f32 %v7185_v35, %v7123_v18  ;;  %v5662_v41 = vpop.f32.mrf.mxu1  ;;  %v6916_v18 = vpop.permute.xlu0 %6915  ;;  %v12109_v63 = vld [vmem:[#allocation23_spill] sm:$0xff] }
 0x300   : > { %6545 = vst [vmem:[%s11624_s22 + $0x190] sm:$0xff] %v6481_v6  ;;  %v6993_v22 = vmul.f32 %v11819_v1, %v6481_v6  ;;  %v6484_v42 = vadd.f32 %v9368_v8, %v5774_v29  ;;  %v5773_v9 = vadd.f32 %v5662_v41, %v12104_v36  ;;  %v9371_v45 = vpop.f32.mrf.mxu0  ;;  %v7127_v38 = vmul.f32 %v6994_v17, %v6482_v2  ;;  %v6921_v20 = vpop.permute.xlu1 %6920 }
 0x301   : > { %v7187_v14 = vadd.f32 %v7186_v21, %v7124_v62  ;;  %v7055_v32 = vadd.f32 %v7054_v47, %v6992_v5  ;;  %v9273_v56 = vpop.f32.mrf.mxu1  ;;  %v12110_v21 = vld [vmem:[#allocation24_spill] sm:$0xff] }
 0x302   : > { %v7126_v51 = vmul.f32 %v6993_v22, %v6481_v6  ;;  %6548 = vst [vmem:[%s11624_s22 + $0x1a8] sm:$0xff] %v6484_v42  ;;  %v6483_v0 = vadd.f32 %v6372_v52, %v5773_v9  ;;  %v5776_v28 = vadd.f32 %v9273_v56, %v12105_v48  ;;  %v6382_v30 = vpop.f32.mrf.mxu0  ;;  %v6996_v43 = vmul.f32 %v6891_v12, %v6484_v42 }
 0x303   : > { %v7056_v57 = vadd.f32 %v7055_v32, %v6993_v22  ;;  %v7188_v49 = vadd.f32 %v7187_v14, %v7125_v26  ;;  %v5672_v1 = vpop.f32.mrf.mxu1  ;;  %v6926_v48 = vpop.permute.xlu0 %6925 }
 0x304   : > { %6547 = vst [vmem:[%s11624_s22 + $0x1a0] sm:$0xff] %v6483_v0  ;;  %v6995_v4 = vmul.f32 %v6886_v7, %v6483_v0  ;;  %v6486_v37 = vadd.f32 %v9371_v45, %v5776_v28  ;;  %v5775_v58 = vadd.f32 %v5672_v1, %v12106_v27  ;;  %v9374_v53 = vpop.f32.mrf.mxu0  ;;  %v7129_v12 = vmul.f32 %v6996_v43, %v6484_v42 }
 0x305   : > { %v7189_v34 = vadd.f32 %v7188_v49, %v7126_v51  ;;  %v7057_v25 = vadd.f32 %v7056_v57, %v6994_v17  ;;  %v9276_v50 = vpop.f32.mrf.mxu1  ;;  %v12111_v17 = vld [vmem:[#allocation25_spill] sm:$0xff]  ;;  %v12112_v49 = vld [vmem:[#allocation26_spill] sm:$0xff] }
 0x306   : > { %v7128_v23 = vmul.f32 %v6995_v4, %v6483_v0  ;;  %6550 = vst [vmem:[%s11624_s22 + $0x1b8] sm:$0xff] %v6486_v37  ;;  %v6485_v54 = vadd.f32 %v6382_v30, %v5775_v58  ;;  %v5778_v10 = vadd.f32 %v9276_v50, %v12107_v11  ;;  %v6392_v46 = vpop.f32.mrf.mxu0  ;;  %v6998_v59 = vmul.f32 %v6901_v3, %v6486_v37 }
 0x307   : > { %v7058_v39 = vadd.f32 %v7057_v25, %v6995_v4  ;;  %v7190_v33 = vadd.f32 %v7189_v34, %v7127_v38  ;;  %v5682_v7 = vpop.f32.mrf.mxu1  ;;  %v6931_v38 = vpop.permute.xlu1 %6930  ;;  %v12113_v25 = vld [vmem:[#allocation27_spill] sm:$0xff] }
 0x308   : > { %6549 = vst [vmem:[%s11624_s22 + $0x1b0] sm:$0xff] %v6485_v54  ;;  %v6997_v60 = vmul.f32 %v6896_v40, %v6485_v54  ;;  %v6488_v13 = vadd.f32 %v9374_v53, %v5778_v10  ;;  %v5777_v15 = vadd.f32 %v5682_v7, %v12108_v24  ;;  %v9377_v55 = vpop.f32.mrf.mxu0  ;;  %v7131_v52 = vmul.f32 %v6998_v59, %v6486_v37  ;;  %v12114_v10 = vld [vmem:[#allocation28_spill] sm:$0xff] }
 0x309   : > { %v7191_v44 = vadd.f32 %v7190_v33, %v7128_v23  ;;  %v7059_v2 = vadd.f32 %v7058_v39, %v6996_v43  ;;  %v9279_v16 = vpop.f32.mrf.mxu1 }
 0x30a   : > { %v7130_v35 = vmul.f32 %v6997_v60, %v6485_v54  ;;  %6552 = vst [vmem:[%s11624_s22 + $0x1c8] sm:$0xff] %v6488_v13  ;;  %v6487_v5 = vadd.f32 %v6392_v46, %v5777_v15  ;;  %v5780_v61 = vadd.f32 %v9279_v16, %v12109_v63  ;;  %v6402_v6 = vpop.f32.mrf.mxu0  ;;  %v7000_v22 = vmul.f32 %v6911_v19, %v6488_v13 }
 0x30b   : > { %v7060_v8 = vadd.f32 %v7059_v2, %v6997_v60  ;;  %v7192_v62 = vadd.f32 %v7191_v44, %v7129_v12  ;;  %v5692_v40 = vpop.f32.mrf.mxu1  ;;  %v6936_v12 = vpop.permute.xlu0 %6935 }
 0x30c   : > { %6551 = vst [vmem:[%s11624_s22 + $0x1c0] sm:$0xff] %v6487_v5  ;;  %v6999_v29 = vmul.f32 %v6906_v31, %v6487_v5  ;;  %v6490_v47 = vadd.f32 %v9377_v55, %v5780_v61  ;;  %v5779_v41 = vadd.f32 %v5692_v40, %v12110_v21  ;;  %v9380_v9 = vpop.f32.mrf.mxu0  ;;  %v7133_v30 = vmul.f32 %v7000_v22, %v6488_v13  ;;  %v6941_v2 = vpop.permute.xlu1 %6940 }
 0x30d   : > { %v7193_v3 = vadd.f32 %v7192_v62, %v7130_v35  ;;  %v7061_v42 = vadd.f32 %v7060_v8, %v6998_v59  ;;  %v9282_v36 = vpop.f32.mrf.mxu1 }
 0x30e   : > { %v7132_v26 = vmul.f32 %v6999_v29, %v6487_v5  ;;  %6554 = vst [vmem:[%s11624_s22 + $0x1d8] sm:$0xff] %v6490_v47  ;;  %v6489_v14 = vadd.f32 %v6402_v6, %v5779_v41  ;;  %v5782_v32 = vadd.f32 %v9282_v36, %v12111_v17  ;;  %v6412_v0 = vpop.f32.mrf.mxu0  ;;  %v7002_v4 = vmul.f32 %v6921_v20, %v6490_v47 }
 0x30f   : > { %v7062_v56 = vadd.f32 %v7061_v42, %v6999_v29  ;;  %v7194_v45 = vadd.f32 %v7193_v3, %v7131_v52  ;;  %v5702_v51 = vpop.f32.mrf.mxu1 }
 0x310   : > { %6553 = vst [vmem:[%s11624_s22 + $0x1d0] sm:$0xff] %v6489_v14  ;;  %v7001_v28 = vmul.f32 %v6916_v18, %v6489_v14  ;;  %v6492_v57 = vadd.f32 %v9380_v9, %v5782_v32  ;;  %v5781_v1 = vadd.f32 %v5702_v51, %v12112_v49  ;;  %v9383_v58 = vpop.f32.mrf.mxu0  ;;  %v7135_v33 = vmul.f32 %v7002_v4, %v6490_v47 }
 0x311   : > { %v7195_v31 = vadd.f32 %v7194_v45, %v7132_v26  ;;  %v7063_v37 = vadd.f32 %v7062_v56, %v7000_v22  ;;  %v9285_v27 = vpop.f32.mrf.mxu1 }
 0x312   : > { %v7134_v34 = vmul.f32 %v7001_v28, %v6489_v14  ;;  %6556 = vst [vmem:[%s11624_s22 + $0x1e8] sm:$0xff] %v6492_v57  ;;  %v6491_v43 = vadd.f32 %v6412_v0, %v5781_v1  ;;  %v5784_v50 = vadd.f32 %v9285_v27, %v12113_v25  ;;  %v7004_v46 = vmul.f32 %v6931_v38, %v6492_v57  ;;  %v6422_v13 = vpop.f32.mrf.mxu0 }
 0x313   : > { %v7064_v53 = vadd.f32 %v7063_v37, %v7001_v28  ;;  %v7196_v19 = vadd.f32 %v7195_v31, %v7133_v30  ;;  %v5712_v23 = vpop.f32.mrf.mxu1 }
 0x314   : > { %6555 = vst [vmem:[%s11624_s22 + $0x1e0] sm:$0xff] %v6491_v43  ;;  %v7003_v54 = vmul.f32 %v6926_v48, %v6491_v43  ;;  %v6494_v11 = vadd.f32 %v9383_v58, %v5784_v50  ;;  %v5783_v39 = vadd.f32 %v5712_v23, %v12114_v10  ;;  %v7137_v55 = vmul.f32 %v7004_v46, %v6492_v57 }
 0x315   : > { %v7197_v7 = vadd.f32 %v7196_v19, %v7134_v34  ;;  %v7065_v60 = vadd.f32 %v7064_v53, %v7002_v4 }
 0x316   : > { %v7136_v24 = vmul.f32 %v7003_v54, %v6491_v43  ;;  %6558 = vst [vmem:[%s11624_s22 + $0x1f8] sm:$0xff] %v6494_v11  ;;  %v6493_v15 = vadd.f32 %v6422_v13, %v5783_v39  ;;  %v7006_v35 = vmul.f32 %v6941_v2, %v6494_v11 }
 0x317   : > { %v7066_v44 = vadd.f32 %v7065_v60, %v7003_v54  ;;  %v7198_v59 = vadd.f32 %v7197_v7, %v7135_v33 }
 0x318   : > { %6557 = vst [vmem:[%s11624_s22 + $0x1f0] sm:$0xff] %v6493_v15  ;;  %v7005_v16 = vmul.f32 %v6936_v12, %v6493_v15  ;;  %v7139_v62 = vmul.f32 %v7006_v35, %v6494_v11 }
 0x319   : > { %v7199_v18 = vadd.f32 %v7198_v59, %v7136_v24  ;;  %v7067_v5 = vadd.f32 %v7066_v44, %v7004_v46 }
 0x31a   : > { %v7138_v63 = vmul.f32 %v7005_v16, %v6493_v15 }
 0x31b   : > { %v7068_v61 = vadd.f32 %v7067_v5, %v7005_v16  ;;  %v7200_v8 = vadd.f32 %v7199_v18, %v7137_v55 }
 0x31d   : > { %v7069_v40 = vadd.f32 %v7068_v61, %v7006_v35  ;;  %v7201_v6 = vadd.f32 %v7200_v8, %v7138_v63 }
 0x31f   : > { %v7070_v20 = vrot.slane %v7069_v40, 4  ;;  %v7202_v29 = vadd.f32 %v7201_v6, %v7139_v62 }
 0x321   : > { %v7071_v47 = vadd.f32 %v7070_v20, %v7069_v40  ;;  %v7203_v21 = vrot.slane %v7202_v29, 4 }
 0x323   : > { %v7072_v41 = vrot.slane %v7071_v47, 2  ;;  %v7204_v52 = vadd.f32 %v7203_v21, %v7202_v29 }
 0x325   : > { %v7073_v3 = vadd.f32 %v7072_v41, %v7071_v47  ;;  %v7205_v22 = vrot.slane %v7204_v52, 2 }
 0x327   : > { %v7074_v42 = vrot.slane %v7073_v3, 1  ;;  %v7206_v36 = vadd.f32 %v7205_v22, %v7204_v52 }
 0x329   : > { %v7207_v9 = vrot.slane %v7206_v36, 1  ;;  %v7075_v26 = vadd.f32 %v7074_v42, %v7073_v3 }
 0x32b   : > { %v7208_v14 = vadd.f32 %v7207_v9, %v7206_v36 }
 0x32d   : > { %v7210_v17 = vsel %vm7209_vm2, %v7075_v26, %v7208_v14 }
 0x32e   : > { %7211 = vst [vmem:[%s231_s27] sm:$0x3] %v7210_v17 }
 0x32f PF: > { %s15_s15 = sadd.s32 1, %s9404_s15  }
 0x330   : > { %p12_p5 = scmp.ge.s32.totalorder %s15_s15, 4  }
 0x332   :  { %14 = sbr.rel (!%p12_p5) target bundleno = 1 (0x1), region = 85 }

// kernel: conv_block_forward.6
= control target key start
LH: loop header
LB: loop body
LE: loop exit
PB: predicated region body
PF: predicated region fallthrough
CT: control target
= control target key end

     0   :  { %s7780_s15 = smov 0   ;;  %s10025_s0 = inlined_call_operand.vmem [shape: f32[2,550,128], index: 0, kind: input, shape index: {}]   ;;  %s10026_s1 = inlined_call_operand.vmem [shape: f32[9,128,128], index: 1, kind: input, shape index: {}]   ;;  %s10027_s2 = inlined_call_operand.vmem [shape: f32[1024,1], index: 2, kind: input, shape index: {}]   ;;  %s10028_s3 = inlined_call_operand.vmem [shape: f32[1024,128], index: 3, kind: output, shape index: {0}]   ;;  %s10029_s4 = inlined_call_operand.vmem [shape: f32[2,2,128], index: 4, kind: output, shape index: {1}]  }
   0x1 LB: > { %s7786_s16 = sadd.s32 4294967295, %s7752_s15   ;;  %p5693_p0 = scmp.ge.s32.totalorder %s7752_s15, 1  ;;  %s7752_s15 = sphi %s7780_s15, %s15_s15  }
   0x2   : > { %p176_p1 = scmp.lt.s32.totalorder %s7752_s15, 3 }
   0x4   : > { %p177_p2 = pnand %p5693_p0, %p176_p1 }
   0x6   : > { %180 = sbr.rel (%p177_p2) target bundleno = 839 (0x347), region = 32 }
   0xb   : > { %v5715_v0 = vld [vmem:[%s10026_s1 + $0xf8] sm:$0xff]  ;;  %v5714_v1 = vld [vmem:[%s10026_s1 + $0xf0] sm:$0xff]  ;;  %v5713_v2 = vld [vmem:[%s10026_s1 + $0xe8] sm:$0xff]  ;;  %p211_p3 = scmp.lt.s32.totalorder %s7786_s16, 1  ;;  %s5695_s28 = sshll.u32 %s7786_s16, 6  ;;  %vm5587_vm0 = vcmask 1040384  }
   0xc   : > { %7702 = vmatprep.subr.mxu1 %v5715_v0  ;;  %6550 = vmatprep.subr.mxu0 %v5715_v0  ;;  %v5712_v3 = vld [vmem:[%s10026_s1 + $0xe0] sm:$0xff]  ;;  %v5711_v4 = vld [vmem:[%s10026_s1 + $0xd8] sm:$0xff]  ;;  %v5710_v5 = vld [vmem:[%s10026_s1 + $0xd0] sm:$0xff]  ;;  %p217_p4 = scmp.lt.s32.totalorder %s5695_s28, 127 }
   0xd   : > { %7718 = vmatpush3.msra.mxu1 %v5715_v0  ;;  %6551 = vmatpush3.msra.mxu0 %v5715_v0  ;;  %v5709_v6 = vld [vmem:[%s10026_s1 + $0xc8] sm:$0xff]  ;;  %v5708_v7 = vld [vmem:[%s10026_s1 + $0xc0] sm:$0xff]  ;;  %v5707_v8 = vld [vmem:[%s10026_s1 + $0xb8] sm:$0xff]  ;;  %s7825_s13 = scalar_select %p211_p3, %s7786_s16, 1 }
   0xe   : > { %7703 = vmatprep.subr.mxu1 %v5714_v1  ;;  %6552 = vmatprep.subr.mxu0 %v5714_v1  ;;  %v5706_v9 = vld [vmem:[%s10026_s1 + $0xb0] sm:$0xff]  ;;  %v5705_v10 = vld [vmem:[%s10026_s1 + $0xa8] sm:$0xff]  ;;  %v5704_v11 = vld [vmem:[%s10026_s1 + $0xa0] sm:$0xff]  ;;  %s10264_s28 = smov (!%p217_p4, %s5695_s28), 127 }
   0xf   : > { %7719 = vmatpush3.msra.mxu1 %v5714_v1  ;;  %6553 = vmatpush3.msra.mxu0 %v5714_v1  ;;  %v5703_v12 = vld [vmem:[%s10026_s1 + $0x98] sm:$0xff]  ;;  %s7734_s20 = smul.u32 552, %s7825_s13  ;;  %v5702_v13 = vld [vmem:[%s10026_s1 + $0x90] sm:$0xff]  ;;  %v5701_v14 = vld [vmem:[%s10026_s1 + $0x88] sm:$0xff]  ;;  %s5696_s16 = sshll.u32 %s10264_s28, 3 }
  0x10   : > { %7704 = vmatprep.subr.mxu1 %v5713_v2  ;;  %6554 = vmatprep.subr.mxu0 %v5713_v2  ;;  %v5700_v15 = vld [vmem:[%s10026_s1 + $0x80] sm:$0xff]  ;;  %v311_v19 = vld [vmem:[%s10026_s1 + $0x78] sm:$0xff]  ;;  %v310_v25 = vld [vmem:[%s10026_s1 + $0x70] sm:$0xff]  ;;  %s8768_s5 = scalar_lea.vmem %s10027_s2, %s5696_s16  ;;  %s9773_s6 = scalar_lea.vmem %s10028_s3, %s5696_s16 }
  0x11   : > { %7720 = vmatpush3.msra.mxu1 %v5713_v2  ;;  %6555 = vmatpush3.msra.mxu0 %v5713_v2  ;;  %s7843_s27 = scalar_lea.vmem %s10025_s0, %s7734_s20  ;;  %v5731_v21 = vld [vmem:[%s10026_s1 + $0x178] sm:$0xff]  ;;  %v5730_v27 = vld [vmem:[%s10026_s1 + $0x170] sm:$0xff]  ;;  %v309_v31 = vld [vmem:[%s10026_s1 + $0x68] sm:$0xff]  ;;  %s5699_s28 = sshll.u32 %s7825_s13, 1 }
  0x12   : > { %7705 = vmatprep.subr.mxu1 %v5712_v3  ;;  %6556 = vmatprep.subr.mxu0 %v5712_v3  ;;  %v344_v16 = vld [vmem:[%s7843_s27 + $0x101] sm:$0xff]  ;;  %v345_v18 = vld [vmem:[%s7843_s27 + $0x109] sm:$0xff]  ;;  %v346_v22 = vld [vmem:[%s7843_s27 + $0x111] sm:$0xff]  ;;  %s231_s8 = scalar_lea.vmem %s10029_s4, %s5699_s28 }
  0x13   : > { %7721 = vmatpush3.msra.mxu1 %v5712_v3  ;;  %6557 = vmatpush3.msra.mxu0 %v5712_v3  ;;  %v312_v17 = vld [vmem:[%s7843_s27 + $0x1] sm:$0xff]  ;;  %v313_v20 = vld [vmem:[%s7843_s27 + $0x9] sm:$0xff]  ;;  %v314_v23 = vld [vmem:[%s7843_s27 + $0x11] sm:$0xff] }
  0x14   : > { %7706 = vmatprep.subr.mxu1 %v5711_v4  ;;  %6558 = vmatprep.subr.mxu0 %v5711_v4  ;;  %v347_v24 = vld [vmem:[%s7843_s27 + $0x119] sm:$0xff]  ;;  %v348_v28 = vld [vmem:[%s7843_s27 + $0x121] sm:$0xff]  ;;  %v349_v30 = vld [vmem:[%s7843_s27 + $0x129] sm:$0xff] }
  0x15   : > { %7722 = vmatpush3.msra.mxu1 %v5711_v4  ;;  %6559 = vmatpush3.msra.mxu0 %v5711_v4  ;;  %v315_v26 = vld [vmem:[%s7843_s27 + $0x19] sm:$0xff]  ;;  %v316_v29 = vld [vmem:[%s7843_s27 + $0x21] sm:$0xff]  ;;  %v317_v32 = vld [vmem:[%s7843_s27 + $0x29] sm:$0xff] }
  0x16   : > { %7707 = vmatprep.subr.mxu1 %v5710_v5  ;;  %6560 = vmatprep.subr.mxu0 %v5710_v5  ;;  %v5729_v33 = vld [vmem:[%s10026_s1 + $0x168] sm:$0xff]  ;;  %v350_v34 = vld [vmem:[%s7843_s27 + $0x131] sm:$0xff]  ;;  %v351_v36 = vld [vmem:[%s7843_s27 + $0x139] sm:$0xff] }
  0x17   : > { %7723 = vmatpush3.msra.mxu1 %v5710_v5  ;;  %6561 = vmatpush3.msra.mxu0 %v5710_v5  ;;  %v318_v35 = vld [vmem:[%s7843_s27 + $0x31] sm:$0xff]  ;;  %v308_v37 = vld [vmem:[%s10026_s1 + $0x60] sm:$0xff]  ;;  %v353_v42 = vld [vmem:[%s7843_s27 + $0x149] sm:$0xff] }
  0x18   : > { %7708 = vmatprep.subr.mxu1 %v5709_v6  ;;  %6562 = vmatprep.subr.mxu0 %v5709_v6  ;;  %v319_v38 = vld [vmem:[%s7843_s27 + $0x39] sm:$0xff]  ;;  %v352_v40 = vld [vmem:[%s7843_s27 + $0x141] sm:$0xff]  ;;  %v321_v44 = vld [vmem:[%s7843_s27 + $0x49] sm:$0xff] }
  0x19   : > { %7724 = vmatpush3.msra.mxu1 %v5709_v6  ;;  %6563 = vmatpush3.msra.mxu0 %v5709_v6  ;;  %v5728_v39 = vld [vmem:[%s10026_s1 + $0x160] sm:$0xff]  ;;  %v307_v43 = vld [vmem:[%s10026_s1 + $0x58] sm:$0xff]  ;;  %v306_v49 = vld [vmem:[%s10026_s1 + $0x50] sm:$0xff] }
  0x1a   : > { %7709 = vmatprep.subr.mxu1 %v5708_v7  ;;  %6564 = vmatprep.subr.mxu0 %v5708_v7  ;;  %v320_v41 = vld [vmem:[%s7843_s27 + $0x41] sm:$0xff]  ;;  %v5727_v45 = vld [vmem:[%s10026_s1 + $0x158] sm:$0xff]  ;;  %v5726_v51 = vld [vmem:[%s10026_s1 + $0x150] sm:$0xff] }
  0x1b   : > { %7725 = vmatpush3.msra.mxu1 %v5708_v7  ;;  %6565 = vmatpush3.msra.mxu0 %v5708_v7  ;;  %v354_v46 = vld [vmem:[%s7843_s27 + $0x151] sm:$0xff]  ;;  %v355_v48 = vld [vmem:[%s7843_s27 + $0x159] sm:$0xff]  ;;  %v356_v52 = vld [vmem:[%s7843_s27 + $0x161] sm:$0xff] }
  0x1c   : > { %7710 = vmatprep.subr.mxu1 %v5707_v8  ;;  %6566 = vmatprep.subr.mxu0 %v5707_v8  ;;  %v322_v47 = vld [vmem:[%s7843_s27 + $0x51] sm:$0xff]  ;;  %v323_v50 = vld [vmem:[%s7843_s27 + $0x59] sm:$0xff]  ;;  %v324_v53 = vld [vmem:[%s7843_s27 + $0x61] sm:$0xff] }
  0x1d   : > { %7726 = vmatpush3.msra.mxu1 %v5707_v8  ;;  %6567 = vmatpush3.msra.mxu0 %v5707_v8  ;;  %v357_v54 = vld [vmem:[%s7843_s27 + $0x169] sm:$0xff]  ;;  %v358_v58 = vld [vmem:[%s7843_s27 + $0x171] sm:$0xff]  ;;  %v359_v60 = vld [vmem:[%s7843_s27 + $0x179] sm:$0xff] }
  0x1e   : > { %7711 = vmatprep.subr.mxu1 %v5706_v9  ;;  %6568 = vmatprep.subr.mxu0 %v5706_v9  ;;  %v305_v55 = vld [vmem:[%s10026_s1 + $0x48] sm:$0xff]  ;;  %v326_v59 = vld [vmem:[%s7843_s27 + $0x71] sm:$0xff]  ;;  %v304_v61 = vld [vmem:[%s10026_s1 + $0x40] sm:$0xff] }
  0x1f   : > { %7727 = vmatpush3.msra.mxu1 %v5706_v9  ;;  %6569 = vmatpush3.msra.mxu0 %v5706_v9  ;;  %v325_v56 = vld [vmem:[%s7843_s27 + $0x69] sm:$0xff]  ;;  %v327_v62 = vld [vmem:[%s7843_s27 + $0x79] sm:$0xff]  ;;  %v360_v0 = vld [vmem:[%s7843_s27 + $0x181] sm:$0xff] }
  0x20   : > { %7712 = vmatprep.subr.mxu1 %v5705_v10  ;;  %6570 = vmatprep.subr.mxu0 %v5705_v10  ;;  %v5725_v57 = vld [vmem:[%s10026_s1 + $0x148] sm:$0xff]  ;;  %v5724_v63 = vld [vmem:[%s10026_s1 + $0x140] sm:$0xff]  ;;  %v303_v3 = vld [vmem:[%s10026_s1 + $0x38] sm:$0xff] }
  0x21   : > { %7728 = vmatpush3.msra.mxu1 %v5705_v10  ;;  %6571 = vmatpush3.msra.mxu0 %v5705_v10  ;;  %v328_v1 = vld [vmem:[%s7843_s27 + $0x81] sm:$0xff]  ;;  %v361_v2 = vld [vmem:[%s7843_s27 + $0x189] sm:$0xff]  ;;  %v5723_v5 = vld [vmem:[%s10026_s1 + $0x138] sm:$0xff] }
  0x22   : > { %7713 = vmatprep.subr.mxu1 %v5704_v11  ;;  %6572 = vmatprep.subr.mxu0 %v5704_v11  ;;  %v329_v4 = vld [vmem:[%s7843_s27 + $0x89] sm:$0xff]  ;;  %v362_v6 = vld [vmem:[%s7843_s27 + $0x191] sm:$0xff]  ;;  %v363_v8 = vld [vmem:[%s7843_s27 + $0x199] sm:$0xff] }
  0x23   : > { %7729 = vmatpush3.msra.mxu1 %v5704_v11  ;;  %6573 = vmatpush3.msra.mxu0 %v5704_v11  ;;  %v330_v7 = vld [vmem:[%s7843_s27 + $0x91] sm:$0xff]  ;;  %v331_v10 = vld [vmem:[%s7843_s27 + $0x99] sm:$0xff] }
  0x24   : > { %7714 = vmatprep.subr.mxu1 %v5703_v12  ;;  %6574 = vmatprep.subr.mxu0 %v5703_v12  ;;  %v302_v9 = vld [vmem:[%s10026_s1 + $0x30] sm:$0xff] }
  0x25   : > { %7730 = vmatpush3.msra.mxu1 %v5703_v12  ;;  %6575 = vmatpush3.msra.mxu0 %v5703_v12  ;;  %v5722_v11 = vld [vmem:[%s10026_s1 + $0x130] sm:$0xff]  ;;  %v364_v12 = vld [vmem:[%s7843_s27 + $0x1a1] sm:$0xff] }
  0x26   : > { %7715 = vmatprep.subr.mxu1 %v5702_v13  ;;  %6576 = vmatprep.subr.mxu0 %v5702_v13 }
  0x27   : > { %7731 = vmatpush3.msra.mxu1 %v5702_v13  ;;  %6577 = vmatpush3.msra.mxu0 %v5702_v13  ;;  %v332_v13 = vld [vmem:[%s7843_s27 + $0xa1] sm:$0xff] }
  0x28   : > { %7716 = vmatprep.subr.mxu1 %v5701_v14  ;;  %6578 = vmatprep.subr.mxu0 %v5701_v14 }
  0x29   : > { %7732 = vmatpush3.msra.mxu1 %v5701_v14  ;;  %6579 = vmatpush3.msra.mxu0 %v5701_v14  ;;  %v365_v14 = vld [vmem:[%s7843_s27 + $0x1a9] sm:$0xff] }
  0x2a   : > { %7717 = vmatprep.subr.mxu1 %v5700_v15  ;;  %6580 = vmatprep.subr.mxu0 %v5700_v15 }
  0x2b   : > { %7733 = vmatpush3.msra.mxu1 %v5700_v15  ;;  %6630 = vmatprep.mubr.f32.mxu1 %v344_v16  ;;  %v333_v16 = vld [vmem:[%s7843_s27 + $0xa9] sm:$0xff] }
  0x2c   : > { %6581 = vmatpush3.msra.mxu0 %v5700_v15  ;;  %6582 = vmatprep.mubr.f32.mxu0 %v312_v17  ;;  %v301_v15 = vld [vmem:[%s10026_s1 + $0x28] sm:$0xff] }
  0x2d   : > { %6631 = vmatmul.mubr.f32.vlgmr.msra.gmra.mxu1 %v345_v18  ;;  %6678 = vmatprep.subr.mxu1 %v311_v19  ;;  %v5721_v17 = vld [vmem:[%s10026_s1 + $0x128] sm:$0xff]  ;;  %v366_v18 = vld [vmem:[%s7843_s27 + $0x1b1] sm:$0xff] }
  0x2e   : > { %6583 = vmatmul.mubr.f32.vlgmr.msra.gmra.mxu0 %v313_v20  ;;  %6679 = vmatpush3.msra.mxu1 %v311_v19  ;;  %v334_v19 = vld [vmem:[%s7843_s27 + $0xb1] sm:$0xff]  ;;  %v367_v20 = vld [vmem:[%s7843_s27 + $0x1b9] sm:$0xff] }
  0x2f   : > { %6806 = vmatprep.subr.mxu0 %v5731_v21  ;;  %6633 = vmatprep.mubr.f32.mxu1 %v346_v22  ;;  %v335_v22 = vld [vmem:[%s7843_s27 + $0xb9] sm:$0xff] }
  0x30   : > { %6807 = vmatpush3.msra.mxu0 %v5731_v21  ;;  %6585 = vmatprep.mubr.f32.mxu0 %v314_v23  ;;  %v300_v21 = vld [vmem:[%s10026_s1 + $0x20] sm:$0xff] }
  0x31   : > { %6634 = vmatmul.mubr.f32.gmra.mxu1 %v347_v24  ;;  %6680 = vmatprep.subr.mxu1 %v310_v25  ;;  %v5720_v23 = vld [vmem:[%s10026_s1 + $0x120] sm:$0xff] }
  0x32   : > { %6586 = vmatmul.mubr.f32.gmra.mxu0 %v315_v26  ;;  %6681 = vmatpush3.msra.mxu1 %v310_v25  ;;  %v368_v24 = vld [vmem:[%s7843_s27 + $0x1c1] sm:$0xff]  ;;  %v369_v26 = vld [vmem:[%s7843_s27 + $0x1c9] sm:$0xff] }
  0x33   : > { %6808 = vmatprep.subr.mxu0 %v5730_v27  ;;  %6636 = vmatprep.mubr.f32.mxu1 %v348_v28  ;;  %v336_v25 = vld [vmem:[%s7843_s27 + $0xc1] sm:$0xff]  ;;  %v337_v28 = vld [vmem:[%s7843_s27 + $0xc9] sm:$0xff] }
  0x34   : > { %6809 = vmatpush3.msra.mxu0 %v5730_v27  ;;  %6588 = vmatprep.mubr.f32.mxu0 %v316_v29  ;;  %v299_v27 = vld [vmem:[%s10026_s1 + $0x18] sm:$0xff] }
  0x35   : > { %6637 = vmatmul.mubr.f32.gmra.mxu1 %v349_v30  ;;  %6682 = vmatprep.subr.mxu1 %v309_v31  ;;  %v5719_v29 = vld [vmem:[%s10026_s1 + $0x118] sm:$0xff] }
  0x36   : > { %6589 = vmatmul.mubr.f32.gmra.mxu0 %v317_v32  ;;  %6683 = vmatpush3.msra.mxu1 %v309_v31  ;;  %v370_v30 = vld [vmem:[%s7843_s27 + $0x1d1] sm:$0xff]  ;;  %v371_v32 = vld [vmem:[%s7843_s27 + $0x1d9] sm:$0xff] }
  0x37   : > { %6810 = vmatprep.subr.mxu0 %v5729_v33  ;;  %6639 = vmatprep.mubr.f32.mxu1 %v350_v34  ;;  %v338_v31 = vld [vmem:[%s7843_s27 + $0xd1] sm:$0xff]  ;;  %v339_v34 = vld [vmem:[%s7843_s27 + $0xd9] sm:$0xff] }
  0x38   : > { %6811 = vmatpush3.msra.mxu0 %v5729_v33  ;;  %6591 = vmatprep.mubr.f32.mxu0 %v318_v35  ;;  %v298_v33 = vld [vmem:[%s10026_s1 + $0x10] sm:$0xff] }
  0x39   : > { %6640 = vmatmul.mubr.f32.gmra.mxu1 %v351_v36  ;;  %6684 = vmatprep.subr.mxu1 %v308_v37  ;;  %v5718_v35 = vld [vmem:[%s10026_s1 + $0x110] sm:$0xff]  ;;  %v372_v36 = vld [vmem:[%s7843_s27 + $0x1e1] sm:$0xff] }
  0x3a   : > { %6592 = vmatmul.mubr.f32.gmra.mxu0 %v319_v38  ;;  %6685 = vmatpush3.msra.mxu1 %v308_v37  ;;  %v340_v37 = vld [vmem:[%s7843_s27 + $0xe1] sm:$0xff]  ;;  %v373_v38 = vld [vmem:[%s7843_s27 + $0x1e9] sm:$0xff] }
  0x3b   : > { %6812 = vmatprep.subr.mxu0 %v5728_v39  ;;  %6642 = vmatprep.mubr.f32.mxu1 %v352_v40  ;;  %v341_v40 = vld [vmem:[%s7843_s27 + $0xe9] sm:$0xff] }
  0x3c   : > { %6813 = vmatpush3.msra.mxu0 %v5728_v39  ;;  %6594 = vmatprep.mubr.f32.mxu0 %v320_v41  ;;  %v297_v39 = vld [vmem:[%s10026_s1 + $0x8] sm:$0xff] }
  0x3d   : > { %6643 = vmatmul.mubr.f32.gmra.mxu1 %v353_v42  ;;  %6686 = vmatprep.subr.mxu1 %v307_v43  ;;  %v5717_v41 = vld [vmem:[%s10026_s1 + $0x108] sm:$0xff]  ;;  %v374_v42 = vld [vmem:[%s7843_s27 + $0x1f1] sm:$0xff] }
  0x3e   : > { %6595 = vmatmul.mubr.f32.gmra.mxu0 %v321_v44  ;;  %6687 = vmatpush3.msra.mxu1 %v307_v43  ;;  %v342_v43 = vld [vmem:[%s7843_s27 + $0xf1] sm:$0xff]  ;;  %v375_v44 = vld [vmem:[%s7843_s27 + $0x1f9] sm:$0xff] }
  0x3f   : > { %6814 = vmatprep.subr.mxu0 %v5727_v45  ;;  %6645 = vmatprep.mubr.f32.mxu1 %v354_v46  ;;  %v343_v46 = vld [vmem:[%s7843_s27 + $0xf9] sm:$0xff] }
  0x40   : > { %6815 = vmatpush3.msra.mxu0 %v5727_v45  ;;  %6597 = vmatprep.mubr.f32.mxu0 %v322_v47  ;;  %v296_v45 = vld [vmem:[%s10026_s1] sm:$0xff] }
  0x41   : > { %6646 = vmatmul.mubr.f32.gmra.mxu1 %v355_v48  ;;  %6688 = vmatprep.subr.mxu1 %v306_v49  ;;  %v5716_v47 = vld [vmem:[%s10026_s1 + $0x100] sm:$0xff] }
  0x42   : > { %6598 = vmatmul.mubr.f32.gmra.mxu0 %v323_v50  ;;  %6689 = vmatpush3.msra.mxu1 %v306_v49  ;;  %v232_v48 = vld [vmem:[%s7843_s27] sm:$0xff]  ;;  %v233_v50 = vld [vmem:[%s7843_s27 + $0x8] sm:$0xff] }
  0x43   : > { %6816 = vmatprep.subr.mxu0 %v5726_v51  ;;  %6648 = vmatprep.mubr.f32.mxu1 %v356_v52  ;;  %v1163_v49 = vld [vmem:[%s7843_s27 + $0x2] sm:$0xff]  ;;  %v1164_v52 = vld [vmem:[%s7843_s27 + $0xa] sm:$0xff] }
  0x44   : > { %6817 = vmatpush3.msra.mxu0 %v5726_v51  ;;  %6600 = vmatprep.mubr.f32.mxu0 %v324_v53  ;;  %v5747_v51 = vld [vmem:[%s10026_s1 + $0x1f8] sm:$0xff] }
  0x45   : > { %6649 = vmatmul.mubr.f32.gmra.mxu1 %v357_v54  ;;  %6690 = vmatprep.subr.mxu1 %v305_v55  ;;  %v5763_v53 = vld [vmem:[%s10026_s1 + $0x278] sm:$0xff]  ;;  %v234_v54 = vld [vmem:[%s7843_s27 + $0x10] sm:$0xff] }
  0x46   : > { %6601 = vmatmul.mubr.f32.gmra.mxu0 %v325_v56  ;;  %6691 = vmatpush3.msra.mxu1 %v305_v55  ;;  %v8020_v55 = vld [vmem:[%s7843_s27 + $0x12] sm:$0xff] }
  0x47   : > { %6818 = vmatprep.subr.mxu0 %v5725_v57  ;;  %6651 = vmatprep.mubr.f32.mxu1 %v358_v58  ;;  %v235_v56 = vld [vmem:[%s7843_s27 + $0x18] sm:$0xff] }
  0x48   : > { %6819 = vmatpush3.msra.mxu0 %v5725_v57  ;;  %6603 = vmatprep.mubr.f32.mxu0 %v326_v59  ;;  %v5746_v57 = vld [vmem:[%s10026_s1 + $0x1f0] sm:$0xff]  ;;  %v8027_v58 = vld [vmem:[%s7843_s27 + $0x1a] sm:$0xff] }
  0x49   : > { %6652 = vmatmul.mubr.f32.gmra.mxu1 %v359_v60  ;;  %6692 = vmatprep.subr.mxu1 %v304_v61  ;;  %v236_v59 = vld [vmem:[%s7843_s27 + $0x20] sm:$0xff] }
  0x4a   : > { %6604 = vmatmul.mubr.f32.gmra.mxu0 %v327_v62  ;;  %6693 = vmatpush3.msra.mxu1 %v304_v61  ;;  %v8032_v60 = vld [vmem:[%s7843_s27 + $0x22] sm:$0xff]  ;;  %v5762_v61 = vld [vmem:[%s10026_s1 + $0x270] sm:$0xff] }
  0x4b   : > { %6820 = vmatprep.subr.mxu0 %v5724_v63  ;;  %6654 = vmatprep.mubr.f32.mxu1 %v360_v0  ;;  %v5745_v62 = vld [vmem:[%s10026_s1 + $0x1e8] sm:$0xff] }
  0x4c   : > { %6821 = vmatpush3.msra.mxu0 %v5724_v63  ;;  %6606 = vmatprep.mubr.f32.mxu0 %v328_v1  ;;  %v237_v63 = vld [vmem:[%s7843_s27 + $0x28] sm:$0xff]  ;;  %v238_v1 = vld [vmem:[%s7843_s27 + $0x30] sm:$0xff] }
  0x4d   : > { %6655 = vmatmul.mubr.f32.gmra.mxu1 %v361_v2  ;;  %6694 = vmatprep.subr.mxu1 %v303_v3  ;;  %v8044_v0 = vld [vmem:[%s7843_s27 + $0x2a] sm:$0xff]  ;;  %v8048_v2 = vld [vmem:[%s7843_s27 + $0x32] sm:$0xff] }
  0x4e   : > { %6607 = vmatmul.mubr.f32.gmra.mxu0 %v329_v4  ;;  %6695 = vmatpush3.msra.mxu1 %v303_v3  ;;  %v5761_v3 = vld [vmem:[%s10026_s1 + $0x268] sm:$0xff]  ;;  %v5744_v4 = vld [vmem:[%s10026_s1 + $0x1e0] sm:$0xff] }
  0x4f   : > { %6822 = vmatprep.subr.mxu0 %v5723_v5  ;;  %6657 = vmatprep.mubr.f32.mxu1 %v362_v6  ;;  %v8060_v6 = vld [vmem:[%s7843_s27 + $0x3a] sm:$0xff] }
  0x50   : > { %6823 = vmatpush3.msra.mxu0 %v5723_v5  ;;  %6609 = vmatprep.mubr.f32.mxu0 %v330_v7  ;;  %v239_v5 = vld [vmem:[%s7843_s27 + $0x38] sm:$0xff]  ;;  %v240_v7 = vld [vmem:[%s7843_s27 + $0x40] sm:$0xff] }
  0x51   : > { %6658 = vmatmul.mubr.f32.gmra.mxu1 %v363_v8  ;;  %6696 = vmatprep.subr.mxu1 %v302_v9  ;;  %v8064_v8 = vld [vmem:[%s7843_s27 + $0x42] sm:$0xff] }
  0x52   : > { %6610 = vmatmul.mubr.f32.gmra.mxu0 %v331_v10  ;;  %6697 = vmatpush3.msra.mxu1 %v302_v9  ;;  %v5760_v9 = vld [vmem:[%s10026_s1 + $0x260] sm:$0xff]  ;;  %v5743_v10 = vld [vmem:[%s10026_s1 + $0x1d8] sm:$0xff] }
  0x53   : > { %6824 = vmatprep.subr.mxu0 %v5722_v11  ;;  %6660 = vmatprep.mubr.f32.mxu1 %v364_v12  ;;  %v8076_v12 = vld [vmem:[%s7843_s27 + $0x4a] sm:$0xff] }
  0x54   : > { %6825 = vmatpush3.msra.mxu0 %v5722_v11  ;;  %6612 = vmatprep.mubr.f32.mxu0 %v332_v13  ;;  %v241_v11 = vld [vmem:[%s7843_s27 + $0x48] sm:$0xff]  ;;  %v242_v13 = vld [vmem:[%s7843_s27 + $0x50] sm:$0xff] }
  0x55   : > { %6661 = vmatmul.mubr.f32.gmra.mxu1 %v365_v14  ;;  %6698 = vmatprep.subr.mxu1 %v301_v15  ;;  %v8080_v14 = vld [vmem:[%s7843_s27 + $0x52] sm:$0xff] }
  0x56   : > { %6613 = vmatmul.mubr.f32.gmra.mxu0 %v333_v16  ;;  %6699 = vmatpush3.msra.mxu1 %v301_v15  ;;  %v5759_v15 = vld [vmem:[%s10026_s1 + $0x258] sm:$0xff]  ;;  %v5742_v16 = vld [vmem:[%s10026_s1 + $0x1d0] sm:$0xff] }
  0x57   : > { %6826 = vmatprep.subr.mxu0 %v5721_v17  ;;  %6663 = vmatprep.mubr.f32.mxu1 %v366_v18  ;;  %v8092_v18 = vld [vmem:[%s7843_s27 + $0x5a] sm:$0xff] }
  0x58   : > { %6827 = vmatpush3.msra.mxu0 %v5721_v17  ;;  %6615 = vmatprep.mubr.f32.mxu0 %v334_v19  ;;  %v243_v17 = vld [vmem:[%s7843_s27 + $0x58] sm:$0xff]  ;;  %v244_v19 = vld [vmem:[%s7843_s27 + $0x60] sm:$0xff] }
  0x59   : > { %6664 = vmatmul.mubr.f32.gmra.mxu1 %v367_v20  ;;  %6700 = vmatprep.subr.mxu1 %v300_v21  ;;  %v8096_v20 = vld [vmem:[%s7843_s27 + $0x62] sm:$0xff] }
  0x5a   : > { %6616 = vmatmul.mubr.f32.gmra.mxu0 %v335_v22  ;;  %6701 = vmatpush3.msra.mxu1 %v300_v21  ;;  %v5758_v21 = vld [vmem:[%s10026_s1 + $0x250] sm:$0xff]  ;;  %v5741_v22 = vld [vmem:[%s10026_s1 + $0x1c8] sm:$0xff] }
  0x5b   : > { %6828 = vmatprep.subr.mxu0 %v5720_v23  ;;  %6666 = vmatprep.mubr.f32.mxu1 %v368_v24  ;;  %v8108_v24 = vld [vmem:[%s7843_s27 + $0x6a] sm:$0xff] }
  0x5c   : > { %6829 = vmatpush3.msra.mxu0 %v5720_v23  ;;  %6618 = vmatprep.mubr.f32.mxu0 %v336_v25  ;;  %v245_v23 = vld [vmem:[%s7843_s27 + $0x68] sm:$0xff]  ;;  %v246_v25 = vld [vmem:[%s7843_s27 + $0x70] sm:$0xff] }
  0x5d   : > { %6667 = vmatmul.mubr.f32.gmra.mxu1 %v369_v26  ;;  %6702 = vmatprep.subr.mxu1 %v299_v27  ;;  %v8112_v26 = vld [vmem:[%s7843_s27 + $0x72] sm:$0xff] }
  0x5e   : > { %6619 = vmatmul.mubr.f32.gmra.mxu0 %v337_v28  ;;  %6703 = vmatpush3.msra.mxu1 %v299_v27  ;;  %v5757_v27 = vld [vmem:[%s10026_s1 + $0x248] sm:$0xff]  ;;  %v5740_v28 = vld [vmem:[%s10026_s1 + $0x1c0] sm:$0xff] }
  0x5f   : > { %6830 = vmatprep.subr.mxu0 %v5719_v29  ;;  %6669 = vmatprep.mubr.f32.mxu1 %v370_v30  ;;  %v8124_v30 = vld [vmem:[%s7843_s27 + $0x7a] sm:$0xff] }
  0x60   : > { %6831 = vmatpush3.msra.mxu0 %v5719_v29  ;;  %6621 = vmatprep.mubr.f32.mxu0 %v338_v31  ;;  %v247_v29 = vld [vmem:[%s7843_s27 + $0x78] sm:$0xff]  ;;  %v248_v31 = vld [vmem:[%s7843_s27 + $0x80] sm:$0xff] }
  0x61   : > { %6670 = vmatmul.mubr.f32.gmra.mxu1 %v371_v32  ;;  %6704 = vmatprep.subr.mxu1 %v298_v33  ;;  %v8128_v32 = vld [vmem:[%s7843_s27 + $0x82] sm:$0xff] }
  0x62   : > { %6622 = vmatmul.mubr.f32.gmra.mxu0 %v339_v34  ;;  %6705 = vmatpush3.msra.mxu1 %v298_v33  ;;  %v5756_v33 = vld [vmem:[%s10026_s1 + $0x240] sm:$0xff]  ;;  %v5739_v34 = vld [vmem:[%s10026_s1 + $0x1b8] sm:$0xff] }
  0x63   : > { %6832 = vmatprep.subr.mxu0 %v5718_v35  ;;  %6672 = vmatprep.mubr.f32.mxu1 %v372_v36  ;;  %v8140_v36 = vld [vmem:[%s7843_s27 + $0x8a] sm:$0xff] }
  0x64   : > { %6833 = vmatpush3.msra.mxu0 %v5718_v35  ;;  %6624 = vmatprep.mubr.f32.mxu0 %v340_v37  ;;  %v249_v35 = vld [vmem:[%s7843_s27 + $0x88] sm:$0xff]  ;;  %v250_v37 = vld [vmem:[%s7843_s27 + $0x90] sm:$0xff] }
  0x65   : > { %6673 = vmatmul.mubr.f32.gmra.mxu1 %v373_v38  ;;  %6706 = vmatprep.subr.mxu1 %v297_v39  ;;  %v8144_v38 = vld [vmem:[%s7843_s27 + $0x92] sm:$0xff] }
  0x66   : > { %6625 = vmatmul.mubr.f32.gmra.mxu0 %v341_v40  ;;  %6707 = vmatpush3.msra.mxu1 %v297_v39  ;;  %v5755_v39 = vld [vmem:[%s10026_s1 + $0x238] sm:$0xff]  ;;  %v5738_v40 = vld [vmem:[%s10026_s1 + $0x1b0] sm:$0xff] }
  0x67   : > { %6834 = vmatprep.subr.mxu0 %v5717_v41  ;;  %6675 = vmatprep.mubr.f32.mxu1 %v374_v42  ;;  %v8156_v42 = vld [vmem:[%s7843_s27 + $0x9a] sm:$0xff] }
  0x68   : > { %6835 = vmatpush3.msra.mxu0 %v5717_v41  ;;  %6627 = vmatprep.mubr.f32.mxu0 %v342_v43  ;;  %v251_v41 = vld [vmem:[%s7843_s27 + $0x98] sm:$0xff]  ;;  %v252_v43 = vld [vmem:[%s7843_s27 + $0xa0] sm:$0xff] }
  0x69   : > { %6676 = vmatmul.mubr.f32.gmra.mxu1 %v375_v44  ;;  %6708 = vmatprep.subr.mxu1 %v296_v45  ;;  %v8160_v44 = vld [vmem:[%s7843_s27 + $0xa2] sm:$0xff] }
  0x6a   : > { %6628 = vmatmul.mubr.f32.gmra.mxu0 %v343_v46  ;;  %6709 = vmatpush3.msra.mxu1 %v296_v45  ;;  %v5754_v45 = vld [vmem:[%s10026_s1 + $0x230] sm:$0xff]  ;;  %v5737_v46 = vld [vmem:[%s10026_s1 + $0x1a8] sm:$0xff] }
  0x6b   : > { %6836 = vmatprep.subr.mxu0 %v5716_v47  ;;  %6710 = vmatprep.mubr.f32.mxu1 %v232_v48  ;;  %v8172_v48 = vld [vmem:[%s7843_s27 + $0xaa] sm:$0xff] }
  0x6c   : > { %6837 = vmatpush3.msra.mxu0 %v5716_v47  ;;  %6838 = vmatprep.mubr.f32.mxu0 %v1163_v49  ;;  %v253_v47 = vld [vmem:[%s7843_s27 + $0xa8] sm:$0xff]  ;;  %v254_v49 = vld [vmem:[%s7843_s27 + $0xb0] sm:$0xff] }
  0x6d   : > { %6711 = vmatmul.mubr.f32.vlgmr.msra.gmra.mxu1 %v233_v50  ;;  %6934 = vmatprep.subr.mxu1 %v5747_v51  ;;  %v8176_v50 = vld [vmem:[%s7843_s27 + $0xb2] sm:$0xff] }
  0x6e   : > { %6839 = vmatmul.mubr.f32.vlgmr.msra.gmra.mxu0 %v1164_v52  ;;  %6935 = vmatpush3.msra.mxu1 %v5747_v51  ;;  %v5753_v51 = vld [vmem:[%s10026_s1 + $0x228] sm:$0xff]  ;;  %v5736_v52 = vld [vmem:[%s10026_s1 + $0x1a0] sm:$0xff] }
  0x6f   : > { %7062 = vmatprep.subr.mxu0 %v5763_v53  ;;  %6713 = vmatprep.mubr.f32.mxu1 %v234_v54  ;;  %v8188_v54 = vld [vmem:[%s7843_s27 + $0xba] sm:$0xff] }
  0x70   : > { %7063 = vmatpush3.msra.mxu0 %v5763_v53  ;;  %6841 = vmatprep.mubr.f32.mxu0 %v8020_v55  ;;  %v255_v53 = vld [vmem:[%s7843_s27 + $0xb8] sm:$0xff] }
  0x71   : > { %6714 = vmatmul.mubr.f32.gmra.mxu1 %v235_v56  ;;  %6936 = vmatprep.subr.mxu1 %v5746_v57  ;;  %v256_v56 = vld [vmem:[%s7843_s27 + $0xc0] sm:$0xff] }
  0x72   : > { %6842 = vmatmul.mubr.f32.gmra.mxu0 %v8027_v58  ;;  %6716 = vmatprep.mubr.f32.mxu1 %v236_v59  ;;  %v5752_v59 = vld [vmem:[%s10026_s1 + $0x220] sm:$0xff] }
  0x73   : > { %6844 = vmatprep.mubr.f32.mxu0 %v8032_v60  ;;  %6937 = vmatpush3.msra.mxu1 %v5746_v57  ;;  %v8192_v57 = vld [vmem:[%s7843_s27 + $0xc2] sm:$0xff] }
  0x74   : > { %7064 = vmatprep.subr.mxu0 %v5762_v61  ;;  %6938 = vmatprep.subr.mxu1 %v5745_v62 }
  0x75   : > { %6717 = vmatmul.mubr.f32.gmra.mxu1 %v237_v63  ;;  %7065 = vmatpush3.msra.mxu0 %v5762_v61  ;;  %v5735_v61 = vld [vmem:[%s10026_s1 + $0x198] sm:$0xff]  ;;  %v8204_v63 = vld [vmem:[%s7843_s27 + $0xca] sm:$0xff] }
  0x76   : > { %6845 = vmatmul.mubr.f32.gmra.mxu0 %v8044_v0  ;;  %6719 = vmatprep.mubr.f32.mxu1 %v238_v1  ;;  %v258_v1 = vld [vmem:[%s7843_s27 + $0xd0] sm:$0xff] }
  0x77   : > { %6847 = vmatprep.mubr.f32.mxu0 %v8048_v2  ;;  %6939 = vmatpush3.msra.mxu1 %v5745_v62  ;;  %v257_v62 = vld [vmem:[%s7843_s27 + $0xc8] sm:$0xff] }
  0x78   : > { %7066 = vmatprep.subr.mxu0 %v5761_v3  ;;  %6940 = vmatprep.subr.mxu1 %v5744_v4 }
  0x79   : > { %6720 = vmatmul.mubr.f32.gmra.mxu1 %v239_v5  ;;  %7067 = vmatpush3.msra.mxu0 %v5761_v3  ;;  %v8208_v3 = vld [vmem:[%s7843_s27 + $0xd2] sm:$0xff] }
  0x7a   : > { %6848 = vmatmul.mubr.f32.gmra.mxu0 %v8060_v6  ;;  %6722 = vmatprep.mubr.f32.mxu1 %v240_v7  ;;  %v5734_v5 = vld [vmem:[%s10026_s1 + $0x190] sm:$0xff]  ;;  %v259_v7 = vld [vmem:[%s7843_s27 + $0xd8] sm:$0xff] }
  0x7b   : > { %6850 = vmatprep.mubr.f32.mxu0 %v8064_v8  ;;  %6941 = vmatpush3.msra.mxu1 %v5744_v4  ;;  %v5751_v4 = vld [vmem:[%s10026_s1 + $0x218] sm:$0xff] }
  0x7c   : > { %7068 = vmatprep.subr.mxu0 %v5760_v9  ;;  %6942 = vmatprep.subr.mxu1 %v5743_v10 }
  0x7d   : > { %6723 = vmatmul.mubr.f32.gmra.mxu1 %v241_v11  ;;  %7069 = vmatpush3.msra.mxu0 %v5760_v9  ;;  %v8220_v9 = vld [vmem:[%s7843_s27 + $0xda] sm:$0xff]  ;;  %v8224_v11 = vld [vmem:[%s7843_s27 + $0xe2] sm:$0xff] }
  0x7e   : > { %6851 = vmatmul.mubr.f32.gmra.mxu0 %v8076_v12  ;;  %6725 = vmatprep.mubr.f32.mxu1 %v242_v13  ;;  %v5750_v13 = vld [vmem:[%s10026_s1 + $0x210] sm:$0xff] }
  0x7f   : > { %6853 = vmatprep.mubr.f32.mxu0 %v8080_v14  ;;  %6943 = vmatpush3.msra.mxu1 %v5743_v10  ;;  %v260_v10 = vld [vmem:[%s7843_s27 + $0xe0] sm:$0xff] }
  0x80   : > { %7070 = vmatprep.subr.mxu0 %v5759_v15  ;;  %6944 = vmatprep.subr.mxu1 %v5742_v16 }
  0x81   : > { %6726 = vmatmul.mubr.f32.gmra.mxu1 %v243_v17  ;;  %7071 = vmatpush3.msra.mxu0 %v5759_v15  ;;  %v5733_v15 = vld [vmem:[%s10026_s1 + $0x188] sm:$0xff] }
  0x82   : > { %6854 = vmatmul.mubr.f32.gmra.mxu0 %v8092_v18  ;;  %6728 = vmatprep.mubr.f32.mxu1 %v244_v19  ;;  %v8236_v17 = vld [vmem:[%s7843_s27 + $0xea] sm:$0xff] }
  0x83   : > { %6856 = vmatprep.mubr.f32.mxu0 %v8096_v20  ;;  %6945 = vmatpush3.msra.mxu1 %v5742_v16  ;;  %v261_v16 = vld [vmem:[%s7843_s27 + $0xe8] sm:$0xff]  ;;  %v262_v19 = vld [vmem:[%s7843_s27 + $0xf0] sm:$0xff] }
  0x84   : > { %7072 = vmatprep.subr.mxu0 %v5758_v21  ;;  %6946 = vmatprep.subr.mxu1 %v5741_v22 }
  0x85   : > { %6729 = vmatmul.mubr.f32.gmra.mxu1 %v245_v23  ;;  %7073 = vmatpush3.msra.mxu0 %v5758_v21  ;;  %v8240_v21 = vld [vmem:[%s7843_s27 + $0xf2] sm:$0xff]  ;;  %v5732_v23 = vld [vmem:[%s10026_s1 + $0x180] sm:$0xff] }
  0x86   : > { %6857 = vmatmul.mubr.f32.gmra.mxu0 %v8108_v24  ;;  %6731 = vmatprep.mubr.f32.mxu1 %v246_v25  ;;  %v263_v25 = vld [vmem:[%s7843_s27 + $0xf8] sm:$0xff] }
  0x87   : > { %6859 = vmatprep.mubr.f32.mxu0 %v8112_v26  ;;  %6947 = vmatpush3.msra.mxu1 %v5741_v22  ;;  %v5749_v22 = vld [vmem:[%s10026_s1 + $0x208] sm:$0xff] }
  0x88   : > { %7074 = vmatprep.subr.mxu0 %v5757_v27  ;;  %6948 = vmatprep.subr.mxu1 %v5740_v28 }
  0x89   : > { %6732 = vmatmul.mubr.f32.gmra.mxu1 %v247_v29  ;;  %7075 = vmatpush3.msra.mxu0 %v5757_v27  ;;  %v8252_v27 = vld [vmem:[%s7843_s27 + $0xfa] sm:$0xff]  ;;  %v8256_v29 = vld [vmem:[%s7843_s27 + $0x102] sm:$0xff] }
  0x8a   : > { %6860 = vmatmul.mubr.f32.gmra.mxu0 %v8124_v30  ;;  %6734 = vmatprep.mubr.f32.mxu1 %v248_v31  ;;  %v5748_v31 = vld [vmem:[%s10026_s1 + $0x200] sm:$0xff] }
  0x8b   : > { %6862 = vmatprep.mubr.f32.mxu0 %v8128_v32  ;;  %6949 = vmatpush3.msra.mxu1 %v5740_v28  ;;  %v264_v28 = vld [vmem:[%s7843_s27 + $0x100] sm:$0xff] }
  0x8c   : > { %7076 = vmatprep.subr.mxu0 %v5756_v33  ;;  %6950 = vmatprep.subr.mxu1 %v5739_v34 }
  0x8d   : > { %6735 = vmatmul.mubr.f32.gmra.mxu1 %v249_v35  ;;  %7077 = vmatpush3.msra.mxu0 %v5756_v33  ;;  %v8264_v33 = vld [vmem:[%s10026_s1 + $0x2f8] sm:$0xff]  ;;  %v8270_v35 = vld [vmem:[%s7843_s27 + $0x10a] sm:$0xff] }
  0x8e   : > { %6863 = vmatmul.mubr.f32.gmra.mxu0 %v8140_v36  ;;  %6737 = vmatprep.mubr.f32.mxu1 %v250_v37  ;;  %v266_v37 = vld [vmem:[%s7843_s27 + $0x110] sm:$0xff] }
  0x8f   : > { %6865 = vmatprep.mubr.f32.mxu0 %v8144_v38  ;;  %6951 = vmatpush3.msra.mxu1 %v5739_v34  ;;  %v265_v34 = vld [vmem:[%s7843_s27 + $0x108] sm:$0xff] }
  0x90   : > { %7078 = vmatprep.subr.mxu0 %v5755_v39  ;;  %6952 = vmatprep.subr.mxu1 %v5738_v40 }
  0x91   : > { %6738 = vmatmul.mubr.f32.gmra.mxu1 %v251_v41  ;;  %7079 = vmatpush3.msra.mxu0 %v5755_v39  ;;  %v8274_v39 = vld [vmem:[%s7843_s27 + $0x112] sm:$0xff] }
  0x92   : > { %6866 = vmatmul.mubr.f32.gmra.mxu0 %v8156_v42  ;;  %6740 = vmatprep.mubr.f32.mxu1 %v252_v43  ;;  %v267_v41 = vld [vmem:[%s7843_s27 + $0x118] sm:$0xff] }
  0x93   : > { %6868 = vmatprep.mubr.f32.mxu0 %v8160_v44  ;;  %6953 = vmatpush3.msra.mxu1 %v5738_v40  ;;  %v8280_v40 = vld [vmem:[%s10026_s1 + $0x378] sm:$0xff] }
  0x94   : > { %7080 = vmatprep.subr.mxu0 %v5754_v45  ;;  %6954 = vmatprep.subr.mxu1 %v5737_v46  ;;  %v8286_v43 = vld [vmem:[%s7843_s27 + $0x11a] sm:$0xff] }
  0x95   : > { %6741 = vmatmul.mubr.f32.gmra.mxu1 %v253_v47  ;;  %7081 = vmatpush3.msra.mxu0 %v5754_v45  ;;  %v268_v45 = vld [vmem:[%s7843_s27 + $0x120] sm:$0xff]  ;;  %v269_v47 = vld [vmem:[%s7843_s27 + $0x128] sm:$0xff] }
  0x96   : > { %6869 = vmatmul.mubr.f32.gmra.mxu0 %v8172_v48  ;;  %6743 = vmatprep.mubr.f32.mxu1 %v254_v49  ;;  %v8297_v49 = vld [vmem:[%s7843_s27 + $0x12a] sm:$0xff] }
  0x97   : > { %6871 = vmatprep.mubr.f32.mxu0 %v8176_v50  ;;  %6955 = vmatpush3.msra.mxu1 %v5737_v46  ;;  %v8291_v46 = vld [vmem:[%s7843_s27 + $0x122] sm:$0xff] }
  0x98   : > { %7082 = vmatprep.subr.mxu0 %v5753_v51  ;;  %6956 = vmatprep.subr.mxu1 %v5736_v52 }
  0x99   : > { %6744 = vmatmul.mubr.f32.gmra.mxu1 %v255_v53  ;;  %7083 = vmatpush3.msra.mxu0 %v5753_v51  ;;  %v270_v51 = vld [vmem:[%s7843_s27 + $0x130] sm:$0xff]  ;;  %v271_v53 = vld [vmem:[%s7843_s27 + $0x138] sm:$0xff] }
  0x9a   : > { %6872 = vmatmul.mubr.f32.gmra.mxu0 %v8188_v54  ;;  %6746 = vmatprep.mubr.f32.mxu1 %v256_v56  ;;  %v8307_v56 = vld [vmem:[%s7843_s27 + $0x13a] sm:$0xff] }
  0x9b   : > { %6874 = vmatprep.mubr.f32.mxu0 %v8192_v57  ;;  %6957 = vmatpush3.msra.mxu1 %v5736_v52  ;;  %v8301_v52 = vld [vmem:[%s7843_s27 + $0x132] sm:$0xff] }
  0x9c   : > { %7084 = vmatprep.subr.mxu0 %v5752_v59  ;;  %6958 = vmatprep.subr.mxu1 %v5735_v61 }
  0x9d   : > { %6747 = vmatmul.mubr.f32.gmra.mxu1 %v257_v62  ;;  %7085 = vmatpush3.msra.mxu0 %v5752_v59  ;;  %v272_v59 = vld [vmem:[%s7843_s27 + $0x140] sm:$0xff]  ;;  %v273_v62 = vld [vmem:[%s7843_s27 + $0x148] sm:$0xff] }
  0x9e   : > { %6875 = vmatmul.mubr.f32.gmra.mxu0 %v8204_v63  ;;  %6749 = vmatprep.mubr.f32.mxu1 %v258_v1  ;;  %v8317_v1 = vld [vmem:[%s7843_s27 + $0x14a] sm:$0xff] }
  0x9f   : > { %6877 = vmatprep.mubr.f32.mxu0 %v8208_v3  ;;  %6959 = vmatpush3.msra.mxu1 %v5735_v61  ;;  %v8311_v61 = vld [vmem:[%s7843_s27 + $0x142] sm:$0xff] }
  0xa0   : > { %7086 = vmatprep.subr.mxu0 %v5751_v4  ;;  %6960 = vmatprep.subr.mxu1 %v5734_v5 }
  0xa1   : > { %6750 = vmatmul.mubr.f32.gmra.mxu1 %v259_v7  ;;  %7087 = vmatpush3.msra.mxu0 %v5751_v4  ;;  %v274_v4 = vld [vmem:[%s7843_s27 + $0x150] sm:$0xff]  ;;  %v275_v7 = vld [vmem:[%s7843_s27 + $0x158] sm:$0xff] }
  0xa2   : > { %6878 = vmatmul.mubr.f32.gmra.mxu0 %v8220_v9  ;;  %6752 = vmatprep.mubr.f32.mxu1 %v260_v10  ;;  %v8327_v10 = vld [vmem:[%s7843_s27 + $0x15a] sm:$0xff] }
  0xa3   : > { %6880 = vmatprep.mubr.f32.mxu0 %v8224_v11  ;;  %6961 = vmatpush3.msra.mxu1 %v5734_v5  ;;  %v8321_v5 = vld [vmem:[%s7843_s27 + $0x152] sm:$0xff] }
  0xa4   : > { %7088 = vmatprep.subr.mxu0 %v5750_v13  ;;  %6962 = vmatprep.subr.mxu1 %v5733_v15 }
  0xa5   : > { %6753 = vmatmul.mubr.f32.gmra.mxu1 %v261_v16  ;;  %7089 = vmatpush3.msra.mxu0 %v5750_v13  ;;  %v276_v13 = vld [vmem:[%s7843_s27 + $0x160] sm:$0xff]  ;;  %v277_v16 = vld [vmem:[%s7843_s27 + $0x168] sm:$0xff] }
  0xa6   : > { %6881 = vmatmul.mubr.f32.gmra.mxu0 %v8236_v17  ;;  %6755 = vmatprep.mubr.f32.mxu1 %v262_v19  ;;  %v8337_v19 = vld [vmem:[%s7843_s27 + $0x16a] sm:$0xff] }
  0xa7   : > { %6883 = vmatprep.mubr.f32.mxu0 %v8240_v21  ;;  %6963 = vmatpush3.msra.mxu1 %v5733_v15  ;;  %v8331_v15 = vld [vmem:[%s7843_s27 + $0x162] sm:$0xff] }
  0xa8   : > { %7090 = vmatprep.subr.mxu0 %v5749_v22  ;;  %6964 = vmatprep.subr.mxu1 %v5732_v23 }
  0xa9   : > { %6756 = vmatmul.mubr.f32.gmra.mxu1 %v263_v25  ;;  %7091 = vmatpush3.msra.mxu0 %v5749_v22  ;;  %v278_v22 = vld [vmem:[%s7843_s27 + $0x170] sm:$0xff]  ;;  %v279_v25 = vld [vmem:[%s7843_s27 + $0x178] sm:$0xff] }
  0xaa   : > { %6884 = vmatmul.mubr.f32.gmra.mxu0 %v8252_v27  ;;  %6758 = vmatprep.mubr.f32.mxu1 %v264_v28  ;;  %v8347_v28 = vld [vmem:[%s7843_s27 + $0x17a] sm:$0xff] }
  0xab   : > { %6886 = vmatprep.mubr.f32.mxu0 %v8256_v29  ;;  %6965 = vmatpush3.msra.mxu1 %v5732_v23  ;;  %v8341_v23 = vld [vmem:[%s7843_s27 + $0x172] sm:$0xff] }
  0xac   : > { %7092 = vmatprep.subr.mxu0 %v5748_v31  ;;  %7190 = vmatprep.subr.mxu1 %v8264_v33 }
  0xad   : > { %6759 = vmatmul.mubr.f32.gmra.mxu1 %v265_v34  ;;  %7093 = vmatpush3.msra.mxu0 %v5748_v31  ;;  %v280_v31 = vld [vmem:[%s7843_s27 + $0x180] sm:$0xff] }
  0xae   : > { %6887 = vmatmul.mubr.f32.gmra.mxu0 %v8270_v35  ;;  %6761 = vmatprep.mubr.f32.mxu1 %v266_v37  ;;  %v8351_v34 = vld [vmem:[%s7843_s27 + $0x182] sm:$0xff] }
  0xaf   : > { %6889 = vmatprep.mubr.f32.mxu0 %v8274_v39  ;;  %7318 = vmatprep.subr.mxu0 %v8280_v40  ;;  %v281_v37 = vld [vmem:[%s7843_s27 + $0x188] sm:$0xff] }
  0xb1   : > { %6762 = vmatmul.mubr.f32.gmra.mxu1 %v267_v41  ;;  %v8357_v41 = vld [vmem:[%s7843_s27 + $0x18a] sm:$0xff] }
  0xb2   : > { %6890 = vmatmul.mubr.f32.gmra.mxu0 %v8286_v43  ;;  %6764 = vmatprep.mubr.f32.mxu1 %v268_v45  ;;  %v282_v45 = vld [vmem:[%s7843_s27 + $0x190] sm:$0xff] }
  0xb3   : > { %6892 = vmatprep.mubr.f32.mxu0 %v8291_v46 }
  0xb5   : > { %6765 = vmatmul.mubr.f32.gmra.mxu1 %v269_v47  ;;  %v8361_v47 = vld [vmem:[%s7843_s27 + $0x192] sm:$0xff] }
  0xb6   : > { %6893 = vmatmul.mubr.f32.gmra.mxu0 %v8297_v49  ;;  %6767 = vmatprep.mubr.f32.mxu1 %v270_v51  ;;  %v283_v51 = vld [vmem:[%s7843_s27 + $0x198] sm:$0xff] }
  0xb7   : > { %6895 = vmatprep.mubr.f32.mxu0 %v8301_v52 }
  0xb9   : > { %6768 = vmatmul.mubr.f32.gmra.mxu1 %v271_v53  ;;  %v8367_v53 = vld [vmem:[%s7843_s27 + $0x19a] sm:$0xff] }
  0xba   : > { %6896 = vmatmul.mubr.f32.gmra.mxu0 %v8307_v56  ;;  %6770 = vmatprep.mubr.f32.mxu1 %v272_v59  ;;  %v284_v59 = vld [vmem:[%s7843_s27 + $0x1a0] sm:$0xff] }
  0xbb   : > { %6898 = vmatprep.mubr.f32.mxu0 %v8311_v61 }
  0xbd   : > { %6771 = vmatmul.mubr.f32.gmra.mxu1 %v273_v62  ;;  %v8371_v62 = vld [vmem:[%s7843_s27 + $0x1a2] sm:$0xff] }
  0xbe   : > { %6899 = vmatmul.mubr.f32.gmra.mxu0 %v8317_v1  ;;  %6773 = vmatprep.mubr.f32.mxu1 %v274_v4  ;;  %v285_v4 = vld [vmem:[%s7843_s27 + $0x1a8] sm:$0xff] }
  0xbf   : > { %6901 = vmatprep.mubr.f32.mxu0 %v8321_v5 }
  0xc1   : > { %6774 = vmatmul.mubr.f32.gmra.mxu1 %v275_v7  ;;  %v8377_v7 = vld [vmem:[%s7843_s27 + $0x1aa] sm:$0xff] }
  0xc2   : > { %6902 = vmatmul.mubr.f32.gmra.mxu0 %v8327_v10  ;;  %6776 = vmatprep.mubr.f32.mxu1 %v276_v13  ;;  %v286_v13 = vld [vmem:[%s7843_s27 + $0x1b0] sm:$0xff] }
  0xc3   : > { %6904 = vmatprep.mubr.f32.mxu0 %v8331_v15 }
  0xc5   : > { %6777 = vmatmul.mubr.f32.gmra.mxu1 %v277_v16  ;;  %v8381_v16 = vld [vmem:[%s7843_s27 + $0x1b2] sm:$0xff] }
  0xc6   : > { %6905 = vmatmul.mubr.f32.gmra.mxu0 %v8337_v19  ;;  %6779 = vmatprep.mubr.f32.mxu1 %v278_v22  ;;  %v287_v22 = vld [vmem:[%s7843_s27 + $0x1b8] sm:$0xff] }
  0xc7   : > { %6907 = vmatprep.mubr.f32.mxu0 %v8341_v23 }
  0xc9   : > { %6780 = vmatmul.mubr.f32.gmra.mxu1 %v279_v25  ;;  %v8387_v25 = vld [vmem:[%s7843_s27 + $0x1ba] sm:$0xff] }
  0xca   : > { %6908 = vmatmul.mubr.f32.gmra.mxu0 %v8347_v28  ;;  %6782 = vmatprep.mubr.f32.mxu1 %v280_v31  ;;  %10039 = vst [vmem:[#allocation2_spill] sm:$0xff] %v8387_v25  ;;  %v288_v31 = vld [vmem:[%s7843_s27 + $0x1c0] sm:$0xff] }
  0xcb   : > { %6910 = vmatprep.mubr.f32.mxu0 %v8351_v34 }
  0xcd   : > { %6783 = vmatmul.mubr.f32.gmra.mxu1 %v281_v37  ;;  %v8391_v37 = vld [vmem:[%s7843_s27 + $0x1c2] sm:$0xff] }
  0xce   : > { %6911 = vmatmul.mubr.f32.gmra.mxu0 %v8357_v41  ;;  %6785 = vmatprep.mubr.f32.mxu1 %v282_v45  ;;  %10040 = vst [vmem:[#allocation3_spill] sm:$0xff] %v8391_v37  ;;  %v289_v45 = vld [vmem:[%s7843_s27 + $0x1c8] sm:$0xff] }
  0xcf   : > { %6913 = vmatprep.mubr.f32.mxu0 %v8361_v47 }
  0xd1   : > { %6786 = vmatmul.mubr.f32.gmra.mxu1 %v283_v51  ;;  %v8397_v51 = vld [vmem:[%s7843_s27 + $0x1ca] sm:$0xff] }
  0xd2   : > { %6914 = vmatmul.mubr.f32.gmra.mxu0 %v8367_v53  ;;  %6788 = vmatprep.mubr.f32.mxu1 %v284_v59  ;;  %10041 = vst [vmem:[#allocation4_spill] sm:$0xff] %v8397_v51  ;;  %v290_v59 = vld [vmem:[%s7843_s27 + $0x1d0] sm:$0xff] }
  0xd3   : > { %6916 = vmatprep.mubr.f32.mxu0 %v8371_v62 }
  0xd5   : > { %6789 = vmatmul.mubr.f32.gmra.mxu1 %v285_v4  ;;  %v8401_v4 = vld [vmem:[%s7843_s27 + $0x1d2] sm:$0xff] }
  0xd6   : > { %6917 = vmatmul.mubr.f32.gmra.mxu0 %v8377_v7  ;;  %6791 = vmatprep.mubr.f32.mxu1 %v286_v13  ;;  %10042 = vst [vmem:[#allocation5_spill] sm:$0xff] %v8401_v4  ;;  %v291_v13 = vld [vmem:[%s7843_s27 + $0x1d8] sm:$0xff] }
  0xd7   : > { %6919 = vmatprep.mubr.f32.mxu0 %v8381_v16 }
  0xd9   : > { %6792 = vmatmul.mubr.f32.gmra.mxu1 %v287_v22  ;;  %v8407_v22 = vld [vmem:[%s7843_s27 + $0x1da] sm:$0xff] }
  0xda   : > { %6920 = vmatmul.mubr.f32.gmra.mxu0 %v8387_v25  ;;  %6794 = vmatprep.mubr.f32.mxu1 %v288_v31  ;;  %10043 = vst [vmem:[#allocation6_spill] sm:$0xff] %v8407_v22  ;;  %v292_v31 = vld [vmem:[%s7843_s27 + $0x1e0] sm:$0xff]  ;;  %v293_v25 = vld [vmem:[%s7843_s27 + $0x1e8] sm:$0xff] }
  0xdb   : > { %6922 = vmatprep.mubr.f32.mxu0 %v8391_v37  ;;  %v8411_v37 = vld [vmem:[%s7843_s27 + $0x1e2] sm:$0xff] }
  0xdc   : > { %10044 = vst [vmem:[#allocation7_spill] sm:$0xff] %v8411_v37 }
  0xdd   : > { %6795 = vmatmul.mubr.f32.gmra.mxu1 %v289_v45  ;;  %v8417_v45 = vld [vmem:[%s7843_s27 + $0x1ea] sm:$0xff] }
  0xde   : > { %6923 = vmatmul.mubr.f32.gmra.mxu0 %v8397_v51  ;;  %6797 = vmatprep.mubr.f32.mxu1 %v290_v59  ;;  %v294_v59 = vld [vmem:[%s7843_s27 + $0x1f0] sm:$0xff]  ;;  %v295_v51 = vld [vmem:[%s7843_s27 + $0x1f8] sm:$0xff] }
  0xdf   : > { %6925 = vmatprep.mubr.f32.mxu0 %v8401_v4  ;;  %v8421_v4 = vld [vmem:[%s7843_s27 + $0x1f2] sm:$0xff] }
  0xe0   : > { %10045 = vst [vmem:[#allocation8_spill] sm:$0xff] %v8421_v4 }
  0xe1   : > { %6798 = vmatmul.mubr.f32.gmra.mxu1 %v291_v13  ;;  %v8427_v13 = vld [vmem:[%s7843_s27 + $0x1fa] sm:$0xff] }
  0xe2   : > { %6926 = vmatmul.mubr.f32.gmra.mxu0 %v8407_v22  ;;  %6800 = vmatprep.mubr.f32.mxu1 %v292_v31  ;;  %10046 = vst [vmem:[#allocation9_spill] sm:$0xff] %v8427_v13  ;;  %v2223_v31 = vld [vmem:[%s7843_s27 + $0x13] sm:$0xff] }
  0xe3   : > { %6928 = vmatprep.mubr.f32.mxu0 %v8411_v37  ;;  %v2224_v37 = vld [vmem:[%s7843_s27 + $0x1b] sm:$0xff] }
  0xe5   : > { %6801 = vmatmul.mubr.f32.gmra.mxu1 %v293_v25  ;;  %v2225_v25 = vld [vmem:[%s7843_s27 + $0x23] sm:$0xff] }
  0xe6   : > { %6929 = vmatmul.mubr.f32.gmra.mxu0 %v8417_v45  ;;  %6803 = vmatprep.mubr.f32.mxu1 %v294_v59  ;;  %v5778_v59 = vld [vmem:[%s10026_s1 + $0x2f0] sm:$0xff] }
  0xe7   : > { %6931 = vmatprep.mubr.f32.mxu0 %v8421_v4 }
  0xe9   : > { %6804 = vmatmul.mubr.f32.gmra.mxu1 %v295_v51 }
  0xea   : > { %6932 = vmatmul.mubr.f32.gmra.mxu0 %v8427_v13  ;;  %6966 = vmatprep.mubr.f32.mxu1 %v8020_v55  ;;  %v5794_v55 = vld [vmem:[%s10026_s1 + $0x370] sm:$0xff] }
  0xeb   : > { %7094 = vmatprep.mubr.f32.mxu0 %v2223_v31 }
  0xed   : > { %v8433_v22 = vpop.f32.mrf.mxu1  ;;  %6967 = vmatmul.mubr.f32.vlgmr.msra.gmra.mxu1 %v8027_v58  ;;  %v2226_v58 = vld [vmem:[%s7843_s27 + $0x2b] sm:$0xff] }
  0xee   : > { %10047 = vst [vmem:[#allocation10_spill] sm:$0xff] %v8433_v22  ;;  %v8440_v4 = vpop.f32.mrf.mxu0  ;;  %7095 = vmatmul.mubr.f32.vlgmr.msra.gmra.mxu0 %v2224_v37  ;;  %7191 = vmatpush3.msra.mxu1 %v8264_v33  ;;  %v2227_v22 = vld [vmem:[%s7843_s27 + $0x33] sm:$0xff]  ;;  %v5777_v33 = vld [vmem:[%s10026_s1 + $0x2e8] sm:$0xff] }
  0xef   : > { %v8446_v51 = vpop.f32.mrf.mxu1  ;;  %6969 = vmatprep.mubr.f32.mxu1 %v8032_v60  ;;  %7319 = vmatpush3.msra.mxu0 %v8280_v40  ;;  %v5793_v40 = vld [vmem:[%s10026_s1 + $0x368] sm:$0xff] }
  0xf0   : > { %10048 = vst [vmem:[#allocation11_spill] sm:$0xff] %v8446_v51  ;;  %v8451_v31 = vpop.f32.mrf.mxu0  ;;  %7097 = vmatprep.mubr.f32.mxu0 %v2225_v25  ;;  %7192 = vmatprep.subr.mxu1 %v5778_v59  ;;  %v2229_v51 = vld [vmem:[%s7843_s27 + $0x43] sm:$0xff] }
  0xf1   : > { %v8454_v37 = vpop.f32.mrf.mxu1  ;;  %6970 = vmatmul.mubr.f32.gmra.mxu1 %v8044_v0  ;;  %7320 = vmatprep.subr.mxu0 %v5794_v55 }
  0xf2   : > { %10049 = vst [vmem:[#allocation12_spill] sm:$0xff] %v8454_v37  ;;  %v8460_v60 = vpop.f32.mrf.mxu0  ;;  %7098 = vmatmul.mubr.f32.gmra.mxu0 %v2226_v58  ;;  %6972 = vmatprep.mubr.f32.mxu1 %v8048_v2  ;;  %v2228_v37 = vld [vmem:[%s7843_s27 + $0x3b] sm:$0xff] }
  0xf3   : > { %v8466_v25 = vpop.f32.mrf.mxu1  ;;  %7100 = vmatprep.mubr.f32.mxu0 %v2227_v22  ;;  %7193 = vmatpush3.msra.mxu1 %v5778_v59  ;;  %v5776_v2 = vld [vmem:[%s10026_s1 + $0x2e0] sm:$0xff] }
  0xf4   : > { %10050 = vst [vmem:[#allocation13_spill] sm:$0xff] %v8466_v25  ;;  %v8469_v0 = vpop.f32.mrf.mxu0  ;;  %7321 = vmatpush3.msra.mxu0 %v5794_v55  ;;  %7194 = vmatprep.subr.mxu1 %v5777_v33  ;;  %v5792_v22 = vld [vmem:[%s10026_s1 + $0x360] sm:$0xff]  ;;  %v2230_v55 = vld [vmem:[%s7843_s27 + $0x4b] sm:$0xff] }
  0xf5   : > { %v8472_v13 = vpop.f32.mrf.mxu1  ;;  %6973 = vmatmul.mubr.f32.gmra.mxu1 %v8060_v6  ;;  %7322 = vmatprep.subr.mxu0 %v5793_v40 }
  0xf6   : > { %10051 = vst [vmem:[#allocation14_spill] sm:$0xff] %v8472_v13  ;;  %v8478_v58 = vpop.f32.mrf.mxu0  ;;  %7101 = vmatmul.mubr.f32.gmra.mxu0 %v2228_v37  ;;  %6975 = vmatprep.mubr.f32.mxu1 %v8064_v8  ;;  %v2231_v13 = vld [vmem:[%s7843_s27 + $0x53] sm:$0xff] }
  0xf7   : > { %v8484_v59 = vpop.f32.mrf.mxu1  ;;  %7103 = vmatprep.mubr.f32.mxu0 %v2229_v51  ;;  %7195 = vmatpush3.msra.mxu1 %v5777_v33  ;;  %v5775_v8 = vld [vmem:[%s10026_s1 + $0x2d8] sm:$0xff] }
  0xf8   : > { %10052 = vst [vmem:[#allocation15_spill] sm:$0xff] %v8484_v59  ;;  %v8487_v6 = vpop.f32.mrf.mxu0  ;;  %7323 = vmatpush3.msra.mxu0 %v5793_v40  ;;  %7196 = vmatprep.subr.mxu1 %v5776_v2  ;;  %v5791_v51 = vld [vmem:[%s10026_s1 + $0x358] sm:$0xff] }
  0xf9   : > { %v8490_v25 = vpop.f32.mrf.mxu1  ;;  %6976 = vmatmul.mubr.f32.gmra.mxu1 %v8076_v12  ;;  %7324 = vmatprep.subr.mxu0 %v5792_v22  ;;  %v2232_v40 = vld [vmem:[%s7843_s27 + $0x5b] sm:$0xff] }
  0xfa   : > { %10053 = vst [vmem:[#allocation16_spill] sm:$0xff] %v8490_v25  ;;  %v8496_v37 = vpop.f32.mrf.mxu0  ;;  %7104 = vmatmul.mubr.f32.gmra.mxu0 %v2230_v55  ;;  %6978 = vmatprep.mubr.f32.mxu1 %v8080_v14  ;;  %v2233_v25 = vld [vmem:[%s7843_s27 + $0x63] sm:$0xff]  ;;  %v5774_v14 = vld [vmem:[%s10026_s1 + $0x2d0] sm:$0xff] }
  0xfb   : > { %v8502_v33 = vpop.f32.mrf.mxu1  ;;  %7106 = vmatprep.mubr.f32.mxu0 %v2231_v13  ;;  %7197 = vmatpush3.msra.mxu1 %v5776_v2  ;;  %v5790_v13 = vld [vmem:[%s10026_s1 + $0x350] sm:$0xff] }
  0xfc   : > { %10054 = vst [vmem:[#allocation17_spill] sm:$0xff] %v8502_v33  ;;  %v8505_v12 = vpop.f32.mrf.mxu0  ;;  %7325 = vmatpush3.msra.mxu0 %v5792_v22  ;;  %7198 = vmatprep.subr.mxu1 %v5775_v8  ;;  %v2234_v22 = vld [vmem:[%s7843_s27 + $0x6b] sm:$0xff] }
  0xfd   : > { %v8508_v59 = vpop.f32.mrf.mxu1  ;;  %6979 = vmatmul.mubr.f32.gmra.mxu1 %v8092_v18  ;;  %7326 = vmatprep.subr.mxu0 %v5791_v51 }
  0xfe   : > { %10055 = vst [vmem:[#allocation18_spill] sm:$0xff] %v8508_v59  ;;  %v8514_v55 = vpop.f32.mrf.mxu0  ;;  %7107 = vmatmul.mubr.f32.gmra.mxu0 %v2232_v40  ;;  %6981 = vmatprep.mubr.f32.mxu1 %v8096_v20  ;;  %v2235_v59 = vld [vmem:[%s7843_s27 + $0x73] sm:$0xff]  ;;  %v5773_v20 = vld [vmem:[%s10026_s1 + $0x2c8] sm:$0xff] }
  0xff   : > { %v8520_v2 = vpop.f32.mrf.mxu1  ;;  %7109 = vmatprep.mubr.f32.mxu0 %v2233_v25  ;;  %7199 = vmatpush3.msra.mxu1 %v5775_v8  ;;  %v5789_v25 = vld [vmem:[%s10026_s1 + $0x348] sm:$0xff] }
 0x100   : > { %10056 = vst [vmem:[#allocation19_spill] sm:$0xff] %v8520_v2  ;;  %v8523_v18 = vpop.f32.mrf.mxu0  ;;  %7327 = vmatpush3.msra.mxu0 %v5791_v51  ;;  %7200 = vmatprep.subr.mxu1 %v5774_v14  ;;  %v2236_v51 = vld [vmem:[%s7843_s27 + $0x7b] sm:$0xff] }
 0x101   : > { %v8526_v33 = vpop.f32.mrf.mxu1  ;;  %6982 = vmatmul.mubr.f32.gmra.mxu1 %v8108_v24  ;;  %7328 = vmatprep.subr.mxu0 %v5790_v13 }
 0x102   : > { %10057 = vst [vmem:[#allocation20_spill] sm:$0xff] %v8526_v33  ;;  %v8532_v40 = vpop.f32.mrf.mxu0  ;;  %7110 = vmatmul.mubr.f32.gmra.mxu0 %v2234_v22  ;;  %6984 = vmatprep.mubr.f32.mxu1 %v8112_v26  ;;  %v2237_v33 = vld [vmem:[%s7843_s27 + $0x83] sm:$0xff] }
 0x103   : > { %v8538_v8 = vpop.f32.mrf.mxu1  ;;  %7112 = vmatprep.mubr.f32.mxu0 %v2235_v59  ;;  %7201 = vmatpush3.msra.mxu1 %v5774_v14  ;;  %v5772_v26 = vld [vmem:[%s10026_s1 + $0x2c0] sm:$0xff] }
 0x104   : > { %10058 = vst [vmem:[#allocation21_spill] sm:$0xff] %v8538_v8  ;;  %v8541_v24 = vpop.f32.mrf.mxu0  ;;  %7329 = vmatpush3.msra.mxu0 %v5790_v13  ;;  %7202 = vmatprep.subr.mxu1 %v5773_v20  ;;  %v5788_v59 = vld [vmem:[%s10026_s1 + $0x340] sm:$0xff]  ;;  %v2238_v13 = vld [vmem:[%s7843_s27 + $0x8b] sm:$0xff] }
 0x105   : > { %v8544_v2 = vpop.f32.mrf.mxu1  ;;  %6985 = vmatmul.mubr.f32.gmra.mxu1 %v8124_v30  ;;  %7330 = vmatprep.subr.mxu0 %v5789_v25 }
 0x106   : > { %10059 = vst [vmem:[#allocation22_spill] sm:$0xff] %v8544_v2  ;;  %v8550_v22 = vpop.f32.mrf.mxu0  ;;  %7113 = vmatmul.mubr.f32.gmra.mxu0 %v2236_v51  ;;  %6987 = vmatprep.mubr.f32.mxu1 %v8128_v32  ;;  %v2239_v2 = vld [vmem:[%s7843_s27 + $0x93] sm:$0xff] }
 0x107   : > { %v8556_v14 = vpop.f32.mrf.mxu1  ;;  %7115 = vmatprep.mubr.f32.mxu0 %v2237_v33  ;;  %7203 = vmatpush3.msra.mxu1 %v5773_v20  ;;  %v5771_v32 = vld [vmem:[%s10026_s1 + $0x2b8] sm:$0xff] }
 0x108   : > { %10060 = vst [vmem:[#allocation23_spill] sm:$0xff] %v8556_v14  ;;  %v8559_v30 = vpop.f32.mrf.mxu0  ;;  %7331 = vmatpush3.msra.mxu0 %v5789_v25  ;;  %7204 = vmatprep.subr.mxu1 %v5772_v26  ;;  %v5787_v33 = vld [vmem:[%s10026_s1 + $0x338] sm:$0xff] }
 0x109   : > { %v8562_v8 = vpop.f32.mrf.mxu1  ;;  %6988 = vmatmul.mubr.f32.gmra.mxu1 %v8140_v36  ;;  %7332 = vmatprep.subr.mxu0 %v5788_v59  ;;  %v2240_v25 = vld [vmem:[%s7843_s27 + $0x9b] sm:$0xff] }
 0x10a   : > { %10061 = vst [vmem:[#allocation24_spill] sm:$0xff] %v8562_v8  ;;  %v8568_v51 = vpop.f32.mrf.mxu0  ;;  %7116 = vmatmul.mubr.f32.gmra.mxu0 %v2238_v13  ;;  %6990 = vmatprep.mubr.f32.mxu1 %v8144_v38  ;;  %v2241_v8 = vld [vmem:[%s7843_s27 + $0xa3] sm:$0xff]  ;;  %v5770_v38 = vld [vmem:[%s10026_s1 + $0x2b0] sm:$0xff] }
 0x10b   : > { %v8574_v20 = vpop.f32.mrf.mxu1  ;;  %7118 = vmatprep.mubr.f32.mxu0 %v2239_v2  ;;  %7205 = vmatpush3.msra.mxu1 %v5772_v26  ;;  %v5786_v2 = vld [vmem:[%s10026_s1 + $0x330] sm:$0xff] }
 0x10c   : > { %10062 = vst [vmem:[#allocation25_spill] sm:$0xff] %v8574_v20  ;;  %v8577_v36 = vpop.f32.mrf.mxu0  ;;  %7333 = vmatpush3.msra.mxu0 %v5788_v59  ;;  %7206 = vmatprep.subr.mxu1 %v5771_v32  ;;  %v2242_v59 = vld [vmem:[%s7843_s27 + $0xab] sm:$0xff] }
 0x10d   : > { %v8580_v14 = vpop.f32.mrf.mxu1  ;;  %6991 = vmatmul.mubr.f32.gmra.mxu1 %v8156_v42  ;;  %7334 = vmatprep.subr.mxu0 %v5787_v33 }
 0x10e   : > { %10063 = vst [vmem:[#allocation26_spill] sm:$0xff] %v8580_v14  ;;  %v8586_v13 = vpop.f32.mrf.mxu0  ;;  %7119 = vmatmul.mubr.f32.gmra.mxu0 %v2240_v25  ;;  %6993 = vmatprep.mubr.f32.mxu1 %v8160_v44  ;;  %v2243_v14 = vld [vmem:[%s7843_s27 + $0xb3] sm:$0xff]  ;;  %v5769_v44 = vld [vmem:[%s10026_s1 + $0x2a8] sm:$0xff] }
 0x10f   : > { %v8592_v26 = vpop.f32.mrf.mxu1  ;;  %7121 = vmatprep.mubr.f32.mxu0 %v2241_v8  ;;  %7207 = vmatpush3.msra.mxu1 %v5771_v32  ;;  %v5785_v8 = vld [vmem:[%s10026_s1 + $0x328] sm:$0xff] }
 0x110   : > { %10064 = vst [vmem:[#allocation27_spill] sm:$0xff] %v8592_v26  ;;  %v8595_v42 = vpop.f32.mrf.mxu0  ;;  %7335 = vmatpush3.msra.mxu0 %v5787_v33  ;;  %7208 = vmatprep.subr.mxu1 %v5770_v38  ;;  %v2244_v33 = vld [vmem:[%s7843_s27 + $0xbb] sm:$0xff] }
 0x111   : > { %v8598_v20 = vpop.f32.mrf.mxu1  ;;  %6994 = vmatmul.mubr.f32.gmra.mxu1 %v8172_v48  ;;  %7336 = vmatprep.subr.mxu0 %v5786_v2 }
 0x112   : > { %10065 = vst [vmem:[#allocation28_spill] sm:$0xff] %v8598_v20  ;;  %v8604_v25 = vpop.f32.mrf.mxu0  ;;  %7122 = vmatmul.mubr.f32.gmra.mxu0 %v2242_v59  ;;  %6996 = vmatprep.mubr.f32.mxu1 %v8176_v50  ;;  %v2245_v20 = vld [vmem:[%s7843_s27 + $0xc3] sm:$0xff] }
 0x113   : > { %v8610_v32 = vpop.f32.mrf.mxu1  ;;  %7124 = vmatprep.mubr.f32.mxu0 %v2243_v14  ;;  %7209 = vmatpush3.msra.mxu1 %v5770_v38  ;;  %v5768_v50 = vld [vmem:[%s10026_s1 + $0x2a0] sm:$0xff] }
 0x114   : > { %10066 = vst [vmem:[#allocation29_spill] sm:$0xff] %v8610_v32  ;;  %v8613_v48 = vpop.f32.mrf.mxu0  ;;  %7337 = vmatpush3.msra.mxu0 %v5786_v2  ;;  %7210 = vmatprep.subr.mxu1 %v5769_v44  ;;  %v5784_v14 = vld [vmem:[%s10026_s1 + $0x320] sm:$0xff]  ;;  %v2246_v2 = vld [vmem:[%s7843_s27 + $0xcb] sm:$0xff] }
 0x115   : > { %v8616_v26 = vpop.f32.mrf.mxu1  ;;  %6997 = vmatmul.mubr.f32.gmra.mxu1 %v8188_v54  ;;  %7338 = vmatprep.subr.mxu0 %v5785_v8 }
 0x116   : > { %10067 = vst [vmem:[#allocation30_spill] sm:$0xff] %v8616_v26  ;;  %v8622_v59 = vpop.f32.mrf.mxu0  ;;  %7125 = vmatmul.mubr.f32.gmra.mxu0 %v2244_v33  ;;  %6999 = vmatprep.mubr.f32.mxu1 %v8192_v57  ;;  %v2247_v26 = vld [vmem:[%s7843_s27 + $0xd3] sm:$0xff] }
 0x117   : > { %v8628_v38 = vpop.f32.mrf.mxu1  ;;  %7127 = vmatprep.mubr.f32.mxu0 %v2245_v20  ;;  %7211 = vmatpush3.msra.mxu1 %v5769_v44  ;;  %v5767_v57 = vld [vmem:[%s10026_s1 + $0x298] sm:$0xff] }
 0x118   : > { %10068 = vst [vmem:[#allocation31_spill] sm:$0xff] %v8628_v38  ;;  %v8631_v54 = vpop.f32.mrf.mxu0  ;;  %7339 = vmatpush3.msra.mxu0 %v5785_v8  ;;  %7212 = vmatprep.subr.mxu1 %v5768_v50  ;;  %v5783_v20 = vld [vmem:[%s10026_s1 + $0x318] sm:$0xff] }
 0x119   : > { %v8634_v32 = vpop.f32.mrf.mxu1  ;;  %7000 = vmatmul.mubr.f32.gmra.mxu1 %v8204_v63  ;;  %7340 = vmatprep.subr.mxu0 %v5784_v14  ;;  %v2248_v8 = vld [vmem:[%s7843_s27 + $0xdb] sm:$0xff] }
 0x11a   : > { %10069 = vst [vmem:[#allocation32_spill] sm:$0xff] %v8634_v32  ;;  %v8640_v33 = vpop.f32.mrf.mxu0  ;;  %7128 = vmatmul.mubr.f32.gmra.mxu0 %v2246_v2  ;;  %7002 = vmatprep.mubr.f32.mxu1 %v8208_v3  ;;  %v2249_v32 = vld [vmem:[%s7843_s27 + $0xe3] sm:$0xff]  ;;  %v5766_v3 = vld [vmem:[%s10026_s1 + $0x290] sm:$0xff] }
 0x11b   : > { %v8646_v44 = vpop.f32.mrf.mxu1  ;;  %7130 = vmatprep.mubr.f32.mxu0 %v2247_v26  ;;  %7213 = vmatpush3.msra.mxu1 %v5768_v50  ;;  %v5782_v26 = vld [vmem:[%s10026_s1 + $0x310] sm:$0xff] }
 0x11c   : > { %10070 = vst [vmem:[#allocation33_spill] sm:$0xff] %v8646_v44  ;;  %v8649_v63 = vpop.f32.mrf.mxu0  ;;  %7341 = vmatpush3.msra.mxu0 %v5784_v14  ;;  %7214 = vmatprep.subr.mxu1 %v5767_v57  ;;  %v2250_v14 = vld [vmem:[%s7843_s27 + $0xeb] sm:$0xff] }
 0x11d   : > { %v8652_v38 = vpop.f32.mrf.mxu1  ;;  %7003 = vmatmul.mubr.f32.gmra.mxu1 %v8220_v9  ;;  %7342 = vmatprep.subr.mxu0 %v5783_v20 }
 0x11e   : > { %10071 = vst [vmem:[#allocation34_spill] sm:$0xff] %v8652_v38  ;;  %v8658_v2 = vpop.f32.mrf.mxu0  ;;  %7131 = vmatmul.mubr.f32.gmra.mxu0 %v2248_v8  ;;  %7005 = vmatprep.mubr.f32.mxu1 %v8224_v11  ;;  %v2251_v38 = vld [vmem:[%s7843_s27 + $0xf3] sm:$0xff]  ;;  %v5765_v11 = vld [vmem:[%s10026_s1 + $0x288] sm:$0xff] }
 0x11f   : > { %v8664_v50 = vpop.f32.mrf.mxu1  ;;  %7133 = vmatprep.mubr.f32.mxu0 %v2249_v32  ;;  %7215 = vmatpush3.msra.mxu1 %v5767_v57  ;;  %v5781_v32 = vld [vmem:[%s10026_s1 + $0x308] sm:$0xff] }
 0x120   : > { %10072 = vst [vmem:[#allocation35_spill] sm:$0xff] %v8664_v50  ;;  %v8667_v9 = vpop.f32.mrf.mxu0  ;;  %7343 = vmatpush3.msra.mxu0 %v5783_v20  ;;  %7216 = vmatprep.subr.mxu1 %v5766_v3  ;;  %v2252_v20 = vld [vmem:[%s7843_s27 + $0xfb] sm:$0xff] }
 0x121   : > { %v8670_v44 = vpop.f32.mrf.mxu1  ;;  %7006 = vmatmul.mubr.f32.gmra.mxu1 %v8236_v17  ;;  %7344 = vmatprep.subr.mxu0 %v5782_v26 }
 0x122   : > { %10073 = vst [vmem:[#allocation36_spill] sm:$0xff] %v8670_v44  ;;  %v8676_v8 = vpop.f32.mrf.mxu0  ;;  %7134 = vmatmul.mubr.f32.gmra.mxu0 %v2250_v14  ;;  %7008 = vmatprep.mubr.f32.mxu1 %v8240_v21  ;;  %v2253_v44 = vld [vmem:[%s7843_s27 + $0x103] sm:$0xff] }
 0x123   : > { %v8682_v57 = vpop.f32.mrf.mxu1  ;;  %7136 = vmatprep.mubr.f32.mxu0 %v2251_v38  ;;  %7217 = vmatpush3.msra.mxu1 %v5766_v3  ;;  %v5764_v21 = vld [vmem:[%s10026_s1 + $0x280] sm:$0xff] }
 0x124   : > { %10074 = vst [vmem:[#allocation37_spill] sm:$0xff] %v8682_v57  ;;  %v8685_v17 = vpop.f32.mrf.mxu0  ;;  %7345 = vmatpush3.msra.mxu0 %v5782_v26  ;;  %7218 = vmatprep.subr.mxu1 %v5765_v11  ;;  %v5780_v38 = vld [vmem:[%s10026_s1 + $0x300] sm:$0xff]  ;;  %v2254_v26 = vld [vmem:[%s7843_s27 + $0x10b] sm:$0xff] }
 0x125   : > { %v8688_v50 = vpop.f32.mrf.mxu1  ;;  %7009 = vmatmul.mubr.f32.gmra.mxu1 %v8252_v27  ;;  %7346 = vmatprep.subr.mxu0 %v5781_v32 }
 0x126   : > { %10075 = vst [vmem:[#allocation38_spill] sm:$0xff] %v8688_v50  ;;  %v8694_v14 = vpop.f32.mrf.mxu0  ;;  %7137 = vmatmul.mubr.f32.gmra.mxu0 %v2252_v20  ;;  %7011 = vmatprep.mubr.f32.mxu1 %v8256_v29  ;;  %v2255_v50 = vld [vmem:[%s7843_s27 + $0x113] sm:$0xff] }
 0x127   : > { %v8700_v3 = vpop.f32.mrf.mxu1  ;;  %7139 = vmatprep.mubr.f32.mxu0 %v2253_v44  ;;  %7219 = vmatpush3.msra.mxu1 %v5765_v11  ;;  %v8712_v29 = vld [vmem:[%s10026_s1 + $0x3f8] sm:$0xff] }
 0x128   : > { %10076 = vst [vmem:[#allocation39_spill] sm:$0xff] %v8700_v3  ;;  %v8703_v27 = vpop.f32.mrf.mxu0  ;;  %7347 = vmatpush3.msra.mxu0 %v5781_v32  ;;  %7220 = vmatprep.subr.mxu1 %v5764_v21  ;;  %10078 = vst [vmem:[#allocation41_spill] sm:$0xff] %v8712_v29  ;;  %v8720_v11 = vld [vmem:[%s10026_s1 + $0x478] sm:$0xff] }
 0x129   : > { %v8706_v57 = vpop.f32.mrf.mxu1  ;;  %7012 = vmatmul.mubr.f32.gmra.mxu1 %v8270_v35  ;;  %7348 = vmatprep.subr.mxu0 %v5780_v38  ;;  %v2256_v35 = vld [vmem:[%s7843_s27 + $0x11b] sm:$0xff] }
 0x12a   : > { %10077 = vst [vmem:[#allocation40_spill] sm:$0xff] %v8706_v57  ;;  %v8714_v44 = vpop.f32.mrf.mxu0  ;;  %7140 = vmatmul.mubr.f32.gmra.mxu0 %v2254_v26  ;;  %7014 = vmatprep.mubr.f32.mxu1 %v8274_v39  ;;  %v2257_v57 = vld [vmem:[%s7843_s27 + $0x123] sm:$0xff] }
 0x12b   : > { %v8722_v32 = vpop.f32.mrf.mxu1  ;;  %7142 = vmatprep.mubr.f32.mxu0 %v2255_v50  ;;  %7221 = vmatpush3.msra.mxu1 %v5764_v21  ;;  %v2258_v21 = vld [vmem:[%s7843_s27 + $0x12b] sm:$0xff] }
 0x12c   : > { %10079 = vst [vmem:[#allocation42_spill] sm:$0xff] %v8722_v32  ;;  %v8725_v20 = vpop.f32.mrf.mxu0  ;;  %7349 = vmatpush3.msra.mxu0 %v5780_v38  ;;  %7446 = vmatprep.subr.mxu1 %v8712_v29 }
 0x12d   : > { %10080 = vst [vmem:[#allocation43_spill] sm:$0xff] %v8725_v20  ;;  %v6712_v26 = vpop.f32.mrf.mxu1  ;;  %7015 = vmatmul.mubr.f32.gmra.mxu1 %v8286_v43  ;;  %7574 = vmatprep.subr.mxu0 %v8720_v11  ;;  %v2259_v43 = vld [vmem:[%s7843_s27 + $0x133] sm:$0xff] }
 0x12e   : > { %v850_v39 = vadd.f32 %v6712_v26, %v8440_v4  ;;  %v6840_v3 = vpop.f32.mrf.mxu0  ;;  %7143 = vmatmul.mubr.f32.gmra.mxu0 %v2256_v35  ;;  %7017 = vmatprep.mubr.f32.mxu1 %v8291_v46 }
 0x12f   : > { %v844_v50 = vpop.f32.mrf.mxu1  ;;  %7145 = vmatprep.mubr.f32.mxu0 %v2257_v57 }
 0x130   : > { %v8734_v32 = vadd.f32 %v6840_v3, %v850_v39  ;;  %v845_v38 = vadd.f32 %v844_v50, %v8451_v31  ;;  %v1310_v29 = vpop.f32.mrf.mxu0  ;;  %v2260_v3 = vld [vmem:[%s7843_s27 + $0x13b] sm:$0xff]  ;;  %v2261_v50 = vld [vmem:[%s7843_s27 + $0x143] sm:$0xff] }
 0x131   : > { %v6715_v20 = vpop.f32.mrf.mxu1  ;;  %7018 = vmatmul.mubr.f32.gmra.mxu1 %v8297_v49 }
 0x132   : > { %v8739_v4 = vadd.f32 %v1310_v29, %v845_v38  ;;  %v860_v35 = vadd.f32 %v6715_v20, %v8460_v60  ;;  %v6843_v46 = vpop.f32.mrf.mxu0  ;;  %7146 = vmatmul.mubr.f32.gmra.mxu0 %v2258_v21  ;;  %7020 = vmatprep.mubr.f32.mxu1 %v8301_v52  ;;  %v2262_v20 = vld [vmem:[%s7843_s27 + $0x14b] sm:$0xff] }
 0x133   : > { %v854_v57 = vpop.f32.mrf.mxu1  ;;  %7148 = vmatprep.mubr.f32.mxu0 %v2259_v43  ;;  %v2263_v43 = vld [vmem:[%s7843_s27 + $0x153] sm:$0xff] }
 0x134   : > { %v8745_v31 = vadd.f32 %v6843_v46, %v860_v35  ;;  %v855_v26 = vadd.f32 %v854_v57, %v8469_v0  ;;  %v1320_v39 = vpop.f32.mrf.mxu0 }
 0x135   : > { %v6718_v49 = vpop.f32.mrf.mxu1  ;;  %7021 = vmatmul.mubr.f32.gmra.mxu1 %v8307_v56 }
 0x136   : > { %v8750_v60 = vadd.f32 %v1320_v39, %v855_v26  ;;  %v870_v52 = vadd.f32 %v6718_v49, %v8478_v58  ;;  %v6846_v29 = vpop.f32.mrf.mxu0  ;;  %7149 = vmatmul.mubr.f32.gmra.mxu0 %v2260_v3  ;;  %7023 = vmatprep.mubr.f32.mxu1 %v8311_v61  ;;  %v7754_v3 = vmov 0   ;;  %v2265_v49 = vld [vmem:[%s7843_s27 + $0x163] sm:$0xff] }
 0x137   : > { %v864_v0 = vpop.f32.mrf.mxu1  ;;  %7151 = vmatprep.mubr.f32.mxu0 %v2261_v50  ;;  %7744 = vset.pattern.permute.xlu0 %v7754_v3 }
 0x138   : > { %v8757_v21 = vadd.f32 %v6846_v29, %v870_v52  ;;  %v865_v56 = vadd.f32 %v864_v0, %v8487_v6  ;;  %v1330_v38 = vpop.f32.mrf.mxu0  ;;  %v4937_v6 = vld [vmem:[%s8768_s5] sm:$0xff]  ;;  %7745 = vset.pattern.permute.xlu1 %v7754_v3  ;;  %v4939_v0 = vld [vmem:[%s8768_s5 + $0x10] sm:$0xff] }
 0x139   : > { %v6721_v58 = vpop.f32.mrf.mxu1  ;;  %7024 = vmatmul.mubr.f32.gmra.mxu1 %v8317_v1  ;;  %v2264_v1 = vld [vmem:[%s7843_s27 + $0x15b] sm:$0xff]  ;;  %5003 = vperm.xlu0 %7744, %v4937_v6  }
 0x13a   : > { %v8770_v61 = vadd.f32 %v1330_v38, %v865_v56  ;;  %v880_v35 = vadd.f32 %v6721_v58, %v8496_v37  ;;  %v6849_v46 = vpop.f32.mrf.mxu0  ;;  %7152 = vmatmul.mubr.f32.gmra.mxu0 %v2262_v20  ;;  %7026 = vmatprep.mubr.f32.mxu1 %v8321_v5  ;;  %v4938_v20 = vld [vmem:[%s8768_s5 + $0x8] sm:$0xff]  ;;  %v2267_v58 = vld [vmem:[%s7843_s27 + $0x173] sm:$0xff] }
 0x13b   : > { %v874_v57 = vpop.f32.mrf.mxu1  ;;  %7154 = vmatprep.mubr.f32.mxu0 %v2263_v43  ;;  %v2266_v56 = vld [vmem:[%s7843_s27 + $0x16b] sm:$0xff]  ;;  %5013 = vperm.xlu1 %7745, %v4939_v0   ;;  %v4940_v6 = vld [vmem:[%s8768_s5 + $0x18] sm:$0xff] }
 0x13c   : > { %v8776_v26 = vadd.f32 %v6849_v46, %v880_v35  ;;  %v875_v39 = vadd.f32 %v874_v57, %v8505_v12  ;;  %v1340_v50 = vpop.f32.mrf.mxu0  ;;  %v4941_v57 = vld [vmem:[%s8768_s5 + $0x20] sm:$0xff] }
 0x13d   : > { %v6724_v37 = vpop.f32.mrf.mxu1  ;;  %7027 = vmatmul.mubr.f32.gmra.mxu1 %v8327_v10  ;;  %5008 = vperm.xlu0 %7744, %v4938_v20  }
 0x13e   : > { %v8781_v5 = vadd.f32 %v1340_v50, %v875_v39  ;;  %v890_v52 = vadd.f32 %v6724_v37, %v8514_v55  ;;  %v6852_v29 = vpop.f32.mrf.mxu0  ;;  %7155 = vmatmul.mubr.f32.gmra.mxu0 %v2264_v1  ;;  %7029 = vmatprep.mubr.f32.mxu1 %v8331_v15  ;;  %v2269_v50 = vld [vmem:[%s7843_s27 + $0x183] sm:$0xff] }
 0x13f   : > { %v884_v12 = vpop.f32.mrf.mxu1  ;;  %7157 = vmatprep.mubr.f32.mxu0 %v2265_v49  ;;  %5018 = vperm.xlu1 %7745, %v4940_v6  }
 0x140   : > { %v8788_v38 = vadd.f32 %v6852_v29, %v890_v52  ;;  %v885_v10 = vadd.f32 %v884_v12, %v8523_v18  ;;  %v1350_v43 = vpop.f32.mrf.mxu0  ;;  %v2268_v18 = vld [vmem:[%s7843_s27 + $0x17b] sm:$0xff]  ;;  %v4942_v52 = vld [vmem:[%s8768_s5 + $0x28] sm:$0xff]  ;;  %v4943_v29 = vld [vmem:[%s8768_s5 + $0x30] sm:$0xff] }
 0x141   : > { %v6727_v55 = vpop.f32.mrf.mxu1  ;;  %7030 = vmatmul.mubr.f32.gmra.mxu1 %v8337_v19  ;;  %5023 = vperm.xlu0 %7744, %v4941_v57   ;;  %v2273_v57 = vld [vmem:[%s7843_s27 + $0x1a3] sm:$0xff] }
 0x142   : > { %v8793_v15 = vadd.f32 %v1350_v43, %v885_v10  ;;  %v900_v35 = vadd.f32 %v6727_v55, %v8532_v40  ;;  %v6855_v46 = vpop.f32.mrf.mxu0  ;;  %7158 = vmatmul.mubr.f32.gmra.mxu0 %v2266_v56  ;;  %7032 = vmatprep.mubr.f32.mxu1 %v8341_v23  ;;  %v2271_v56 = vld [vmem:[%s7843_s27 + $0x193] sm:$0xff]  ;;  %v4945_v55 = vld [vmem:[%s8768_s5 + $0x40] sm:$0xff] }
 0x143   : > { %v894_v1 = vpop.f32.mrf.mxu1  ;;  %7160 = vmatprep.mubr.f32.mxu0 %v2267_v58  ;;  %5028 = vperm.xlu1 %7745, %v4942_v52   ;;  %v4944_v58 = vld [vmem:[%s8768_s5 + $0x38] sm:$0xff] }
 0x144   : > { %v8800_v3 = vadd.f32 %v6855_v46, %v900_v35  ;;  %v895_v19 = vadd.f32 %v894_v1, %v8541_v24  ;;  %v1360_v39 = vpop.f32.mrf.mxu0  ;;  %v2270_v24 = vld [vmem:[%s7843_s27 + $0x18b] sm:$0xff] }
 0x145   : > { %v6730_v40 = vpop.f32.mrf.mxu1  ;;  %7033 = vmatmul.mubr.f32.gmra.mxu1 %v8347_v28  ;;  %5033 = vperm.xlu0 %7744, %v4943_v29  }
 0x146   : > { %v8805_v23 = vadd.f32 %v1360_v39, %v895_v19  ;;  %v910_v49 = vadd.f32 %v6730_v40, %v8550_v22  ;;  %v6858_v37 = vpop.f32.mrf.mxu0  ;;  %7161 = vmatmul.mubr.f32.gmra.mxu0 %v2268_v18  ;;  %7035 = vmatprep.mubr.f32.mxu1 %v8351_v34  ;;  %v4946_v19 = vld [vmem:[%s8768_s5 + $0x48] sm:$0xff]  ;;  %v4947_v39 = vld [vmem:[%s8768_s5 + $0x50] sm:$0xff] }
 0x147   : > { %v904_v0 = vpop.f32.mrf.mxu1  ;;  %7163 = vmatprep.mubr.f32.mxu0 %v2269_v50  ;;  %5038 = vperm.xlu1 %7745, %v4944_v58  }
 0x148   : > { %v8812_v20 = vadd.f32 %v6858_v37, %v910_v49  ;;  %v905_v28 = vadd.f32 %v904_v0, %v8559_v30  ;;  %v1370_v12 = vpop.f32.mrf.mxu0  ;;  %v2272_v30 = vld [vmem:[%s7843_s27 + $0x19b] sm:$0xff]  ;;  %v2275_v37 = vld [vmem:[%s7843_s27 + $0x1b3] sm:$0xff] }
 0x149   : > { %v6733_v22 = vpop.f32.mrf.mxu1  ;;  %7036 = vmatmul.mubr.f32.gmra.mxu1 %v8357_v41  ;;  %5043 = vperm.xlu0 %7744, %v4945_v55   ;;  %v4948_v0 = vld [vmem:[%s8768_s5 + $0x58] sm:$0xff]  ;;  %v10082_v55 = vld [vmem:[#allocation3_spill] sm:$0xff] }
 0x14a   : > { %v8817_v34 = vadd.f32 %v1370_v12, %v905_v28  ;;  %v920_v10 = vadd.f32 %v6733_v22, %v8568_v51  ;;  %v6861_v43 = vpop.f32.mrf.mxu0  ;;  %7164 = vmatmul.mubr.f32.gmra.mxu0 %v2270_v24  ;;  %7038 = vmatprep.mubr.f32.mxu1 %v8361_v47  ;;  %v4949_v24 = vld [vmem:[%s8768_s5 + $0x60] sm:$0xff] }
 0x14b   : > { %v914_v35 = vpop.f32.mrf.mxu1  ;;  %7166 = vmatprep.mubr.f32.mxu0 %v2271_v56  ;;  %5048 = vperm.xlu1 %7745, %v4946_v19   ;;  %v2277_v22 = vld [vmem:[%s7843_s27 + $0x1c3] sm:$0xff] }
 0x14c   : > { %v8824_v46 = vadd.f32 %v6861_v43, %v920_v10  ;;  %v915_v41 = vadd.f32 %v914_v35, %v8577_v36  ;;  %v1380_v6 = vpop.f32.mrf.mxu0  ;;  %v2274_v36 = vld [vmem:[%s7843_s27 + $0x1ab] sm:$0xff]  ;;  %v10081_v10 = vld [vmem:[#allocation2_spill] sm:$0xff] }
 0x14d   : > { %v6736_v51 = vpop.f32.mrf.mxu1  ;;  %7039 = vmatmul.mubr.f32.gmra.mxu1 %v8367_v53  ;;  %5053 = vperm.xlu0 %7744, %v4947_v39   ;;  %v4950_v35 = vld [vmem:[%s8768_s5 + $0x68] sm:$0xff] }
 0x14e   : > { %v8829_v47 = vadd.f32 %v1380_v6, %v915_v41  ;;  %v930_v1 = vadd.f32 %v6736_v51, %v8586_v13  ;;  %v6864_v18 = vpop.f32.mrf.mxu0  ;;  %7167 = vmatmul.mubr.f32.gmra.mxu0 %v2272_v30  ;;  %7041 = vmatprep.mubr.f32.mxu1 %v8371_v62  ;;  %v4951_v30 = vld [vmem:[%s8768_s5 + $0x70] sm:$0xff] }
 0x14f   : > { %v924_v50 = vpop.f32.mrf.mxu1  ;;  %7169 = vmatprep.mubr.f32.mxu0 %v2273_v57  ;;  %5058 = vperm.xlu1 %7745, %v4948_v0   ;;  %v2281_v0 = vld [vmem:[%s7843_s27 + $0x1e3] sm:$0xff] }
 0x150   : > { %v8836_v40 = vadd.f32 %v6864_v18, %v930_v1  ;;  %v925_v53 = vadd.f32 %v924_v50, %v8595_v42  ;;  %v1390_v49 = vpop.f32.mrf.mxu0  ;;  %v2276_v42 = vld [vmem:[%s7843_s27 + $0x1bb] sm:$0xff]  ;;  %v2279_v1 = vld [vmem:[%s7843_s27 + $0x1d3] sm:$0xff] }
 0x151   : > { %v6739_v13 = vpop.f32.mrf.mxu1  ;;  %7042 = vmatmul.mubr.f32.gmra.mxu1 %v8377_v7  ;;  %5063 = vperm.xlu0 %7744, %v4949_v24   ;;  %v10083_v18 = vld [vmem:[#allocation4_spill] sm:$0xff]  ;;  %v10085_v24 = vld [vmem:[#allocation6_spill] sm:$0xff] }
 0x152   : > { %v8841_v62 = vadd.f32 %v1390_v49, %v925_v53  ;;  %v940_v52 = vadd.f32 %v6739_v13, %v8604_v25  ;;  %v6867_v29 = vpop.f32.mrf.mxu0  ;;  %7170 = vmatmul.mubr.f32.gmra.mxu0 %v2274_v36  ;;  %7044 = vmatprep.mubr.f32.mxu1 %v8381_v16  ;;  %v10084_v36 = vld [vmem:[#allocation5_spill] sm:$0xff]  ;;  %v4953_v49 = vld [vmem:[%s8768_s5 + $0x80] sm:$0xff] }
 0x153   : > { %v934_v28 = vpop.f32.mrf.mxu1  ;;  %7172 = vmatprep.mubr.f32.mxu0 %v2275_v37  ;;  %5068 = vperm.xlu1 %7745, %v4950_v35   ;;  %v4952_v53 = vld [vmem:[%s8768_s5 + $0x78] sm:$0xff] }
 0x154   : > { %v8848_v12 = vadd.f32 %v6867_v29, %v940_v52  ;;  %v935_v7 = vadd.f32 %v934_v28, %v8613_v48  ;;  %v1400_v56 = vpop.f32.mrf.mxu0  ;;  %v2278_v48 = vld [vmem:[%s7843_s27 + $0x1cb] sm:$0xff] }
 0x155   : > { %v6742_v25 = vpop.f32.mrf.mxu1  ;;  %7045 = vmatmul.mubr.f32.gmra.mxu1 %v10081_v10  ;;  %5073 = vperm.xlu0 %7744, %v4951_v30  }
 0x156   : > { %v8853_v16 = vadd.f32 %v1400_v56, %v935_v7  ;;  %v950_v43 = vadd.f32 %v6742_v25, %v8622_v59  ;;  %v6870_v58 = vpop.f32.mrf.mxu0  ;;  %7173 = vmatmul.mubr.f32.gmra.mxu0 %v2276_v42  ;;  %7047 = vmatprep.mubr.f32.mxu1 %v10082_v55  ;;  %v10086_v56 = vld [vmem:[#allocation7_spill] sm:$0xff]  ;;  %v4955_v25 = vld [vmem:[%s8768_s5 + $0x90] sm:$0xff] }
 0x157   : > { %v944_v41 = vpop.f32.mrf.mxu1  ;;  %7175 = vmatprep.mubr.f32.mxu0 %v2277_v22  ;;  %5078 = vperm.xlu1 %7745, %v4952_v53   ;;  %v4954_v22 = vld [vmem:[%s8768_s5 + $0x88] sm:$0xff]  ;;  %v10088_v53 = vld [vmem:[#allocation9_spill] sm:$0xff] }
 0x158   : > { %v8860_v6 = vadd.f32 %v6870_v58, %v950_v43  ;;  %v945_v57 = vadd.f32 %v944_v41, %v8631_v54  ;;  %v1410_v51 = vpop.f32.mrf.mxu0  ;;  %v2280_v54 = vld [vmem:[%s7843_s27 + $0x1db] sm:$0xff] }
 0x159   : > { %v6745_v59 = vpop.f32.mrf.mxu1  ;;  %7048 = vmatmul.mubr.f32.gmra.mxu1 %v10083_v18  ;;  %5083 = vperm.xlu0 %7744, %v4953_v49   ;;  %v1755_v18 = vld [vmem:[%s7843_s27 + $0x202] sm:$0xff] }
 0x15a   : > { %v8865_v19 = vadd.f32 %v1410_v51, %v945_v57  ;;  %v960_v39 = vadd.f32 %v6745_v59, %v8640_v33  ;;  %v6873_v50 = vpop.f32.mrf.mxu0  ;;  %7176 = vmatmul.mubr.f32.gmra.mxu0 %v2278_v48  ;;  %7050 = vmatprep.mubr.f32.mxu1 %v10084_v36  ;;  %v10087_v57 = vld [vmem:[#allocation8_spill] sm:$0xff]  ;;  %v4956_v51 = vld [vmem:[%s8768_s5 + $0x98] sm:$0xff] }
 0x15b   : > { %v954_v37 = vpop.f32.mrf.mxu1  ;;  %7178 = vmatprep.mubr.f32.mxu0 %v2279_v1  ;;  %5088 = vperm.xlu1 %7745, %v4954_v22   ;;  %v4957_v1 = vld [vmem:[%s8768_s5 + $0xa0] sm:$0xff] }
 0x15c   : > { %v8872_v13 = vadd.f32 %v6873_v50, %v960_v39  ;;  %v955_v52 = vadd.f32 %v954_v37, %v8649_v63  ;;  %v1420_v29 = vpop.f32.mrf.mxu0  ;;  %v2282_v63 = vld [vmem:[%s7843_s27 + $0x1eb] sm:$0xff]  ;;  %v2285_v50 = vld [vmem:[%s7843_s27 + $0x203] sm:$0xff] }
 0x15d   : > { %v6748_v33 = vpop.f32.mrf.mxu1  ;;  %7051 = vmatmul.mubr.f32.gmra.mxu1 %v10085_v24  ;;  %5093 = vperm.xlu0 %7744, %v4955_v25   ;;  %v2753_v24 = vld [vmem:[%s7843_s27 + $0x14] sm:$0xff] }
 0x15e   : > { %v8877_v28 = vadd.f32 %v1420_v29, %v955_v52  ;;  %v970_v42 = vadd.f32 %v6748_v33, %v8658_v2  ;;  %v6876_v7 = vpop.f32.mrf.mxu0  ;;  %7179 = vmatmul.mubr.f32.gmra.mxu0 %v2280_v54  ;;  %7053 = vmatprep.mubr.f32.mxu1 %v10086_v56  ;;  %v2283_v2 = vld [vmem:[%s7843_s27 + $0x1f3] sm:$0xff]  ;;  %v1756_v52 = vld [vmem:[%s7843_s27 + $0x20a] sm:$0xff] }
 0x15f   : > { %v964_v10 = vpop.f32.mrf.mxu1  ;;  %7181 = vmatprep.mubr.f32.mxu0 %v2281_v0  ;;  %5098 = vperm.xlu1 %7745, %v4956_v51   ;;  %v4958_v29 = vld [vmem:[%s8768_s5 + $0xa8] sm:$0xff]  ;;  %v4959_v0 = vld [vmem:[%s8768_s5 + $0xb0] sm:$0xff] }
 0x160   : > { %v8884_v43 = vadd.f32 %v6876_v7, %v970_v42  ;;  %v965_v58 = vadd.f32 %v964_v10, %v8667_v9  ;;  %v1430_v55 = vpop.f32.mrf.mxu0  ;;  %v2284_v9 = vld [vmem:[%s7843_s27 + $0x1fb] sm:$0xff]  ;;  %v2286_v33 = vld [vmem:[%s7843_s27 + $0x20b] sm:$0xff] }
 0x161   : > { %v6751_v35 = vpop.f32.mrf.mxu1  ;;  %7054 = vmatmul.mubr.f32.gmra.mxu1 %v8417_v45  ;;  %5103 = vperm.xlu0 %7744, %v4957_v1   ;;  %v3283_v56 = vld [vmem:[%s7843_s27 + $0x24] sm:$0xff] }
 0x162   : > { %v8889_v30 = vadd.f32 %v1430_v55, %v965_v58  ;;  %v980_v41 = vadd.f32 %v6751_v35, %v8676_v8  ;;  %v6879_v48 = vpop.f32.mrf.mxu0  ;;  %7182 = vmatmul.mubr.f32.gmra.mxu0 %v2282_v63  ;;  %7056 = vmatprep.mubr.f32.mxu1 %v10087_v57  ;;  %v2754_v58 = vld [vmem:[%s7843_s27 + $0x1c] sm:$0xff] }
 0x163   : > { %v974_v59 = vpop.f32.mrf.mxu1  ;;  %7184 = vmatprep.mubr.f32.mxu0 %v2283_v2  ;;  %5108 = vperm.xlu1 %7745, %v4958_v29   ;;  %v4960_v55 = vld [vmem:[%s8768_s5 + $0xb8] sm:$0xff]  ;;  %v4961_v2 = vld [vmem:[%s8768_s5 + $0xc0] sm:$0xff] }
 0x164   : > { %v8897_v45 = vadd.f32 %v6879_v48, %v980_v41  ;;  %v975_v39 = vadd.f32 %v974_v59, %v8685_v17  ;;  %v1440_v8 = vpop.f32.mrf.mxu0  ;;  %v10089_v48 = vld [vmem:[#allocation43_spill] sm:$0xff]  ;;  %v5810_v59 = vld [vmem:[%s10026_s1 + $0x3f0] sm:$0xff] }
 0x165   : > { %v6754_v36 = vpop.f32.mrf.mxu1  ;;  %7057 = vmatmul.mubr.f32.gmra.mxu1 %v10088_v53  ;;  %5113 = vperm.xlu0 %7744, %v4959_v0  }
 0x166   : > { %v8902_v49 = vadd.f32 %v1440_v8, %v975_v39  ;;  %v990_v37 = vadd.f32 %v6754_v36, %v8694_v14  ;;  %v6882_v54 = vpop.f32.mrf.mxu0  ;;  %7185 = vmatmul.mubr.f32.gmra.mxu0 %v2284_v9  ;;  %7059 = vmatprep.mubr.f32.mxu1 %v1755_v18  ;;  %v10090_v18 = vld [vmem:[#allocation10_spill] sm:$0xff]  ;;  %v5826_v36 = vld [vmem:[%s10026_s1 + $0x470] sm:$0xff] }
 0x167   : > { %v984_v17 = vpop.f32.mrf.mxu1  ;;  %7187 = vmatprep.mubr.f32.mxu0 %v2285_v50  ;;  %5118 = vperm.xlu1 %7745, %v4960_v55   ;;  %v10091_v50 = vld [vmem:[#allocation41_spill] sm:$0xff] }
 0x168   : > { %v8910_v42 = vadd.f32 %v6882_v54, %v990_v37  ;;  %v985_v7 = vadd.f32 %v984_v17, %v8703_v27  ;;  %v1450_v14 = vpop.f32.mrf.mxu0  ;;  %v3284_v27 = vld [vmem:[%s7843_s27 + $0x2c] sm:$0xff]  ;;  %v3286_v37 = vld [vmem:[%s7843_s27 + $0x3c] sm:$0xff]  ;;  %v3287_v17 = vld [vmem:[%s7843_s27 + $0x44] sm:$0xff] }
 0x169   : > { %v6757_v22 = vpop.f32.mrf.mxu1  ;;  %7060 = vmatmul.mubr.f32.gmra.mxu1 %v1756_v52  ;;  %5123 = vperm.xlu0 %7744, %v4961_v2   ;;  %v10092_v52 = vld [vmem:[#allocation11_spill] sm:$0xff]  ;;  %v10094_v55 = vld [vmem:[#allocation13_spill] sm:$0xff] }
 0x16a   : > { %v8914_v25 = vadd.f32 %v1450_v14, %v985_v7  ;;  %v1000_v10 = vadd.f32 %v6757_v22, %v8714_v44  ;;  %v6885_v63 = vpop.f32.mrf.mxu0  ;;  %7188 = vmatmul.mubr.f32.gmra.mxu0 %v2286_v33  ;;  %7222 = vmatprep.mubr.f32.mxu1 %v2753_v24  ;;  %v3285_v44 = vld [vmem:[%s7843_s27 + $0x34] sm:$0xff]  ;;  %v5809_v24 = vld [vmem:[%s10026_s1 + $0x3e8] sm:$0xff] }
 0x16b   : > { %v994_v35 = vpop.f32.mrf.mxu1  ;;  %7350 = vmatprep.mubr.f32.mxu0 %v3283_v56  ;;  %v5825_v22 = vld [vmem:[%s10026_s1 + $0x468] sm:$0xff] }
 0x16c   : > { %v8921_v41 = vadd.f32 %v6885_v63, %v1000_v10  ;;  %v995_v57 = vadd.f32 %v994_v35, %v10089_v48  ;;  %v1460_v51 = vpop.f32.mrf.mxu0  ;;  %v3288_v63 = vld [vmem:[%s7843_s27 + $0x4c] sm:$0xff] }
 0x16d   : > { %v6760_v1 = vpop.f32.mrf.mxu1  ;;  %7223 = vmatmul.mubr.f32.vlgmr.msra.gmra.mxu1 %v2754_v58 }
 0x16e   : > { %v8928_v9 = vadd.f32 %v1460_v51, %v995_v57  ;;  %v1010_v39 = vadd.f32 %v6760_v1, %v10090_v18  ;;  %v6888_v8 = vpop.f32.mrf.mxu0  ;;  %7351 = vmatmul.mubr.f32.vlgmr.msra.gmra.mxu0 %v3284_v27  ;;  %7447 = vmatpush3.msra.mxu1 %v10091_v50  ;;  %v5808_v57 = vld [vmem:[%s10026_s1 + $0x3e0] sm:$0xff] }
 0x16f   : > { %v1004_v53 = vpop.f32.mrf.mxu1  ;;  %7225 = vmatprep.mubr.f32.mxu1 %v3283_v56  ;;  %7575 = vmatpush3.msra.mxu0 %v8720_v11  ;;  %v10093_v11 = vld [vmem:[#allocation12_spill] sm:$0xff]  ;;  %v10095_v1 = vld [vmem:[#allocation14_spill] sm:$0xff] }
 0x170   : > { %v8937_v54 = vadd.f32 %v6888_v8, %v1010_v39  ;;  %v1005_v29 = vadd.f32 %v1004_v53, %v10092_v52  ;;  %v1470_v0 = vpop.f32.mrf.mxu0  ;;  %7353 = vmatprep.mubr.f32.mxu0 %v3285_v44  ;;  %7448 = vmatprep.subr.mxu1 %v5810_v59  ;;  %v5824_v18 = vld [vmem:[%s10026_s1 + $0x460] sm:$0xff] }
 0x171   : > { %v6763_v33 = vpop.f32.mrf.mxu1  ;;  %7226 = vmatmul.mubr.f32.gmra.mxu1 %v3284_v27  ;;  %7576 = vmatprep.subr.mxu0 %v5826_v36  ;;  %v3289_v27 = vld [vmem:[%s7843_s27 + $0x54] sm:$0xff]  ;;  %v3290_v8 = vld [vmem:[%s7843_s27 + $0x5c] sm:$0xff]  ;;  %v3291_v52 = vld [vmem:[%s7843_s27 + $0x64] sm:$0xff] }
 0x172   : > { %v8944_v7 = vadd.f32 %v1470_v0, %v1005_v29  ;;  %v1020_v14 = vadd.f32 %v6763_v33, %v10093_v11  ;;  %v6891_v56 = vpop.f32.mrf.mxu0  ;;  %7354 = vmatmul.mubr.f32.gmra.mxu0 %v3286_v37  ;;  %7228 = vmatprep.mubr.f32.mxu1 %v3285_v44  ;;  %v5807_v0 = vld [vmem:[%s10026_s1 + $0x3d8] sm:$0xff]  ;;  %v10097_v33 = vld [vmem:[#allocation16_spill] sm:$0xff] }
 0x173   : > { %v1014_v10 = vpop.f32.mrf.mxu1  ;;  %7356 = vmatprep.mubr.f32.mxu0 %v3287_v17  ;;  %7449 = vmatpush3.msra.mxu1 %v5810_v59 }
 0x174   : > { %v8951_v58 = vadd.f32 %v6891_v56, %v1020_v14  ;;  %v1015_v2 = vadd.f32 %v1014_v10, %v10094_v55  ;;  %v1480_v35 = vpop.f32.mrf.mxu0  ;;  %7577 = vmatpush3.msra.mxu0 %v5826_v36  ;;  %7450 = vmatprep.subr.mxu1 %v5809_v24  ;;  %v10096_v36 = vld [vmem:[#allocation15_spill] sm:$0xff]  ;;  %v5823_v14 = vld [vmem:[%s10026_s1 + $0x458] sm:$0xff] }
 0x175   : > { %v6766_v48 = vpop.f32.mrf.mxu1  ;;  %7229 = vmatmul.mubr.f32.gmra.mxu1 %v3286_v37  ;;  %7578 = vmatprep.subr.mxu0 %v5825_v22 }
 0x176   : > { %v8958_v51 = vadd.f32 %v1480_v35, %v1015_v2  ;;  %v1030_v44 = vadd.f32 %v6766_v48, %v10095_v1  ;;  %v6894_v59 = vpop.f32.mrf.mxu0  ;;  %7357 = vmatmul.mubr.f32.gmra.mxu0 %v3288_v63  ;;  %7231 = vmatprep.mubr.f32.mxu1 %v3287_v17  ;;  %v3293_v35 = vld [vmem:[%s7843_s27 + $0x74] sm:$0xff] }
 0x177   : > { %v1024_v39 = vpop.f32.mrf.mxu1  ;;  %7359 = vmatprep.mubr.f32.mxu0 %v3289_v27  ;;  %7451 = vmatpush3.msra.mxu1 %v5809_v24 }
 0x178   : > { %v8965_v50 = vadd.f32 %v6894_v59, %v1030_v44  ;;  %v1025_v53 = vadd.f32 %v1024_v39, %v10096_v36  ;;  %v1490_v37 = vpop.f32.mrf.mxu0  ;;  %7579 = vmatpush3.msra.mxu0 %v5825_v22  ;;  %7452 = vmatprep.subr.mxu1 %v5808_v57  ;;  %v3292_v22 = vld [vmem:[%s7843_s27 + $0x6c] sm:$0xff] }
 0x179   : > { %v6769_v29 = vpop.f32.mrf.mxu1  ;;  %7232 = vmatmul.mubr.f32.gmra.mxu1 %v3288_v63  ;;  %7580 = vmatprep.subr.mxu0 %v5824_v18  ;;  %v10098_v63 = vld [vmem:[#allocation17_spill] sm:$0xff] }
 0x17a   : > { %v8972_v17 = vadd.f32 %v1490_v37, %v1025_v53  ;;  %v1040_v24 = vadd.f32 %v6769_v29, %v10097_v33  ;;  %v6897_v11 = vpop.f32.mrf.mxu0  ;;  %7360 = vmatmul.mubr.f32.gmra.mxu0 %v3290_v8  ;;  %7234 = vmatprep.mubr.f32.mxu1 %v3289_v27  ;;  %v5806_v27 = vld [vmem:[%s10026_s1 + $0x3d0] sm:$0xff]  ;;  %v10100_v53 = vld [vmem:[#allocation19_spill] sm:$0xff] }
 0x17b   : > { %v1034_v56 = vpop.f32.mrf.mxu1  ;;  %7362 = vmatprep.mubr.f32.mxu0 %v3291_v52  ;;  %7453 = vmatpush3.msra.mxu1 %v5808_v57  ;;  %v10099_v57 = vld [vmem:[#allocation18_spill] sm:$0xff] }
 0x17c   : > { %v8979_v10 = vadd.f32 %v6897_v11, %v1040_v24  ;;  %v1035_v55 = vadd.f32 %v1034_v56, %v10098_v63  ;;  %v1500_v2 = vpop.f32.mrf.mxu0  ;;  %7581 = vmatpush3.msra.mxu0 %v5824_v18  ;;  %7454 = vmatprep.subr.mxu1 %v5807_v0  ;;  %v5822_v18 = vld [vmem:[%s10026_s1 + $0x450] sm:$0xff]  ;;  %v3295_v33 = vld [vmem:[%s7843_s27 + $0x84] sm:$0xff] }
 0x17d   : > { %v6772_v48 = vpop.f32.mrf.mxu1  ;;  %7235 = vmatmul.mubr.f32.gmra.mxu1 %v3290_v8  ;;  %7582 = vmatprep.subr.mxu0 %v5823_v14  ;;  %v3294_v8 = vld [vmem:[%s7843_s27 + $0x7c] sm:$0xff] }
 0x17e   : > { %v8986_v1 = vadd.f32 %v1500_v2, %v1035_v55  ;;  %v1050_v44 = vadd.f32 %v6772_v48, %v10099_v57  ;;  %v6900_v59 = vpop.f32.mrf.mxu0  ;;  %7363 = vmatmul.mubr.f32.gmra.mxu0 %v3292_v22  ;;  %7237 = vmatprep.mubr.f32.mxu1 %v3291_v52  ;;  %v5805_v52 = vld [vmem:[%s10026_s1 + $0x3c8] sm:$0xff]  ;;  %v10102_v48 = vld [vmem:[#allocation21_spill] sm:$0xff] }
 0x17f   : > { %v1044_v39 = vpop.f32.mrf.mxu1  ;;  %7365 = vmatprep.mubr.f32.mxu0 %v3293_v35  ;;  %7455 = vmatpush3.msra.mxu1 %v5807_v0  ;;  %v10101_v0 = vld [vmem:[#allocation20_spill] sm:$0xff] }
 0x180   : > { %v8993_v36 = vadd.f32 %v6900_v59, %v1050_v44  ;;  %v1045_v37 = vadd.f32 %v1044_v39, %v10100_v53  ;;  %v1510_v29 = vpop.f32.mrf.mxu0  ;;  %7583 = vmatpush3.msra.mxu0 %v5823_v14  ;;  %7456 = vmatprep.subr.mxu1 %v5806_v27  ;;  %v5821_v14 = vld [vmem:[%s10026_s1 + $0x448] sm:$0xff]  ;;  %v3297_v59 = vld [vmem:[%s7843_s27 + $0x94] sm:$0xff] }
 0x181   : > { %v6775_v24 = vpop.f32.mrf.mxu1  ;;  %7238 = vmatmul.mubr.f32.gmra.mxu1 %v3292_v22  ;;  %7584 = vmatprep.subr.mxu0 %v5822_v18  ;;  %v3296_v22 = vld [vmem:[%s7843_s27 + $0x8c] sm:$0xff] }
 0x182   : > { %v9000_v11 = vadd.f32 %v1510_v29, %v1045_v37  ;;  %v1060_v56 = vadd.f32 %v6775_v24, %v10101_v0  ;;  %v6903_v63 = vpop.f32.mrf.mxu0  ;;  %7366 = vmatmul.mubr.f32.gmra.mxu0 %v3294_v8  ;;  %7240 = vmatprep.mubr.f32.mxu1 %v3293_v35  ;;  %v5804_v35 = vld [vmem:[%s10026_s1 + $0x3c0] sm:$0xff] }
 0x183   : > { %v1054_v55 = vpop.f32.mrf.mxu1  ;;  %7368 = vmatprep.mubr.f32.mxu0 %v3295_v33  ;;  %7457 = vmatpush3.msra.mxu1 %v5806_v27  ;;  %v10103_v27 = vld [vmem:[#allocation22_spill] sm:$0xff] }
 0x184   : > { %v9007_v2 = vadd.f32 %v6903_v63, %v1060_v56  ;;  %v1055_v57 = vadd.f32 %v1054_v55, %v10102_v48  ;;  %v1520_v44 = vpop.f32.mrf.mxu0  ;;  %7585 = vmatpush3.msra.mxu0 %v5822_v18  ;;  %7458 = vmatprep.subr.mxu1 %v5805_v52  ;;  %v5820_v18 = vld [vmem:[%s10026_s1 + $0x440] sm:$0xff]  ;;  %v10105_v56 = vld [vmem:[#allocation23_spill] sm:$0xff] }
 0x185   : > { %v6778_v39 = vpop.f32.mrf.mxu1  ;;  %7241 = vmatmul.mubr.f32.gmra.mxu1 %v3294_v8  ;;  %7586 = vmatprep.subr.mxu0 %v5821_v14  ;;  %v3298_v8 = vld [vmem:[%s7843_s27 + $0x9c] sm:$0xff]  ;;  %v3299_v48 = vld [vmem:[%s7843_s27 + $0xa4] sm:$0xff] }
 0x186   : > { %v9014_v53 = vadd.f32 %v1520_v44, %v1055_v57  ;;  %v1070_v37 = vadd.f32 %v6778_v39, %v10103_v27  ;;  %v6906_v29 = vpop.f32.mrf.mxu0  ;;  %7369 = vmatmul.mubr.f32.gmra.mxu0 %v3296_v22  ;;  %7243 = vmatprep.mubr.f32.mxu1 %v3295_v33  ;;  %v5803_v33 = vld [vmem:[%s10026_s1 + $0x3b8] sm:$0xff] }
 0x187   : > { %v1064_v24 = vpop.f32.mrf.mxu1  ;;  %7371 = vmatprep.mubr.f32.mxu0 %v3297_v59  ;;  %7459 = vmatpush3.msra.mxu1 %v5805_v52  ;;  %v10107_v52 = vld [vmem:[#allocation24_spill] sm:$0xff] }
 0x188   : > { %v9021_v0 = vadd.f32 %v6906_v29, %v1070_v37  ;;  %v1065_v63 = vadd.f32 %v1064_v24, %v10105_v56  ;;  %v1530_v55 = vpop.f32.mrf.mxu0  ;;  %7587 = vmatpush3.msra.mxu0 %v5821_v14  ;;  %7460 = vmatprep.subr.mxu1 %v5804_v35  ;;  %v5819_v14 = vld [vmem:[%s10026_s1 + $0x438] sm:$0xff] }
 0x189   : > { %v6781_v57 = vpop.f32.mrf.mxu1  ;;  %7244 = vmatmul.mubr.f32.gmra.mxu1 %v3296_v22  ;;  %7588 = vmatprep.subr.mxu0 %v5820_v18  ;;  %v3300_v22 = vld [vmem:[%s7843_s27 + $0xac] sm:$0xff]  ;;  %v10109_v24 = vld [vmem:[#allocation25_spill] sm:$0xff] }
 0x18a   : > { %10104 = vst [vmem:[#allocation2_spill] sm:$0xff] %v9021_v0  ;;  %v9028_v44 = vadd.f32 %v1530_v55, %v1065_v63  ;;  %v1080_v39 = vadd.f32 %v6781_v57, %v10107_v52  ;;  %v6909_v27 = vpop.f32.mrf.mxu0  ;;  %7372 = vmatmul.mubr.f32.gmra.mxu0 %v3298_v8  ;;  %7246 = vmatprep.mubr.f32.mxu1 %v3297_v59  ;;  %v3301_v63 = vld [vmem:[%s7843_s27 + $0xb4] sm:$0xff] }
 0x18b   : > { %v1074_v37 = vpop.f32.mrf.mxu1  ;;  %7374 = vmatprep.mubr.f32.mxu0 %v3299_v48  ;;  %7461 = vmatpush3.msra.mxu1 %v5804_v35  ;;  %v5802_v59 = vld [vmem:[%s10026_s1 + $0x3b0] sm:$0xff]  ;;  %v10111_v35 = vld [vmem:[#allocation26_spill] sm:$0xff] }
 0x18c   : > { %10106 = vst [vmem:[#allocation3_spill] sm:$0xff] %v9028_v44  ;;  %v9035_v29 = vadd.f32 %v6909_v27, %v1080_v39  ;;  %v1075_v56 = vadd.f32 %v1074_v37, %v10109_v24  ;;  %v1540_v0 = vpop.f32.mrf.mxu0  ;;  %7589 = vmatpush3.msra.mxu0 %v5820_v18  ;;  %7462 = vmatprep.subr.mxu1 %v5803_v33  ;;  %v5818_v18 = vld [vmem:[%s10026_s1 + $0x430] sm:$0xff]  ;;  %v10113_v24 = vld [vmem:[#allocation27_spill] sm:$0xff] }
 0x18d   : > { %v6784_v55 = vpop.f32.mrf.mxu1  ;;  %7247 = vmatmul.mubr.f32.gmra.mxu1 %v3298_v8  ;;  %7590 = vmatprep.subr.mxu0 %v5819_v14  ;;  %v3302_v8 = vld [vmem:[%s7843_s27 + $0xbc] sm:$0xff] }
 0x18e   : > { %10108 = vst [vmem:[#allocation4_spill] sm:$0xff] %v9035_v29  ;;  %v9042_v57 = vadd.f32 %v1540_v0, %v1075_v56  ;;  %v1090_v52 = vadd.f32 %v6784_v55, %v10111_v35  ;;  %v6912_v39 = vpop.f32.mrf.mxu0  ;;  %7375 = vmatmul.mubr.f32.gmra.mxu0 %v3300_v22  ;;  %7249 = vmatprep.mubr.f32.mxu1 %v3299_v48  ;;  %v3303_v0 = vld [vmem:[%s7843_s27 + $0xc4] sm:$0xff] }
 0x18f   : > { %v1084_v27 = vpop.f32.mrf.mxu1  ;;  %7377 = vmatprep.mubr.f32.mxu0 %v3301_v63  ;;  %7463 = vmatpush3.msra.mxu1 %v5803_v33  ;;  %v5801_v48 = vld [vmem:[%s10026_s1 + $0x3a8] sm:$0xff]  ;;  %v10115_v33 = vld [vmem:[#allocation28_spill] sm:$0xff] }
 0x190   : > { %10110 = vst [vmem:[#allocation5_spill] sm:$0xff] %v9042_v57  ;;  %v9049_v37 = vadd.f32 %v6912_v39, %v1090_v52  ;;  %v1085_v29 = vadd.f32 %v1084_v27, %v10113_v24  ;;  %v1550_v44 = vpop.f32.mrf.mxu0  ;;  %7591 = vmatpush3.msra.mxu0 %v5819_v14  ;;  %7464 = vmatprep.subr.mxu1 %v5802_v59  ;;  %v5817_v14 = vld [vmem:[%s10026_s1 + $0x428] sm:$0xff]  ;;  %v10117_v24 = vld [vmem:[#allocation29_spill] sm:$0xff] }
 0x191   : > { %v6787_v56 = vpop.f32.mrf.mxu1  ;;  %7250 = vmatmul.mubr.f32.gmra.mxu1 %v3300_v22  ;;  %7592 = vmatprep.subr.mxu0 %v5818_v18  ;;  %v3304_v22 = vld [vmem:[%s7843_s27 + $0xcc] sm:$0xff] }
 0x192   : > { %10112 = vst [vmem:[#allocation6_spill] sm:$0xff] %v9049_v37  ;;  %v9056_v55 = vadd.f32 %v1550_v44, %v1085_v29  ;;  %v1100_v35 = vadd.f32 %v6787_v56, %v10115_v33  ;;  %v6915_v52 = vpop.f32.mrf.mxu0  ;;  %7378 = vmatmul.mubr.f32.gmra.mxu0 %v3302_v8  ;;  %7252 = vmatprep.mubr.f32.mxu1 %v3301_v63  ;;  %v3305_v44 = vld [vmem:[%s7843_s27 + $0xd4] sm:$0xff]  ;;  %v5800_v63 = vld [vmem:[%s10026_s1 + $0x3a0] sm:$0xff] }
 0x193   : > { %v1094_v39 = vpop.f32.mrf.mxu1  ;;  %7380 = vmatprep.mubr.f32.mxu0 %v3303_v0  ;;  %7465 = vmatpush3.msra.mxu1 %v5802_v59  ;;  %v10119_v59 = vld [vmem:[#allocation30_spill] sm:$0xff] }
 0x194   : > { %10114 = vst [vmem:[#allocation7_spill] sm:$0xff] %v9056_v55  ;;  %v9063_v27 = vadd.f32 %v6915_v52, %v1100_v35  ;;  %v1095_v37 = vadd.f32 %v1094_v39, %v10117_v24  ;;  %v1560_v57 = vpop.f32.mrf.mxu0  ;;  %7593 = vmatpush3.msra.mxu0 %v5818_v18  ;;  %7466 = vmatprep.subr.mxu1 %v5801_v48  ;;  %v5816_v18 = vld [vmem:[%s10026_s1 + $0x420] sm:$0xff]  ;;  %v10121_v24 = vld [vmem:[#allocation31_spill] sm:$0xff] }
 0x195   : > { %v6790_v29 = vpop.f32.mrf.mxu1  ;;  %7253 = vmatmul.mubr.f32.gmra.mxu1 %v3302_v8  ;;  %7594 = vmatprep.subr.mxu0 %v5817_v14  ;;  %v3306_v8 = vld [vmem:[%s7843_s27 + $0xdc] sm:$0xff] }
 0x196   : > { %10116 = vst [vmem:[#allocation8_spill] sm:$0xff] %v9063_v27  ;;  %v9070_v56 = vadd.f32 %v1560_v57, %v1095_v37  ;;  %v1110_v33 = vadd.f32 %v6790_v29, %v10119_v59  ;;  %v6918_v35 = vpop.f32.mrf.mxu0  ;;  %7381 = vmatmul.mubr.f32.gmra.mxu0 %v3304_v22  ;;  %7255 = vmatprep.mubr.f32.mxu1 %v3303_v0  ;;  %v3307_v57 = vld [vmem:[%s7843_s27 + $0xe4] sm:$0xff]  ;;  %v5799_v0 = vld [vmem:[%s10026_s1 + $0x398] sm:$0xff] }
 0x197   : > { %v1104_v52 = vpop.f32.mrf.mxu1  ;;  %7383 = vmatprep.mubr.f32.mxu0 %v3305_v44  ;;  %7467 = vmatpush3.msra.mxu1 %v5801_v48  ;;  %v10123_v48 = vld [vmem:[#allocation32_spill] sm:$0xff] }
 0x198   : > { %10118 = vst [vmem:[#allocation9_spill] sm:$0xff] %v9070_v56  ;;  %v9077_v39 = vadd.f32 %v6918_v35, %v1110_v33  ;;  %v1105_v27 = vadd.f32 %v1104_v52, %v10121_v24  ;;  %v1570_v55 = vpop.f32.mrf.mxu0  ;;  %7595 = vmatpush3.msra.mxu0 %v5817_v14  ;;  %7468 = vmatprep.subr.mxu1 %v5800_v63  ;;  %v5815_v14 = vld [vmem:[%s10026_s1 + $0x418] sm:$0xff] }
 0x199   : > { %v6793_v37 = vpop.f32.mrf.mxu1  ;;  %7256 = vmatmul.mubr.f32.gmra.mxu1 %v3304_v22  ;;  %7596 = vmatprep.subr.mxu0 %v5816_v18  ;;  %v3308_v22 = vld [vmem:[%s7843_s27 + $0xec] sm:$0xff]  ;;  %v10125_v24 = vld [vmem:[#allocation33_spill] sm:$0xff] }
 0x19a   : > { %10120 = vst [vmem:[#allocation43_spill] sm:$0xff] %v9077_v39  ;;  %v9084_v29 = vadd.f32 %v1570_v55, %v1105_v27  ;;  %v1120_v59 = vadd.f32 %v6793_v37, %v10123_v48  ;;  %v6921_v33 = vpop.f32.mrf.mxu0  ;;  %7384 = vmatmul.mubr.f32.gmra.mxu0 %v3306_v8  ;;  %7258 = vmatprep.mubr.f32.mxu1 %v3305_v44  ;;  %v3309_v55 = vld [vmem:[%s7843_s27 + $0xf4] sm:$0xff] }
 0x19b   : > { %v1114_v35 = vpop.f32.mrf.mxu1  ;;  %7386 = vmatprep.mubr.f32.mxu0 %v3307_v57  ;;  %7469 = vmatpush3.msra.mxu1 %v5800_v63  ;;  %v5798_v44 = vld [vmem:[%s10026_s1 + $0x390] sm:$0xff]  ;;  %v10127_v63 = vld [vmem:[#allocation34_spill] sm:$0xff] }
 0x19c   : > { %10122 = vst [vmem:[#allocation10_spill] sm:$0xff] %v9084_v29  ;;  %v9091_v52 = vadd.f32 %v6921_v33, %v1120_v59  ;;  %v1115_v39 = vadd.f32 %v1114_v35, %v10125_v24  ;;  %v1580_v56 = vpop.f32.mrf.mxu0  ;;  %7597 = vmatpush3.msra.mxu0 %v5816_v18  ;;  %7470 = vmatprep.subr.mxu1 %v5799_v0  ;;  %v5814_v18 = vld [vmem:[%s10026_s1 + $0x410] sm:$0xff]  ;;  %v10129_v24 = vld [vmem:[#allocation35_spill] sm:$0xff] }
 0x19d   : > { %v6796_v27 = vpop.f32.mrf.mxu1  ;;  %7259 = vmatmul.mubr.f32.gmra.mxu1 %v3306_v8  ;;  %7598 = vmatprep.subr.mxu0 %v5815_v14  ;;  %v3310_v8 = vld [vmem:[%s7843_s27 + $0xfc] sm:$0xff] }
 0x19e   : > { %10124 = vst [vmem:[#allocation41_spill] sm:$0xff] %v9091_v52  ;;  %v9098_v37 = vadd.f32 %v1580_v56, %v1115_v39  ;;  %v1130_v48 = vadd.f32 %v6796_v27, %v10127_v63  ;;  %v6924_v59 = vpop.f32.mrf.mxu0  ;;  %7387 = vmatmul.mubr.f32.gmra.mxu0 %v3308_v22  ;;  %7261 = vmatprep.mubr.f32.mxu1 %v3307_v57  ;;  %v3311_v56 = vld [vmem:[%s7843_s27 + $0x104] sm:$0xff] }
 0x19f   : > { %v1124_v33 = vpop.f32.mrf.mxu1  ;;  %7389 = vmatprep.mubr.f32.mxu0 %v3309_v55  ;;  %7471 = vmatpush3.msra.mxu1 %v5799_v0  ;;  %v5797_v57 = vld [vmem:[%s10026_s1 + $0x388] sm:$0xff]  ;;  %v10131_v0 = vld [vmem:[#allocation36_spill] sm:$0xff] }
 0x1a0   : > { %10126 = vst [vmem:[#allocation11_spill] sm:$0xff] %v9098_v37  ;;  %v9105_v35 = vadd.f32 %v6924_v59, %v1130_v48  ;;  %v1125_v52 = vadd.f32 %v1124_v33, %v10129_v24  ;;  %v1590_v29 = vpop.f32.mrf.mxu0  ;;  %7599 = vmatpush3.msra.mxu0 %v5815_v14  ;;  %7472 = vmatprep.subr.mxu1 %v5798_v44  ;;  %v5813_v14 = vld [vmem:[%s10026_s1 + $0x408] sm:$0xff]  ;;  %v10133_v24 = vld [vmem:[#allocation37_spill] sm:$0xff] }
 0x1a1   : > { %v6799_v39 = vpop.f32.mrf.mxu1  ;;  %7262 = vmatmul.mubr.f32.gmra.mxu1 %v3308_v22  ;;  %7600 = vmatprep.subr.mxu0 %v5814_v18  ;;  %v3312_v22 = vld [vmem:[%s7843_s27 + $0x10c] sm:$0xff] }
 0x1a2   : > { %10128 = vst [vmem:[#allocation12_spill] sm:$0xff] %v9105_v35  ;;  %v9112_v27 = vadd.f32 %v1590_v29, %v1125_v52  ;;  %v1140_v63 = vadd.f32 %v6799_v39, %v10131_v0  ;;  %v6927_v48 = vpop.f32.mrf.mxu0  ;;  %7390 = vmatmul.mubr.f32.gmra.mxu0 %v3310_v8  ;;  %7264 = vmatprep.mubr.f32.mxu1 %v3309_v55  ;;  %v3313_v29 = vld [vmem:[%s7843_s27 + $0x114] sm:$0xff]  ;;  %v5796_v55 = vld [vmem:[%s10026_s1 + $0x380] sm:$0xff] }
 0x1a3   : > { %v1134_v59 = vpop.f32.mrf.mxu1  ;;  %7392 = vmatprep.mubr.f32.mxu0 %v3311_v56  ;;  %7473 = vmatpush3.msra.mxu1 %v5798_v44  ;;  %v10135_v44 = vld [vmem:[#allocation38_spill] sm:$0xff] }
 0x1a4   : > { %10130 = vst [vmem:[#allocation13_spill] sm:$0xff] %v9112_v27  ;;  %v9119_v33 = vadd.f32 %v6927_v48, %v1140_v63  ;;  %v1135_v35 = vadd.f32 %v1134_v59, %v10133_v24  ;;  %v1600_v37 = vpop.f32.mrf.mxu0  ;;  %7601 = vmatpush3.msra.mxu0 %v5814_v18  ;;  %7474 = vmatprep.subr.mxu1 %v5797_v57  ;;  %v5812_v18 = vld [vmem:[%s10026_s1 + $0x400] sm:$0xff]  ;;  %v10137_v24 = vld [vmem:[#allocation39_spill] sm:$0xff] }
 0x1a5   : > { %v6802_v52 = vpop.f32.mrf.mxu1  ;;  %7265 = vmatmul.mubr.f32.gmra.mxu1 %v3310_v8  ;;  %7602 = vmatprep.subr.mxu0 %v5813_v14  ;;  %v3314_v8 = vld [vmem:[%s7843_s27 + $0x11c] sm:$0xff] }
 0x1a6   : > { %10132 = vst [vmem:[#allocation14_spill] sm:$0xff] %v9119_v33  ;;  %v9126_v39 = vadd.f32 %v1600_v37, %v1135_v35  ;;  %v1150_v0 = vadd.f32 %v6802_v52, %v10135_v44  ;;  %v6930_v63 = vpop.f32.mrf.mxu0  ;;  %7393 = vmatmul.mubr.f32.gmra.mxu0 %v3312_v22  ;;  %7267 = vmatprep.mubr.f32.mxu1 %v3311_v56  ;;  %v3315_v52 = vld [vmem:[%s7843_s27 + $0x124] sm:$0xff]  ;;  %v10138_v33 = vld [vmem:[#allocation40_spill] sm:$0xff] }
 0x1a7   : > { %v1144_v48 = vpop.f32.mrf.mxu1  ;;  %7395 = vmatprep.mubr.f32.mxu0 %v3313_v29  ;;  %7475 = vmatpush3.msra.mxu1 %v5797_v57  ;;  %v4962_v56 = vld [vmem:[%s8768_s5 + $0xc8] sm:$0xff] }
 0x1a8   : > { %10134 = vst [vmem:[#allocation15_spill] sm:$0xff] %v9126_v39  ;;  %v9133_v59 = vadd.f32 %v6930_v63, %v1150_v0  ;;  %v1145_v37 = vadd.f32 %v1144_v48, %v10137_v24  ;;  %v1610_v35 = vpop.f32.mrf.mxu0  ;;  %7603 = vmatpush3.msra.mxu0 %v5813_v14  ;;  %7476 = vmatprep.subr.mxu1 %v5796_v55  ;;  %v4963_v0 = vld [vmem:[%s8768_s5 + $0xd0] sm:$0xff] }
 0x1a9   : > { %v6805_v44 = vpop.f32.mrf.mxu1  ;;  %7268 = vmatmul.mubr.f32.gmra.mxu1 %v3312_v22  ;;  %7604 = vmatprep.subr.mxu0 %v5812_v18  ;;  %v3316_v48 = vld [vmem:[%s7843_s27 + $0x12c] sm:$0xff]  ;;  %v10139_v22 = vld [vmem:[#allocation42_spill] sm:$0xff] }
 0x1aa   : > { %10136 = vst [vmem:[#allocation16_spill] sm:$0xff] %v9133_v59  ;;  %v9138_v39 = vadd.f32 %v1610_v35, %v1145_v37  ;;  %v1160_v27 = vadd.f32 %v6805_v44, %v10138_v33  ;;  %v6933_v57 = vpop.f32.mrf.mxu0  ;;  %7396 = vmatmul.mubr.f32.gmra.mxu0 %v3314_v8  ;;  %7270 = vmatprep.mubr.f32.mxu1 %v3313_v29  ;;  %v3317_v37 = vld [vmem:[%s7843_s27 + $0x134] sm:$0xff] }
 0x1ab   : > { %v1154_v63 = vpop.f32.mrf.mxu1  ;;  %7398 = vmatprep.mubr.f32.mxu0 %v3315_v52  ;;  %7477 = vmatpush3.msra.mxu1 %v5796_v55  ;;  %v4964_v29 = vld [vmem:[%s8768_s5 + $0xd8] sm:$0xff] }
 0x1ac   : > { %v9143_v14 = vadd.f32 %v6933_v57, %v1160_v27  ;;  %v1155_v24 = vadd.f32 %v1154_v63, %v10139_v22  ;;  %v1620_v59 = vpop.f32.mrf.mxu0  ;;  %7605 = vmatpush3.msra.mxu0 %v5812_v18  ;;  %5128 = vperm.xlu1 %7745, %v4962_v56   ;;  %v4965_v27 = vld [vmem:[%s8768_s5 + $0xe0] sm:$0xff] }
 0x1ad   : > { %v6968_v33 = vpop.f32.mrf.mxu1  ;;  %7271 = vmatmul.mubr.f32.gmra.mxu1 %v3314_v8  ;;  %5133 = vperm.xlu0 %7744, %v4963_v0   ;;  %v3318_v63 = vld [vmem:[%s7843_s27 + $0x13c] sm:$0xff]  ;;  %v3319_v0 = vld [vmem:[%s7843_s27 + $0x144] sm:$0xff] }
 0x1ae   : > { %v9148_v35 = vadd.f32 %v1620_v59, %v1155_v24  ;;  %v2160_v44 = vadd.f32 %v6968_v33, %v8734_v32  ;;  %v7096_v55 = vpop.f32.mrf.mxu0  ;;  %7399 = vmatmul.mubr.f32.gmra.mxu0 %v3316_v48  ;;  %7273 = vmatprep.mubr.f32.mxu1 %v3315_v52  ;;  %v4966_v32 = vld [vmem:[%s8768_s5 + $0xe8] sm:$0xff]  ;;  %v4967_v33 = vld [vmem:[%s8768_s5 + $0xf0] sm:$0xff] }
 0x1af   : > { %v1840_v57 = vpop.f32.mrf.mxu1  ;;  %7401 = vmatprep.mubr.f32.mxu0 %v3317_v37 }
 0x1b0   : > { %v9153_v18 = vadd.f32 %v7096_v55, %v2160_v44  ;;  %v2159_v56 = vadd.f32 %v1840_v57, %v8739_v4  ;;  %v2370_v8 = vpop.f32.mrf.mxu0  ;;  %5138 = vperm.xlu1 %7745, %v4964_v29   ;;  %v3320_v4 = vld [vmem:[%s7843_s27 + $0x14c] sm:$0xff] }
 0x1b1   : > { %v6971_v59 = vpop.f32.mrf.mxu1  ;;  %7274 = vmatmul.mubr.f32.gmra.mxu1 %v3316_v48  ;;  %5143 = vperm.xlu0 %7744, %v4965_v27   ;;  %v3321_v27 = vld [vmem:[%s7843_s27 + $0x154] sm:$0xff] }
 0x1b2   : > { %v9158_v22 = vadd.f32 %v2370_v8, %v2159_v56  ;;  %v2162_v52 = vadd.f32 %v6971_v59, %v8745_v31  ;;  %v7099_v24 = vpop.f32.mrf.mxu0  ;;  %7402 = vmatmul.mubr.f32.gmra.mxu0 %v3318_v63  ;;  %7276 = vmatprep.mubr.f32.mxu1 %v3317_v37  ;;  %v4968_v31 = vld [vmem:[%s8768_s5 + $0xf8] sm:$0xff]  ;;  %v4969_v59 = vld [vmem:[%s8768_s5 + $0x100] sm:$0xff] }
 0x1b3   : > { %v1850_v44 = vpop.f32.mrf.mxu1  ;;  %7404 = vmatprep.mubr.f32.mxu0 %v3319_v0 }
 0x1b4   : > { %v9163_v55 = vadd.f32 %v7099_v24, %v2162_v52  ;;  %v2161_v29 = vadd.f32 %v1850_v44, %v8750_v60  ;;  %v2380_v48 = vpop.f32.mrf.mxu0  ;;  %5148 = vperm.xlu1 %7745, %v4966_v32   ;;  %v3322_v60 = vld [vmem:[%s7843_s27 + $0x15c] sm:$0xff] }
 0x1b5   : > { %v6974_v57 = vpop.f32.mrf.mxu1  ;;  %7277 = vmatmul.mubr.f32.gmra.mxu1 %v3318_v63  ;;  %5153 = vperm.xlu0 %7744, %v4967_v33   ;;  %v3323_v33 = vld [vmem:[%s7843_s27 + $0x164] sm:$0xff] }
 0x1b6   : > { %v9168_v56 = vadd.f32 %v2380_v48, %v2161_v29  ;;  %v2164_v37 = vadd.f32 %v6974_v57, %v8757_v21  ;;  %v7102_v8 = vpop.f32.mrf.mxu0  ;;  %7405 = vmatmul.mubr.f32.gmra.mxu0 %v3320_v4  ;;  %7279 = vmatprep.mubr.f32.mxu1 %v3319_v0  ;;  %v4970_v21 = vld [vmem:[%s8768_s5 + $0x108] sm:$0xff]  ;;  %v4971_v57 = vld [vmem:[%s8768_s5 + $0x110] sm:$0xff] }
 0x1b7   : > { %v1860_v52 = vpop.f32.mrf.mxu1  ;;  %7407 = vmatprep.mubr.f32.mxu0 %v3321_v27 }
 0x1b8   : > { %v9173_v24 = vadd.f32 %v7102_v8, %v2164_v37  ;;  %v2163_v32 = vadd.f32 %v1860_v52, %v8770_v61  ;;  %v2390_v63 = vpop.f32.mrf.mxu0  ;;  %5158 = vperm.xlu1 %7745, %v4968_v31   ;;  %v3324_v61 = vld [vmem:[%s7843_s27 + $0x16c] sm:$0xff] }
 0x1b9   : > { %v6977_v44 = vpop.f32.mrf.mxu1  ;;  %7280 = vmatmul.mubr.f32.gmra.mxu1 %v3320_v4  ;;  %5163 = vperm.xlu0 %7744, %v4969_v59   ;;  %v3325_v59 = vld [vmem:[%s7843_s27 + $0x174] sm:$0xff] }
 0x1ba   : > { %v9178_v29 = vadd.f32 %v2390_v63, %v2163_v32  ;;  %v2166_v0 = vadd.f32 %v6977_v44, %v8776_v26  ;;  %v7105_v48 = vpop.f32.mrf.mxu0  ;;  %7408 = vmatmul.mubr.f32.gmra.mxu0 %v3322_v60  ;;  %7282 = vmatprep.mubr.f32.mxu1 %v3321_v27  ;;  %v4972_v26 = vld [vmem:[%s8768_s5 + $0x118] sm:$0xff]  ;;  %v4973_v44 = vld [vmem:[%s8768_s5 + $0x120] sm:$0xff] }
 0x1bb   : > { %v1870_v37 = vpop.f32.mrf.mxu1  ;;  %7410 = vmatprep.mubr.f32.mxu0 %v3323_v33 }
 0x1bc   : > { %v9183_v8 = vadd.f32 %v7105_v48, %v2166_v0  ;;  %v2165_v31 = vadd.f32 %v1870_v37, %v8781_v5  ;;  %v2400_v4 = vpop.f32.mrf.mxu0  ;;  %5168 = vperm.xlu1 %7745, %v4970_v21   ;;  %v3326_v5 = vld [vmem:[%s7843_s27 + $0x17c] sm:$0xff] }
 0x1bd   : > { %v6980_v52 = vpop.f32.mrf.mxu1  ;;  %7283 = vmatmul.mubr.f32.gmra.mxu1 %v3322_v60  ;;  %5173 = vperm.xlu0 %7744, %v4971_v57   ;;  %v3327_v57 = vld [vmem:[%s7843_s27 + $0x184] sm:$0xff] }
 0x1be   : > { %v9188_v32 = vadd.f32 %v2400_v4, %v2165_v31  ;;  %v2168_v27 = vadd.f32 %v6980_v52, %v8788_v38  ;;  %v7108_v63 = vpop.f32.mrf.mxu0  ;;  %7411 = vmatmul.mubr.f32.gmra.mxu0 %v3324_v61  ;;  %7285 = vmatprep.mubr.f32.mxu1 %v3323_v33  ;;  %v4974_v38 = vld [vmem:[%s8768_s5 + $0x128] sm:$0xff]  ;;  %v4975_v52 = vld [vmem:[%s8768_s5 + $0x130] sm:$0xff] }
 0x1bf   : > { %v1880_v0 = vpop.f32.mrf.mxu1  ;;  %7413 = vmatprep.mubr.f32.mxu0 %v3325_v59 }
 0x1c0   : > { %v9193_v48 = vadd.f32 %v7108_v63, %v2168_v27  ;;  %v2167_v21 = vadd.f32 %v1880_v0, %v8793_v15  ;;  %v2410_v60 = vpop.f32.mrf.mxu0  ;;  %5178 = vperm.xlu1 %7745, %v4972_v26   ;;  %v3328_v15 = vld [vmem:[%s7843_s27 + $0x18c] sm:$0xff] }
 0x1c1   : > { %v6983_v37 = vpop.f32.mrf.mxu1  ;;  %7286 = vmatmul.mubr.f32.gmra.mxu1 %v3324_v61  ;;  %5183 = vperm.xlu0 %7744, %v4973_v44   ;;  %v3329_v44 = vld [vmem:[%s7843_s27 + $0x194] sm:$0xff] }
 0x1c2   : > { %v9198_v31 = vadd.f32 %v2410_v60, %v2167_v21  ;;  %v2170_v33 = vadd.f32 %v6983_v37, %v8800_v3  ;;  %v7111_v4 = vpop.f32.mrf.mxu0  ;;  %7414 = vmatmul.mubr.f32.gmra.mxu0 %v3326_v5  ;;  %7288 = vmatprep.mubr.f32.mxu1 %v3325_v59  ;;  %v4976_v3 = vld [vmem:[%s8768_s5 + $0x138] sm:$0xff]  ;;  %v4977_v37 = vld [vmem:[%s8768_s5 + $0x140] sm:$0xff] }
 0x1c3   : > { %v1890_v27 = vpop.f32.mrf.mxu1  ;;  %7416 = vmatprep.mubr.f32.mxu0 %v3327_v57 }
 0x1c4   : > { %v9203_v63 = vadd.f32 %v7111_v4, %v2170_v33  ;;  %v2169_v26 = vadd.f32 %v1890_v27, %v8805_v23  ;;  %v2420_v61 = vpop.f32.mrf.mxu0  ;;  %5188 = vperm.xlu1 %7745, %v4974_v38   ;;  %v3330_v23 = vld [vmem:[%s7843_s27 + $0x19c] sm:$0xff] }
 0x1c5   : > { %v6986_v0 = vpop.f32.mrf.mxu1  ;;  %7289 = vmatmul.mubr.f32.gmra.mxu1 %v3326_v5  ;;  %5193 = vperm.xlu0 %7744, %v4975_v52   ;;  %v3331_v52 = vld [vmem:[%s7843_s27 + $0x1a4] sm:$0xff] }
 0x1c6   : > { %v9208_v21 = vadd.f32 %v2420_v61, %v2169_v26  ;;  %v2172_v59 = vadd.f32 %v6986_v0, %v8812_v20  ;;  %v7114_v60 = vpop.f32.mrf.mxu0  ;;  %7417 = vmatmul.mubr.f32.gmra.mxu0 %v3328_v15  ;;  %7291 = vmatprep.mubr.f32.mxu1 %v3327_v57  ;;  %v4978_v20 = vld [vmem:[%s8768_s5 + $0x148] sm:$0xff]  ;;  %v4979_v0 = vld [vmem:[%s8768_s5 + $0x150] sm:$0xff] }
 0x1c7   : > { %v1900_v33 = vpop.f32.mrf.mxu1  ;;  %7419 = vmatprep.mubr.f32.mxu0 %v3329_v44 }
 0x1c8   : > { %v9213_v4 = vadd.f32 %v7114_v60, %v2172_v59  ;;  %v2171_v38 = vadd.f32 %v1900_v33, %v8817_v34  ;;  %v2430_v5 = vpop.f32.mrf.mxu0  ;;  %5198 = vperm.xlu1 %7745, %v4976_v3   ;;  %v3332_v34 = vld [vmem:[%s7843_s27 + $0x1ac] sm:$0xff] }
 0x1c9   : > { %v6989_v27 = vpop.f32.mrf.mxu1  ;;  %7292 = vmatmul.mubr.f32.gmra.mxu1 %v3328_v15  ;;  %5203 = vperm.xlu0 %7744, %v4977_v37   ;;  %v3333_v37 = vld [vmem:[%s7843_s27 + $0x1b4] sm:$0xff] }
 0x1ca   : > { %v9218_v26 = vadd.f32 %v2430_v5, %v2171_v38  ;;  %v2174_v57 = vadd.f32 %v6989_v27, %v8824_v46  ;;  %v7117_v61 = vpop.f32.mrf.mxu0  ;;  %7420 = vmatmul.mubr.f32.gmra.mxu0 %v3330_v23  ;;  %7294 = vmatprep.mubr.f32.mxu1 %v3329_v44  ;;  %v4980_v46 = vld [vmem:[%s8768_s5 + $0x158] sm:$0xff]  ;;  %v4981_v27 = vld [vmem:[%s8768_s5 + $0x160] sm:$0xff] }
 0x1cb   : > { %v1910_v59 = vpop.f32.mrf.mxu1  ;;  %7422 = vmatprep.mubr.f32.mxu0 %v3331_v52 }
 0x1cc   : > { %v9223_v60 = vadd.f32 %v7117_v61, %v2174_v57  ;;  %v2173_v3 = vadd.f32 %v1910_v59, %v8829_v47  ;;  %v2440_v15 = vpop.f32.mrf.mxu0  ;;  %5208 = vperm.xlu1 %7745, %v4978_v20   ;;  %v3334_v47 = vld [vmem:[%s7843_s27 + $0x1bc] sm:$0xff] }
 0x1cd   : > { %v6992_v33 = vpop.f32.mrf.mxu1  ;;  %7295 = vmatmul.mubr.f32.gmra.mxu1 %v3330_v23  ;;  %5213 = vperm.xlu0 %7744, %v4979_v0   ;;  %v3335_v0 = vld [vmem:[%s7843_s27 + $0x1c4] sm:$0xff] }
 0x1ce   : > { %v9228_v38 = vadd.f32 %v2440_v15, %v2173_v3  ;;  %v2176_v44 = vadd.f32 %v6992_v33, %v8836_v40  ;;  %v7120_v5 = vpop.f32.mrf.mxu0  ;;  %7423 = vmatmul.mubr.f32.gmra.mxu0 %v3332_v34  ;;  %7297 = vmatprep.mubr.f32.mxu1 %v3331_v52  ;;  %v4982_v40 = vld [vmem:[%s8768_s5 + $0x168] sm:$0xff]  ;;  %v4983_v33 = vld [vmem:[%s8768_s5 + $0x170] sm:$0xff] }
 0x1cf   : > { %v1920_v57 = vpop.f32.mrf.mxu1  ;;  %7425 = vmatprep.mubr.f32.mxu0 %v3333_v37 }
 0x1d0   : > { %v9233_v61 = vadd.f32 %v7120_v5, %v2176_v44  ;;  %v2175_v20 = vadd.f32 %v1920_v57, %v8841_v62  ;;  %v2450_v23 = vpop.f32.mrf.mxu0  ;;  %5218 = vperm.xlu1 %7745, %v4980_v46   ;;  %v3336_v62 = vld [vmem:[%s7843_s27 + $0x1cc] sm:$0xff] }
 0x1d1   : > { %v6995_v59 = vpop.f32.mrf.mxu1  ;;  %7298 = vmatmul.mubr.f32.gmra.mxu1 %v3332_v34  ;;  %5223 = vperm.xlu0 %7744, %v4981_v27   ;;  %v3337_v27 = vld [vmem:[%s7843_s27 + $0x1d4] sm:$0xff] }
 0x1d2   : > { %v9238_v3 = vadd.f32 %v2450_v23, %v2175_v20  ;;  %v2178_v52 = vadd.f32 %v6995_v59, %v8848_v12  ;;  %v7123_v15 = vpop.f32.mrf.mxu0  ;;  %7426 = vmatmul.mubr.f32.gmra.mxu0 %v3334_v47  ;;  %7300 = vmatprep.mubr.f32.mxu1 %v3333_v37  ;;  %v4984_v12 = vld [vmem:[%s8768_s5 + $0x178] sm:$0xff]  ;;  %v4985_v59 = vld [vmem:[%s8768_s5 + $0x180] sm:$0xff] }
 0x1d3   : > { %v1930_v44 = vpop.f32.mrf.mxu1  ;;  %7428 = vmatprep.mubr.f32.mxu0 %v3335_v0 }
 0x1d4   : > { %v9243_v5 = vadd.f32 %v7123_v15, %v2178_v52  ;;  %v2177_v46 = vadd.f32 %v1930_v44, %v8853_v16  ;;  %v2460_v34 = vpop.f32.mrf.mxu0  ;;  %5228 = vperm.xlu1 %7745, %v4982_v40   ;;  %v3338_v16 = vld [vmem:[%s7843_s27 + $0x1dc] sm:$0xff] }
 0x1d5   : > { %v6998_v57 = vpop.f32.mrf.mxu1  ;;  %7301 = vmatmul.mubr.f32.gmra.mxu1 %v3334_v47  ;;  %5233 = vperm.xlu0 %7744, %v4983_v33   ;;  %v3339_v33 = vld [vmem:[%s7843_s27 + $0x1e4] sm:$0xff] }
 0x1d6   : > { %v9248_v20 = vadd.f32 %v2460_v34, %v2177_v46  ;;  %v2180_v37 = vadd.f32 %v6998_v57, %v8860_v6  ;;  %v7126_v23 = vpop.f32.mrf.mxu0  ;;  %7429 = vmatmul.mubr.f32.gmra.mxu0 %v3336_v62  ;;  %7303 = vmatprep.mubr.f32.mxu1 %v3335_v0  ;;  %v4986_v6 = vld [vmem:[%s8768_s5 + $0x188] sm:$0xff]  ;;  %v4987_v57 = vld [vmem:[%s8768_s5 + $0x190] sm:$0xff] }
 0x1d7   : > { %v1940_v52 = vpop.f32.mrf.mxu1  ;;  %7431 = vmatprep.mubr.f32.mxu0 %v3337_v27 }
 0x1d8   : > { %v9253_v15 = vadd.f32 %v7126_v23, %v2180_v37  ;;  %v2179_v40 = vadd.f32 %v1940_v52, %v8865_v19  ;;  %v2470_v47 = vpop.f32.mrf.mxu0  ;;  %5238 = vperm.xlu1 %7745, %v4984_v12   ;;  %v3340_v19 = vld [vmem:[%s7843_s27 + $0x1ec] sm:$0xff] }
 0x1d9   : > { %v7001_v44 = vpop.f32.mrf.mxu1  ;;  %7304 = vmatmul.mubr.f32.gmra.mxu1 %v3336_v62  ;;  %5243 = vperm.xlu0 %7744, %v4985_v59   ;;  %v3341_v59 = vld [vmem:[%s7843_s27 + $0x1f4] sm:$0xff] }
 0x1da   : > { %v9258_v46 = vadd.f32 %v2470_v47, %v2179_v40  ;;  %v2182_v0 = vadd.f32 %v7001_v44, %v8872_v13  ;;  %v7129_v34 = vpop.f32.mrf.mxu0  ;;  %7432 = vmatmul.mubr.f32.gmra.mxu0 %v3338_v16  ;;  %7306 = vmatprep.mubr.f32.mxu1 %v3337_v27  ;;  %v4988_v13 = vld [vmem:[%s8768_s5 + $0x198] sm:$0xff]  ;;  %v4989_v44 = vld [vmem:[%s8768_s5 + $0x1a0] sm:$0xff] }
 0x1db   : > { %v1950_v37 = vpop.f32.mrf.mxu1  ;;  %7434 = vmatprep.mubr.f32.mxu0 %v3339_v33 }
 0x1dc   : > { %v9263_v23 = vadd.f32 %v7129_v34, %v2182_v0  ;;  %v2181_v12 = vadd.f32 %v1950_v37, %v8877_v28  ;;  %v2480_v62 = vpop.f32.mrf.mxu0  ;;  %5248 = vperm.xlu1 %7745, %v4986_v6   ;;  %v3342_v28 = vld [vmem:[%s7843_s27 + $0x1fc] sm:$0xff] }
 0x1dd   : > { %v7004_v52 = vpop.f32.mrf.mxu1  ;;  %7307 = vmatmul.mubr.f32.gmra.mxu1 %v3338_v16  ;;  %5253 = vperm.xlu0 %7744, %v4987_v57   ;;  %v3343_v57 = vld [vmem:[%s7843_s27 + $0x204] sm:$0xff] }
 0x1de   : > { %v9268_v40 = vadd.f32 %v2480_v62, %v2181_v12  ;;  %v2184_v27 = vadd.f32 %v7004_v52, %v8884_v43  ;;  %v7132_v47 = vpop.f32.mrf.mxu0  ;;  %7435 = vmatmul.mubr.f32.gmra.mxu0 %v3340_v19  ;;  %7309 = vmatprep.mubr.f32.mxu1 %v3339_v33  ;;  %v4990_v43 = vld [vmem:[%s8768_s5 + $0x1a8] sm:$0xff]  ;;  %v4991_v52 = vld [vmem:[%s8768_s5 + $0x1b0] sm:$0xff] }
 0x1df   : > { %v1960_v0 = vpop.f32.mrf.mxu1  ;;  %7437 = vmatprep.mubr.f32.mxu0 %v3341_v59 }
 0x1e0   : > { %v9273_v34 = vadd.f32 %v7132_v47, %v2184_v27  ;;  %v2183_v6 = vadd.f32 %v1960_v0, %v8889_v30  ;;  %v2490_v16 = vpop.f32.mrf.mxu0  ;;  %5258 = vperm.xlu1 %7745, %v4988_v13   ;;  %v3344_v30 = vld [vmem:[%s7843_s27 + $0x20c] sm:$0xff] }
 0x1e1   : > { %v7007_v37 = vpop.f32.mrf.mxu1  ;;  %7310 = vmatmul.mubr.f32.gmra.mxu1 %v3340_v19  ;;  %5263 = vperm.xlu0 %7744, %v4989_v44   ;;  %v3345_v44 = vld [vmem:[%s7843_s27 + $0x214] sm:$0xff] }
 0x1e2   : > { %v9278_v12 = vadd.f32 %v2490_v16, %v2183_v6  ;;  %v2186_v33 = vadd.f32 %v7007_v37, %v8897_v45  ;;  %v7135_v62 = vpop.f32.mrf.mxu0  ;;  %7438 = vmatmul.mubr.f32.gmra.mxu0 %v3342_v28  ;;  %7312 = vmatprep.mubr.f32.mxu1 %v3341_v59  ;;  %v4992_v45 = vld [vmem:[%s8768_s5 + $0x1b8] sm:$0xff]  ;;  %v4993_v37 = vld [vmem:[%s8768_s5 + $0x1c0] sm:$0xff] }
 0x1e3   : > { %v1970_v27 = vpop.f32.mrf.mxu1  ;;  %7440 = vmatprep.mubr.f32.mxu0 %v3343_v57 }
 0x1e4   : > { %v9283_v47 = vadd.f32 %v7135_v62, %v2186_v33  ;;  %v2185_v13 = vadd.f32 %v1970_v27, %v8902_v49  ;;  %v2500_v19 = vpop.f32.mrf.mxu0  ;;  %5268 = vperm.xlu1 %7745, %v4990_v43   ;;  %v3346_v33 = vld [vmem:[%s7843_s27 + $0x21c] sm:$0xff]  ;;  %v3813_v62 = vld [vmem:[%s7843_s27 + $0x25] sm:$0xff] }
 0x1e5   : > { %v7010_v0 = vpop.f32.mrf.mxu1  ;;  %7313 = vmatmul.mubr.f32.gmra.mxu1 %v3342_v28  ;;  %5273 = vperm.xlu0 %7744, %v4991_v52   ;;  %v4343_v27 = vld [vmem:[%s7843_s27 + $0x26] sm:$0xff] }
 0x1e6   : > { %v9288_v59 = vadd.f32 %v2500_v19, %v2185_v13  ;;  %v2188_v6 = vadd.f32 %v7010_v0, %v8910_v42  ;;  %v7138_v16 = vpop.f32.mrf.mxu0  ;;  %7441 = vmatmul.mubr.f32.gmra.mxu0 %v3344_v30  ;;  %7315 = vmatprep.mubr.f32.mxu1 %v3343_v57  ;;  %v4994_v57 = vld [vmem:[%s8768_s5 + $0x1c8] sm:$0xff] }
 0x1e7   : > { %v1980_v49 = vpop.f32.mrf.mxu1  ;;  %7443 = vmatprep.mubr.f32.mxu0 %v3345_v44  ;;  %v3814_v0 = vld [vmem:[%s7843_s27 + $0x2d] sm:$0xff] }
 0x1e8   : > { %v9294_v43 = vadd.f32 %v7138_v16, %v2188_v6  ;;  %v2187_v28 = vadd.f32 %v1980_v49, %v8914_v25  ;;  %v2510_v52 = vpop.f32.mrf.mxu0  ;;  %5278 = vperm.xlu1 %7745, %v4992_v45   ;;  %v4995_v25 = vld [vmem:[%s8768_s5 + $0x1d0] sm:$0xff] }
 0x1e9   : > { %v7013_v42 = vpop.f32.mrf.mxu1  ;;  %7316 = vmatmul.mubr.f32.gmra.mxu1 %v3344_v30  ;;  %5283 = vperm.xlu0 %7744, %v4993_v37   ;;  %v4344_v16 = vld [vmem:[%s7843_s27 + $0x2e] sm:$0xff] }
 0x1ea   : > { %v9299_v13 = vadd.f32 %v2510_v52, %v2187_v28  ;;  %v2190_v19 = vadd.f32 %v7013_v42, %v8921_v41  ;;  %v7141_v44 = vpop.f32.mrf.mxu0  ;;  %7444 = vmatmul.mubr.f32.gmra.mxu0 %v3346_v33  ;;  %7478 = vmatprep.mubr.f32.mxu1 %v3813_v62  ;;  %v3815_v45 = vld [vmem:[%s7843_s27 + $0x35] sm:$0xff]  ;;  %v3816_v42 = vld [vmem:[%s7843_s27 + $0x3d] sm:$0xff] }
 0x1eb   : > { %v1990_v6 = vpop.f32.mrf.mxu1  ;;  %7606 = vmatprep.mubr.f32.mxu0 %v4343_v27  ;;  %v4345_v28 = vld [vmem:[%s7843_s27 + $0x36] sm:$0xff] }
 0x1ec   : > { %v9306_v30 = vadd.f32 %v7141_v44, %v2190_v19  ;;  %v2189_v37 = vadd.f32 %v1990_v6, %v8928_v9  ;;  %v2520_v49 = vpop.f32.mrf.mxu0  ;;  %5288 = vperm.xlu1 %7745, %v4994_v57   ;;  %v4996_v33 = vld [vmem:[%s8768_s5 + $0x1d8] sm:$0xff]  ;;  %v4997_v9 = vld [vmem:[%s8768_s5 + $0x1e0] sm:$0xff] }
 0x1ed   : > { %v7016_v41 = vpop.f32.mrf.mxu1  ;;  %7479 = vmatmul.mubr.f32.vlgmr.msra.gmra.mxu1 %v3814_v0  ;;  %5293 = vperm.xlu0 %7744, %v4995_v25   ;;  %v4346_v44 = vld [vmem:[%s7843_s27 + $0x3e] sm:$0xff] }
 0x1ee   : > { %v9311_v62 = vadd.f32 %v2520_v49, %v2189_v37  ;;  %v2192_v52 = vadd.f32 %v7016_v41, %v8937_v54  ;;  %v7144_v27 = vpop.f32.mrf.mxu0  ;;  %7607 = vmatmul.mubr.f32.vlgmr.msra.gmra.mxu0 %v4344_v16  ;;  %7481 = vmatprep.mubr.f32.mxu1 %v3815_v45  ;;  %v3817_v57 = vld [vmem:[%s7843_s27 + $0x45] sm:$0xff]  ;;  %v3818_v41 = vld [vmem:[%s7843_s27 + $0x4d] sm:$0xff] }
 0x1ef   : > { %v2000_v19 = vpop.f32.mrf.mxu1  ;;  %7609 = vmatprep.mubr.f32.mxu0 %v4345_v28  ;;  %v4347_v37 = vld [vmem:[%s7843_s27 + $0x46] sm:$0xff] }
 0x1f0   : > { %v9318_v0 = vadd.f32 %v7144_v27, %v2192_v52  ;;  %v2191_v25 = vadd.f32 %v2000_v19, %v8944_v7  ;;  %v2530_v6 = vpop.f32.mrf.mxu0  ;;  %5298 = vperm.xlu1 %7745, %v4996_v33   ;;  %v4998_v16 = vld [vmem:[%s8768_s5 + $0x1e8] sm:$0xff]  ;;  %v4999_v7 = vld [vmem:[%s8768_s5 + $0x1f0] sm:$0xff] }
 0x1f1   : > { %v7019_v54 = vpop.f32.mrf.mxu1  ;;  %7482 = vmatmul.mubr.f32.gmra.mxu1 %v3816_v42  ;;  %5303 = vperm.xlu0 %7744, %v4997_v9   ;;  %v4348_v27 = vld [vmem:[%s7843_s27 + $0x4e] sm:$0xff] }
 0x1f2   : > { %v9323_v45 = vadd.f32 %v2530_v6, %v2191_v25  ;;  %v2194_v49 = vadd.f32 %v7019_v54, %v8951_v58  ;;  %v7147_v28 = vpop.f32.mrf.mxu0  ;;  %7610 = vmatmul.mubr.f32.gmra.mxu0 %v4346_v44  ;;  %7484 = vmatprep.mubr.f32.mxu1 %v3817_v57  ;;  %v3819_v33 = vld [vmem:[%s7843_s27 + $0x55] sm:$0xff]  ;;  %v3820_v54 = vld [vmem:[%s7843_s27 + $0x5d] sm:$0xff] }
 0x1f3   : > { %v2010_v52 = vpop.f32.mrf.mxu1  ;;  %7612 = vmatprep.mubr.f32.mxu0 %v4347_v37  ;;  %v4349_v25 = vld [vmem:[%s7843_s27 + $0x56] sm:$0xff] }
 0x1f4   : > { %v9330_v19 = vadd.f32 %v7147_v28, %v2194_v49  ;;  %v2193_v42 = vadd.f32 %v2010_v52, %v8958_v51  ;;  %v2540_v9 = vpop.f32.mrf.mxu0  ;;  %5308 = vperm.xlu1 %7745, %v4998_v16   ;;  %v5000_v44 = vld [vmem:[%s8768_s5 + $0x1f8] sm:$0xff]  ;;  %v3821_v28 = vld [vmem:[%s7843_s27 + $0x65] sm:$0xff] }
 0x1f5   : > { %v7022_v58 = vpop.f32.mrf.mxu1  ;;  %7485 = vmatmul.mubr.f32.gmra.mxu1 %v3818_v41  ;;  %5313 = vperm.xlu0 %7744, %v4999_v7   ;;  %v4350_v51 = vld [vmem:[%s7843_s27 + $0x5e] sm:$0xff]  ;;  %v4351_v52 = vld [vmem:[%s7843_s27 + $0x66] sm:$0xff] }
 0x1f6   : > { %v9335_v57 = vadd.f32 %v2540_v9, %v2193_v42  ;;  %v2196_v6 = vadd.f32 %v7022_v58, %v8965_v50  ;;  %v7150_v37 = vpop.f32.mrf.mxu0  ;;  %7613 = vmatmul.mubr.f32.gmra.mxu0 %v4348_v27  ;;  %7487 = vmatprep.mubr.f32.mxu1 %v3819_v33  ;;  %v3822_v9 = vld [vmem:[%s7843_s27 + $0x6d] sm:$0xff] }
 0x1f7   : > { %v2020_v49 = vpop.f32.mrf.mxu1  ;;  %7615 = vmatprep.mubr.f32.mxu0 %v4349_v25  ;;  %v4352_v58 = vld [vmem:[%s7843_s27 + $0x6e] sm:$0xff] }
 0x1f8   : > { %v9341_v16 = vadd.f32 %v7150_v37, %v2196_v6  ;;  %v2195_v41 = vadd.f32 %v2020_v49, %v8972_v17  ;;  %v2550_v7 = vpop.f32.mrf.mxu0  ;;  %5318 = vperm.xlu1 %7745, %v5000_v44   ;;  %v3823_v17 = vld [vmem:[%s7843_s27 + $0x75] sm:$0xff] }
 0x1f9   : > { %v7025_v50 = vpop.f32.mrf.mxu1  ;;  %7488 = vmatmul.mubr.f32.gmra.mxu1 %v3820_v54  ;;  %v4353_v54 = vld [vmem:[%s7843_s27 + $0x76] sm:$0xff] }
 0x1fa   : > { %v9345_v27 = vadd.f32 %v2550_v7, %v2195_v41  ;;  %v2198_v33 = vadd.f32 %v7025_v50, %v8979_v10  ;;  %v7153_v42 = vpop.f32.mrf.mxu0  ;;  %7616 = vmatmul.mubr.f32.gmra.mxu0 %v4350_v51  ;;  %7490 = vmatprep.mubr.f32.mxu1 %v3821_v28  ;;  %v3824_v41 = vld [vmem:[%s7843_s27 + $0x7d] sm:$0xff]  ;;  %v3825_v50 = vld [vmem:[%s7843_s27 + $0x85] sm:$0xff] }
 0x1fb   : > { %v2030_v25 = vpop.f32.mrf.mxu1  ;;  %7618 = vmatprep.mubr.f32.mxu0 %v4351_v52  ;;  %v4354_v52 = vld [vmem:[%s7843_s27 + $0x7e] sm:$0xff] }
 0x1fc   : > { %v9351_v6 = vadd.f32 %v7153_v42, %v2198_v33  ;;  %v2197_v44 = vadd.f32 %v2030_v25, %v8986_v1  ;;  %v2560_v37 = vpop.f32.mrf.mxu0 }
 0x1fd   : > { %v7028_v49 = vpop.f32.mrf.mxu1  ;;  %7491 = vmatmul.mubr.f32.gmra.mxu1 %v3822_v9  ;;  %v4355_v9 = vld [vmem:[%s7843_s27 + $0x86] sm:$0xff] }
 0x1fe   : > { %v9355_v10 = vadd.f32 %v2560_v37, %v2197_v44  ;;  %v2200_v51 = vadd.f32 %v7028_v49, %v8993_v36  ;;  %v7156_v28 = vpop.f32.mrf.mxu0  ;;  %7619 = vmatmul.mubr.f32.gmra.mxu0 %v4352_v58  ;;  %7493 = vmatprep.mubr.f32.mxu1 %v3823_v17  ;;  %v3826_v44 = vld [vmem:[%s7843_s27 + $0x8d] sm:$0xff]  ;;  %v3827_v49 = vld [vmem:[%s7843_s27 + $0x95] sm:$0xff] }
 0x1ff   : > { %v2040_v7 = vpop.f32.mrf.mxu1  ;;  %7621 = vmatprep.mubr.f32.mxu0 %v4353_v54  ;;  %v4356_v54 = vld [vmem:[%s7843_s27 + $0x8e] sm:$0xff] }
 0x200   : > { %v9361_v1 = vadd.f32 %v7156_v28, %v2200_v51  ;;  %v2199_v33 = vadd.f32 %v2040_v7, %v9000_v11  ;;  %v2570_v42 = vpop.f32.mrf.mxu0 }
 0x201   : > { %v7031_v25 = vpop.f32.mrf.mxu1  ;;  %7494 = vmatmul.mubr.f32.gmra.mxu1 %v3824_v41  ;;  %v4357_v41 = vld [vmem:[%s7843_s27 + $0x96] sm:$0xff] }
 0x202   : > { %v9365_v36 = vadd.f32 %v2570_v42, %v2199_v33  ;;  %v2202_v58 = vadd.f32 %v7031_v25, %v9007_v2  ;;  %v7159_v17 = vpop.f32.mrf.mxu0  ;;  %7622 = vmatmul.mubr.f32.gmra.mxu0 %v4354_v52  ;;  %7496 = vmatprep.mubr.f32.mxu1 %v3825_v50  ;;  %v10141_v52 = vld [vmem:[#allocation2_spill] sm:$0xff] }
 0x203   : > { %v2050_v37 = vpop.f32.mrf.mxu1  ;;  %7624 = vmatprep.mubr.f32.mxu0 %v4355_v9  ;;  %v3828_v42 = vld [vmem:[%s7843_s27 + $0x9d] sm:$0xff] }
 0x204   : > { %v9371_v11 = vadd.f32 %v7159_v17, %v2202_v58  ;;  %v2201_v51 = vadd.f32 %v2050_v37, %v9014_v53  ;;  %v2580_v28 = vpop.f32.mrf.mxu0  ;;  %v4358_v25 = vld [vmem:[%s7843_s27 + $0x9e] sm:$0xff]  ;;  %v10143_v17 = vld [vmem:[#allocation3_spill] sm:$0xff] }
 0x205   : > { %v7034_v7 = vpop.f32.mrf.mxu1  ;;  %7497 = vmatmul.mubr.f32.gmra.mxu1 %v3826_v44  ;;  %v3829_v58 = vld [vmem:[%s7843_s27 + $0xa5] sm:$0xff] }
 0x206   : > { %v9375_v2 = vadd.f32 %v2580_v28, %v2201_v51  ;;  %v2204_v50 = vadd.f32 %v7034_v7, %v10141_v52  ;;  %v7162_v33 = vpop.f32.mrf.mxu0  ;;  %7625 = vmatmul.mubr.f32.gmra.mxu0 %v4356_v54  ;;  %7499 = vmatprep.mubr.f32.mxu1 %v3827_v49  ;;  %v4359_v51 = vld [vmem:[%s7843_s27 + $0xa6] sm:$0xff]  ;;  %v10145_v54 = vld [vmem:[#allocation4_spill] sm:$0xff] }
 0x207   : > { %v2060_v9 = vpop.f32.mrf.mxu1  ;;  %7627 = vmatprep.mubr.f32.mxu0 %v4357_v41  ;;  %v3830_v41 = vld [vmem:[%s7843_s27 + $0xad] sm:$0xff] }
 0x208   : > { %10140 = vst [vmem:[#allocation17_spill] sm:$0xff] %v9375_v2  ;;  %v9381_v53 = vadd.f32 %v7162_v33, %v2204_v50  ;;  %v2203_v37 = vadd.f32 %v2060_v9, %v10143_v17  ;;  %v2590_v44 = vpop.f32.mrf.mxu0  ;;  %v4360_v50 = vld [vmem:[%s7843_s27 + $0xae] sm:$0xff]  ;;  %v10147_v17 = vld [vmem:[#allocation5_spill] sm:$0xff] }
 0x209   : > { %v7037_v28 = vpop.f32.mrf.mxu1  ;;  %7500 = vmatmul.mubr.f32.gmra.mxu1 %v3828_v42  ;;  %v3831_v33 = vld [vmem:[%s7843_s27 + $0xb5] sm:$0xff] }
 0x20a   : > { %10142 = vst [vmem:[#allocation18_spill] sm:$0xff] %v9381_v53  ;;  %v9385_v7 = vadd.f32 %v2590_v44, %v2203_v37  ;;  %v2206_v49 = vadd.f32 %v7037_v28, %v10145_v54  ;;  %v7165_v52 = vpop.f32.mrf.mxu0  ;;  %7628 = vmatmul.mubr.f32.gmra.mxu0 %v4358_v25  ;;  %7502 = vmatprep.mubr.f32.mxu1 %v3829_v58  ;;  %v4361_v37 = vld [vmem:[%s7843_s27 + $0xb6] sm:$0xff]  ;;  %v10149_v25 = vld [vmem:[#allocation6_spill] sm:$0xff] }
 0x20b   : > { %v2070_v2 = vpop.f32.mrf.mxu1  ;;  %7630 = vmatprep.mubr.f32.mxu0 %v4359_v51  ;;  %v3832_v51 = vld [vmem:[%s7843_s27 + $0xbd] sm:$0xff] }
 0x20c   : > { %10144 = vst [vmem:[#allocation19_spill] sm:$0xff] %v9385_v7  ;;  %v9391_v9 = vadd.f32 %v7165_v52, %v2206_v49  ;;  %v2205_v53 = vadd.f32 %v2070_v2, %v10147_v17  ;;  %v2600_v42 = vpop.f32.mrf.mxu0  ;;  %v4362_v49 = vld [vmem:[%s7843_s27 + $0xbe] sm:$0xff]  ;;  %v10151_v17 = vld [vmem:[#allocation7_spill] sm:$0xff] }
 0x20d   : > { %v7040_v44 = vpop.f32.mrf.mxu1  ;;  %7503 = vmatmul.mubr.f32.gmra.mxu1 %v3830_v41  ;;  %v3833_v52 = vld [vmem:[%s7843_s27 + $0xc5] sm:$0xff] }
 0x20e   : > { %10146 = vst [vmem:[#allocation20_spill] sm:$0xff] %v9391_v9  ;;  %v9395_v28 = vadd.f32 %v2600_v42, %v2205_v53  ;;  %v2208_v58 = vadd.f32 %v7040_v44, %v10149_v25  ;;  %v7168_v54 = vpop.f32.mrf.mxu0  ;;  %7631 = vmatmul.mubr.f32.gmra.mxu0 %v4360_v50  ;;  %7505 = vmatprep.mubr.f32.mxu1 %v3831_v33  ;;  %v4363_v53 = vld [vmem:[%s7843_s27 + $0xc6] sm:$0xff]  ;;  %v10153_v50 = vld [vmem:[#allocation8_spill] sm:$0xff] }
 0x20f   : > { %v2080_v7 = vpop.f32.mrf.mxu1  ;;  %7633 = vmatprep.mubr.f32.mxu0 %v4361_v37  ;;  %v3834_v37 = vld [vmem:[%s7843_s27 + $0xcd] sm:$0xff] }
 0x210   : > { %10148 = vst [vmem:[#allocation21_spill] sm:$0xff] %v9395_v28  ;;  %v9401_v2 = vadd.f32 %v7168_v54, %v2208_v58  ;;  %v2207_v9 = vadd.f32 %v2080_v7, %v10151_v17  ;;  %v2610_v41 = vpop.f32.mrf.mxu0  ;;  %v4364_v58 = vld [vmem:[%s7843_s27 + $0xce] sm:$0xff]  ;;  %v10155_v17 = vld [vmem:[#allocation9_spill] sm:$0xff] }
 0x211   : > { %v7043_v42 = vpop.f32.mrf.mxu1  ;;  %7506 = vmatmul.mubr.f32.gmra.mxu1 %v3832_v51  ;;  %v3835_v54 = vld [vmem:[%s7843_s27 + $0xd5] sm:$0xff] }
 0x212   : > { %10150 = vst [vmem:[#allocation22_spill] sm:$0xff] %v9401_v2  ;;  %v9405_v44 = vadd.f32 %v2610_v41, %v2207_v9  ;;  %v2210_v33 = vadd.f32 %v7043_v42, %v10153_v50  ;;  %v7171_v25 = vpop.f32.mrf.mxu0  ;;  %7634 = vmatmul.mubr.f32.gmra.mxu0 %v4362_v49  ;;  %7508 = vmatprep.mubr.f32.mxu1 %v3833_v52  ;;  %v4365_v9 = vld [vmem:[%s7843_s27 + $0xd6] sm:$0xff]  ;;  %v10157_v49 = vld [vmem:[#allocation43_spill] sm:$0xff] }
 0x213   : > { %v2090_v28 = vpop.f32.mrf.mxu1  ;;  %7636 = vmatprep.mubr.f32.mxu0 %v4363_v53  ;;  %v3836_v53 = vld [vmem:[%s7843_s27 + $0xdd] sm:$0xff] }
 0x214   : > { %10152 = vst [vmem:[#allocation23_spill] sm:$0xff] %v9405_v44  ;;  %v9411_v7 = vadd.f32 %v7171_v25, %v2210_v33  ;;  %v2209_v2 = vadd.f32 %v2090_v28, %v10155_v17  ;;  %v2620_v51 = vpop.f32.mrf.mxu0  ;;  %v4366_v33 = vld [vmem:[%s7843_s27 + $0xde] sm:$0xff] }
 0x215   : > { %v7046_v41 = vpop.f32.mrf.mxu1  ;;  %7509 = vmatmul.mubr.f32.gmra.mxu1 %v3834_v37  ;;  %v3837_v25 = vld [vmem:[%s7843_s27 + $0xe5] sm:$0xff] }
 0x216   : > { %10154 = vst [vmem:[#allocation24_spill] sm:$0xff] %v9411_v7  ;;  %v9415_v42 = vadd.f32 %v2620_v51, %v2209_v2  ;;  %v2212_v52 = vadd.f32 %v7046_v41, %v10157_v49  ;;  %v7174_v50 = vpop.f32.mrf.mxu0  ;;  %7637 = vmatmul.mubr.f32.gmra.mxu0 %v4364_v58  ;;  %7511 = vmatprep.mubr.f32.mxu1 %v3835_v54  ;;  %v10159_v17 = vld [vmem:[#allocation10_spill] sm:$0xff]  ;;  %v10161_v58 = vld [vmem:[#allocation41_spill] sm:$0xff] }
 0x217   : > { %v2100_v44 = vpop.f32.mrf.mxu1  ;;  %7639 = vmatprep.mubr.f32.mxu0 %v4365_v9  ;;  %v4367_v2 = vld [vmem:[%s7843_s27 + $0xe6] sm:$0xff] }
 0x218   : > { %10156 = vst [vmem:[#allocation25_spill] sm:$0xff] %v9415_v42  ;;  %v9421_v28 = vadd.f32 %v7174_v50, %v2212_v52  ;;  %v2211_v7 = vadd.f32 %v2100_v44, %v10159_v17  ;;  %v2630_v37 = vpop.f32.mrf.mxu0  ;;  %v3838_v9 = vld [vmem:[%s7843_s27 + $0xed] sm:$0xff]  ;;  %v3839_v50 = vld [vmem:[%s7843_s27 + $0xf5] sm:$0xff] }
 0x219   : > { %v7049_v51 = vpop.f32.mrf.mxu1  ;;  %7512 = vmatmul.mubr.f32.gmra.mxu1 %v3836_v53  ;;  %v4368_v52 = vld [vmem:[%s7843_s27 + $0xee] sm:$0xff] }
 0x21a   : > { %10158 = vst [vmem:[#allocation26_spill] sm:$0xff] %v9421_v28  ;;  %v9425_v41 = vadd.f32 %v2630_v37, %v2211_v7  ;;  %v2214_v54 = vadd.f32 %v7049_v51, %v10161_v58  ;;  %v7177_v49 = vpop.f32.mrf.mxu0  ;;  %7640 = vmatmul.mubr.f32.gmra.mxu0 %v4366_v33  ;;  %7514 = vmatprep.mubr.f32.mxu1 %v3837_v25  ;;  %v10163_v17 = vld [vmem:[#allocation11_spill] sm:$0xff]  ;;  %v4369_v7 = vld [vmem:[%s7843_s27 + $0xf6] sm:$0xff] }
 0x21b   : > { %v2110_v42 = vpop.f32.mrf.mxu1  ;;  %7642 = vmatprep.mubr.f32.mxu0 %v4367_v2  ;;  %v10165_v33 = vld [vmem:[#allocation12_spill] sm:$0xff]  ;;  %v3840_v2 = vld [vmem:[%s7843_s27 + $0xfd] sm:$0xff] }
 0x21c   : > { %10160 = vst [vmem:[#allocation27_spill] sm:$0xff] %v9425_v41  ;;  %v9431_v44 = vadd.f32 %v7177_v49, %v2214_v54  ;;  %v2213_v28 = vadd.f32 %v2110_v42, %v10163_v17  ;;  %v2640_v53 = vpop.f32.mrf.mxu0  ;;  %v4370_v54 = vld [vmem:[%s7843_s27 + $0xfe] sm:$0xff] }
 0x21d   : > { %v7052_v37 = vpop.f32.mrf.mxu1  ;;  %7515 = vmatmul.mubr.f32.gmra.mxu1 %v3838_v9  ;;  %v3841_v49 = vld [vmem:[%s7843_s27 + $0x105] sm:$0xff]  ;;  %v10167_v17 = vld [vmem:[#allocation13_spill] sm:$0xff] }
 0x21e   : > { %10162 = vst [vmem:[#allocation28_spill] sm:$0xff] %v9431_v44  ;;  %v9435_v51 = vadd.f32 %v2640_v53, %v2213_v28  ;;  %v2216_v25 = vadd.f32 %v7052_v37, %v10165_v33  ;;  %v7180_v58 = vpop.f32.mrf.mxu0  ;;  %7643 = vmatmul.mubr.f32.gmra.mxu0 %v4368_v52  ;;  %7517 = vmatprep.mubr.f32.mxu1 %v3839_v50  ;;  %v4371_v28 = vld [vmem:[%s7843_s27 + $0x106] sm:$0xff] }
 0x21f   : > { %v2120_v41 = vpop.f32.mrf.mxu1  ;;  %7645 = vmatprep.mubr.f32.mxu0 %v4369_v7  ;;  %v10169_v52 = vld [vmem:[#allocation14_spill] sm:$0xff]  ;;  %v3842_v7 = vld [vmem:[%s7843_s27 + $0x10d] sm:$0xff] }
 0x220   : > { %10164 = vst [vmem:[#allocation29_spill] sm:$0xff] %v9435_v51  ;;  %v9441_v42 = vadd.f32 %v7180_v58, %v2216_v25  ;;  %v2215_v44 = vadd.f32 %v2120_v41, %v10167_v17  ;;  %v2650_v9 = vpop.f32.mrf.mxu0  ;;  %v4372_v25 = vld [vmem:[%s7843_s27 + $0x10e] sm:$0xff] }
 0x221   : > { %v7055_v53 = vpop.f32.mrf.mxu1  ;;  %7518 = vmatmul.mubr.f32.gmra.mxu1 %v3840_v2  ;;  %v3843_v58 = vld [vmem:[%s7843_s27 + $0x115] sm:$0xff]  ;;  %v10170_v17 = vld [vmem:[#allocation15_spill] sm:$0xff] }
 0x222   : > { %10166 = vst [vmem:[#allocation30_spill] sm:$0xff] %v9441_v42  ;;  %v9445_v37 = vadd.f32 %v2650_v9, %v2215_v44  ;;  %v2218_v50 = vadd.f32 %v7055_v53, %v10169_v52  ;;  %v7183_v33 = vpop.f32.mrf.mxu0  ;;  %7646 = vmatmul.mubr.f32.gmra.mxu0 %v4370_v54  ;;  %7520 = vmatprep.mubr.f32.mxu1 %v3841_v49  ;;  %v4373_v44 = vld [vmem:[%s7843_s27 + $0x116] sm:$0xff] }
 0x223   : > { %v2130_v51 = vpop.f32.mrf.mxu1  ;;  %7648 = vmatprep.mubr.f32.mxu0 %v4371_v28  ;;  %v10171_v54 = vld [vmem:[#allocation16_spill] sm:$0xff]  ;;  %v3844_v28 = vld [vmem:[%s7843_s27 + $0x11d] sm:$0xff] }
 0x224   : > { %10168 = vst [vmem:[#allocation31_spill] sm:$0xff] %v9445_v37  ;;  %v9451_v41 = vadd.f32 %v7183_v33, %v2218_v50  ;;  %v2217_v42 = vadd.f32 %v2130_v51, %v10170_v17  ;;  %v2660_v2 = vpop.f32.mrf.mxu0  ;;  %v4374_v50 = vld [vmem:[%s7843_s27 + $0x11e] sm:$0xff] }
 0x225   : > { %v7058_v9 = vpop.f32.mrf.mxu1  ;;  %7521 = vmatmul.mubr.f32.gmra.mxu1 %v3842_v7  ;;  %v3845_v33 = vld [vmem:[%s7843_s27 + $0x125] sm:$0xff] }
 0x226   : > { %v9455_v53 = vadd.f32 %v2660_v2, %v2217_v42  ;;  %v2220_v49 = vadd.f32 %v7058_v9, %v10171_v54  ;;  %v7186_v52 = vpop.f32.mrf.mxu0  ;;  %7649 = vmatmul.mubr.f32.gmra.mxu0 %v4372_v25  ;;  %7523 = vmatprep.mubr.f32.mxu1 %v3843_v58  ;;  %v4375_v42 = vld [vmem:[%s7843_s27 + $0x126] sm:$0xff] }
 0x227   : > { %v2140_v37 = vpop.f32.mrf.mxu1  ;;  %7651 = vmatprep.mubr.f32.mxu0 %v4373_v44  ;;  %v3846_v44 = vld [vmem:[%s7843_s27 + $0x12d] sm:$0xff] }
 0x228   : > { %v9461_v51 = vadd.f32 %v7186_v52, %v2220_v49  ;;  %v2219_v17 = vadd.f32 %v2140_v37, %v9138_v39  ;;  %v2670_v7 = vpop.f32.mrf.mxu0  ;;  %v4376_v49 = vld [vmem:[%s7843_s27 + $0x12e] sm:$0xff] }
 0x229   : > { %v7061_v2 = vpop.f32.mrf.mxu1  ;;  %7524 = vmatmul.mubr.f32.gmra.mxu1 %v3844_v28  ;;  %v3847_v52 = vld [vmem:[%s7843_s27 + $0x135] sm:$0xff] }
 0x22a   : > { %v9465_v9 = vadd.f32 %v2670_v7, %v2219_v17  ;;  %v2222_v25 = vadd.f32 %v7061_v2, %v9143_v14  ;;  %v7189_v58 = vpop.f32.mrf.mxu0  ;;  %7652 = vmatmul.mubr.f32.gmra.mxu0 %v4374_v50  ;;  %7526 = vmatprep.mubr.f32.mxu1 %v3845_v33  ;;  %v4377_v17 = vld [vmem:[%s7843_s27 + $0x136] sm:$0xff] }
 0x22b   : > { %v2150_v54 = vpop.f32.mrf.mxu1  ;;  %7654 = vmatprep.mubr.f32.mxu0 %v4375_v42  ;;  %v3848_v42 = vld [vmem:[%s7843_s27 + $0x13d] sm:$0xff] }
 0x22c   : > { %v9471_v39 = vadd.f32 %v7189_v58, %v2222_v25  ;;  %v2221_v37 = vadd.f32 %v2150_v54, %v9148_v35  ;;  %v2680_v28 = vpop.f32.mrf.mxu0  ;;  %v4378_v25 = vld [vmem:[%s7843_s27 + $0x13e] sm:$0xff] }
 0x22d   : > { %v7224_v7 = vpop.f32.mrf.mxu1  ;;  %7527 = vmatmul.mubr.f32.gmra.mxu1 %v3846_v44  ;;  %v3849_v58 = vld [vmem:[%s7843_s27 + $0x145] sm:$0xff] }
 0x22e   : > { %v9475_v14 = vadd.f32 %v2680_v28, %v2221_v37  ;;  %v3220_v50 = vadd.f32 %v7224_v7, %v9153_v18  ;;  %v7352_v33 = vpop.f32.mrf.mxu0  ;;  %7655 = vmatmul.mubr.f32.gmra.mxu0 %v4376_v49  ;;  %7529 = vmatprep.mubr.f32.mxu1 %v3847_v52  ;;  %v4379_v37 = vld [vmem:[%s7843_s27 + $0x146] sm:$0xff] }
 0x22f   : > { %v2900_v2 = vpop.f32.mrf.mxu1  ;;  %7657 = vmatprep.mubr.f32.mxu0 %v4377_v17  ;;  %v3850_v17 = vld [vmem:[%s7843_s27 + $0x14d] sm:$0xff] }
 0x230   : > { %v9481_v35 = vadd.f32 %v7352_v33, %v3220_v50  ;;  %v3219_v54 = vadd.f32 %v2900_v2, %v9158_v22  ;;  %v3430_v44 = vpop.f32.mrf.mxu0  ;;  %v4380_v50 = vld [vmem:[%s7843_s27 + $0x14e] sm:$0xff] }
 0x231   : > { %v7227_v28 = vpop.f32.mrf.mxu1  ;;  %7530 = vmatmul.mubr.f32.gmra.mxu1 %v3848_v42  ;;  %v3851_v33 = vld [vmem:[%s7843_s27 + $0x155] sm:$0xff] }
 0x232   : > { %v9485_v18 = vadd.f32 %v3430_v44, %v3219_v54  ;;  %v3222_v49 = vadd.f32 %v7227_v28, %v9163_v55  ;;  %v7355_v52 = vpop.f32.mrf.mxu0  ;;  %7658 = vmatmul.mubr.f32.gmra.mxu0 %v4378_v25  ;;  %7532 = vmatprep.mubr.f32.mxu1 %v3849_v58  ;;  %v4381_v54 = vld [vmem:[%s7843_s27 + $0x156] sm:$0xff] }
 0x233   : > { %v2910_v7 = vpop.f32.mrf.mxu1  ;;  %7660 = vmatprep.mubr.f32.mxu0 %v4379_v37  ;;  %v3852_v37 = vld [vmem:[%s7843_s27 + $0x15d] sm:$0xff] }
 0x234   : > { %v9491_v22 = vadd.f32 %v7355_v52, %v3222_v49  ;;  %v3221_v2 = vadd.f32 %v2910_v7, %v9168_v56  ;;  %v3440_v42 = vpop.f32.mrf.mxu0  ;;  %v4382_v49 = vld [vmem:[%s7843_s27 + $0x15e] sm:$0xff] }
 0x235   : > { %v7230_v44 = vpop.f32.mrf.mxu1  ;;  %7533 = vmatmul.mubr.f32.gmra.mxu1 %v3850_v17  ;;  %v3853_v52 = vld [vmem:[%s7843_s27 + $0x165] sm:$0xff] }
 0x236   : > { %v9495_v55 = vadd.f32 %v3440_v42, %v3221_v2  ;;  %v3224_v25 = vadd.f32 %v7230_v44, %v9173_v24  ;;  %v7358_v58 = vpop.f32.mrf.mxu0  ;;  %7661 = vmatmul.mubr.f32.gmra.mxu0 %v4380_v50  ;;  %7535 = vmatprep.mubr.f32.mxu1 %v3851_v33  ;;  %v4383_v2 = vld [vmem:[%s7843_s27 + $0x166] sm:$0xff] }
 0x237   : > { %v2920_v28 = vpop.f32.mrf.mxu1  ;;  %7663 = vmatprep.mubr.f32.mxu0 %v4381_v54  ;;  %v3854_v54 = vld [vmem:[%s7843_s27 + $0x16d] sm:$0xff] }
 0x238   : > { %v9501_v56 = vadd.f32 %v7358_v58, %v3224_v25  ;;  %v3223_v7 = vadd.f32 %v2920_v28, %v9178_v29  ;;  %v3450_v17 = vpop.f32.mrf.mxu0  ;;  %v4384_v25 = vld [vmem:[%s7843_s27 + $0x16e] sm:$0xff] }
 0x239   : > { %v7233_v42 = vpop.f32.mrf.mxu1  ;;  %7536 = vmatmul.mubr.f32.gmra.mxu1 %v3852_v37  ;;  %v3855_v58 = vld [vmem:[%s7843_s27 + $0x175] sm:$0xff] }
 0x23a   : > { %v9505_v24 = vadd.f32 %v3450_v17, %v3223_v7  ;;  %v3226_v50 = vadd.f32 %v7233_v42, %v9183_v8  ;;  %v7361_v33 = vpop.f32.mrf.mxu0  ;;  %7664 = vmatmul.mubr.f32.gmra.mxu0 %v4382_v49  ;;  %7538 = vmatprep.mubr.f32.mxu1 %v3853_v52  ;;  %v4385_v7 = vld [vmem:[%s7843_s27 + $0x176] sm:$0xff] }
 0x23b   : > { %v2930_v44 = vpop.f32.mrf.mxu1  ;;  %7666 = vmatprep.mubr.f32.mxu0 %v4383_v2  ;;  %v3856_v2 = vld [vmem:[%s7843_s27 + $0x17d] sm:$0xff] }
 0x23c   : > { %v9511_v29 = vadd.f32 %v7361_v33, %v3226_v50  ;;  %v3225_v28 = vadd.f32 %v2930_v44, %v9188_v32  ;;  %v3460_v37 = vpop.f32.mrf.mxu0  ;;  %v4386_v50 = vld [vmem:[%s7843_s27 + $0x17e] sm:$0xff] }
 0x23d   : > { %v7236_v17 = vpop.f32.mrf.mxu1  ;;  %7539 = vmatmul.mubr.f32.gmra.mxu1 %v3854_v54  ;;  %v3857_v33 = vld [vmem:[%s7843_s27 + $0x185] sm:$0xff] }
 0x23e   : > { %v9515_v8 = vadd.f32 %v3460_v37, %v3225_v28  ;;  %v3228_v49 = vadd.f32 %v7236_v17, %v9193_v48  ;;  %v7364_v52 = vpop.f32.mrf.mxu0  ;;  %7667 = vmatmul.mubr.f32.gmra.mxu0 %v4384_v25  ;;  %7541 = vmatprep.mubr.f32.mxu1 %v3855_v58  ;;  %v4387_v28 = vld [vmem:[%s7843_s27 + $0x186] sm:$0xff] }
 0x23f   : > { %v2940_v42 = vpop.f32.mrf.mxu1  ;;  %7669 = vmatprep.mubr.f32.mxu0 %v4385_v7  ;;  %v3858_v7 = vld [vmem:[%s7843_s27 + $0x18d] sm:$0xff] }
 0x240   : > { %v9521_v32 = vadd.f32 %v7364_v52, %v3228_v49  ;;  %v3227_v44 = vadd.f32 %v2940_v42, %v9198_v31  ;;  %v3470_v54 = vpop.f32.mrf.mxu0  ;;  %v4388_v49 = vld [vmem:[%s7843_s27 + $0x18e] sm:$0xff] }
 0x241   : > { %v7239_v37 = vpop.f32.mrf.mxu1  ;;  %7542 = vmatmul.mubr.f32.gmra.mxu1 %v3856_v2  ;;  %v3859_v52 = vld [vmem:[%s7843_s27 + $0x195] sm:$0xff] }
 0x242   : > { %v9525_v48 = vadd.f32 %v3470_v54, %v3227_v44  ;;  %v3230_v25 = vadd.f32 %v7239_v37, %v9203_v63  ;;  %v7367_v58 = vpop.f32.mrf.mxu0  ;;  %7670 = vmatmul.mubr.f32.gmra.mxu0 %v4386_v50  ;;  %7544 = vmatprep.mubr.f32.mxu1 %v3857_v33  ;;  %v4389_v44 = vld [vmem:[%s7843_s27 + $0x196] sm:$0xff] }
 0x243   : > { %v2950_v17 = vpop.f32.mrf.mxu1  ;;  %7672 = vmatprep.mubr.f32.mxu0 %v4387_v28  ;;  %v3860_v28 = vld [vmem:[%s7843_s27 + $0x19d] sm:$0xff] }
 0x244   : > { %v9531_v31 = vadd.f32 %v7367_v58, %v3230_v25  ;;  %v3229_v42 = vadd.f32 %v2950_v17, %v9208_v21  ;;  %v3480_v2 = vpop.f32.mrf.mxu0  ;;  %v4390_v25 = vld [vmem:[%s7843_s27 + $0x19e] sm:$0xff] }
 0x245   : > { %v7242_v54 = vpop.f32.mrf.mxu1  ;;  %7545 = vmatmul.mubr.f32.gmra.mxu1 %v3858_v7  ;;  %v3861_v58 = vld [vmem:[%s7843_s27 + $0x1a5] sm:$0xff] }
 0x246   : > { %v9535_v63 = vadd.f32 %v3480_v2, %v3229_v42  ;;  %v3232_v50 = vadd.f32 %v7242_v54, %v9213_v4  ;;  %v7370_v33 = vpop.f32.mrf.mxu0  ;;  %7673 = vmatmul.mubr.f32.gmra.mxu0 %v4388_v49  ;;  %7547 = vmatprep.mubr.f32.mxu1 %v3859_v52  ;;  %v4391_v42 = vld [vmem:[%s7843_s27 + $0x1a6] sm:$0xff] }
 0x247   : > { %v2960_v37 = vpop.f32.mrf.mxu1  ;;  %7675 = vmatprep.mubr.f32.mxu0 %v4389_v44  ;;  %v3862_v44 = vld [vmem:[%s7843_s27 + $0x1ad] sm:$0xff] }
 0x248   : > { %v9541_v21 = vadd.f32 %v7370_v33, %v3232_v50  ;;  %v3231_v17 = vadd.f32 %v2960_v37, %v9218_v26  ;;  %v3490_v7 = vpop.f32.mrf.mxu0  ;;  %v4392_v50 = vld [vmem:[%s7843_s27 + $0x1ae] sm:$0xff] }
 0x249   : > { %v7245_v2 = vpop.f32.mrf.mxu1  ;;  %7548 = vmatmul.mubr.f32.gmra.mxu1 %v3860_v28  ;;  %v3863_v33 = vld [vmem:[%s7843_s27 + $0x1b5] sm:$0xff] }
 0x24a   : > { %v9545_v4 = vadd.f32 %v3490_v7, %v3231_v17  ;;  %v3234_v49 = vadd.f32 %v7245_v2, %v9223_v60  ;;  %v7373_v52 = vpop.f32.mrf.mxu0  ;;  %7676 = vmatmul.mubr.f32.gmra.mxu0 %v4390_v25  ;;  %7550 = vmatprep.mubr.f32.mxu1 %v3861_v58  ;;  %v4393_v17 = vld [vmem:[%s7843_s27 + $0x1b6] sm:$0xff] }
 0x24b   : > { %v2970_v54 = vpop.f32.mrf.mxu1  ;;  %7678 = vmatprep.mubr.f32.mxu0 %v4391_v42  ;;  %v3864_v42 = vld [vmem:[%s7843_s27 + $0x1bd] sm:$0xff] }
 0x24c   : > { %v9551_v26 = vadd.f32 %v7373_v52, %v3234_v49  ;;  %v3233_v37 = vadd.f32 %v2970_v54, %v9228_v38  ;;  %v3500_v28 = vpop.f32.mrf.mxu0  ;;  %v4394_v49 = vld [vmem:[%s7843_s27 + $0x1be] sm:$0xff] }
 0x24d   : > { %v7248_v7 = vpop.f32.mrf.mxu1  ;;  %7551 = vmatmul.mubr.f32.gmra.mxu1 %v3862_v44  ;;  %v3865_v52 = vld [vmem:[%s7843_s27 + $0x1c5] sm:$0xff] }
 0x24e   : > { %v9555_v60 = vadd.f32 %v3500_v28, %v3233_v37  ;;  %v3236_v25 = vadd.f32 %v7248_v7, %v9233_v61  ;;  %v7376_v58 = vpop.f32.mrf.mxu0  ;;  %7679 = vmatmul.mubr.f32.gmra.mxu0 %v4392_v50  ;;  %7553 = vmatprep.mubr.f32.mxu1 %v3863_v33  ;;  %v4395_v37 = vld [vmem:[%s7843_s27 + $0x1c6] sm:$0xff] }
 0x24f   : > { %v2980_v2 = vpop.f32.mrf.mxu1  ;;  %7681 = vmatprep.mubr.f32.mxu0 %v4393_v17  ;;  %v3866_v17 = vld [vmem:[%s7843_s27 + $0x1cd] sm:$0xff] }
 0x250   : > { %v9561_v38 = vadd.f32 %v7376_v58, %v3236_v25  ;;  %v3235_v54 = vadd.f32 %v2980_v2, %v9238_v3  ;;  %v3510_v44 = vpop.f32.mrf.mxu0  ;;  %v4396_v25 = vld [vmem:[%s7843_s27 + $0x1ce] sm:$0xff] }
 0x251   : > { %v7251_v28 = vpop.f32.mrf.mxu1  ;;  %7554 = vmatmul.mubr.f32.gmra.mxu1 %v3864_v42  ;;  %v3867_v58 = vld [vmem:[%s7843_s27 + $0x1d5] sm:$0xff] }
 0x252   : > { %v9565_v61 = vadd.f32 %v3510_v44, %v3235_v54  ;;  %v3238_v50 = vadd.f32 %v7251_v28, %v9243_v5  ;;  %v7379_v33 = vpop.f32.mrf.mxu0  ;;  %7682 = vmatmul.mubr.f32.gmra.mxu0 %v4394_v49  ;;  %7556 = vmatprep.mubr.f32.mxu1 %v3865_v52  ;;  %v4397_v54 = vld [vmem:[%s7843_s27 + $0x1d6] sm:$0xff] }
 0x253   : > { %v2990_v7 = vpop.f32.mrf.mxu1  ;;  %7684 = vmatprep.mubr.f32.mxu0 %v4395_v37  ;;  %v3868_v37 = vld [vmem:[%s7843_s27 + $0x1dd] sm:$0xff] }
 0x254   : > { %v9571_v3 = vadd.f32 %v7379_v33, %v3238_v50  ;;  %v3237_v2 = vadd.f32 %v2990_v7, %v9248_v20  ;;  %v3520_v42 = vpop.f32.mrf.mxu0  ;;  %v4398_v50 = vld [vmem:[%s7843_s27 + $0x1de] sm:$0xff] }
 0x255   : > { %v7254_v44 = vpop.f32.mrf.mxu1  ;;  %7557 = vmatmul.mubr.f32.gmra.mxu1 %v3866_v17  ;;  %v3869_v33 = vld [vmem:[%s7843_s27 + $0x1e5] sm:$0xff] }
 0x256   : > { %v9575_v5 = vadd.f32 %v3520_v42, %v3237_v2  ;;  %v3240_v49 = vadd.f32 %v7254_v44, %v9253_v15  ;;  %v7382_v52 = vpop.f32.mrf.mxu0  ;;  %7685 = vmatmul.mubr.f32.gmra.mxu0 %v4396_v25  ;;  %7559 = vmatprep.mubr.f32.mxu1 %v3867_v58  ;;  %v4399_v2 = vld [vmem:[%s7843_s27 + $0x1e6] sm:$0xff] }
 0x257   : > { %v3000_v28 = vpop.f32.mrf.mxu1  ;;  %7687 = vmatprep.mubr.f32.mxu0 %v4397_v54  ;;  %v3870_v54 = vld [vmem:[%s7843_s27 + $0x1ed] sm:$0xff] }
 0x258   : > { %v9581_v20 = vadd.f32 %v7382_v52, %v3240_v49  ;;  %v3239_v7 = vadd.f32 %v3000_v28, %v9258_v46  ;;  %v3530_v17 = vpop.f32.mrf.mxu0  ;;  %v4400_v49 = vld [vmem:[%s7843_s27 + $0x1ee] sm:$0xff] }
 0x259   : > { %v7257_v42 = vpop.f32.mrf.mxu1  ;;  %7560 = vmatmul.mubr.f32.gmra.mxu1 %v3868_v37  ;;  %v3871_v52 = vld [vmem:[%s7843_s27 + $0x1f5] sm:$0xff] }
 0x25a   : > { %v9585_v15 = vadd.f32 %v3530_v17, %v3239_v7  ;;  %v3242_v25 = vadd.f32 %v7257_v42, %v9263_v23  ;;  %v7385_v58 = vpop.f32.mrf.mxu0  ;;  %7688 = vmatmul.mubr.f32.gmra.mxu0 %v4398_v50  ;;  %7562 = vmatprep.mubr.f32.mxu1 %v3869_v33  ;;  %v4401_v7 = vld [vmem:[%s7843_s27 + $0x1f6] sm:$0xff] }
 0x25b   : > { %v3010_v44 = vpop.f32.mrf.mxu1  ;;  %7690 = vmatprep.mubr.f32.mxu0 %v4399_v2  ;;  %v3872_v2 = vld [vmem:[%s7843_s27 + $0x1fd] sm:$0xff] }
 0x25c   : > { %v9591_v46 = vadd.f32 %v7385_v58, %v3242_v25  ;;  %v3241_v28 = vadd.f32 %v3010_v44, %v9268_v40  ;;  %v3540_v37 = vpop.f32.mrf.mxu0  ;;  %v4402_v25 = vld [vmem:[%s7843_s27 + $0x1fe] sm:$0xff] }
 0x25d   : > { %v7260_v17 = vpop.f32.mrf.mxu1  ;;  %7563 = vmatmul.mubr.f32.gmra.mxu1 %v3870_v54  ;;  %v3873_v58 = vld [vmem:[%s7843_s27 + $0x205] sm:$0xff] }
 0x25e   : > { %v9595_v23 = vadd.f32 %v3540_v37, %v3241_v28  ;;  %v3244_v50 = vadd.f32 %v7260_v17, %v9273_v34  ;;  %v7388_v33 = vpop.f32.mrf.mxu0  ;;  %7691 = vmatmul.mubr.f32.gmra.mxu0 %v4400_v49  ;;  %7565 = vmatprep.mubr.f32.mxu1 %v3871_v52  ;;  %v4403_v28 = vld [vmem:[%s7843_s27 + $0x206] sm:$0xff] }
 0x25f   : > { %v3020_v42 = vpop.f32.mrf.mxu1  ;;  %7693 = vmatprep.mubr.f32.mxu0 %v4401_v7  ;;  %v3874_v7 = vld [vmem:[%s7843_s27 + $0x20d] sm:$0xff] }
 0x260   : > { %v9601_v40 = vadd.f32 %v7388_v33, %v3244_v50  ;;  %v3243_v44 = vadd.f32 %v3020_v42, %v9278_v12  ;;  %v3550_v54 = vpop.f32.mrf.mxu0  ;;  %v4404_v50 = vld [vmem:[%s7843_s27 + $0x20e] sm:$0xff] }
 0x261   : > { %v7263_v37 = vpop.f32.mrf.mxu1  ;;  %7566 = vmatmul.mubr.f32.gmra.mxu1 %v3872_v2  ;;  %v3875_v33 = vld [vmem:[%s7843_s27 + $0x215] sm:$0xff] }
 0x262   : > { %10172 = vst [vmem:[#allocation32_spill] sm:$0xff] %v9601_v40  ;;  %v9605_v34 = vadd.f32 %v3550_v54, %v3243_v44  ;;  %v3246_v49 = vadd.f32 %v7263_v37, %v9283_v47  ;;  %v7391_v52 = vpop.f32.mrf.mxu0  ;;  %7694 = vmatmul.mubr.f32.gmra.mxu0 %v4402_v25  ;;  %7568 = vmatprep.mubr.f32.mxu1 %v3873_v58  ;;  %v4405_v2 = vld [vmem:[%s7843_s27 + $0x216] sm:$0xff]  ;;  %v4406_v37 = vld [vmem:[%s7843_s27 + $0x21e] sm:$0xff] }
 0x263   : > { %v3030_v17 = vpop.f32.mrf.mxu1  ;;  %7696 = vmatprep.mubr.f32.mxu0 %v4403_v28  ;;  %v3876_v58 = vld [vmem:[%s7843_s27 + $0x21d] sm:$0xff] }
 0x264   : > { %10173 = vst [vmem:[#allocation33_spill] sm:$0xff] %v9605_v34  ;;  %v9611_v12 = vadd.f32 %v7391_v52, %v3246_v49  ;;  %v3245_v42 = vadd.f32 %v3030_v17, %v9288_v59  ;;  %v3560_v40 = vpop.f32.mrf.mxu0 }
 0x265   : > { %v7266_v44 = vpop.f32.mrf.mxu1  ;;  %7569 = vmatmul.mubr.f32.gmra.mxu1 %v3874_v7 }
 0x266   : > { %v9615_v54 = vadd.f32 %v3560_v40, %v3245_v42  ;;  %v3248_v47 = vadd.f32 %v7266_v44, %v9294_v43  ;;  %v7394_v25 = vpop.f32.mrf.mxu0  ;;  %7697 = vmatmul.mubr.f32.gmra.mxu0 %v4404_v50  ;;  %7571 = vmatprep.mubr.f32.mxu1 %v3875_v33 }
 0x267   : > { %v3040_v28 = vpop.f32.mrf.mxu1  ;;  %7699 = vmatprep.mubr.f32.mxu0 %v4405_v2 }
 0x268   : > { %10174 = vst [vmem:[#allocation34_spill] sm:$0xff] %v9615_v54  ;;  %v9620_v34 = vadd.f32 %v7394_v25, %v3248_v47  ;;  %v3247_v49 = vadd.f32 %v3040_v28, %v9299_v13  ;;  %v3570_v59 = vpop.f32.mrf.mxu0 }
 0x269   : > { %v7269_v52 = vpop.f32.mrf.mxu1  ;;  %7572 = vmatmul.mubr.f32.gmra.mxu1 %v3876_v58 }
 0x26a   : > { %10175 = vst [vmem:[#allocation35_spill] sm:$0xff] %v9620_v34  ;;  %v9623_v17 = vadd.f32 %v3570_v59, %v3247_v49  ;;  %v3250_v40 = vadd.f32 %v7269_v52, %v9306_v30  ;;  %v7397_v7 = vpop.f32.mrf.mxu0  ;;  %7700 = vmatmul.mubr.f32.gmra.mxu0 %v4406_v37 }
 0x26b   : > { %v3050_v43 = vpop.f32.mrf.mxu1 }
 0x26c   : > { %10176 = vst [vmem:[#allocation36_spill] sm:$0xff] %v9623_v17  ;;  %v9626_v50 = vadd.f32 %v7397_v7, %v3250_v40  ;;  %v3249_v33 = vadd.f32 %v3050_v43, %v9311_v62  ;;  %v3580_v42 = vpop.f32.mrf.mxu0 }
 0x26d   : > { %v7272_v2 = vpop.f32.mrf.mxu1 }
 0x26e   : > { %10177 = vst [vmem:[#allocation37_spill] sm:$0xff] %v9626_v50  ;;  %v9629_v44 = vadd.f32 %v3580_v42, %v3249_v33  ;;  %v3252_v13 = vadd.f32 %v7272_v2, %v9318_v0  ;;  %v7400_v47 = vpop.f32.mrf.mxu0  ;;  %v9641_v0 = vpop.permute.xlu0 %5003 }
 0x26f   : > { %v3060_v25 = vpop.f32.mrf.mxu1  ;;  %v9643_v42 = vpop.permute.xlu1 %5013 }
 0x270   : > { %10178 = vst [vmem:[#allocation38_spill] sm:$0xff] %v9629_v44  ;;  %v9632_v58 = vadd.f32 %v7400_v47, %v3252_v13  ;;  %v3251_v28 = vadd.f32 %v3060_v25, %v9323_v45  ;;  %v3590_v30 = vpop.f32.mrf.mxu0 }
 0x271   : > { %v7275_v49 = vpop.f32.mrf.mxu1 }
 0x272   : > { %10179 = vst [vmem:[#allocation39_spill] sm:$0xff] %v9632_v58  ;;  %v9635_v37 = vadd.f32 %v3590_v30, %v3251_v28  ;;  %v3254_v59 = vadd.f32 %v7275_v49, %v9330_v19  ;;  %v7403_v52 = vpop.f32.mrf.mxu0 }
 0x273   : > { %v3070_v62 = vpop.f32.mrf.mxu1 }
 0x274   : > { %10180 = vst [vmem:[#allocation40_spill] sm:$0xff] %v9635_v37  ;;  %v9638_v40 = vadd.f32 %v7403_v52, %v3254_v59  ;;  %v3253_v7 = vadd.f32 %v3070_v62, %v9335_v57  ;;  %v3600_v43 = vpop.f32.mrf.mxu0  ;;  %v9654_v52 = vpop.permute.xlu0 %5008 }
 0x275   : > { %v7278_v33 = vpop.f32.mrf.mxu1 }
 0x276   : > { %10181 = vst [vmem:[#allocation42_spill] sm:$0xff] %v9638_v40  ;;  %v9645_v2 = vadd.f32 %v3600_v43, %v3253_v7  ;;  %v3256_v45 = vadd.f32 %v7278_v33, %v9341_v16  ;;  %v7406_v13 = vpop.f32.mrf.mxu0  ;;  %v9656_v7 = vpop.permute.xlu1 %5018 }
 0x277   : > { %v3080_v47 = vpop.f32.mrf.mxu1 }
 0x278   : > { %10182 = vst [vmem:[#allocation2_spill] sm:$0xff] %v9645_v2  ;;  %v9648_v25 = vadd.f32 %v7406_v13, %v3256_v45  ;;  %v3255_v19 = vadd.f32 %v3080_v47, %v9345_v27  ;;  %v3610_v28 = vpop.f32.mrf.mxu0 }
 0x279   : > { %v7281_v30 = vpop.f32.mrf.mxu1 }
 0x27a   : > { %10183 = vst [vmem:[#allocation3_spill] sm:$0xff] %v9648_v25  ;;  %v9651_v49 = vadd.f32 %v3610_v28, %v3255_v19  ;;  %v3258_v57 = vadd.f32 %v7281_v30, %v9351_v6  ;;  %v7409_v59 = vpop.f32.mrf.mxu0 }
 0x27b   : > { %v3090_v62 = vpop.f32.mrf.mxu1 }
 0x27c   : > { %10184 = vst [vmem:[#allocation4_spill] sm:$0xff] %v9651_v49  ;;  %v9658_v43 = vadd.f32 %v7409_v59, %v3258_v57  ;;  %v3257_v16 = vadd.f32 %v3090_v62, %v9355_v10  ;;  %v3620_v33 = vpop.f32.mrf.mxu0  ;;  %v9667_v49 = vpop.permute.xlu0 %5023 }
 0x27d   : > { %v7284_v45 = vpop.f32.mrf.mxu1  ;;  %v9669_v57 = vpop.permute.xlu1 %5028 }
 0x27e   : > { %10185 = vst [vmem:[#allocation5_spill] sm:$0xff] %v9658_v43  ;;  %v9661_v13 = vadd.f32 %v3620_v33, %v3257_v16  ;;  %v3260_v27 = vadd.f32 %v7284_v45, %v9361_v1  ;;  %v7412_v47 = vpop.f32.mrf.mxu0  ;;  %v10190_v1 = vld [vmem:[#allocation17_spill] sm:$0xff] }
 0x27f   : > { %v3100_v19 = vpop.f32.mrf.mxu1 }
 0x280   : > { %10186 = vst [vmem:[#allocation6_spill] sm:$0xff] %v9661_v13  ;;  %v9664_v28 = vadd.f32 %v7412_v47, %v3260_v27  ;;  %v3259_v6 = vadd.f32 %v3100_v19, %v9365_v36  ;;  %v3630_v30 = vpop.f32.mrf.mxu0  ;;  %v10192_v36 = vld [vmem:[#allocation18_spill] sm:$0xff]  ;;  %v9680_v43 = vpop.permute.xlu0 %5033 }
 0x281   : > { %v7287_v25 = vpop.f32.mrf.mxu1 }
 0x282   : > { %10187 = vst [vmem:[#allocation7_spill] sm:$0xff] %v9664_v28  ;;  %v9671_v59 = vadd.f32 %v3630_v30, %v3259_v6  ;;  %v3262_v10 = vadd.f32 %v7287_v25, %v9371_v11  ;;  %v7415_v62 = vpop.f32.mrf.mxu0  ;;  %v9682_v6 = vpop.permute.xlu1 %5038  ;;  %v10194_v11 = vld [vmem:[#allocation19_spill] sm:$0xff] }
 0x283   : > { %v3110_v16 = vpop.f32.mrf.mxu1 }
 0x284   : > { %10188 = vst [vmem:[#allocation8_spill] sm:$0xff] %v9671_v59  ;;  %v9674_v33 = vadd.f32 %v7415_v62, %v3262_v10  ;;  %v3261_v45 = vadd.f32 %v3110_v16, %v10190_v1  ;;  %v3640_v27 = vpop.f32.mrf.mxu0  ;;  %v10196_v16 = vld [vmem:[#allocation20_spill] sm:$0xff]  ;;  %v9693_v40 = vpop.permute.xlu0 %5043 }
 0x285   : > { %v7290_v47 = vpop.f32.mrf.mxu1 }
 0x286   : > { %10189 = vst [vmem:[#allocation9_spill] sm:$0xff] %v9674_v33  ;;  %v9677_v28 = vadd.f32 %v3640_v27, %v3261_v45  ;;  %v3264_v19 = vadd.f32 %v7290_v47, %v10192_v36  ;;  %v7418_v13 = vpop.f32.mrf.mxu0  ;;  %v10198_v47 = vld [vmem:[#allocation21_spill] sm:$0xff] }
 0x287   : > { %v3120_v2 = vpop.f32.mrf.mxu1 }
 0x288   : > { %10191 = vst [vmem:[#allocation43_spill] sm:$0xff] %v9677_v28  ;;  %v9684_v30 = vadd.f32 %v7418_v13, %v3264_v19  ;;  %v3263_v25 = vadd.f32 %v3120_v2, %v10194_v11  ;;  %v3650_v10 = vpop.f32.mrf.mxu0  ;;  %v9695_v13 = vpop.permute.xlu1 %5048  ;;  %v10200_v2 = vld [vmem:[#allocation22_spill] sm:$0xff] }
 0x289   : > { %v7293_v62 = vpop.f32.mrf.mxu1  ;;  %v9706_v58 = vpop.permute.xlu0 %5053 }
 0x28a   : > { %10193 = vst [vmem:[#allocation10_spill] sm:$0xff] %v9684_v30  ;;  %v9687_v33 = vadd.f32 %v3650_v10, %v3263_v25  ;;  %v3266_v1 = vadd.f32 %v7293_v62, %v10196_v16  ;;  %v7421_v45 = vpop.f32.mrf.mxu0  ;;  %v10202_v62 = vld [vmem:[#allocation23_spill] sm:$0xff] }
 0x28b   : > { %v3130_v27 = vpop.f32.mrf.mxu1 }
 0x28c   : > { %10195 = vst [vmem:[#allocation41_spill] sm:$0xff] %v9687_v33  ;;  %v9690_v28 = vadd.f32 %v7421_v45, %v3266_v1  ;;  %v3265_v36 = vadd.f32 %v3130_v27, %v10198_v47  ;;  %v3660_v59 = vpop.f32.mrf.mxu0  ;;  %v10204_v27 = vld [vmem:[#allocation24_spill] sm:$0xff] }
 0x28d   : > { %v7296_v37 = vpop.f32.mrf.mxu1  ;;  %v9719_v50 = vpop.permute.xlu0 %5063 }
 0x28e   : > { %10197 = vst [vmem:[#allocation11_spill] sm:$0xff] %v9690_v28  ;;  %v9697_v19 = vadd.f32 %v3660_v59, %v3265_v36  ;;  %v3268_v11 = vadd.f32 %v7296_v37, %v10200_v2  ;;  %v7424_v25 = vpop.f32.mrf.mxu0  ;;  %v9708_v59 = vpop.permute.xlu1 %5058  ;;  %v10206_v37 = vld [vmem:[#allocation25_spill] sm:$0xff] }
 0x28f   : > { %v3140_v10 = vpop.f32.mrf.mxu1 }
 0x290   : > { %10199 = vst [vmem:[#allocation12_spill] sm:$0xff] %v9697_v19  ;;  %v9700_v33 = vadd.f32 %v7424_v25, %v3268_v11  ;;  %v3267_v16 = vadd.f32 %v3140_v10, %v10202_v62  ;;  %v3670_v1 = vpop.f32.mrf.mxu0  ;;  %v10208_v10 = vld [vmem:[#allocation26_spill] sm:$0xff] }
 0x291   : > { %v7299_v45 = vpop.f32.mrf.mxu1  ;;  %v9732_v34 = vpop.permute.xlu0 %5073 }
 0x292   : > { %10201 = vst [vmem:[#allocation13_spill] sm:$0xff] %v9700_v33  ;;  %v9703_v28 = vadd.f32 %v3670_v1, %v3267_v16  ;;  %v3270_v47 = vadd.f32 %v7299_v45, %v10204_v27  ;;  %v7427_v30 = vpop.f32.mrf.mxu0  ;;  %v10210_v45 = vld [vmem:[#allocation27_spill] sm:$0xff] }
 0x293   : > { %v3150_v44 = vpop.f32.mrf.mxu1 }
 0x294   : > { %10203 = vst [vmem:[#allocation14_spill] sm:$0xff] %v9703_v28  ;;  %v9710_v36 = vadd.f32 %v7427_v30, %v3270_v47  ;;  %v3269_v2 = vadd.f32 %v3150_v44, %v10206_v37  ;;  %v3680_v11 = vpop.f32.mrf.mxu0  ;;  %v9721_v30 = vpop.permute.xlu1 %5068  ;;  %v10212_v44 = vld [vmem:[#allocation28_spill] sm:$0xff] }
 0x295   : > { %v7302_v25 = vpop.f32.mrf.mxu1 }
 0x296   : > { %10205 = vst [vmem:[#allocation15_spill] sm:$0xff] %v9710_v36  ;;  %v9713_v33 = vadd.f32 %v3680_v11, %v3269_v2  ;;  %v3272_v62 = vadd.f32 %v7302_v25, %v10208_v10  ;;  %v7430_v16 = vpop.f32.mrf.mxu0  ;;  %v10214_v25 = vld [vmem:[#allocation29_spill] sm:$0xff] }
 0x297   : > { %v3160_v1 = vpop.f32.mrf.mxu1 }
 0x298   : > { %10207 = vst [vmem:[#allocation16_spill] sm:$0xff] %v9713_v33  ;;  %v9716_v28 = vadd.f32 %v7430_v16, %v3272_v62  ;;  %v3271_v27 = vadd.f32 %v3160_v1, %v10210_v45  ;;  %v3690_v19 = vpop.f32.mrf.mxu0  ;;  %v10216_v1 = vld [vmem:[#allocation30_spill] sm:$0xff] }
 0x299   : > { %v7305_v17 = vpop.f32.mrf.mxu1 }
 0x29a   : > { %10209 = vst [vmem:[#allocation17_spill] sm:$0xff] %v9716_v28  ;;  %v9723_v47 = vadd.f32 %v3690_v19, %v3271_v27  ;;  %v3274_v37 = vadd.f32 %v7305_v17, %v10212_v44  ;;  %v7433_v2 = vpop.f32.mrf.mxu0  ;;  %v9734_v19 = vpop.permute.xlu1 %5078  ;;  %v10217_v17 = vld [vmem:[#allocation31_spill] sm:$0xff] }
 0x29b   : > { %v3170_v11 = vpop.f32.mrf.mxu1 }
 0x29c   : > { %10211 = vst [vmem:[#allocation18_spill] sm:$0xff] %v9723_v47  ;;  %v9726_v33 = vadd.f32 %v7433_v2, %v3274_v37  ;;  %v3273_v10 = vadd.f32 %v3170_v11, %v10214_v25  ;;  %v3700_v62 = vpop.f32.mrf.mxu0 }
 0x29d   : > { %v7308_v16 = vpop.f32.mrf.mxu1 }
 0x29e   : > { %10213 = vst [vmem:[#allocation19_spill] sm:$0xff] %v9726_v33  ;;  %v9729_v28 = vadd.f32 %v3700_v62, %v3273_v10  ;;  %v3276_v45 = vadd.f32 %v7308_v16, %v10216_v1  ;;  %v7436_v36 = vpop.f32.mrf.mxu0 }
 0x29f   : > { %v3180_v54 = vpop.f32.mrf.mxu1 }
 0x2a0   : > { %10215 = vst [vmem:[#allocation20_spill] sm:$0xff] %v9729_v28  ;;  %v9736_v27 = vadd.f32 %v7436_v36, %v3276_v45  ;;  %v3275_v44 = vadd.f32 %v3180_v54, %v10217_v17  ;;  %v3710_v37 = vpop.f32.mrf.mxu0  ;;  %v9745_v28 = vpop.permute.xlu0 %5083 }
 0x2a1   : > { %v7311_v2 = vpop.f32.mrf.mxu1  ;;  %v9747_v36 = vpop.permute.xlu1 %5088 }
 0x2a2   : > { %v9739_v33 = vadd.f32 %v3710_v37, %v3275_v44  ;;  %v3278_v11 = vadd.f32 %v7311_v2, %v9451_v41  ;;  %v7439_v25 = vpop.f32.mrf.mxu0 }
 0x2a3   : > { %v3190_v10 = vpop.f32.mrf.mxu1 }
 0x2a4   : > { %10218 = vst [vmem:[#allocation21_spill] sm:$0xff] %v9739_v33  ;;  %v9742_v62 = vadd.f32 %v7439_v25, %v3278_v11  ;;  %v3277_v16 = vadd.f32 %v3190_v10, %v9455_v53  ;;  %v3720_v1 = vpop.f32.mrf.mxu0 }
 0x2a5   : > { %v7314_v47 = vpop.f32.mrf.mxu1 }
 0x2a6   : > { %10219 = vst [vmem:[#allocation22_spill] sm:$0xff] %v9742_v62  ;;  %v9749_v45 = vadd.f32 %v3720_v1, %v3277_v16  ;;  %v3280_v54 = vadd.f32 %v7314_v47, %v9461_v51  ;;  %v7442_v17 = vpop.f32.mrf.mxu0  ;;  %v9758_v62 = vpop.permute.xlu0 %5093 }
 0x2a7   : > { %v3200_v44 = vpop.f32.mrf.mxu1  ;;  %v9760_v1 = vpop.permute.xlu1 %5098 }
 0x2a8   : > { %10220 = vst [vmem:[#allocation23_spill] sm:$0xff] %v9749_v45  ;;  %v9752_v37 = vadd.f32 %v7442_v17, %v3280_v54  ;;  %v3279_v41 = vadd.f32 %v3200_v44, %v9465_v9  ;;  %v3730_v2 = vpop.f32.mrf.mxu0 }
 0x2a9   : > { %v7317_v11 = vpop.f32.mrf.mxu1 }
 0x2aa   : > { %10221 = vst [vmem:[#allocation24_spill] sm:$0xff] %v9752_v37  ;;  %v9755_v53 = vadd.f32 %v3730_v2, %v3279_v41  ;;  %v3282_v25 = vadd.f32 %v7317_v11, %v9471_v39  ;;  %v7445_v10 = vpop.f32.mrf.mxu0 }
 0x2ab   : > { %v3210_v16 = vpop.f32.mrf.mxu1 }
 0x2ac   : > { %10222 = vst [vmem:[#allocation25_spill] sm:$0xff] %v9755_v53  ;;  %v9762_v51 = vadd.f32 %v7445_v10, %v3282_v25  ;;  %v3281_v47 = vadd.f32 %v3210_v16, %v9475_v14  ;;  %v3740_v54 = vpop.f32.mrf.mxu0  ;;  %v9776_v25 = vpop.permute.xlu0 %5103 }
 0x2ad   : > { %v7480_v17 = vpop.f32.mrf.mxu1  ;;  %v9778_v16 = vpop.permute.xlu1 %5108 }
 0x2ae   : > { %10223 = vst [vmem:[#allocation26_spill] sm:$0xff] %v9762_v51  ;;  %v9765_v9 = vadd.f32 %v3740_v54, %v3281_v47  ;;  %v4280_v44 = vadd.f32 %v7480_v17, %v9481_v35  ;;  %v7608_v41 = vpop.f32.mrf.mxu0 }
 0x2af   : > { %v3960_v39 = vpop.f32.mrf.mxu1 }
 0x2b0   : > { %10224 = vst [vmem:[#allocation27_spill] sm:$0xff] %v9765_v9  ;;  %v4810_v2 = vadd.f32 %v7608_v41, %v4280_v44  ;;  %v4279_v11 = vadd.f32 %v3960_v39, %v9485_v18  ;;  %v4490_v14 = vpop.f32.mrf.mxu0 }
 0x2b1   : > { %v7483_v10 = vpop.f32.mrf.mxu1 }
 0x2b2   : > { %4874 = vst [vmem:[%s9773_s6 + $0x8] sm:$0xff] %v4810_v2  ;;  %v5322_v35 = vmul.f32 %v9654_v52, %v4810_v2  ;;  %v4809_v47 = vadd.f32 %v4490_v14, %v4279_v11  ;;  %v4282_v54 = vadd.f32 %v7483_v10, %v9491_v22  ;;  %v7611_v17 = vpop.f32.mrf.mxu0  ;;  %v9787_v11 = vpop.permute.xlu0 %5113 }
 0x2b3   : > { %v3970_v9 = vpop.f32.mrf.mxu1  ;;  %v9791_v10 = vpop.permute.xlu1 %5118 }
 0x2b4   : > { %4873 = vst [vmem:[%s9773_s6] sm:$0xff] %v4809_v47  ;;  %v5321_v44 = vmul.f32 %v9641_v0, %v4809_v47  ;;  %v4812_v41 = vadd.f32 %v7611_v17, %v4282_v54  ;;  %v4281_v18 = vadd.f32 %v3970_v9, %v9495_v55  ;;  %v4500_v39 = vpop.f32.mrf.mxu0  ;;  %v5455_v53 = vmul.f32 %v5322_v35, %v4810_v2 }
 0x2b5   : > { %v7486_v51 = vpop.f32.mrf.mxu1 }
 0x2b6   : > { %v5385_v37 = vadd.f32 %v5322_v35, %v5321_v44  ;;  %v5454_v45 = vmul.f32 %v5321_v44, %v4809_v47  ;;  %4876 = vst [vmem:[%s9773_s6 + $0x18] sm:$0xff] %v4812_v41  ;;  %v4811_v33 = vadd.f32 %v4500_v39, %v4281_v18  ;;  %v7614_v52 = vpop.f32.mrf.mxu0  ;;  %v5324_v22 = vmul.f32 %v9656_v7, %v4812_v41 }
 0x2b7   : > { %v4284_v14 = vadd.f32 %v7486_v51, %v9501_v56  ;;  %v3980_v0 = vpop.f32.mrf.mxu1 }
 0x2b8   : > { %v5518_v54 = vadd.f32 %v5455_v53, %v5454_v45  ;;  %4875 = vst [vmem:[%s9773_s6 + $0x10] sm:$0xff] %v4811_v33  ;;  %v5323_v55 = vmul.f32 %v9643_v42, %v4811_v33  ;;  %v4283_v9 = vadd.f32 %v3980_v0, %v9505_v24  ;;  %v4510_v2 = vpop.f32.mrf.mxu0  ;;  %v5457_v51 = vmul.f32 %v5324_v22, %v4812_v41 }
 0x2b9   : > { %v4814_v35 = vadd.f32 %v7614_v52, %v4284_v14  ;;  %v7489_v47 = vpop.f32.mrf.mxu1  ;;  %v9801_v14 = vpop.permute.xlu0 %5123 }
 0x2ba   : > { %v5386_v17 = vadd.f32 %v5385_v37, %v5323_v55  ;;  %v5456_v44 = vmul.f32 %v5323_v55, %v4811_v33  ;;  %v4813_v18 = vadd.f32 %v4510_v2, %v4283_v9  ;;  %v4286_v7 = vadd.f32 %v7489_v47, %v9511_v29  ;;  %v7617_v56 = vpop.f32.mrf.mxu0  ;;  %v9804_v29 = vpop.permute.xlu1 %5128 }
 0x2bb   : > { %4878 = vst [vmem:[%s9773_s6 + $0x28] sm:$0xff] %v4814_v35  ;;  %v5326_v45 = vmul.f32 %v9669_v57, %v4814_v35  ;;  %v3990_v53 = vpop.f32.mrf.mxu1 }
 0x2bc   : > { %v5519_v39 = vadd.f32 %v5518_v54, %v5456_v44  ;;  %4877 = vst [vmem:[%s9773_s6 + $0x20] sm:$0xff] %v4813_v18  ;;  %v5325_v42 = vmul.f32 %v9667_v49, %v4813_v18  ;;  %v5387_v24 = vadd.f32 %v5386_v17, %v5324_v22  ;;  %v4816_v0 = vadd.f32 %v7617_v56, %v4286_v7  ;;  %v4520_v52 = vpop.f32.mrf.mxu0 }
 0x2bd   : > { %v4285_v33 = vadd.f32 %v3990_v53, %v9515_v8  ;;  %v7492_v37 = vpop.f32.mrf.mxu1  ;;  %v5459_v22 = vmul.f32 %v5326_v45, %v4814_v35  ;;  %v9813_v35 = vpop.permute.xlu0 %5133 }
 0x2be   : > { %v5388_v41 = vadd.f32 %v5387_v24, %v5325_v42  ;;  %v5458_v55 = vmul.f32 %v5325_v42, %v4813_v18  ;;  %v5520_v9 = vadd.f32 %v5519_v39, %v5457_v51  ;;  %4880 = vst [vmem:[%s9773_s6 + $0x38] sm:$0xff] %v4816_v0  ;;  %v7620_v57 = vpop.f32.mrf.mxu0  ;;  %v4288_v2 = vadd.f32 %v7492_v37, %v9521_v32 }
 0x2bf   : > { %v4815_v54 = vadd.f32 %v4520_v52, %v4285_v33  ;;  %v4000_v49 = vpop.f32.mrf.mxu1  ;;  %v5328_v7 = vmul.f32 %v9682_v6, %v4816_v0  ;;  %v9816_v52 = vpop.permute.xlu1 %5138 }
 0x2c0   : > { %v5521_v47 = vadd.f32 %v5520_v9, %v5458_v55  ;;  %v5389_v17 = vadd.f32 %v5388_v41, %v5326_v45  ;;  %v4287_v44 = vadd.f32 %v4000_v49, %v9525_v48  ;;  %v4530_v8 = vpop.f32.mrf.mxu0  ;;  %v4818_v56 = vadd.f32 %v7620_v57, %v4288_v2 }
 0x2c1   : > { %4879 = vst [vmem:[%s9773_s6 + $0x30] sm:$0xff] %v4815_v54  ;;  %v5327_v18 = vmul.f32 %v9680_v43, %v4815_v54  ;;  %v7495_v51 = vpop.f32.mrf.mxu1  ;;  %v5461_v41 = vmul.f32 %v5328_v7, %v4816_v0 }
 0x2c2   : > { %v5522_v53 = vadd.f32 %v5521_v47, %v5459_v22  ;;  %v4817_v39 = vadd.f32 %v4530_v8, %v4287_v44  ;;  %v4290_v32 = vadd.f32 %v7495_v51, %v9531_v31  ;;  %v7623_v42 = vpop.f32.mrf.mxu0  ;;  %4882 = vst [vmem:[%s9773_s6 + $0x48] sm:$0xff] %v4818_v56  ;;  %v5330_v55 = vmul.f32 %v9695_v13, %v4818_v56  ;;  %v9827_v13 = vpop.permute.xlu0 %5143 }
 0x2c3   : > { %v5390_v24 = vadd.f32 %v5389_v17, %v5327_v18  ;;  %v5460_v45 = vmul.f32 %v5327_v18, %v4815_v54  ;;  %v4010_v48 = vpop.f32.mrf.mxu1 }
 0x2c4   : > { %4881 = vst [vmem:[%s9773_s6 + $0x40] sm:$0xff] %v4817_v39  ;;  %v5329_v6 = vmul.f32 %v9693_v40, %v4817_v39  ;;  %v4820_v43 = vadd.f32 %v7623_v42, %v4290_v32  ;;  %v4289_v33 = vadd.f32 %v4010_v48, %v9535_v63  ;;  %v4540_v37 = vpop.f32.mrf.mxu0 }
 0x2c5   : > { %v5523_v31 = vadd.f32 %v5522_v53, %v5460_v45  ;;  %v5391_v9 = vadd.f32 %v5390_v24, %v5328_v7  ;;  %v7498_v57 = vpop.f32.mrf.mxu1  ;;  %v5463_v7 = vmul.f32 %v5330_v55, %v4818_v56 }
 0x2c6   : > { %v5462_v2 = vmul.f32 %v5329_v6, %v4817_v39  ;;  %4884 = vst [vmem:[%s9773_s6 + $0x58] sm:$0xff] %v4820_v43  ;;  %v4819_v54 = vadd.f32 %v4540_v37, %v4289_v33  ;;  %v4292_v49 = vadd.f32 %v7498_v57, %v9541_v21  ;;  %v7626_v22 = vpop.f32.mrf.mxu0  ;;  %v5332_v51 = vmul.f32 %v9708_v59, %v4820_v43  ;;  %v9830_v39 = vpop.permute.xlu1 %5148 }
 0x2c7   : > { %v5392_v47 = vadd.f32 %v5391_v9, %v5329_v6  ;;  %v5524_v40 = vadd.f32 %v5523_v31, %v5461_v41  ;;  %v4020_v17 = vpop.f32.mrf.mxu1 }
 0x2c8   : > { %4883 = vst [vmem:[%s9773_s6 + $0x50] sm:$0xff] %v4819_v54  ;;  %v5331_v63 = vmul.f32 %v9706_v58, %v4819_v54  ;;  %v4822_v44 = vadd.f32 %v7626_v22, %v4292_v49  ;;  %v4291_v0 = vadd.f32 %v4020_v17, %v9545_v4  ;;  %v4550_v8 = vpop.f32.mrf.mxu0  ;;  %v5465_v37 = vmul.f32 %v5332_v51, %v4820_v43  ;;  %v9840_v49 = vpop.permute.xlu0 %5153 }
 0x2c9   : > { %v5525_v18 = vadd.f32 %v5524_v40, %v5462_v2  ;;  %v5393_v21 = vadd.f32 %v5392_v47, %v5330_v55  ;;  %v7501_v53 = vpop.f32.mrf.mxu1 }
 0x2ca   : > { %v5464_v32 = vmul.f32 %v5331_v63, %v4819_v54  ;;  %4886 = vst [vmem:[%s9773_s6 + $0x68] sm:$0xff] %v4822_v44  ;;  %v4821_v42 = vadd.f32 %v4550_v8, %v4291_v0  ;;  %v4294_v58 = vadd.f32 %v7501_v53, %v9551_v26  ;;  %v7629_v24 = vpop.f32.mrf.mxu0  ;;  %v5334_v31 = vmul.f32 %v9721_v30, %v4822_v44  ;;  %v9842_v47 = vpop.permute.xlu1 %5158 }
 0x2cb   : > { %v5394_v4 = vadd.f32 %v5393_v21, %v5331_v63  ;;  %v5526_v45 = vadd.f32 %v5525_v18, %v5463_v7  ;;  %v4030_v48 = vpop.f32.mrf.mxu1 }
 0x2cc   : > { %4885 = vst [vmem:[%s9773_s6 + $0x60] sm:$0xff] %v4821_v42  ;;  %v5333_v56 = vmul.f32 %v9719_v50, %v4821_v42  ;;  %v4824_v6 = vadd.f32 %v7629_v24, %v4294_v58  ;;  %v4293_v59 = vadd.f32 %v4030_v48, %v9555_v60  ;;  %v4560_v33 = vpop.f32.mrf.mxu0  ;;  %v5467_v63 = vmul.f32 %v5334_v31, %v4822_v44 }
 0x2cd   : > { %v5527_v41 = vadd.f32 %v5526_v45, %v5464_v32  ;;  %v5395_v55 = vadd.f32 %v5394_v4, %v5332_v51  ;;  %v7504_v9 = vpop.f32.mrf.mxu1 }
 0x2ce   : > { %v5466_v26 = vmul.f32 %v5333_v56, %v4821_v42  ;;  %4888 = vst [vmem:[%s9773_s6 + $0x78] sm:$0xff] %v4824_v6  ;;  %v4823_v57 = vadd.f32 %v4560_v33, %v4293_v59  ;;  %v4296_v2 = vadd.f32 %v7504_v9, %v9561_v38  ;;  %v7632_v54 = vpop.f32.mrf.mxu0  ;;  %v5336_v38 = vmul.f32 %v9734_v19, %v4824_v6  ;;  %v9853_v19 = vpop.permute.xlu0 %5163 }
 0x2cf   : > { %v5396_v50 = vadd.f32 %v5395_v55, %v5333_v56  ;;  %v5528_v22 = vadd.f32 %v5527_v41, %v5465_v37  ;;  %v4040_v60 = vpop.f32.mrf.mxu1  ;;  %v9856_v59 = vpop.permute.xlu1 %5168 }
 0x2d0   : > { %4887 = vst [vmem:[%s9773_s6 + $0x70] sm:$0xff] %v4823_v57  ;;  %v5335_v43 = vmul.f32 %v9732_v34, %v4823_v57  ;;  %v4826_v30 = vadd.f32 %v7632_v54, %v4296_v2  ;;  %v4295_v40 = vadd.f32 %v4040_v60, %v9565_v61  ;;  %v4570_v17 = vpop.f32.mrf.mxu0  ;;  %v5469_v4 = vmul.f32 %v5336_v38, %v4824_v6 }
 0x2d1   : > { %v5529_v0 = vadd.f32 %v5528_v22, %v5466_v26  ;;  %v5397_v8 = vadd.f32 %v5396_v50, %v5334_v31  ;;  %v7507_v7 = vpop.f32.mrf.mxu1 }
 0x2d2   : > { %v5468_v18 = vmul.f32 %v5335_v43, %v4823_v57  ;;  %4890 = vst [vmem:[%s9773_s6 + $0x88] sm:$0xff] %v4826_v30  ;;  %v4825_v51 = vadd.f32 %v4570_v17, %v4295_v40  ;;  %v4298_v21 = vadd.f32 %v7507_v7, %v9571_v3  ;;  %v7635_v53 = vpop.f32.mrf.mxu0  ;;  %v5338_v48 = vmul.f32 %v9747_v36, %v4826_v30  ;;  %v9866_v17 = vpop.permute.xlu0 %5173 }
 0x2d3   : > { %v5398_v32 = vadd.f32 %v5397_v8, %v5335_v43  ;;  %v5530_v34 = vadd.f32 %v5529_v0, %v5467_v63  ;;  %v4050_v42 = vpop.f32.mrf.mxu1  ;;  %v9868_v0 = vpop.permute.xlu1 %5178 }
 0x2d4   : > { %4889 = vst [vmem:[%s9773_s6 + $0x80] sm:$0xff] %v4825_v51  ;;  %v5337_v61 = vmul.f32 %v9745_v28, %v4825_v51  ;;  %v4828_v58 = vadd.f32 %v7635_v53, %v4298_v21  ;;  %v4297_v44 = vadd.f32 %v4050_v42, %v9575_v5  ;;  %v4580_v24 = vpop.f32.mrf.mxu0  ;;  %v5471_v57 = vmul.f32 %v5338_v48, %v4826_v30 }
 0x2d5   : > { %v5531_v45 = vadd.f32 %v5530_v34, %v5468_v18  ;;  %v5399_v3 = vadd.f32 %v5398_v32, %v5336_v38  ;;  %v7510_v56 = vpop.f32.mrf.mxu1  ;;  %v10225_v34 = vld [vmem:[#allocation32_spill] sm:$0xff] }
 0x2d6   : > { %v5470_v33 = vmul.f32 %v5337_v61, %v4825_v51  ;;  %4892 = vst [vmem:[%s9773_s6 + $0x98] sm:$0xff] %v4828_v58  ;;  %v4827_v37 = vadd.f32 %v4580_v24, %v4297_v44  ;;  %v4300_v28 = vadd.f32 %v7510_v56, %v9581_v20  ;;  %v7638_v41 = vpop.f32.mrf.mxu0  ;;  %v5340_v54 = vmul.f32 %v9760_v1, %v4828_v58 }
 0x2d7   : > { %v5400_v5 = vadd.f32 %v5399_v3, %v5337_v61  ;;  %v5532_v31 = vadd.f32 %v5531_v45, %v5469_v4  ;;  %v4060_v55 = vpop.f32.mrf.mxu1 }
 0x2d8   : > { %4891 = vst [vmem:[%s9773_s6 + $0x90] sm:$0xff] %v4827_v37  ;;  %v5339_v6 = vmul.f32 %v9758_v62, %v4827_v37  ;;  %v4830_v9 = vadd.f32 %v7638_v41, %v4300_v28  ;;  %v4299_v36 = vadd.f32 %v4060_v55, %v9585_v15  ;;  %v4590_v26 = vpop.f32.mrf.mxu0  ;;  %v5473_v7 = vmul.f32 %v5340_v54, %v4828_v58  ;;  %v10226_v58 = vld [vmem:[#allocation33_spill] sm:$0xff]  ;;  %v9882_v41 = vpop.permute.xlu1 %5188 }
 0x2d9   : > { %v5533_v2 = vadd.f32 %v5532_v31, %v5470_v33  ;;  %v5401_v50 = vadd.f32 %v5400_v5, %v5338_v48  ;;  %v7513_v22 = vpop.f32.mrf.mxu1 }
 0x2da   : > { %v5472_v20 = vmul.f32 %v5339_v6, %v4827_v37  ;;  %4894 = vst [vmem:[%s9773_s6 + $0xa8] sm:$0xff] %v4830_v9  ;;  %v4829_v60 = vadd.f32 %v4590_v26, %v4299_v36  ;;  %v4302_v43 = vadd.f32 %v7513_v22, %v9591_v46  ;;  %v7641_v40 = vpop.f32.mrf.mxu0  ;;  %v5342_v46 = vmul.f32 %v9778_v16, %v4830_v9  ;;  %v9879_v16 = vpop.permute.xlu0 %5183 }
 0x2db   : > { %v5402_v62 = vadd.f32 %v5401_v50, %v5339_v6  ;;  %v5534_v63 = vadd.f32 %v5533_v2, %v5471_v57  ;;  %v4070_v15 = vpop.f32.mrf.mxu1  ;;  %v10227_v2 = vld [vmem:[#allocation34_spill] sm:$0xff] }
 0x2dc   : > { %4893 = vst [vmem:[%s9773_s6 + $0xa0] sm:$0xff] %v4829_v60  ;;  %v5341_v30 = vmul.f32 %v9776_v25, %v4829_v60  ;;  %v4832_v1 = vadd.f32 %v7641_v40, %v4302_v43  ;;  %v4301_v38 = vadd.f32 %v4070_v15, %v9595_v23  ;;  %v4600_v8 = vpop.f32.mrf.mxu0  ;;  %v5475_v3 = vmul.f32 %v5342_v46, %v4830_v9 }
 0x2dd   : > { %v5535_v18 = vadd.f32 %v5534_v63, %v5472_v20  ;;  %v5403_v51 = vadd.f32 %v5402_v62, %v5340_v54  ;;  %v7516_v21 = vpop.f32.mrf.mxu1  ;;  %v10228_v62 = vld [vmem:[#allocation35_spill] sm:$0xff] }
 0x2de   : > { %v5474_v53 = vmul.f32 %v5341_v30, %v4829_v60  ;;  %4896 = vst [vmem:[%s9773_s6 + $0xb8] sm:$0xff] %v4832_v1  ;;  %v4831_v32 = vadd.f32 %v4600_v8, %v4301_v38  ;;  %v4304_v42 = vadd.f32 %v7516_v21, %v10225_v34  ;;  %v7644_v61 = vpop.f32.mrf.mxu0  ;;  %v5344_v33 = vmul.f32 %v9791_v10, %v4832_v1 }
 0x2df   : > { %v5404_v44 = vadd.f32 %v5403_v51, %v5341_v30  ;;  %v5536_v25 = vadd.f32 %v5535_v18, %v5473_v7  ;;  %v4080_v24 = vpop.f32.mrf.mxu1  ;;  %v9892_v30 = vpop.permute.xlu0 %5193  ;;  %v10229_v18 = vld [vmem:[#allocation36_spill] sm:$0xff] }
 0x2e0   : > { %4895 = vst [vmem:[%s9773_s6 + $0xb0] sm:$0xff] %v4831_v32  ;;  %v5343_v23 = vmul.f32 %v9787_v11, %v4831_v32  ;;  %v4834_v4 = vadd.f32 %v7644_v61, %v4304_v42  ;;  %v4303_v45 = vadd.f32 %v4080_v24, %v10226_v58  ;;  %v4610_v48 = vpop.f32.mrf.mxu0  ;;  %v5477_v50 = vmul.f32 %v5344_v33, %v4832_v1  ;;  %v9894_v7 = vpop.permute.xlu1 %5198 }
 0x2e1   : > { %v5537_v56 = vadd.f32 %v5536_v25, %v5474_v53  ;;  %v5405_v37 = vadd.f32 %v5404_v44, %v5342_v46  ;;  %v7519_v28 = vpop.f32.mrf.mxu1  ;;  %v10230_v25 = vld [vmem:[#allocation37_spill] sm:$0xff] }
 0x2e2   : > { %v5476_v5 = vmul.f32 %v5343_v23, %v4831_v32  ;;  %4898 = vst [vmem:[%s9773_s6 + $0xc8] sm:$0xff] %v4834_v4  ;;  %v4833_v31 = vadd.f32 %v4610_v48, %v4303_v45  ;;  %v4306_v11 = vadd.f32 %v7519_v28, %v9611_v12  ;;  %v7647_v55 = vpop.f32.mrf.mxu0  ;;  %v5346_v20 = vmul.f32 %v9804_v29, %v4834_v4 }
 0x2e3   : > { %v5406_v6 = vadd.f32 %v5405_v37, %v5343_v23  ;;  %v5538_v36 = vadd.f32 %v5537_v56, %v5475_v3  ;;  %v4090_v26 = vpop.f32.mrf.mxu1 }
 0x2e4   : > { %4897 = vst [vmem:[%s9773_s6 + $0xc0] sm:$0xff] %v4833_v31  ;;  %v5345_v9 = vmul.f32 %v9801_v14, %v4833_v31  ;;  %v4836_v57 = vadd.f32 %v7647_v55, %v4306_v11  ;;  %v4305_v10 = vadd.f32 %v4090_v26, %v10227_v2  ;;  %v4620_v54 = vpop.f32.mrf.mxu0  ;;  %v5479_v21 = vmul.f32 %v5346_v20, %v4834_v4  ;;  %v10231_v4 = vld [vmem:[#allocation38_spill] sm:$0xff]  ;;  %v9908_v55 = vpop.permute.xlu1 %5208  ;;  %v10232_v26 = vld [vmem:[#allocation39_spill] sm:$0xff] }
 0x2e5   : > { %v5539_v22 = vadd.f32 %v5538_v36, %v5476_v5  ;;  %v5407_v60 = vadd.f32 %v5406_v6, %v5344_v33  ;;  %v7522_v43 = vpop.f32.mrf.mxu1 }
 0x2e6   : > { %v5478_v12 = vmul.f32 %v5345_v9, %v4833_v31  ;;  %4900 = vst [vmem:[%s9773_s6 + $0xd8] sm:$0xff] %v4836_v57  ;;  %v4835_v40 = vadd.f32 %v4620_v54, %v4305_v10  ;;  %v4308_v63 = vadd.f32 %v7522_v43, %v10228_v62  ;;  %v7650_v15 = vpop.f32.mrf.mxu0  ;;  %v5348_v32 = vmul.f32 %v9816_v52, %v4836_v57  ;;  %v9905_v52 = vpop.permute.xlu0 %5203 }
 0x2e7   : > { %v5408_v14 = vadd.f32 %v5407_v60, %v5345_v9  ;;  %v5540_v38 = vadd.f32 %v5539_v22, %v5477_v50  ;;  %v4100_v8 = vpop.f32.mrf.mxu1  ;;  %v10233_v22 = vld [vmem:[#allocation40_spill] sm:$0xff] }
 0x2e8   : > { %4899 = vst [vmem:[%s9773_s6 + $0xd0] sm:$0xff] %v4835_v40  ;;  %v5347_v1 = vmul.f32 %v9813_v35, %v4835_v40  ;;  %v4838_v29 = vadd.f32 %v7650_v15, %v4308_v63  ;;  %v4307_v46 = vadd.f32 %v4100_v8, %v10229_v18  ;;  %v4630_v51 = vpop.f32.mrf.mxu0  ;;  %v5481_v37 = vmul.f32 %v5348_v32, %v4836_v57 }
 0x2e9   : > { %v5541_v53 = vadd.f32 %v5540_v38, %v5478_v12  ;;  %v5409_v34 = vadd.f32 %v5408_v14, %v5346_v20  ;;  %v7525_v42 = vpop.f32.mrf.mxu1  ;;  %v10234_v14 = vld [vmem:[#allocation42_spill] sm:$0xff] }
 0x2ea   : > { %v5480_v61 = vmul.f32 %v5347_v1, %v4835_v40  ;;  %4902 = vst [vmem:[%s9773_s6 + $0xe8] sm:$0xff] %v4838_v29  ;;  %v4837_v44 = vadd.f32 %v4630_v51, %v4307_v46  ;;  %v4310_v24 = vadd.f32 %v7525_v42, %v10230_v25  ;;  %v7653_v23 = vpop.f32.mrf.mxu0  ;;  %v5350_v5 = vmul.f32 %v9830_v39, %v4838_v29  ;;  %v9920_v51 = vpop.permute.xlu1 %5218 }
 0x2eb   : > { %v5410_v58 = vadd.f32 %v5409_v34, %v5347_v1  ;;  %v5542_v35 = vadd.f32 %v5541_v53, %v5479_v21  ;;  %v4110_v45 = vpop.f32.mrf.mxu1  ;;  %v9918_v1 = vpop.permute.xlu0 %5213  ;;  %v10235_v21 = vld [vmem:[#allocation2_spill] sm:$0xff] }
 0x2ec   : > { %4901 = vst [vmem:[%s9773_s6 + $0xe0] sm:$0xff] %v4837_v44  ;;  %v5349_v48 = vmul.f32 %v9827_v13, %v4837_v44  ;;  %v4840_v3 = vadd.f32 %v7653_v23, %v4310_v24  ;;  %v4309_v56 = vadd.f32 %v4110_v45, %v10231_v4  ;;  %v4640_v33 = vpop.f32.mrf.mxu0  ;;  %v5483_v60 = vmul.f32 %v5350_v5, %v4838_v29 }
 0x2ed   : > { %v5543_v28 = vadd.f32 %v5542_v35, %v5480_v61  ;;  %v5411_v31 = vadd.f32 %v5410_v58, %v5348_v32  ;;  %v7528_v11 = vpop.f32.mrf.mxu1  ;;  %v10236_v58 = vld [vmem:[#allocation3_spill] sm:$0xff] }
 0x2ee   : > { %v5482_v6 = vmul.f32 %v5349_v48, %v4837_v44  ;;  %4904 = vst [vmem:[%s9773_s6 + $0xf8] sm:$0xff] %v4840_v3  ;;  %v4839_v36 = vadd.f32 %v4640_v33, %v4309_v56  ;;  %v4312_v13 = vadd.f32 %v7528_v11, %v10232_v26  ;;  %v7656_v9 = vpop.f32.mrf.mxu0  ;;  %v5352_v12 = vmul.f32 %v9842_v47, %v4840_v3  ;;  %v9934_v26 = vpop.permute.xlu1 %5228 }
 0x2ef   : > { %v5412_v2 = vadd.f32 %v5411_v31, %v5349_v48  ;;  %v5544_v10 = vadd.f32 %v5543_v28, %v5481_v37  ;;  %v4120_v54 = vpop.f32.mrf.mxu1 }
 0x2f0   : > { %4903 = vst [vmem:[%s9773_s6 + $0xf0] sm:$0xff] %v4839_v36  ;;  %v5351_v57 = vmul.f32 %v9840_v49, %v4839_v36  ;;  %v4842_v50 = vadd.f32 %v7656_v9, %v4312_v13  ;;  %v4311_v39 = vadd.f32 %v4120_v54, %v10233_v22  ;;  %v4650_v20 = vpop.f32.mrf.mxu0  ;;  %v5485_v34 = vmul.f32 %v5352_v12, %v4840_v3  ;;  %v10237_v3 = vld [vmem:[#allocation4_spill] sm:$0xff] }
 0x2f1   : > { %v5545_v43 = vadd.f32 %v5544_v10, %v5482_v6  ;;  %v5413_v40 = vadd.f32 %v5412_v2, %v5350_v5  ;;  %v7531_v62 = vpop.f32.mrf.mxu1  ;;  %v10238_v2 = vld [vmem:[#allocation5_spill] sm:$0xff] }
 0x2f2   : > { %v5484_v63 = vmul.f32 %v5351_v57, %v4839_v36  ;;  %4906 = vst [vmem:[%s9773_s6 + $0x108] sm:$0xff] %v4842_v50  ;;  %v4841_v15 = vadd.f32 %v4650_v20, %v4311_v39  ;;  %v4314_v38 = vadd.f32 %v7531_v62, %v10234_v14  ;;  %v7659_v8 = vpop.f32.mrf.mxu0  ;;  %v5354_v61 = vmul.f32 %v9856_v59, %v4842_v50  ;;  %v9931_v59 = vpop.permute.xlu0 %5223  ;;  %v10239_v20 = vld [vmem:[#allocation6_spill] sm:$0xff] }
 0x2f3   : > { %v5414_v49 = vadd.f32 %v5413_v40, %v5351_v57  ;;  %v5546_v18 = vadd.f32 %v5545_v43, %v5483_v60  ;;  %v4130_v46 = vpop.f32.mrf.mxu1 }
 0x2f4   : > { %4905 = vst [vmem:[%s9773_s6 + $0x100] sm:$0xff] %v4841_v15  ;;  %v5353_v29 = vmul.f32 %v9853_v19, %v4841_v15  ;;  %v4844_v47 = vadd.f32 %v7659_v8, %v4314_v38  ;;  %v4313_v53 = vadd.f32 %v4130_v46, %v10235_v21  ;;  %v4660_v32 = vpop.f32.mrf.mxu0  ;;  %v5487_v5 = vmul.f32 %v5354_v61, %v4842_v50  ;;  %v10240_v38 = vld [vmem:[#allocation7_spill] sm:$0xff]  ;;  %v9946_v21 = vpop.permute.xlu1 %5238 }
 0x2f5   : > { %v5547_v42 = vadd.f32 %v5546_v18, %v5484_v63  ;;  %v5415_v44 = vadd.f32 %v5414_v49, %v5352_v12  ;;  %v7534_v25 = vpop.f32.mrf.mxu1 }
 0x2f6   : > { %v5486_v24 = vmul.f32 %v5353_v29, %v4841_v15  ;;  %4908 = vst [vmem:[%s9773_s6 + $0x118] sm:$0xff] %v4844_v47  ;;  %v4843_v23 = vadd.f32 %v4660_v32, %v4313_v53  ;;  %v4316_v35 = vadd.f32 %v7534_v25, %v10236_v58  ;;  %v7662_v45 = vpop.f32.mrf.mxu0  ;;  %v5356_v11 = vmul.f32 %v9868_v0, %v4844_v47  ;;  %v9944_v18 = vpop.permute.xlu0 %5233  ;;  %v10241_v53 = vld [vmem:[#allocation8_spill] sm:$0xff] }
 0x2f7   : > { %v5416_v48 = vadd.f32 %v5415_v44, %v5353_v29  ;;  %v5548_v19 = vadd.f32 %v5547_v42, %v5485_v34  ;;  %v4140_v4 = vpop.f32.mrf.mxu1 }
 0x2f8   : > { %4907 = vst [vmem:[%s9773_s6 + $0x110] sm:$0xff] %v4843_v23  ;;  %v5355_v56 = vmul.f32 %v9866_v17, %v4843_v23  ;;  %v4846_v33 = vadd.f32 %v7662_v45, %v4316_v35  ;;  %v4315_v37 = vadd.f32 %v4140_v4, %v10237_v3  ;;  %v4670_v28 = vpop.f32.mrf.mxu0  ;;  %v5489_v43 = vmul.f32 %v5356_v11, %v4844_v47  ;;  %v10242_v35 = vld [vmem:[#allocation9_spill] sm:$0xff] }
 0x2f9   : > { %v5549_v31 = vadd.f32 %v5548_v19, %v5486_v24  ;;  %v5417_v6 = vadd.f32 %v5416_v48, %v5354_v61  ;;  %v7537_v36 = vpop.f32.mrf.mxu1 }
 0x2fa   : > { %v5488_v13 = vmul.f32 %v5355_v56, %v4843_v23  ;;  %4910 = vst [vmem:[%s9773_s6 + $0x128] sm:$0xff] %v4846_v33  ;;  %v4845_v9 = vadd.f32 %v4670_v28, %v4315_v37  ;;  %v4318_v17 = vadd.f32 %v7537_v36, %v10238_v2  ;;  %v7665_v10 = vpop.f32.mrf.mxu0  ;;  %v5358_v40 = vmul.f32 %v9882_v41, %v4846_v33 }
 0x2fb   : > { %v5418_v54 = vadd.f32 %v5417_v6, %v5355_v56  ;;  %v5550_v57 = vadd.f32 %v5549_v31, %v5487_v5  ;;  %v4150_v22 = vpop.f32.mrf.mxu1 }
 0x2fc   : > { %4909 = vst [vmem:[%s9773_s6 + $0x120] sm:$0xff] %v4845_v9  ;;  %v5357_v50 = vmul.f32 %v9879_v16, %v4845_v9  ;;  %v4848_v39 = vadd.f32 %v7665_v10, %v4318_v17  ;;  %v4317_v0 = vadd.f32 %v4150_v22, %v10239_v20  ;;  %v4680_v60 = vpop.f32.mrf.mxu0  ;;  %v5491_v42 = vmul.f32 %v5358_v40, %v4846_v33  ;;  %v10243_v33 = vld [vmem:[#allocation43_spill] sm:$0xff]  ;;  %v10244_v17 = vld [vmem:[#allocation10_spill] sm:$0xff]  ;;  %v10245_v20 = vld [vmem:[#allocation41_spill] sm:$0xff] }
 0x2fd   : > { %v5551_v12 = vadd.f32 %v5550_v57, %v5488_v13  ;;  %v5419_v62 = vadd.f32 %v5418_v54, %v5356_v11  ;;  %v7540_v63 = vpop.f32.mrf.mxu1  ;;  %v9960_v13 = vpop.permute.xlu1 %5248 }
 0x2fe   : > { %v5490_v15 = vmul.f32 %v5357_v50, %v4845_v9  ;;  %4912 = vst [vmem:[%s9773_s6 + $0x138] sm:$0xff] %v4848_v39  ;;  %v4847_v14 = vadd.f32 %v4680_v60, %v4317_v0  ;;  %v4320_v8 = vadd.f32 %v7540_v63, %v10240_v38  ;;  %v7668_v49 = vpop.f32.mrf.mxu0  ;;  %v5360_v44 = vmul.f32 %v9894_v7, %v4848_v39  ;;  %v9957_v7 = vpop.permute.xlu0 %5243 }
 0x2ff   : > { %v5420_v16 = vadd.f32 %v5419_v62, %v5357_v50  ;;  %v5552_v46 = vadd.f32 %v5551_v12, %v5489_v43  ;;  %v4160_v29 = vpop.f32.mrf.mxu1 }
 0x300   : > { %4911 = vst [vmem:[%s9773_s6 + $0x130] sm:$0xff] %v4847_v14  ;;  %v5359_v47 = vmul.f32 %v9892_v30, %v4847_v14  ;;  %v4850_v41 = vadd.f32 %v7668_v49, %v4320_v8  ;;  %v4319_v32 = vadd.f32 %v4160_v29, %v10241_v53  ;;  %v4690_v34 = vpop.f32.mrf.mxu0  ;;  %v5493_v5 = vmul.f32 %v5360_v44, %v4848_v39 }
 0x301   : > { %v5553_v61 = vadd.f32 %v5552_v46, %v5490_v15  ;;  %v5421_v25 = vadd.f32 %v5420_v16, %v5358_v40  ;;  %v7543_v24 = vpop.f32.mrf.mxu1  ;;  %v9972_v29 = vpop.permute.xlu1 %5258 }
 0x302   : > { %v5492_v23 = vmul.f32 %v5359_v47, %v4847_v14  ;;  %4914 = vst [vmem:[%s9773_s6 + $0x148] sm:$0xff] %v4850_v41  ;;  %v4849_v58 = vadd.f32 %v4690_v34, %v4319_v32  ;;  %v4322_v45 = vadd.f32 %v7543_v24, %v10242_v35  ;;  %v7671_v48 = vpop.f32.mrf.mxu0  ;;  %v5362_v11 = vmul.f32 %v9908_v55, %v4850_v41  ;;  %v10246_v14 = vld [vmem:[#allocation11_spill] sm:$0xff]  ;;  %v9970_v49 = vpop.permute.xlu0 %5253 }
 0x303   : > { %v5422_v19 = vadd.f32 %v5421_v25, %v5359_v47  ;;  %v5554_v30 = vadd.f32 %v5553_v61, %v5491_v42  ;;  %v4170_v4 = vpop.f32.mrf.mxu1 }
 0x304   : > { %4913 = vst [vmem:[%s9773_s6 + $0x140] sm:$0xff] %v4849_v58  ;;  %v5361_v56 = vmul.f32 %v9905_v52, %v4849_v58  ;;  %v4852_v3 = vadd.f32 %v7671_v48, %v4322_v45  ;;  %v4321_v37 = vadd.f32 %v4170_v4, %v10243_v33  ;;  %v4700_v28 = vpop.f32.mrf.mxu0  ;;  %v5495_v60 = vmul.f32 %v5362_v11, %v4850_v41  ;;  %v10247_v41 = vld [vmem:[#allocation12_spill] sm:$0xff] }
 0x305   : > { %v5555_v31 = vadd.f32 %v5554_v30, %v5492_v23  ;;  %v5423_v6 = vadd.f32 %v5422_v19, %v5360_v44  ;;  %v7546_v36 = vpop.f32.mrf.mxu1 }
 0x306   : > { %v5494_v9 = vmul.f32 %v5361_v56, %v4849_v58  ;;  %4916 = vst [vmem:[%s9773_s6 + $0x158] sm:$0xff] %v4852_v3  ;;  %v4851_v2 = vadd.f32 %v4700_v28, %v4321_v37  ;;  %v4324_v52 = vadd.f32 %v7546_v36, %v10244_v17  ;;  %v7674_v10 = vpop.f32.mrf.mxu0  ;;  %v5364_v12 = vmul.f32 %v9920_v51, %v4852_v3  ;;  %v10248_v58 = vld [vmem:[#allocation13_spill] sm:$0xff] }
 0x307   : > { %v5424_v54 = vadd.f32 %v5423_v6, %v5361_v56  ;;  %v5556_v57 = vadd.f32 %v5555_v31, %v5493_v5  ;;  %v4180_v22 = vpop.f32.mrf.mxu1  ;;  %v10249_v56 = vld [vmem:[#allocation14_spill] sm:$0xff]  ;;  %v5269_v6 = vpop.permute.xlu1 %5268 }
 0x308   : > { %4915 = vst [vmem:[%s9773_s6 + $0x150] sm:$0xff] %v4851_v2  ;;  %v5363_v50 = vmul.f32 %v9918_v1, %v4851_v2  ;;  %v4854_v39 = vadd.f32 %v7674_v10, %v4324_v52  ;;  %v4323_v55 = vadd.f32 %v4180_v22, %v10245_v20  ;;  %v4710_v0 = vpop.f32.mrf.mxu0  ;;  %v5497_v34 = vmul.f32 %v5364_v12, %v4852_v3 }
 0x309   : > { %v5557_v43 = vadd.f32 %v5556_v57, %v5494_v9  ;;  %v5425_v40 = vadd.f32 %v5424_v54, %v5362_v11  ;;  %v7549_v62 = vpop.f32.mrf.mxu1 }
 0x30a   : > { %v5496_v63 = vmul.f32 %v5363_v50, %v4851_v2  ;;  %4918 = vst [vmem:[%s9773_s6 + $0x168] sm:$0xff] %v4854_v39  ;;  %v4853_v15 = vadd.f32 %v4710_v0, %v4323_v55  ;;  %v4326_v38 = vadd.f32 %v7549_v62, %v10246_v14  ;;  %v7677_v8 = vpop.f32.mrf.mxu0  ;;  %v5366_v61 = vmul.f32 %v9934_v26, %v4854_v39  ;;  %v5264_v26 = vpop.permute.xlu0 %5263  ;;  %v10250_v2 = vld [vmem:[#allocation15_spill] sm:$0xff]  ;;  %v10252_v62 = vld [vmem:[#allocation17_spill] sm:$0xff] }
 0x30b   : > { %v5426_v1 = vadd.f32 %v5425_v40, %v5363_v50  ;;  %v5558_v16 = vadd.f32 %v5557_v43, %v5495_v60  ;;  %v4190_v46 = vpop.f32.mrf.mxu1  ;;  %v10251_v50 = vld [vmem:[#allocation16_spill] sm:$0xff] }
 0x30c   : > { %4917 = vst [vmem:[%s9773_s6 + $0x160] sm:$0xff] %v4853_v15  ;;  %v5365_v47 = vmul.f32 %v9931_v59, %v4853_v15  ;;  %v4856_v51 = vadd.f32 %v7677_v8, %v4326_v38  ;;  %v4325_v53 = vadd.f32 %v4190_v46, %v10247_v41  ;;  %v4720_v32 = vpop.f32.mrf.mxu0  ;;  %v5499_v37 = vmul.f32 %v5366_v61, %v4854_v39 }
 0x30d   : > { %v5559_v42 = vadd.f32 %v5558_v16, %v5496_v63  ;;  %v5427_v44 = vadd.f32 %v5426_v1, %v5364_v12  ;;  %v7552_v25 = vpop.f32.mrf.mxu1  ;;  %v5279_v1 = vpop.permute.xlu1 %5278 }
 0x30e   : > { %v5498_v24 = vmul.f32 %v5365_v47, %v4853_v15  ;;  %4920 = vst [vmem:[%s9773_s6 + $0x178] sm:$0xff] %v4856_v51  ;;  %v4855_v23 = vadd.f32 %v4720_v32, %v4325_v53  ;;  %v4328_v35 = vadd.f32 %v7552_v25, %v10248_v58  ;;  %v7680_v45 = vpop.f32.mrf.mxu0  ;;  %v5368_v5 = vmul.f32 %v9946_v21, %v4856_v51  ;;  %v5274_v14 = vpop.permute.xlu0 %5273  ;;  %v10254_v25 = vld [vmem:[#allocation19_spill] sm:$0xff] }
 0x30f   : > { %v5428_v48 = vadd.f32 %v5427_v44, %v5365_v47  ;;  %v5560_v59 = vadd.f32 %v5559_v42, %v5497_v34  ;;  %v4200_v19 = vpop.f32.mrf.mxu1  ;;  %v10253_v47 = vld [vmem:[#allocation18_spill] sm:$0xff] }
 0x310   : > { %4919 = vst [vmem:[%s9773_s6 + $0x170] sm:$0xff] %v4855_v23  ;;  %v5367_v30 = vmul.f32 %v9944_v18, %v4855_v23  ;;  %v4858_v4 = vadd.f32 %v7680_v45, %v4328_v35  ;;  %v4327_v3 = vadd.f32 %v4200_v19, %v10249_v56  ;;  %v4730_v33 = vpop.f32.mrf.mxu0  ;;  %v5501_v20 = vmul.f32 %v5368_v5, %v4856_v51 }
 0x311   : > { %v5561_v28 = vadd.f32 %v5560_v59, %v5498_v24  ;;  %v5429_v31 = vadd.f32 %v5428_v48, %v5366_v61  ;;  %v7555_v11 = vpop.f32.mrf.mxu1  ;;  %v10255_v59 = vld [vmem:[#allocation20_spill] sm:$0xff] }
 0x312   : > { %v5500_v36 = vmul.f32 %v5367_v30, %v4855_v23  ;;  %4922 = vst [vmem:[%s9773_s6 + $0x188] sm:$0xff] %v4858_v4  ;;  %v4857_v9 = vadd.f32 %v4730_v33, %v4327_v3  ;;  %v4330_v17 = vadd.f32 %v7555_v11, %v10250_v2  ;;  %v7683_v18 = vpop.f32.mrf.mxu0  ;;  %v5370_v0 = vmul.f32 %v9960_v13, %v4858_v4 }
 0x313   : > { %v5430_v52 = vadd.f32 %v5429_v31, %v5367_v30  ;;  %v5562_v10 = vadd.f32 %v5561_v28, %v5499_v37  ;;  %v4210_v54 = vpop.f32.mrf.mxu1  ;;  %v5289_v28 = vpop.permute.xlu1 %5288 }
 0x314   : > { %4921 = vst [vmem:[%s9773_s6 + $0x180] sm:$0xff] %v4857_v9  ;;  %v5369_v57 = vmul.f32 %v9957_v7, %v4857_v9  ;;  %v4860_v22 = vadd.f32 %v7683_v18, %v4330_v17  ;;  %v4329_v39 = vadd.f32 %v4210_v54, %v10251_v50  ;;  %v4740_v21 = vpop.f32.mrf.mxu0  ;;  %v5503_v41 = vmul.f32 %v5370_v0, %v4858_v4 }
 0x315   : > { %v5563_v55 = vadd.f32 %v5562_v10, %v5500_v36  ;;  %v5431_v60 = vadd.f32 %v5430_v52, %v5368_v5  ;;  %v7558_v43 = vpop.f32.mrf.mxu1  ;;  %v10256_v52 = vld [vmem:[#allocation21_spill] sm:$0xff] }
 0x316   : > { %v5502_v12 = vmul.f32 %v5369_v57, %v4857_v9  ;;  %4924 = vst [vmem:[%s9773_s6 + $0x198] sm:$0xff] %v4860_v22  ;;  %v4859_v40 = vadd.f32 %v4740_v21, %v4329_v39  ;;  %v4332_v63 = vadd.f32 %v7558_v43, %v10252_v62  ;;  %v7686_v15 = vpop.f32.mrf.mxu0  ;;  %v5372_v32 = vmul.f32 %v9972_v29, %v4860_v22  ;;  %v5284_v29 = vpop.permute.xlu0 %5283 }
 0x317   : > { %v5432_v7 = vadd.f32 %v5431_v60, %v5369_v57  ;;  %v5564_v38 = vadd.f32 %v5563_v55, %v5501_v20  ;;  %v4220_v8 = vpop.f32.mrf.mxu1  ;;  %v10257_v20 = vld [vmem:[#allocation22_spill] sm:$0xff]  ;;  %v5299_v62 = vpop.permute.xlu1 %5298 }
 0x318   : > { %4923 = vst [vmem:[%s9773_s6 + $0x190] sm:$0xff] %v4859_v40  ;;  %v5371_v16 = vmul.f32 %v9970_v49, %v4859_v40  ;;  %v4862_v46 = vadd.f32 %v7686_v15, %v4332_v63  ;;  %v4331_v13 = vadd.f32 %v4220_v8, %v10253_v47  ;;  %v4750_v51 = vpop.f32.mrf.mxu0  ;;  %v5505_v4 = vmul.f32 %v5372_v32, %v4860_v22 }
 0x319   : > { %v5565_v53 = vadd.f32 %v5564_v38, %v5502_v12  ;;  %v5433_v34 = vadd.f32 %v5432_v7, %v5370_v0  ;;  %v7561_v42 = vpop.f32.mrf.mxu1 }
 0x31a   : > { %v5504_v61 = vmul.f32 %v5371_v16, %v4859_v40  ;;  %4926 = vst [vmem:[%s9773_s6 + $0x1a8] sm:$0xff] %v4862_v46  ;;  %v4861_v44 = vadd.f32 %v4750_v51, %v4331_v13  ;;  %v4334_v24 = vadd.f32 %v7561_v42, %v10254_v25  ;;  %v7689_v23 = vpop.f32.mrf.mxu0  ;;  %v5374_v3 = vmul.f32 %v5269_v6, %v4862_v46  ;;  %v5294_v60 = vpop.permute.xlu0 %5293 }
 0x31b   : > { %v5434_v58 = vadd.f32 %v5433_v34, %v5371_v16  ;;  %v5566_v49 = vadd.f32 %v5565_v53, %v5503_v41  ;;  %v4230_v35 = vpop.f32.mrf.mxu1  ;;  %v10259_v41 = vld [vmem:[#allocation24_spill] sm:$0xff] }
 0x31c   : > { %4925 = vst [vmem:[%s9773_s6 + $0x1a0] sm:$0xff] %v4861_v44  ;;  %v5373_v45 = vmul.f32 %v5264_v26, %v4861_v44  ;;  %v4864_v48 = vadd.f32 %v7689_v23, %v4334_v24  ;;  %v4333_v19 = vadd.f32 %v4230_v35, %v10255_v59  ;;  %v4760_v30 = vpop.f32.mrf.mxu0  ;;  %v5507_v6 = vmul.f32 %v5374_v3, %v4862_v46  ;;  %v10260_v24 = vld [vmem:[#allocation25_spill] sm:$0xff] }
 0x31d   : > { %v5567_v56 = vadd.f32 %v5566_v49, %v5504_v61  ;;  %v5435_v33 = vadd.f32 %v5434_v58, %v5372_v32  ;;  %v7564_v37 = vpop.f32.mrf.mxu1 }
 0x31e   : > { %v5506_v5 = vmul.f32 %v5373_v45, %v4861_v44  ;;  %4928 = vst [vmem:[%s9773_s6 + $0x1b8] sm:$0xff] %v4864_v48  ;;  %v4863_v31 = vadd.f32 %v4760_v30, %v4333_v19  ;;  %v4336_v11 = vadd.f32 %v7564_v37, %v9736_v27  ;;  %v7692_v36 = vpop.f32.mrf.mxu0  ;;  %v5376_v22 = vmul.f32 %v5279_v1, %v4864_v48  ;;  %v5304_v49 = vpop.permute.xlu0 %5303 }
 0x31f   : > { %v5436_v26 = vadd.f32 %v5435_v33, %v5373_v45  ;;  %v5568_v9 = vadd.f32 %v5567_v56, %v5505_v4  ;;  %v4240_v2 = vpop.f32.mrf.mxu1  ;;  %v5309_v30 = vpop.permute.xlu1 %5308  ;;  %v10261_v56 = vld [vmem:[#allocation26_spill] sm:$0xff] }
 0x320   : > { %4927 = vst [vmem:[%s9773_s6 + $0x1b0] sm:$0xff] %v4863_v31  ;;  %v5375_v17 = vmul.f32 %v5274_v14, %v4863_v31  ;;  %v4866_v18 = vadd.f32 %v7692_v36, %v4336_v11  ;;  %v4335_v10 = vadd.f32 %v4240_v2, %v10256_v52  ;;  %v4770_v54 = vpop.f32.mrf.mxu0  ;;  %v10258_v14 = vld [vmem:[#allocation23_spill] sm:$0xff]  ;;  %v5509_v8 = vmul.f32 %v5376_v22, %v4864_v48 }
 0x321   : > { %v5569_v57 = vadd.f32 %v5568_v9, %v5506_v5  ;;  %v5437_v50 = vadd.f32 %v5436_v26, %v5374_v3  ;;  %v7567_v39 = vpop.f32.mrf.mxu1  ;;  %v10262_v36 = vld [vmem:[#allocation27_spill] sm:$0xff] }
 0x322   : > { %v5508_v21 = vmul.f32 %v5375_v17, %v4863_v31  ;;  %4930 = vst [vmem:[%s9773_s6 + $0x1c8] sm:$0xff] %v4866_v18  ;;  %v4865_v27 = vadd.f32 %v4770_v54, %v4335_v10  ;;  %v4338_v55 = vadd.f32 %v7567_v39, %v10257_v20  ;;  %v7695_v0 = vpop.f32.mrf.mxu0  ;;  %v5378_v16 = vmul.f32 %v5289_v28, %v4866_v18 }
 0x323   : > { %v5438_v43 = vadd.f32 %v5437_v50, %v5375_v17  ;;  %v5570_v12 = vadd.f32 %v5569_v57, %v5507_v6  ;;  %v4250_v40 = vpop.f32.mrf.mxu1  ;;  %v5314_v6 = vpop.permute.xlu0 %5313 }
 0x324   : > { %4929 = vst [vmem:[%s9773_s6 + $0x1c0] sm:$0xff] %v4865_v27  ;;  %v5377_v63 = vmul.f32 %v5284_v29, %v4865_v27  ;;  %v4868_v15 = vadd.f32 %v7695_v0, %v4338_v55  ;;  %v4337_v7 = vadd.f32 %v4250_v40, %v10258_v14  ;;  %v4780_v38 = vpop.f32.mrf.mxu0  ;;  %v5511_v35 = vmul.f32 %v5378_v16, %v4866_v18  ;;  %v5319_v50 = vpop.permute.xlu1 %5318 }
 0x325   : > { %v5571_v1 = vadd.f32 %v5570_v12, %v5508_v21  ;;  %v5439_v46 = vadd.f32 %v5438_v43, %v5376_v22  ;;  %v7570_v47 = vpop.f32.mrf.mxu1 }
 0x326   : > { %v5510_v13 = vmul.f32 %v5377_v63, %v4865_v27  ;;  %4932 = vst [vmem:[%s9773_s6 + $0x1d8] sm:$0xff] %v4868_v15  ;;  %v4867_v51 = vadd.f32 %v4780_v38, %v4337_v7  ;;  %v4340_v53 = vadd.f32 %v7570_v47, %v10259_v41  ;;  %v7698_v32 = vpop.f32.mrf.mxu0  ;;  %v5380_v48 = vmul.f32 %v5299_v62, %v4868_v15 }
 0x327   : > { %v5440_v34 = vadd.f32 %v5439_v46, %v5377_v63  ;;  %v5572_v42 = vadd.f32 %v5571_v1, %v5509_v8  ;;  %v4260_v61 = vpop.f32.mrf.mxu1 }
 0x328   : > { %4931 = vst [vmem:[%s9773_s6 + $0x1d0] sm:$0xff] %v4867_v51  ;;  %v5379_v44 = vmul.f32 %v5294_v60, %v4867_v51  ;;  %v4870_v25 = vadd.f32 %v7698_v32, %v4340_v53  ;;  %v4339_v23 = vadd.f32 %v4260_v61, %v10260_v24  ;;  %v4790_v58 = vpop.f32.mrf.mxu0  ;;  %v5513_v9 = vmul.f32 %v5380_v48, %v4868_v15 }
 0x329   : > { %v5573_v45 = vadd.f32 %v5572_v42, %v5510_v13  ;;  %v5441_v59 = vadd.f32 %v5440_v34, %v5378_v16  ;;  %v7573_v19 = vpop.f32.mrf.mxu1 }
 0x32a   : > { %v5512_v29 = vmul.f32 %v5379_v44, %v4867_v51  ;;  %4934 = vst [vmem:[%s9773_s6 + $0x1e8] sm:$0xff] %v4870_v25  ;;  %v4869_v4 = vadd.f32 %v4790_v58, %v4339_v23  ;;  %v4342_v3 = vadd.f32 %v7573_v19, %v10261_v56  ;;  %v7701_v33 = vpop.f32.mrf.mxu0  ;;  %v5382_v17 = vmul.f32 %v5309_v30, %v4870_v25 }
 0x32b   : > { %v5442_v37 = vadd.f32 %v5441_v59, %v5379_v44  ;;  %v5574_v28 = vadd.f32 %v5573_v45, %v5511_v35  ;;  %v4270_v5 = vpop.f32.mrf.mxu1 }
 0x32c   : > { %4933 = vst [vmem:[%s9773_s6 + $0x1e0] sm:$0xff] %v4869_v4  ;;  %v5381_v31 = vmul.f32 %v5304_v49, %v4869_v4  ;;  %v4872_v11 = vadd.f32 %v7701_v33, %v4342_v3  ;;  %v4341_v26 = vadd.f32 %v4270_v5, %v10262_v36  ;;  %v4800_v52 = vpop.f32.mrf.mxu0  ;;  %v5515_v21 = vmul.f32 %v5382_v17, %v4870_v25 }
 0x32d   : > { %v5575_v2 = vadd.f32 %v5574_v28, %v5512_v29  ;;  %v5443_v18 = vadd.f32 %v5442_v37, %v5380_v48 }
 0x32e   : > { %v5514_v10 = vmul.f32 %v5381_v31, %v4869_v4  ;;  %4936 = vst [vmem:[%s9773_s6 + $0x1f8] sm:$0xff] %v4872_v11  ;;  %v4871_v54 = vadd.f32 %v4800_v52, %v4341_v26  ;;  %v5384_v20 = vmul.f32 %v5319_v50, %v4872_v11 }
 0x32f   : > { %v5444_v57 = vadd.f32 %v5443_v18, %v5381_v31  ;;  %v5576_v22 = vadd.f32 %v5575_v2, %v5513_v9 }
 0x330   : > { %4935 = vst [vmem:[%s9773_s6 + $0x1f0] sm:$0xff] %v4871_v54  ;;  %v5383_v39 = vmul.f32 %v5314_v6, %v4871_v54  ;;  %v5517_v12 = vmul.f32 %v5384_v20, %v4872_v11 }
 0x331   : > { %v5577_v27 = vadd.f32 %v5576_v22, %v5514_v10  ;;  %v5445_v55 = vadd.f32 %v5444_v57, %v5382_v17 }
 0x332   : > { %v5516_v0 = vmul.f32 %v5383_v39, %v4871_v54 }
 0x333   : > { %v5446_v60 = vadd.f32 %v5445_v55, %v5383_v39  ;;  %v5578_v43 = vadd.f32 %v5577_v27, %v5515_v21 }
 0x335   : > { %v5447_v40 = vadd.f32 %v5446_v60, %v5384_v20  ;;  %v5579_v62 = vadd.f32 %v5578_v43, %v5516_v0 }
 0x337   : > { %v5448_v63 = vrot.slane %v5447_v40, 4  ;;  %v5580_v15 = vadd.f32 %v5579_v62, %v5517_v12 }
 0x339   : > { %v5449_v14 = vadd.f32 %v5448_v63, %v5447_v40  ;;  %v5581_v7 = vrot.slane %v5580_v15, 4 }
 0x33b   : > { %v5450_v38 = vrot.slane %v5449_v14, 2  ;;  %v5582_v8 = vadd.f32 %v5581_v7, %v5580_v15 }
 0x33d   : > { %v5451_v1 = vadd.f32 %v5450_v38, %v5449_v14  ;;  %v5583_v16 = vrot.slane %v5582_v8, 2 }
 0x33f   : > { %v5452_v46 = vrot.slane %v5451_v1, 1  ;;  %v5584_v47 = vadd.f32 %v5583_v16, %v5582_v8 }
 0x341   : > { %v5585_v13 = vrot.slane %v5584_v47, 1  ;;  %v5453_v51 = vadd.f32 %v5452_v46, %v5451_v1 }
 0x343   : > { %v5586_v41 = vadd.f32 %v5585_v13, %v5584_v47 }
 0x345   : > { %v5588_v53 = vsel %vm5587_vm0, %v5453_v51, %v5586_v41 }
 0x346   : > { %5589 = vst [vmem:[%s231_s8] sm:$0x3] %v5588_v53 }
 0x347 PF: > { %s15_s15 = sadd.s32 1, %s7752_s15  }
 0x348   : > { %p12_p5 = scmp.ge.s32.totalorder %s15_s15, 4  }
 0x34a   :  { %14 = sbr.rel (!%p12_p5) target bundleno = 1 (0x1), region = 85 }

</bundles_post_ra>
